<compile_context>
chip_gen: v6e
topology: v6e:2x2x1
jax: 0.10.0
libtpu: 0.0.40
codegen_flags: <defaults>
</compile_context>

<pallas_src>
import functools
import numpy as np
import jax
import jax.numpy as jnp
from jax import lax
from jax.experimental import pallas as pl
from jax.experimental.pallas import tpu as pltpu

VMEM_SPEC = pl.BlockSpec(memory_space=pltpu.MemorySpace.VMEM)


# --------------------------------------------------------------------------------------
# Host-side constant builders (small tables; pure weight/layout preprocessing)
# --------------------------------------------------------------------------------------
def _build_pool_mats(W, Wp, C):
    """0/1 matrices (W*C, Wp*C): x @ A / x @ B pick the two W-window candidates of
    MaxPool(2, stride 2, pad 1) per output position, already laid out as padded lanes
    wp*C+c (zero columns at wp in {0, Wp-1} give the conv's W zero-padding)."""
    A = np.zeros((W * C, Wp * C), np.float32)
    B = np.zeros((W * C, Wp * C), np.float32)
    for wp in range(1, Wp - 1):
        w = wp - 1
        even, odd = 2 * w, 2 * w - 1
        pa = even if even <= W - 1 else odd       # prefer even tap, clamp at border
        pb = odd if odd >= 0 else even            # prefer odd tap, clamp at border
        for c in range(C):
            A[pa * C + c, wp * C + c] = 1.0
            B[pb * C + c, wp * C + c] = 1.0
    return A, B


def _build_dh_pool_sels(D, H, Dp, Hp):
    """Four 0/1 selection matrices (Dp*Hp, D*H): per batch element, left-multiplying the
    W-pooled slab by each matrix picks one (d,h) candidate of the 2x2 D/H max-pool window
    (clamped at the borders, PyTorch padding=1 semantics); the elementwise max of the four
    products is the pooled, zero-padded (Dp*Hp, Wp*C) block (zero rows = D/H padding)."""
    Do, Ho = Dp - 2, Hp - 2
    sels = np.zeros((4, Dp * Hp, D * H), np.float32)
    for do in range(Do):
        dA = min(2 * do, D - 1)
        dB = max(2 * do - 1, 0)
        for ho in range(Ho):
            hA = min(2 * ho, H - 1)
            hB = max(2 * ho - 1, 0)
            r = (do + 1) * Hp + (ho + 1)
            for i, (d, h) in enumerate(((dA, hA), (dA, hB), (dB, hA), (dB, hB))):
                sels[i, r, d * H + h] = 1.0
    return sels


def _build_tap_weights(w, Wp):
    """(3,3,3,Cin,Cout) DHWIO conv weights -> (9, Wp*Cin, Wp*Cout) block-Toeplitz-over-W
    matrices, one per (kd,kh) tap.  Output columns for wp in {0, Wp-1} are zero, so the
    GEMM directly writes the W zero-padding of the next stage."""
    kD, kH, kW, Cin, Cout = w.shape
    wn = np.asarray(w, np.float32)
    T = np.zeros((kD * kH, Wp * Cin, Wp * Cout), np.float32)
    for kd in range(kD):
        for kh in range(kH):
            t = T[kd * kH + kh]
            for wp in range(1, Wp - 1):
                for kw in range(kW):
                    wi = wp - 1 + kw
                    t[wi * Cin:(wi + 1) * Cin, wp * Cout:(wp + 1) * Cout] = wn[kd, kh, kw]
    return T


def _build_fold_and_lane_mask(Wp, C):
    """Masked fold matrix (Wp*C, Wp*C): right-multiplying the (1, Wp*C) per-lane sums
    broadcasts each channel's interior-lane total to every lane of that channel (the
    zeroed border-lane rows apply the W-padding mask).  Also returns the (1, Wp*C)
    interior-lane 0/1 mask."""
    l = np.arange(Wp * C)
    fold = (l[:, None] % C == l[None, :] % C).astype(np.float32)
    lane_ok = ((l // C >= 1) & (l // C <= Wp - 2)).astype(np.float32)
    return fold * lane_ok[:, None], lane_ok[None, :]


def _build_row_mask(N, Dp, Hp):
    """(R, 1) 0/1 mask of interior rows (dp in 1..Dp-2 and hp in 1..Hp-2)."""
    r = np.arange(N * Dp * Hp)
    dp = (r // Hp) % Dp
    hp = r % Hp
    ok = ((dp >= 1) & (dp <= Dp - 2) & (hp >= 1) & (hp <= Hp - 2)).astype(np.float32)
    return ok[:, None]


def _vmem_bytes(shape, itemsize=4):
    """Crude VMEM footprint of an f32 array with (8,128) tile padding."""
    if len(shape) == 1:
        shape = (1,) + tuple(shape)
    lead = int(np.prod(shape[:-2])) if len(shape) > 2 else 1
    rows = -(-shape[-2] // 8) * 8
    lanes = -(-shape[-1] // 128) * 128
    return lead * rows * lanes * itemsize


# --------------------------------------------------------------------------------------
# Fused encoder kernel
# --------------------------------------------------------------------------------------
def _encoder_kernel(x_ref, sa_ref, sb_ref, sel_ref, w1_ref, w2_ref,
                    p1_ref, p2_ref, g1_ref, b1_ref, g2_ref, b2_ref,
                    rowm_ref, lane1_ref,
                    o_ref, xw_ref, a1_ref, a2_ref, *,
                    N, D, H, Dp, Hp, guard, inv_count, eps):
    f32 = jnp.float32
    R = N * Dp * Hp                                   # padded (n, dp, hp) row count
    DH = D * H
    DpHp = Dp * Hp

    # ---- Stage 1: W-axis maxpool + W zero-pad, folded into lanes, via 0/1 GEMMs ------
    x = x_ref[...]                                    # (N*D*H, W*C0)
    xw_ref[...] = jnp.maximum(
        jnp.dot(x, sa_ref[...], preferred_element_type=f32),
        jnp.dot(x, sb_ref[...], preferred_element_type=f32))   # (N*D*H, Wp*C0)

    # ---- Zero only the guard strips (interior incl. its zero borders is written below)
    a1_ref[pl.ds(0, guard), :] = jnp.zeros((guard, a1_ref.shape[1]), f32)
    a1_ref[pl.ds(guard + R, guard), :] = jnp.zeros((guard, a1_ref.shape[1]), f32)
    a2_ref[pl.ds(0, guard), :] = jnp.zeros((guard, a2_ref.shape[1]), f32)
    a2_ref[pl.ds(guard + R, guard), :] = jnp.zeros((guard, a2_ref.shape[1]), f32)

    # ---- Stage 2: D/H maxpool + zero-pad scatter: 4 selection GEMMs + 1 block store
    #      per batch element (replaces 162 single-row masked stores).
    for n in range(N):
        xn = xw_ref[pl.ds(n * DH, DH), :]             # (D*H, Wp*C0)
        pooled = jnp.dot(sel_ref[0], xn, preferred_element_type=f32)
        for i in range(1, 4):
            pooled = jnp.maximum(
                pooled, jnp.dot(sel_ref[i], xn, preferred_element_type=f32))
        a1_ref[pl.ds(guard + n * DpHp, DpHp), :] = pooled   # (Dp*Hp, Wp*C0)

    row_m = rowm_ref[...]                             # (R, 1) interior-row 0/1 mask

    # ---- conv(3x3x3) + BatchNorm(training stats) + ReLU (bias dropped: BN cancels it)
    def conv_bn_relu(a_ref, w_ref, fold_ref, g_ref, b_ref):
        L_out = w_ref.shape[2]
        acc = jnp.zeros((R, L_out), f32)
        # TODO(synk): fold the 3 kh taps into K (9 -> 3 GEMMs) for v6e/v7x once the
        # shifted-lhs copies are shown to beat the lane-offset stores they need.
        for kd in range(3):                           # 9 shifted K=Wp*Cin GEMMs
            for kh in range(3):
                off = guard + (kd - 1) * Hp + (kh - 1)
                acc = acc + jnp.dot(a_ref[pl.ds(off, R), :], w_ref[kd * 3 + kh],
                                    preferred_element_type=f32)
        # Reduce-then-fold BN statistics: sublane row-reduce first, then a tiny
        # (1,L)@(L,L) fold GEMM whose zeroed border rows also apply the lane mask.
        am = acc * row_m                              # zero border-row contributions
        s1 = jnp.dot(jnp.sum(am, axis=0, keepdims=True), fold_ref[...],
                     preferred_element_type=f32)      # per-channel sums, lane-broadcast
        s2 = jnp.dot(jnp.sum(am * acc, axis=0, keepdims=True), fold_ref[...],
                     preferred_element_type=f32)      # row_m is 0/1 -> row_m * acc^2
        mean = s1 * inv_count
        var = s2 * inv_count - mean * mean            # biased (PyTorch training) variance
        scale = g_ref[...] * lax.rsqrt(var + eps)
        shift = b_ref[...] - mean * scale
        return jnp.maximum(acc * scale + shift, 0.0)  # BN + ReLU

    y1 = conv_bn_relu(a1_ref, w1_ref, p1_ref, g1_ref, b1_ref)
    # Masked interior write: zero D/H border rows + W border lanes = conv2's zero halo.
    a2_ref[pl.ds(guard, R), :] = y1 * (row_m * lane1_ref[...])
    y2 = conv_bn_relu(a2_ref, w2_ref, p2_ref, g2_ref, b2_ref)

    # ---- one lane-dense full-width store; interior trim happens in the XLA wrapper ---
    o_ref[...] = y2


# --------------------------------------------------------------------------------------
# Wrapper
# --------------------------------------------------------------------------------------
def encoder_forward(x, p):
    # x: (N, D, H, W, C0) float32 (NDHWC)
    N, D, H, W, C0 = x.shape
    assert D % 2 == 0 and H % 2 == 0 and W % 2 == 0
    Do, Ho, Wo = D // 2 + 1, H // 2 + 1, W // 2 + 1
    Dp, Hp, Wp = Do + 2, Ho + 2, Wo + 2
    C1 = p['w1'].shape[-1]
    C2 = p['w2'].shape[-1]
    guard = -(-(Hp + 1) // 8) * 8                     # >= Hp+1 and 8-aligned
    R = N * Dp * Hp
    inv_count = 1.0 / float(N * Do * Ho * Wo)

    # small host-side constant tables
    SA, SB = _build_pool_mats(W, Wp, C0)
    SEL = _build_dh_pool_sels(D, H, Dp, Hp)
    w1t = _build_tap_weights(np.asarray(p['w1']), Wp)
    w2t = _build_tap_weights(np.asarray(p['w2']), Wp)
    P1, lane1 = _build_fold_and_lane_mask(Wp, C1)
    P2, _ = _build_fold_and_lane_mask(Wp, C2)
    ROWM = _build_row_mask(N, Dp, Hp)
    g1 = np.tile(np.asarray(p['g1'], np.float32), Wp)[None, :]
    b1 = np.tile(np.asarray(p['be1'], np.float32), Wp)[None, :]
    g2 = np.tile(np.asarray(p['g2'], np.float32), Wp)[None, :]
    b2 = np.tile(np.asarray(p['be2'], np.float32), Wp)[None, :]

    x2d = x.reshape(N * D * H, W * C0)                # free reshape (contiguous)

    # Single-shot, VMEM-resident design: assert the footprint fits the scoped budget.
    shapes = [x2d.shape, SA.shape, SB.shape, SEL.shape, w1t.shape, w2t.shape,
              P1.shape, P2.shape, g1.shape, b1.shape, g2.shape, b2.shape,
              ROWM.shape, lane1.shape,
              (N * D * H, Wp * C0), (R + 2 * guard, Wp * C0), (R + 2 * guard, Wp * C1),
              (R, Wp * C2)]
    vmem_est = sum(_vmem_bytes(s) for s in shapes)
    assert vmem_est < 28 * 1024 * 1024, (
        f"VMEM estimate {vmem_est} B too large for the single-shot kernel; "
        "add a grid over N/D before scaling this up.")

    kernel = functools.partial(
        _encoder_kernel, N=N, D=D, H=H, Dp=Dp, Hp=Hp,
        guard=guard, inv_count=inv_count, eps=1e-5)

    out2d = pl.pallas_call(
        kernel,
        out_shape=jax.ShapeDtypeStruct((R, Wp * C2), jnp.float32),
        in_specs=[VMEM_SPEC] * 14,
        out_specs=VMEM_SPEC,
        scratch_shapes=[
            pltpu.VMEM((N * D * H, Wp * C0), jnp.float32),        # W-pooled input
            pltpu.VMEM((R + 2 * guard, Wp * C0), jnp.float32),    # conv1 input (padded)
            pltpu.VMEM((R + 2 * guard, Wp * C1), jnp.float32),    # conv2 input (padded)
        ],
        compiler_params=pltpu.CompilerParams(vmem_limit_bytes=32 * 1024 * 1024),
    )(x2d, jnp.asarray(SA), jnp.asarray(SB), jnp.asarray(SEL),
      jnp.asarray(w1t), jnp.asarray(w2t), jnp.asarray(P1), jnp.asarray(P2),
      jnp.asarray(g1), jnp.asarray(b1), jnp.asarray(g2), jnp.asarray(b2),
      jnp.asarray(ROWM), jnp.asarray(lane1))

    # free wrapper-side interior trim of the lane-dense padded output
    return out2d.reshape(N, Dp, Hp, Wp, C2)[:, 1:-1, 1:-1, 1:-1, :]


# --------------------------------------------------------------------------------------
# Pure-JAX reference (includes the conv bias, which training-mode BN cancels exactly)
# --------------------------------------------------------------------------------------
def encoder_reference(x, p):
    x = lax.reduce_window(x, -jnp.inf, lax.max, (1, 2, 2, 2, 1), (1, 2, 2, 2, 1),
                          ((0, 0), (1, 1), (1, 1), (1, 1), (0, 0)))

    def conv_bn_relu(x, w, b, g, be):
        y = lax.conv_general_dilated(
            x, w, (1, 1, 1), ((1, 1), (1, 1), (1, 1)),
            dimension_numbers=('NDHWC', 'DHWIO', 'NDHWC'),
            precision=lax.Precision.HIGHEST) + b
        mean = y.mean(axis=(0, 1, 2, 3))
        var = ((y - mean) ** 2).mean(axis=(0, 1, 2, 3))
        y = (y - mean) * lax.rsqrt(var + 1e-5) * g + be
        return jnp.maximum(y, 0.0)

    x = conv_bn_relu(x, p['w1'], p['b1'], p['g1'], p['be1'])
    x = conv_bn_relu(x, p['w2'], p['b2'], p['g2'], p['be2'])
    return x


if __name__ == "__main__":
    key = jax.random.PRNGKey(0)
    N, C_in, S = 2, 4, 16
    C_out = 8                            # Encoder(in_channels=4, out_channels=8, 'cbr')
    c1_in, c1_out = C_in, C_out // 2     # conv1: 4 -> 4
    c2_in, c2_out = c1_out, C_out        # conv2: 4 -> 8

    ks = jax.random.split(key, 9)
    x_ncdhw = jax.random.normal(ks[0], (N, C_in, S, S, S), jnp.float32)  # PyTorch NCDHW
    x = jnp.transpose(x_ncdhw, (0, 2, 3, 4, 1))                          # -> NDHWC

    params = {
        'w1': 0.2 * jax.random.normal(ks[1], (3, 3, 3, c1_in, c1_out), jnp.float32),
        'b1': 0.1 * jax.random.normal(ks[2], (c1_out,), jnp.float32),
        'g1': 1.0 + 0.1 * jax.random.normal(ks[3], (c1_out,), jnp.float32),
        'be1': 0.1 * jax.random.normal(ks[4], (c1_out,), jnp.float32),
        'w2': 0.2 * jax.random.normal(ks[5], (3, 3, 3, c2_in, c2_out), jnp.float32),
        'b2': 0.1 * jax.random.normal(ks[6], (c2_out,), jnp.float32),
        'g2': 1.0 + 0.1 * jax.random.normal(ks[7], (c2_out,), jnp.float32),
        'be2': 0.1 * jax.random.normal(ks[8], (c2_out,), jnp.float32),
    }

    out = jax.block_until_ready(encoder_forward(x, params))
    ref = jax.block_until_ready(encoder_reference(x, params))

    assert out.shape == (N, 9, 9, 9, C_out), out.shape
    if not np.allclose(np.asarray(out), np.asarray(ref), atol=2e-3, rtol=2e-3):
        raise AssertionError("Pallas Encoder output mismatch vs JAX reference")
    print("KERNEL_OK")
</pallas_src>

<mosaic_0001>
module attributes {stable_mosaic.version = 11 : i64} {
  func.func @_encoder_kernel(%arg0: memref<512x64xf32, #tpu.memory_space<vmem>>, %arg1: memref<64x44xf32, #tpu.memory_space<vmem>>, %arg2: memref<64x44xf32, #tpu.memory_space<vmem>>, %arg3: memref<4x121x256xf32, #tpu.memory_space<vmem>>, %arg4: memref<9x44x44xf32, #tpu.memory_space<vmem>>, %arg5: memref<9x44x88xf32, #tpu.memory_space<vmem>>, %arg6: memref<44x44xf32, #tpu.memory_space<vmem>>, %arg7: memref<88x88xf32, #tpu.memory_space<vmem>>, %arg8: memref<1x44xf32, #tpu.memory_space<vmem>>, %arg9: memref<1x44xf32, #tpu.memory_space<vmem>>, %arg10: memref<1x88xf32, #tpu.memory_space<vmem>>, %arg11: memref<1x88xf32, #tpu.memory_space<vmem>>, %arg12: memref<242x1xf32, #tpu.memory_space<vmem>>, %arg13: memref<1x44xf32, #tpu.memory_space<vmem>>, %arg14: memref<242x88xf32, #tpu.memory_space<vmem>>, %arg15: memref<512x44xf32, #tpu.memory_space<vmem>>, %arg16: memref<274x44xf32, #tpu.memory_space<vmem>>, %arg17: memref<274x44xf32, #tpu.memory_space<vmem>>) attributes {dimension_semantics = [], scalar_prefetch = 0 : i64, scratch_operands = 3 : i64, tpu.core_type = #tpu.core_type<tc>} {
    %c0 = arith.constant 0 : index
    %c0_0 = arith.constant 0 : index
    %0 = vector.load %arg0[%c0, %c0_0] : memref<512x64xf32, #tpu.memory_space<vmem>>, vector<512x64xf32>
    %c0_1 = arith.constant 0 : index
    %c0_2 = arith.constant 0 : index
    %1 = vector.load %arg1[%c0_1, %c0_2] : memref<64x44xf32, #tpu.memory_space<vmem>>, vector<64x44xf32>
    %cst = arith.constant dense<0.000000e+00> : vector<512x44xf32>
    %2 = tpu.matmul %0, %1, %cst {dimension_numbers = #tpu.dot_dimension_numbers<[1], [0], [0], [1], [0, 0, 1, 1], [], []>} : vector<512x64xf32>, vector<64x44xf32>, vector<512x44xf32> -> vector<512x44xf32>
    %c0_3 = arith.constant 0 : index
    %c0_4 = arith.constant 0 : index
    %3 = vector.load %arg2[%c0_3, %c0_4] : memref<64x44xf32, #tpu.memory_space<vmem>>, vector<64x44xf32>
    %cst_5 = arith.constant dense<0.000000e+00> : vector<512x44xf32>
    %4 = tpu.matmul %0, %3, %cst_5 {dimension_numbers = #tpu.dot_dimension_numbers<[1], [0], [0], [1], [0, 0, 1, 1], [], []>} : vector<512x64xf32>, vector<64x44xf32>, vector<512x44xf32> -> vector<512x44xf32>
    %5 = arith.maximumf %2, %4 : vector<512x44xf32>
    %c0_6 = arith.constant 0 : index
    %c0_7 = arith.constant 0 : index
    %6 = vector.load %arg15[%c0_6, %c0_7] : memref<512x44xf32, #tpu.memory_space<vmem>>, vector<512x44xf32>
    tpu.vector_store %arg15[%c0_6, %c0_7], %5 {strides = array<i32>} : memref<512x44xf32, #tpu.memory_space<vmem>>, vector<512x44xf32>,
    %cst_8 = arith.constant 0.000000e+00 : f32
    %7 = vector.broadcast %cst_8 : f32 to vector<16x44xf32>
    %c0_9 = arith.constant 0 : index
    %c0_10 = arith.constant 0 : index
    %8 = vector.load %arg16[%c0_9, %c0_10] : memref<274x44xf32, #tpu.memory_space<vmem>>, vector<16x44xf32>
    tpu.vector_store %arg16[%c0_9, %c0_10], %7 {strides = array<i32>} : memref<274x44xf32, #tpu.memory_space<vmem>>, vector<16x44xf32>,
    %cst_11 = arith.constant 0.000000e+00 : f32
    %9 = vector.broadcast %cst_11 : f32 to vector<16x44xf32>
    %c258 = arith.constant 258 : index
    %c0_12 = arith.constant 0 : index
    %10 = vector.load %arg16[%c258, %c0_12] : memref<274x44xf32, #tpu.memory_space<vmem>>, vector<16x44xf32>
    tpu.vector_store %arg16[%c258, %c0_12], %9 {strides = array<i32>} : memref<274x44xf32, #tpu.memory_space<vmem>>, vector<16x44xf32>,
    %cst_13 = arith.constant 0.000000e+00 : f32
    %11 = vector.broadcast %cst_13 : f32 to vector<16x44xf32>
    %c0_14 = arith.constant 0 : index
    %c0_15 = arith.constant 0 : index
    %12 = vector.load %arg17[%c0_14, %c0_15] : memref<274x44xf32, #tpu.memory_space<vmem>>, vector<16x44xf32>
    tpu.vector_store %arg17[%c0_14, %c0_15], %11 {strides = array<i32>} : memref<274x44xf32, #tpu.memory_space<vmem>>, vector<16x44xf32>,
    %cst_16 = arith.constant 0.000000e+00 : f32
    %13 = vector.broadcast %cst_16 : f32 to vector<16x44xf32>
    %c258_17 = arith.constant 258 : index
    %c0_18 = arith.constant 0 : index
    %14 = vector.load %arg17[%c258_17, %c0_18] : memref<274x44xf32, #tpu.memory_space<vmem>>, vector<16x44xf32>
    tpu.vector_store %arg17[%c258_17, %c0_18], %13 {strides = array<i32>} : memref<274x44xf32, #tpu.memory_space<vmem>>, vector<16x44xf32>,
    %c0_19 = arith.constant 0 : index
    %c0_20 = arith.constant 0 : index
    %15 = vector.load %arg15[%c0_19, %c0_20] : memref<512x44xf32, #tpu.memory_space<vmem>>, vector<256x44xf32>
    %c0_21 = arith.constant 0 : index
    %c0_22 = arith.constant 0 : index
    %c0_23 = arith.constant 0 : index
    %16 = vector.load %arg3[%c0_21, %c0_22, %c0_23] : memref<4x121x256xf32, #tpu.memory_space<vmem>>, vector<1x121x256xf32>
    %17 = vector.shape_cast %16 : vector<1x121x256xf32> to vector<121x256xf32>
    %cst_24 = arith.constant dense<0.000000e+00> : vector<121x44xf32>
    %18 = tpu.matmul %17, %15, %cst_24 {dimension_numbers = #tpu.dot_dimension_numbers<[1], [0], [0], [1], [0, 0, 1, 1], [], []>} : vector<121x256xf32>, vector<256x44xf32>, vector<121x44xf32> -> vector<121x44xf32>
    %c1 = arith.constant 1 : index
    %c0_25 = arith.constant 0 : index
    %c0_26 = arith.constant 0 : index
    %19 = vector.load %arg3[%c1, %c0_25, %c0_26] : memref<4x121x256xf32, #tpu.memory_space<vmem>>, vector<1x121x256xf32>
    %20 = vector.shape_cast %19 : vector<1x121x256xf32> to vector<121x256xf32>
    %cst_27 = arith.constant dense<0.000000e+00> : vector<121x44xf32>
    %21 = tpu.matmul %20, %15, %cst_27 {dimension_numbers = #tpu.dot_dimension_numbers<[1], [0], [0], [1], [0, 0, 1, 1], [], []>} : vector<121x256xf32>, vector<256x44xf32>, vector<121x44xf32> -> vector<121x44xf32>
    %22 = arith.maximumf %18, %21 : vector<121x44xf32>
    %c2 = arith.constant 2 : index
    %c0_28 = arith.constant 0 : index
    %c0_29 = arith.constant 0 : index
    %23 = vector.load %arg3[%c2, %c0_28, %c0_29] : memref<4x121x256xf32, #tpu.memory_space<vmem>>, vector<1x121x256xf32>
    %24 = vector.shape_cast %23 : vector<1x121x256xf32> to vector<121x256xf32>
    %cst_30 = arith.constant dense<0.000000e+00> : vector<121x44xf32>
    %25 = tpu.matmul %24, %15, %cst_30 {dimension_numbers = #tpu.dot_dimension_numbers<[1], [0], [0], [1], [0, 0, 1, 1], [], []>} : vector<121x256xf32>, vector<256x44xf32>, vector<121x44xf32> -> vector<121x44xf32>
    %26 = arith.maximumf %22, %25 : vector<121x44xf32>
    %c3 = arith.constant 3 : index
    %c0_31 = arith.constant 0 : index
    %c0_32 = arith.constant 0 : index
    %27 = vector.load %arg3[%c3, %c0_31, %c0_32] : memref<4x121x256xf32, #tpu.memory_space<vmem>>, vector<1x121x256xf32>
    %28 = vector.shape_cast %27 : vector<1x121x256xf32> to vector<121x256xf32>
    %cst_33 = arith.constant dense<0.000000e+00> : vector<121x44xf32>
    %29 = tpu.matmul %28, %15, %cst_33 {dimension_numbers = #tpu.dot_dimension_numbers<[1], [0], [0], [1], [0, 0, 1, 1], [], []>} : vector<121x256xf32>, vector<256x44xf32>, vector<121x44xf32> -> vector<121x44xf32>
    %30 = arith.maximumf %26, %29 : vector<121x44xf32>
    %c16 = arith.constant 16 : index
    %c0_34 = arith.constant 0 : index
    %31 = vector.load %arg16[%c16, %c0_34] : memref<274x44xf32, #tpu.memory_space<vmem>>, vector<121x44xf32>
    tpu.vector_store %arg16[%c16, %c0_34], %30 {strides = array<i32>} : memref<274x44xf32, #tpu.memory_space<vmem>>, vector<121x44xf32>,
    %c256 = arith.constant 256 : index
    %c0_35 = arith.constant 0 : index
    %32 = vector.load %arg15[%c256, %c0_35] : memref<512x44xf32, #tpu.memory_space<vmem>>, vector<256x44xf32>
    %c0_36 = arith.constant 0 : index
    %c0_37 = arith.constant 0 : index
    %c0_38 = arith.constant 0 : index
    %33 = vector.load %arg3[%c0_36, %c0_37, %c0_38] : memref<4x121x256xf32, #tpu.memory_space<vmem>>, vector<1x121x256xf32>
    %34 = vector.shape_cast %33 : vector<1x121x256xf32> to vector<121x256xf32>
    %cst_39 = arith.constant dense<0.000000e+00> : vector<121x44xf32>
    %35 = tpu.matmul %34, %32, %cst_39 {dimension_numbers = #tpu.dot_dimension_numbers<[1], [0], [0], [1], [0, 0, 1, 1], [], []>} : vector<121x256xf32>, vector<256x44xf32>, vector<121x44xf32> -> vector<121x44xf32>
    %c1_40 = arith.constant 1 : index
    %c0_41 = arith.constant 0 : index
    %c0_42 = arith.constant 0 : index
    %36 = vector.load %arg3[%c1_40, %c0_41, %c0_42] : memref<4x121x256xf32, #tpu.memory_space<vmem>>, vector<1x121x256xf32>
    %37 = vector.shape_cast %36 : vector<1x121x256xf32> to vector<121x256xf32>
    %cst_43 = arith.constant dense<0.000000e+00> : vector<121x44xf32>
    %38 = tpu.matmul %37, %32, %cst_43 {dimension_numbers = #tpu.dot_dimension_numbers<[1], [0], [0], [1], [0, 0, 1, 1], [], []>} : vector<121x256xf32>, vector<256x44xf32>, vector<121x44xf32> -> vector<121x44xf32>
    %39 = arith.maximumf %35, %38 : vector<121x44xf32>
    %c2_44 = arith.constant 2 : index
    %c0_45 = arith.constant 0 : index
    %c0_46 = arith.constant 0 : index
    %40 = vector.load %arg3[%c2_44, %c0_45, %c0_46] : memref<4x121x256xf32, #tpu.memory_space<vmem>>, vector<1x121x256xf32>
    %41 = vector.shape_cast %40 : vector<1x121x256xf32> to vector<121x256xf32>
    %cst_47 = arith.constant dense<0.000000e+00> : vector<121x44xf32>
    %42 = tpu.matmul %41, %32, %cst_47 {dimension_numbers = #tpu.dot_dimension_numbers<[1], [0], [0], [1], [0, 0, 1, 1], [], []>} : vector<121x256xf32>, vector<256x44xf32>, vector<121x44xf32> -> vector<121x44xf32>
    %43 = arith.maximumf %39, %42 : vector<121x44xf32>
    %c3_48 = arith.constant 3 : index
    %c0_49 = arith.constant 0 : index
    %c0_50 = arith.constant 0 : index
    %44 = vector.load %arg3[%c3_48, %c0_49, %c0_50] : memref<4x121x256xf32, #tpu.memory_space<vmem>>, vector<1x121x256xf32>
    %45 = vector.shape_cast %44 : vector<1x121x256xf32> to vector<121x256xf32>
    %cst_51 = arith.constant dense<0.000000e+00> : vector<121x44xf32>
    %46 = tpu.matmul %45, %32, %cst_51 {dimension_numbers = #tpu.dot_dimension_numbers<[1], [0], [0], [1], [0, 0, 1, 1], [], []>} : vector<121x256xf32>, vector<256x44xf32>, vector<121x44xf32> -> vector<121x44xf32>
    %47 = arith.maximumf %43, %46 : vector<121x44xf32>
    %c137 = arith.constant 137 : index
    %c0_52 = arith.constant 0 : index
    %48 = vector.load %arg16[%c137, %c0_52] : memref<274x44xf32, #tpu.memory_space<vmem>>, vector<121x44xf32>
    tpu.vector_store %arg16[%c137, %c0_52], %47 {strides = array<i32>} : memref<274x44xf32, #tpu.memory_space<vmem>>, vector<121x44xf32>,
    %c0_53 = arith.constant 0 : index
    %c0_54 = arith.constant 0 : index
    %49 = vector.load %arg12[%c0_53, %c0_54] : memref<242x1xf32, #tpu.memory_space<vmem>>, vector<242x1xf32>
    %cst_55 = arith.constant 0.000000e+00 : f32
    %50 = vector.broadcast %cst_55 : f32 to vector<242x44xf32>
    %c4 = arith.constant 4 : index
    %c0_56 = arith.constant 0 : index
    %51 = vector.load %arg16[%c4, %c0_56] : memref<274x44xf32, #tpu.memory_space<vmem>>, vector<242x44xf32>
    %c0_57 = arith.constant 0 : index
    %c0_58 = arith.constant 0 : index
    %c0_59 = arith.constant 0 : index
    %52 = vector.load %arg4[%c0_57, %c0_58, %c0_59] : memref<9x44x44xf32, #tpu.memory_space<vmem>>, vector<1x44x44xf32>
    %53 = vector.shape_cast %52 : vector<1x44x44xf32> to vector<44x44xf32>
    %cst_60 = arith.constant dense<0.000000e+00> : vector<242x44xf32>
    %54 = tpu.matmul %51, %53, %cst_60 {dimension_numbers = #tpu.dot_dimension_numbers<[1], [0], [0], [1], [0, 0, 1, 1], [], []>} : vector<242x44xf32>, vector<44x44xf32>, vector<242x44xf32> -> vector<242x44xf32>
    %55 = arith.addf %50, %54 : vector<242x44xf32>
    %c5 = arith.constant 5 : index
    %c0_61 = arith.constant 0 : index
    %56 = vector.load %arg16[%c5, %c0_61] : memref<274x44xf32, #tpu.memory_space<vmem>>, vector<242x44xf32>
    %c1_62 = arith.constant 1 : index
    %c0_63 = arith.constant 0 : index
    %c0_64 = arith.constant 0 : index
    %57 = vector.load %arg4[%c1_62, %c0_63, %c0_64] : memref<9x44x44xf32, #tpu.memory_space<vmem>>, vector<1x44x44xf32>
    %58 = vector.shape_cast %57 : vector<1x44x44xf32> to vector<44x44xf32>
    %cst_65 = arith.constant dense<0.000000e+00> : vector<242x44xf32>
    %59 = tpu.matmul %56, %58, %cst_65 {dimension_numbers = #tpu.dot_dimension_numbers<[1], [0], [0], [1], [0, 0, 1, 1], [], []>} : vector<242x44xf32>, vector<44x44xf32>, vector<242x44xf32> -> vector<242x44xf32>
    %60 = arith.addf %55, %59 : vector<242x44xf32>
    %c6 = arith.constant 6 : index
    %c0_66 = arith.constant 0 : index
    %61 = vector.load %arg16[%c6, %c0_66] : memref<274x44xf32, #tpu.memory_space<vmem>>, vector<242x44xf32>
    %c2_67 = arith.constant 2 : index
    %c0_68 = arith.constant 0 : index
    %c0_69 = arith.constant 0 : index
    %62 = vector.load %arg4[%c2_67, %c0_68, %c0_69] : memref<9x44x44xf32, #tpu.memory_space<vmem>>, vector<1x44x44xf32>
    %63 = vector.shape_cast %62 : vector<1x44x44xf32> to vector<44x44xf32>
    %cst_70 = arith.constant dense<0.000000e+00> : vector<242x44xf32>
    %64 = tpu.matmul %61, %63, %cst_70 {dimension_numbers = #tpu.dot_dimension_numbers<[1], [0], [0], [1], [0, 0, 1, 1], [], []>} : vector<242x44xf32>, vector<44x44xf32>, vector<242x44xf32> -> vector<242x44xf32>
    %65 = arith.addf %60, %64 : vector<242x44xf32>
    %c15 = arith.constant 15 : index
    %c0_71 = arith.constant 0 : index
    %66 = vector.load %arg16[%c15, %c0_71] : memref<274x44xf32, #tpu.memory_space<vmem>>, vector<242x44xf32>
    %c3_72 = arith.constant 3 : index
    %c0_73 = arith.constant 0 : index
    %c0_74 = arith.constant 0 : index
    %67 = vector.load %arg4[%c3_72, %c0_73, %c0_74] : memref<9x44x44xf32, #tpu.memory_space<vmem>>, vector<1x44x44xf32>
    %68 = vector.shape_cast %67 : vector<1x44x44xf32> to vector<44x44xf32>
    %cst_75 = arith.constant dense<0.000000e+00> : vector<242x44xf32>
    %69 = tpu.matmul %66, %68, %cst_75 {dimension_numbers = #tpu.dot_dimension_numbers<[1], [0], [0], [1], [0, 0, 1, 1], [], []>} : vector<242x44xf32>, vector<44x44xf32>, vector<242x44xf32> -> vector<242x44xf32>
    %70 = arith.addf %65, %69 : vector<242x44xf32>
    %c16_76 = arith.constant 16 : index
    %c0_77 = arith.constant 0 : index
    %71 = vector.load %arg16[%c16_76, %c0_77] : memref<274x44xf32, #tpu.memory_space<vmem>>, vector<242x44xf32>
    %c4_78 = arith.constant 4 : index
    %c0_79 = arith.constant 0 : index
    %c0_80 = arith.constant 0 : index
    %72 = vector.load %arg4[%c4_78, %c0_79, %c0_80] : memref<9x44x44xf32, #tpu.memory_space<vmem>>, vector<1x44x44xf32>
    %73 = vector.shape_cast %72 : vector<1x44x44xf32> to vector<44x44xf32>
    %cst_81 = arith.constant dense<0.000000e+00> : vector<242x44xf32>
    %74 = tpu.matmul %71, %73, %cst_81 {dimension_numbers = #tpu.dot_dimension_numbers<[1], [0], [0], [1], [0, 0, 1, 1], [], []>} : vector<242x44xf32>, vector<44x44xf32>, vector<242x44xf32> -> vector<242x44xf32>
    %75 = arith.addf %70, %74 : vector<242x44xf32>
    %c17 = arith.constant 17 : index
    %c0_82 = arith.constant 0 : index
    %76 = vector.load %arg16[%c17, %c0_82] : memref<274x44xf32, #tpu.memory_space<vmem>>, vector<242x44xf32>
    %c5_83 = arith.constant 5 : index
    %c0_84 = arith.constant 0 : index
    %c0_85 = arith.constant 0 : index
    %77 = vector.load %arg4[%c5_83, %c0_84, %c0_85] : memref<9x44x44xf32, #tpu.memory_space<vmem>>, vector<1x44x44xf32>
    %78 = vector.shape_cast %77 : vector<1x44x44xf32> to vector<44x44xf32>
    %cst_86 = arith.constant dense<0.000000e+00> : vector<242x44xf32>
    %79 = tpu.matmul %76, %78, %cst_86 {dimension_numbers = #tpu.dot_dimension_numbers<[1], [0], [0], [1], [0, 0, 1, 1], [], []>} : vector<242x44xf32>, vector<44x44xf32>, vector<242x44xf32> -> vector<242x44xf32>
    %80 = arith.addf %75, %79 : vector<242x44xf32>
    %c26 = arith.constant 26 : index
    %c0_87 = arith.constant 0 : index
    %81 = vector.load %arg16[%c26, %c0_87] : memref<274x44xf32, #tpu.memory_space<vmem>>, vector<242x44xf32>
    %c6_88 = arith.constant 6 : index
    %c0_89 = arith.constant 0 : index
    %c0_90 = arith.constant 0 : index
    %82 = vector.load %arg4[%c6_88, %c0_89, %c0_90] : memref<9x44x44xf32, #tpu.memory_space<vmem>>, vector<1x44x44xf32>
    %83 = vector.shape_cast %82 : vector<1x44x44xf32> to vector<44x44xf32>
    %cst_91 = arith.constant dense<0.000000e+00> : vector<242x44xf32>
    %84 = tpu.matmul %81, %83, %cst_91 {dimension_numbers = #tpu.dot_dimension_numbers<[1], [0], [0], [1], [0, 0, 1, 1], [], []>} : vector<242x44xf32>, vector<44x44xf32>, vector<242x44xf32> -> vector<242x44xf32>
    %85 = arith.addf %80, %84 : vector<242x44xf32>
    %c27 = arith.constant 27 : index
    %c0_92 = arith.constant 0 : index
    %86 = vector.load %arg16[%c27, %c0_92] : memref<274x44xf32, #tpu.memory_space<vmem>>, vector<242x44xf32>
    %c7 = arith.constant 7 : index
    %c0_93 = arith.constant 0 : index
    %c0_94 = arith.constant 0 : index
    %87 = vector.load %arg4[%c7, %c0_93, %c0_94] : memref<9x44x44xf32, #tpu.memory_space<vmem>>, vector<1x44x44xf32>
    %88 = vector.shape_cast %87 : vector<1x44x44xf32> to vector<44x44xf32>
    %cst_95 = arith.constant dense<0.000000e+00> : vector<242x44xf32>
    %89 = tpu.matmul %86, %88, %cst_95 {dimension_numbers = #tpu.dot_dimension_numbers<[1], [0], [0], [1], [0, 0, 1, 1], [], []>} : vector<242x44xf32>, vector<44x44xf32>, vector<242x44xf32> -> vector<242x44xf32>
    %90 = arith.addf %85, %89 : vector<242x44xf32>
    %c28 = arith.constant 28 : index
    %c0_96 = arith.constant 0 : index
    %91 = vector.load %arg16[%c28, %c0_96] : memref<274x44xf32, #tpu.memory_space<vmem>>, vector<242x44xf32>
    %c8 = arith.constant 8 : index
    %c0_97 = arith.constant 0 : index
    %c0_98 = arith.constant 0 : index
    %92 = vector.load %arg4[%c8, %c0_97, %c0_98] : memref<9x44x44xf32, #tpu.memory_space<vmem>>, vector<1x44x44xf32>
    %93 = vector.shape_cast %92 : vector<1x44x44xf32> to vector<44x44xf32>
    %cst_99 = arith.constant dense<0.000000e+00> : vector<242x44xf32>
    %94 = tpu.matmul %91, %93, %cst_99 {dimension_numbers = #tpu.dot_dimension_numbers<[1], [0], [0], [1], [0, 0, 1, 1], [], []>} : vector<242x44xf32>, vector<44x44xf32>, vector<242x44xf32> -> vector<242x44xf32>
    %95 = arith.addf %90, %94 : vector<242x44xf32>
    %96 = vector.broadcast %49 : vector<242x1xf32> to vector<242x44xf32>
    %97 = arith.mulf %95, %96 : vector<242x44xf32>
    %cst_100 = arith.constant dense<0.000000e+00> : vector<44xf32>
    %98 = vector.multi_reduction <add>, %97, %cst_100 [0] : vector<242x44xf32> to vector<44xf32>
    %99 = vector.shape_cast %98 : vector<44xf32> to vector<1x44xf32>
    %c0_101 = arith.constant 0 : index
    %c0_102 = arith.constant 0 : index
    %100 = vector.load %arg6[%c0_101, %c0_102] : memref<44x44xf32, #tpu.memory_space<vmem>>, vector<44x44xf32>
    %cst_103 = arith.constant dense<0.000000e+00> : vector<1x44xf32>
    %101 = tpu.matmul %99, %100, %cst_103 {dimension_numbers = #tpu.dot_dimension_numbers<[1], [0], [0], [1], [0, 0, 1, 1], [], []>} : vector<1x44xf32>, vector<44x44xf32>, vector<1x44xf32> -> vector<1x44xf32>
    %102 = arith.mulf %97, %95 : vector<242x44xf32>
    %cst_104 = arith.constant dense<0.000000e+00> : vector<44xf32>
    %103 = vector.multi_reduction <add>, %102, %cst_104 [0] : vector<242x44xf32> to vector<44xf32>
    %104 = vector.shape_cast %103 : vector<44xf32> to vector<1x44xf32>
    %c0_105 = arith.constant 0 : index
    %c0_106 = arith.constant 0 : index
    %105 = vector.load %arg6[%c0_105, %c0_106] : memref<44x44xf32, #tpu.memory_space<vmem>>, vector<44x44xf32>
    %cst_107 = arith.constant dense<0.000000e+00> : vector<1x44xf32>
    %106 = tpu.matmul %104, %105, %cst_107 {dimension_numbers = #tpu.dot_dimension_numbers<[1], [0], [0], [1], [0, 0, 1, 1], [], []>} : vector<1x44xf32>, vector<44x44xf32>, vector<1x44xf32> -> vector<1x44xf32>
    %cst_108 = arith.constant 6.85871055E-4 : f32
    %107 = vector.broadcast %cst_108 : f32 to vector<1x44xf32>
    %108 = arith.mulf %101, %107 : vector<1x44xf32>
    %cst_109 = arith.constant 6.85871055E-4 : f32
    %109 = vector.broadcast %cst_109 : f32 to vector<1x44xf32>
    %110 = arith.mulf %106, %109 : vector<1x44xf32>
    %111 = arith.mulf %108, %108 : vector<1x44xf32>
    %112 = arith.subf %110, %111 : vector<1x44xf32>
    %c0_110 = arith.constant 0 : index
    %c0_111 = arith.constant 0 : index
    %113 = vector.load %arg8[%c0_110, %c0_111] : memref<1x44xf32, #tpu.memory_space<vmem>>, vector<1x44xf32>
    %cst_112 = arith.constant 9.99999974E-6 : f32
    %114 = vector.broadcast %cst_112 : f32 to vector<1x44xf32>
    %115 = arith.addf %112, %114 : vector<1x44xf32>
    %116 = math.rsqrt %115 : vector<1x44xf32>
    %117 = arith.mulf %113, %116 : vector<1x44xf32>
    %c0_113 = arith.constant 0 : index
    %c0_114 = arith.constant 0 : index
    %118 = vector.load %arg9[%c0_113, %c0_114] : memref<1x44xf32, #tpu.memory_space<vmem>>, vector<1x44xf32>
    %119 = arith.mulf %108, %117 : vector<1x44xf32>
    %120 = arith.subf %118, %119 : vector<1x44xf32>
    %121 = vector.broadcast %117 : vector<1x44xf32> to vector<242x44xf32>
    %122 = arith.mulf %95, %121 : vector<242x44xf32>
    %123 = vector.broadcast %120 : vector<1x44xf32> to vector<242x44xf32>
    %124 = arith.addf %122, %123 : vector<242x44xf32>
    %cst_115 = arith.constant 0.000000e+00 : f32
    %125 = vector.broadcast %cst_115 : f32 to vector<242x44xf32>
    %126 = arith.maximumf %124, %125 : vector<242x44xf32>
    %c0_116 = arith.constant 0 : index
    %c0_117 = arith.constant 0 : index
    %127 = vector.load %arg13[%c0_116, %c0_117] : memref<1x44xf32, #tpu.memory_space<vmem>>, vector<1x44xf32>
    %128 = vector.broadcast %49 : vector<242x1xf32> to vector<242x44xf32>
    %129 = vector.broadcast %127 : vector<1x44xf32> to vector<242x44xf32>
    %130 = arith.mulf %128, %129 : vector<242x44xf32>
    %131 = arith.mulf %126, %130 : vector<242x44xf32>
    %c16_118 = arith.constant 16 : index
    %c0_119 = arith.constant 0 : index
    %132 = vector.load %arg17[%c16_118, %c0_119] : memref<274x44xf32, #tpu.memory_space<vmem>>, vector<242x44xf32>
    tpu.vector_store %arg17[%c16_118, %c0_119], %131 {strides = array<i32>} : memref<274x44xf32, #tpu.memory_space<vmem>>, vector<242x44xf32>,
    %cst_120 = arith.constant 0.000000e+00 : f32
    %133 = vector.broadcast %cst_120 : f32 to vector<242x88xf32>
    %c4_121 = arith.constant 4 : index
    %c0_122 = arith.constant 0 : index
    %134 = vector.load %arg17[%c4_121, %c0_122] : memref<274x44xf32, #tpu.memory_space<vmem>>, vector<242x44xf32>
    %c0_123 = arith.constant 0 : index
    %c0_124 = arith.constant 0 : index
    %c0_125 = arith.constant 0 : index
    %135 = vector.load %arg5[%c0_123, %c0_124, %c0_125] : memref<9x44x88xf32, #tpu.memory_space<vmem>>, vector<1x44x88xf32>
    %136 = vector.shape_cast %135 : vector<1x44x88xf32> to vector<44x88xf32>
    %cst_126 = arith.constant dense<0.000000e+00> : vector<242x88xf32>
    %137 = tpu.matmul %134, %136, %cst_126 {dimension_numbers = #tpu.dot_dimension_numbers<[1], [0], [0], [1], [0, 0, 1, 1], [], []>} : vector<242x44xf32>, vector<44x88xf32>, vector<242x88xf32> -> vector<242x88xf32>
    %138 = arith.addf %133, %137 : vector<242x88xf32>
    %c5_127 = arith.constant 5 : index
    %c0_128 = arith.constant 0 : index
    %139 = vector.load %arg17[%c5_127, %c0_128] : memref<274x44xf32, #tpu.memory_space<vmem>>, vector<242x44xf32>
    %c1_129 = arith.constant 1 : index
    %c0_130 = arith.constant 0 : index
    %c0_131 = arith.constant 0 : index
    %140 = vector.load %arg5[%c1_129, %c0_130, %c0_131] : memref<9x44x88xf32, #tpu.memory_space<vmem>>, vector<1x44x88xf32>
    %141 = vector.shape_cast %140 : vector<1x44x88xf32> to vector<44x88xf32>
    %cst_132 = arith.constant dense<0.000000e+00> : vector<242x88xf32>
    %142 = tpu.matmul %139, %141, %cst_132 {dimension_numbers = #tpu.dot_dimension_numbers<[1], [0], [0], [1], [0, 0, 1, 1], [], []>} : vector<242x44xf32>, vector<44x88xf32>, vector<242x88xf32> -> vector<242x88xf32>
    %143 = arith.addf %138, %142 : vector<242x88xf32>
    %c6_133 = arith.constant 6 : index
    %c0_134 = arith.constant 0 : index
    %144 = vector.load %arg17[%c6_133, %c0_134] : memref<274x44xf32, #tpu.memory_space<vmem>>, vector<242x44xf32>
    %c2_135 = arith.constant 2 : index
    %c0_136 = arith.constant 0 : index
    %c0_137 = arith.constant 0 : index
    %145 = vector.load %arg5[%c2_135, %c0_136, %c0_137] : memref<9x44x88xf32, #tpu.memory_space<vmem>>, vector<1x44x88xf32>
    %146 = vector.shape_cast %145 : vector<1x44x88xf32> to vector<44x88xf32>
    %cst_138 = arith.constant dense<0.000000e+00> : vector<242x88xf32>
    %147 = tpu.matmul %144, %146, %cst_138 {dimension_numbers = #tpu.dot_dimension_numbers<[1], [0], [0], [1], [0, 0, 1, 1], [], []>} : vector<242x44xf32>, vector<44x88xf32>, vector<242x88xf32> -> vector<242x88xf32>
    %148 = arith.addf %143, %147 : vector<242x88xf32>
    %c15_139 = arith.constant 15 : index
    %c0_140 = arith.constant 0 : index
    %149 = vector.load %arg17[%c15_139, %c0_140] : memref<274x44xf32, #tpu.memory_space<vmem>>, vector<242x44xf32>
    %c3_141 = arith.constant 3 : index
    %c0_142 = arith.constant 0 : index
    %c0_143 = arith.constant 0 : index
    %150 = vector.load %arg5[%c3_141, %c0_142, %c0_143] : memref<9x44x88xf32, #tpu.memory_space<vmem>>, vector<1x44x88xf32>
    %151 = vector.shape_cast %150 : vector<1x44x88xf32> to vector<44x88xf32>
    %cst_144 = arith.constant dense<0.000000e+00> : vector<242x88xf32>
    %152 = tpu.matmul %149, %151, %cst_144 {dimension_numbers = #tpu.dot_dimension_numbers<[1], [0], [0], [1], [0, 0, 1, 1], [], []>} : vector<242x44xf32>, vector<44x88xf32>, vector<242x88xf32> -> vector<242x88xf32>
    %153 = arith.addf %148, %152 : vector<242x88xf32>
    %c16_145 = arith.constant 16 : index
    %c0_146 = arith.constant 0 : index
    %154 = vector.load %arg17[%c16_145, %c0_146] : memref<274x44xf32, #tpu.memory_space<vmem>>, vector<242x44xf32>
    %c4_147 = arith.constant 4 : index
    %c0_148 = arith.constant 0 : index
    %c0_149 = arith.constant 0 : index
    %155 = vector.load %arg5[%c4_147, %c0_148, %c0_149] : memref<9x44x88xf32, #tpu.memory_space<vmem>>, vector<1x44x88xf32>
    %156 = vector.shape_cast %155 : vector<1x44x88xf32> to vector<44x88xf32>
    %cst_150 = arith.constant dense<0.000000e+00> : vector<242x88xf32>
    %157 = tpu.matmul %154, %156, %cst_150 {dimension_numbers = #tpu.dot_dimension_numbers<[1], [0], [0], [1], [0, 0, 1, 1], [], []>} : vector<242x44xf32>, vector<44x88xf32>, vector<242x88xf32> -> vector<242x88xf32>
    %158 = arith.addf %153, %157 : vector<242x88xf32>
    %c17_151 = arith.constant 17 : index
    %c0_152 = arith.constant 0 : index
    %159 = vector.load %arg17[%c17_151, %c0_152] : memref<274x44xf32, #tpu.memory_space<vmem>>, vector<242x44xf32>
    %c5_153 = arith.constant 5 : index
    %c0_154 = arith.constant 0 : index
    %c0_155 = arith.constant 0 : index
    %160 = vector.load %arg5[%c5_153, %c0_154, %c0_155] : memref<9x44x88xf32, #tpu.memory_space<vmem>>, vector<1x44x88xf32>
    %161 = vector.shape_cast %160 : vector<1x44x88xf32> to vector<44x88xf32>
    %cst_156 = arith.constant dense<0.000000e+00> : vector<242x88xf32>
    %162 = tpu.matmul %159, %161, %cst_156 {dimension_numbers = #tpu.dot_dimension_numbers<[1], [0], [0], [1], [0, 0, 1, 1], [], []>} : vector<242x44xf32>, vector<44x88xf32>, vector<242x88xf32> -> vector<242x88xf32>
    %163 = arith.addf %158, %162 : vector<242x88xf32>
    %c26_157 = arith.constant 26 : index
    %c0_158 = arith.constant 0 : index
    %164 = vector.load %arg17[%c26_157, %c0_158] : memref<274x44xf32, #tpu.memory_space<vmem>>, vector<242x44xf32>
    %c6_159 = arith.constant 6 : index
    %c0_160 = arith.constant 0 : index
    %c0_161 = arith.constant 0 : index
    %165 = vector.load %arg5[%c6_159, %c0_160, %c0_161] : memref<9x44x88xf32, #tpu.memory_space<vmem>>, vector<1x44x88xf32>
    %166 = vector.shape_cast %165 : vector<1x44x88xf32> to vector<44x88xf32>
    %cst_162 = arith.constant dense<0.000000e+00> : vector<242x88xf32>
    %167 = tpu.matmul %164, %166, %cst_162 {dimension_numbers = #tpu.dot_dimension_numbers<[1], [0], [0], [1], [0, 0, 1, 1], [], []>} : vector<242x44xf32>, vector<44x88xf32>, vector<242x88xf32> -> vector<242x88xf32>
    %168 = arith.addf %163, %167 : vector<242x88xf32>
    %c27_163 = arith.constant 27 : index
    %c0_164 = arith.constant 0 : index
    %169 = vector.load %arg17[%c27_163, %c0_164] : memref<274x44xf32, #tpu.memory_space<vmem>>, vector<242x44xf32>
    %c7_165 = arith.constant 7 : index
    %c0_166 = arith.constant 0 : index
    %c0_167 = arith.constant 0 : index
    %170 = vector.load %arg5[%c7_165, %c0_166, %c0_167] : memref<9x44x88xf32, #tpu.memory_space<vmem>>, vector<1x44x88xf32>
    %171 = vector.shape_cast %170 : vector<1x44x88xf32> to vector<44x88xf32>
    %cst_168 = arith.constant dense<0.000000e+00> : vector<242x88xf32>
    %172 = tpu.matmul %169, %171, %cst_168 {dimension_numbers = #tpu.dot_dimension_numbers<[1], [0], [0], [1], [0, 0, 1, 1], [], []>} : vector<242x44xf32>, vector<44x88xf32>, vector<242x88xf32> -> vector<242x88xf32>
    %173 = arith.addf %168, %172 : vector<242x88xf32>
    %c28_169 = arith.constant 28 : index
    %c0_170 = arith.constant 0 : index
    %174 = vector.load %arg17[%c28_169, %c0_170] : memref<274x44xf32, #tpu.memory_space<vmem>>, vector<242x44xf32>
    %c8_171 = arith.constant 8 : index
    %c0_172 = arith.constant 0 : index
    %c0_173 = arith.constant 0 : index
    %175 = vector.load %arg5[%c8_171, %c0_172, %c0_173] : memref<9x44x88xf32, #tpu.memory_space<vmem>>, vector<1x44x88xf32>
    %176 = vector.shape_cast %175 : vector<1x44x88xf32> to vector<44x88xf32>
    %cst_174 = arith.constant dense<0.000000e+00> : vector<242x88xf32>
    %177 = tpu.matmul %174, %176, %cst_174 {dimension_numbers = #tpu.dot_dimension_numbers<[1], [0], [0], [1], [0, 0, 1, 1], [], []>} : vector<242x44xf32>, vector<44x88xf32>, vector<242x88xf32> -> vector<242x88xf32>
    %178 = arith.addf %173, %177 : vector<242x88xf32>
    %179 = vector.broadcast %49 : vector<242x1xf32> to vector<242x88xf32>
    %180 = arith.mulf %178, %179 : vector<242x88xf32>
    %cst_175 = arith.constant dense<0.000000e+00> : vector<88xf32>
    %181 = vector.multi_reduction <add>, %180, %cst_175 [0] : vector<242x88xf32> to vector<88xf32>
    %182 = vector.shape_cast %181 : vector<88xf32> to vector<1x88xf32>
    %c0_176 = arith.constant 0 : index
    %c0_177 = arith.constant 0 : index
    %183 = vector.load %arg7[%c0_176, %c0_177] : memref<88x88xf32, #tpu.memory_space<vmem>>, vector<88x88xf32>
    %cst_178 = arith.constant dense<0.000000e+00> : vector<1x88xf32>
    %184 = tpu.matmul %182, %183, %cst_178 {dimension_numbers = #tpu.dot_dimension_numbers<[1], [0], [0], [1], [0, 0, 1, 1], [], []>} : vector<1x88xf32>, vector<88x88xf32>, vector<1x88xf32> -> vector<1x88xf32>
    %185 = arith.mulf %180, %178 : vector<242x88xf32>
    %cst_179 = arith.constant dense<0.000000e+00> : vector<88xf32>
    %186 = vector.multi_reduction <add>, %185, %cst_179 [0] : vector<242x88xf32> to vector<88xf32>
    %187 = vector.shape_cast %186 : vector<88xf32> to vector<1x88xf32>
    %c0_180 = arith.constant 0 : index
    %c0_181 = arith.constant 0 : index
    %188 = vector.load %arg7[%c0_180, %c0_181] : memref<88x88xf32, #tpu.memory_space<vmem>>, vector<88x88xf32>
    %cst_182 = arith.constant dense<0.000000e+00> : vector<1x88xf32>
    %189 = tpu.matmul %187, %188, %cst_182 {dimension_numbers = #tpu.dot_dimension_numbers<[1], [0], [0], [1], [0, 0, 1, 1], [], []>} : vector<1x88xf32>, vector<88x88xf32>, vector<1x88xf32> -> vector<1x88xf32>
    %cst_183 = arith.constant 6.85871055E-4 : f32
    %190 = vector.broadcast %cst_183 : f32 to vector<1x88xf32>
    %191 = arith.mulf %184, %190 : vector<1x88xf32>
    %cst_184 = arith.constant 6.85871055E-4 : f32
    %192 = vector.broadcast %cst_184 : f32 to vector<1x88xf32>
    %193 = arith.mulf %189, %192 : vector<1x88xf32>
    %194 = arith.mulf %191, %191 : vector<1x88xf32>
    %195 = arith.subf %193, %194 : vector<1x88xf32>
    %c0_185 = arith.constant 0 : index
    %c0_186 = arith.constant 0 : index
    %196 = vector.load %arg10[%c0_185, %c0_186] : memref<1x88xf32, #tpu.memory_space<vmem>>, vector<1x88xf32>
    %cst_187 = arith.constant 9.99999974E-6 : f32
    %197 = vector.broadcast %cst_187 : f32 to vector<1x88xf32>
    %198 = arith.addf %195, %197 : vector<1x88xf32>
    %199 = math.rsqrt %198 : vector<1x88xf32>
    %200 = arith.mulf %196, %199 : vector<1x88xf32>
    %c0_188 = arith.constant 0 : index
    %c0_189 = arith.constant 0 : index
    %201 = vector.load %arg11[%c0_188, %c0_189] : memref<1x88xf32, #tpu.memory_space<vmem>>, vector<1x88xf32>
    %202 = arith.mulf %191, %200 : vector<1x88xf32>
    %203 = arith.subf %201, %202 : vector<1x88xf32>
    %204 = vector.broadcast %200 : vector<1x88xf32> to vector<242x88xf32>
    %205 = arith.mulf %178, %204 : vector<242x88xf32>
    %206 = vector.broadcast %203 : vector<1x88xf32> to vector<242x88xf32>
    %207 = arith.addf %205, %206 : vector<242x88xf32>
    %cst_190 = arith.constant 0.000000e+00 : f32
    %208 = vector.broadcast %cst_190 : f32 to vector<242x88xf32>
    %209 = arith.maximumf %207, %208 : vector<242x88xf32>
    %c0_191 = arith.constant 0 : index
    %c0_192 = arith.constant 0 : index
    %210 = vector.load %arg14[%c0_191, %c0_192] : memref<242x88xf32, #tpu.memory_space<vmem>>, vector<242x88xf32>
    tpu.vector_store %arg14[%c0_191, %c0_192], %209 {strides = array<i32>} : memref<242x88xf32, #tpu.memory_space<vmem>>, vector<242x88xf32>,
    return
  }
}

</mosaic_0001>

<bundles_post_ra>
// kernel: tpu_custom_call.1
= control target key start
LH: loop header
LB: loop body
LE: loop exit
PB: predicated region body
PF: predicated region fallthrough
CT: control target
= control target key end

     0   :  { %vm119_vm0 = vcmask 523264   ;;  %vm1154_vm1 = vcmask 359424   ;;  %vm3038_vm2 = vcmask 1043456   ;;  %vm15595_vm3 = vmmov 0   ;;  %s21922_s1 = inlined_call_operand.vmem [shape: f32[64,44], index: 1, kind: input, shape index: {}]   ;;  %s21923_s2 = inlined_call_operand.vmem [shape: f32[64,44], index: 2, kind: input, shape index: {}]   ;;  %s21924_s0 = inlined_call_operand.vmem [shape: f32[512,64], index: 0, kind: input, shape index: {}]   ;;  %s21925_s3 = inlined_call_operand.vmem [shape: f32[4,121,256], index: 3, kind: input, shape index: {}]   ;;  %s21926_s4 = inlined_call_operand.vmem [shape: f32[9,44,44], index: 4, kind: input, shape index: {}]   ;;  %s21927_s12 = inlined_call_operand.vmem [shape: f32[242,1], index: 12, kind: input, shape index: {}]   ;;  %s21928_s6 = inlined_call_operand.vmem [shape: f32[44,44], index: 6, kind: input, shape index: {}]   ;;  %s21929_s5 = inlined_call_operand.vmem [shape: f32[9,44,88], index: 5, kind: input, shape index: {}]   ;;  %s21930_s13 = inlined_call_operand.vmem [shape: f32[1,44], index: 13, kind: input, shape index: {}]   ;;  %s21931_s8 = inlined_call_operand.vmem [shape: f32[1,44], index: 8, kind: input, shape index: {}]   ;;  %s21932_s9 = inlined_call_operand.vmem [shape: f32[1,44], index: 9, kind: input, shape index: {}]   ;;  %s21933_s7 = inlined_call_operand.vmem [shape: f32[88,88], index: 7, kind: input, shape index: {}]   ;;  %s21934_s10 = inlined_call_operand.vmem [shape: f32[1,88], index: 10, kind: input, shape index: {}]   ;;  %s21935_s11 = inlined_call_operand.vmem [shape: f32[1,88], index: 11, kind: input, shape index: {}]   ;;  %s21936_s14 = inlined_call_operand.vmem [shape: f32[242,88], index: 14, kind: output, shape index: {}]  }
   0x1   :  { %v118_v0 = vld [vmem:[%s21922_s1 + $0x38] sm:$0xff]  ;;  %v117_v2 = vld [vmem:[%s21922_s1 + $0x30] sm:$0xff]  ;;  %v116_v4 = vld [vmem:[%s21922_s1 + $0x28] sm:$0xff]  ;;  %vm2033_vm4 = vcmask 352256   ;;  %vm6518_vm5 = vcmask 353280   ;;  %vm10429_vm6 = vcmask 719872  }
   0x2   :  { %v704_v1 = vld [vmem:[%s21923_s2 + $0x38] sm:$0xff]  ;;  %13391 = vmatprep.subr.mxu0 %v118_v0  ;;  %v703_v3 = vld [vmem:[%s21923_s2 + $0x30] sm:$0xff]  ;;  %v702_v5 = vld [vmem:[%s21923_s2 + $0x28] sm:$0xff]  ;;  %vm10489_vm7 = vcmask 713728  }
   0x3   :  { %13503 = vmatprep.subr.mxu1 %v704_v1  ;;  %13392 = vmatpush3.msra.mxu0 %v118_v0  ;;  %v115_v6 = vld [vmem:[%s21922_s1 + $0x20] sm:$0xff]  ;;  %v114_v8 = vld [vmem:[%s21922_s1 + $0x18] sm:$0xff]  ;;  %v113_v10 = vld [vmem:[%s21922_s1 + $0x10] sm:$0xff] }
   0x4   :  { %13504 = vmatpush3.msra.mxu1 %v704_v1  ;;  %13393 = vmatprep.subr.mxu0 %v117_v2  ;;  %v701_v7 = vld [vmem:[%s21923_s2 + $0x20] sm:$0xff]  ;;  %v700_v9 = vld [vmem:[%s21923_s2 + $0x18] sm:$0xff]  ;;  %v699_v11 = vld [vmem:[%s21923_s2 + $0x10] sm:$0xff] }
   0x5   :  { %13505 = vmatprep.subr.mxu1 %v703_v3  ;;  %13394 = vmatpush3.msra.mxu0 %v117_v2  ;;  %v112_v12 = vld [vmem:[%s21922_s1 + $0x8] sm:$0xff]  ;;  %v111_v14 = vld [vmem:[%s21922_s1] sm:$0xff]  ;;  %v49_v18 = vld [vmem:[%s21924_s0 + $0x10] sm:$0xff] }
   0x6   :  { %13506 = vmatpush3.msra.mxu1 %v703_v3  ;;  %13395 = vmatprep.subr.mxu0 %v116_v4  ;;  %v698_v13 = vld [vmem:[%s21923_s2 + $0x8] sm:$0xff]  ;;  %v697_v15 = vld [vmem:[%s21923_s2] sm:$0xff]  ;;  %v50_v19 = vld [vmem:[%s21924_s0 + $0x18] sm:$0xff] }
   0x7   :  { %13507 = vmatprep.subr.mxu1 %v702_v5  ;;  %13396 = vmatpush3.msra.mxu0 %v116_v4  ;;  %v47_v16 = vld [vmem:[%s21924_s0] sm:$0xff]  ;;  %v48_v17 = vld [vmem:[%s21924_s0 + $0x8] sm:$0xff]  ;;  %v53_v22 = vld [vmem:[%s21924_s0 + $0x30] sm:$0xff] }
   0x8   :  { %13508 = vmatpush3.msra.mxu1 %v702_v5  ;;  %13397 = vmatprep.subr.mxu0 %v115_v6  ;;  %v51_v20 = vld [vmem:[%s21924_s0 + $0x20] sm:$0xff]  ;;  %v52_v21 = vld [vmem:[%s21924_s0 + $0x28] sm:$0xff]  ;;  %v54_v23 = vld [vmem:[%s21924_s0 + $0x38] sm:$0xff] }
   0x9   :  { %13509 = vmatprep.subr.mxu1 %v701_v7  ;;  %13398 = vmatpush3.msra.mxu0 %v115_v6  ;;  %v55_v24 = vld [vmem:[%s21924_s0 + $0x40] sm:$0xff]  ;;  %v56_v25 = vld [vmem:[%s21924_s0 + $0x48] sm:$0xff]  ;;  %v57_v26 = vld [vmem:[%s21924_s0 + $0x50] sm:$0xff] }
   0xa   :  { %13510 = vmatpush3.msra.mxu1 %v701_v7  ;;  %13399 = vmatprep.subr.mxu0 %v114_v8  ;;  %v58_v27 = vld [vmem:[%s21924_s0 + $0x58] sm:$0xff]  ;;  %v59_v28 = vld [vmem:[%s21924_s0 + $0x60] sm:$0xff]  ;;  %v60_v29 = vld [vmem:[%s21924_s0 + $0x68] sm:$0xff] }
   0xb   :  { %13511 = vmatprep.subr.mxu1 %v700_v9  ;;  %13400 = vmatpush3.msra.mxu0 %v114_v8  ;;  %v61_v30 = vld [vmem:[%s21924_s0 + $0x70] sm:$0xff]  ;;  %v62_v31 = vld [vmem:[%s21924_s0 + $0x78] sm:$0xff]  ;;  %v63_v32 = vld [vmem:[%s21924_s0 + $0x80] sm:$0xff] }
   0xc   :  { %13512 = vmatpush3.msra.mxu1 %v700_v9  ;;  %13401 = vmatprep.subr.mxu0 %v113_v10  ;;  %v64_v33 = vld [vmem:[%s21924_s0 + $0x88] sm:$0xff]  ;;  %v65_v34 = vld [vmem:[%s21924_s0 + $0x90] sm:$0xff]  ;;  %v66_v35 = vld [vmem:[%s21924_s0 + $0x98] sm:$0xff] }
   0xd   :  { %13513 = vmatprep.subr.mxu1 %v699_v11  ;;  %13402 = vmatpush3.msra.mxu0 %v113_v10  ;;  %v67_v36 = vld [vmem:[%s21924_s0 + $0xa0] sm:$0xff]  ;;  %v68_v37 = vld [vmem:[%s21924_s0 + $0xa8] sm:$0xff]  ;;  %v69_v38 = vld [vmem:[%s21924_s0 + $0xb0] sm:$0xff] }
   0xe   :  { %13514 = vmatpush3.msra.mxu1 %v699_v11  ;;  %13403 = vmatprep.subr.mxu0 %v112_v12  ;;  %v70_v39 = vld [vmem:[%s21924_s0 + $0xb8] sm:$0xff]  ;;  %v71_v40 = vld [vmem:[%s21924_s0 + $0xc0] sm:$0xff]  ;;  %v72_v41 = vld [vmem:[%s21924_s0 + $0xc8] sm:$0xff] }
   0xf   :  { %13515 = vmatprep.subr.mxu1 %v698_v13  ;;  %13404 = vmatpush3.msra.mxu0 %v112_v12  ;;  %v73_v42 = vld [vmem:[%s21924_s0 + $0xd0] sm:$0xff]  ;;  %v74_v43 = vld [vmem:[%s21924_s0 + $0xd8] sm:$0xff]  ;;  %v75_v44 = vld [vmem:[%s21924_s0 + $0xe0] sm:$0xff] }
  0x10   :  { %13516 = vmatpush3.msra.mxu1 %v698_v13  ;;  %13405 = vmatprep.subr.mxu0 %v111_v14  ;;  %v76_v45 = vld [vmem:[%s21924_s0 + $0xe8] sm:$0xff]  ;;  %v77_v46 = vld [vmem:[%s21924_s0 + $0xf0] sm:$0xff]  ;;  %v78_v47 = vld [vmem:[%s21924_s0 + $0xf8] sm:$0xff] }
  0x11   :  { %13517 = vmatprep.subr.mxu1 %v697_v15  ;;  %13406 = vmatpush3.msra.mxu0 %v111_v14  ;;  %v79_v48 = vld [vmem:[%s21924_s0 + $0x100] sm:$0xff]  ;;  %v80_v49 = vld [vmem:[%s21924_s0 + $0x108] sm:$0xff]  ;;  %v81_v50 = vld [vmem:[%s21924_s0 + $0x110] sm:$0xff] }
  0x12   :  { %13407 = vmatprep.mubr.msk.f32.mxu0 %vm119_vm0, %v47_v16  ;;  %13518 = vmatpush3.msra.mxu1 %v697_v15  ;;  %v82_v51 = vld [vmem:[%s21924_s0 + $0x118] sm:$0xff]  ;;  %v83_v52 = vld [vmem:[%s21924_s0 + $0x120] sm:$0xff]  ;;  %v84_v53 = vld [vmem:[%s21924_s0 + $0x128] sm:$0xff] }
  0x13   :  { %13519 = vmatprep.mubr.msk.f32.mxu1 %vm119_vm0, %v47_v16  ;;  %13408 = vmatmul.mubr.msk.f32.vlgmr.msra.gmra.mxu0 %vm119_vm0, %v48_v17  ;;  %v85_v54 = vld [vmem:[%s21924_s0 + $0x130] sm:$0xff]  ;;  %v86_v55 = vld [vmem:[%s21924_s0 + $0x138] sm:$0xff]  ;;  %v87_v56 = vld [vmem:[%s21924_s0 + $0x140] sm:$0xff] }
  0x14   :  { %13520 = vmatmul.mubr.msk.f32.vlgmr.msra.gmra.mxu1 %vm119_vm0, %v48_v17  ;;  %13410 = vmatprep.mubr.msk.f32.mxu0 %vm119_vm0, %v49_v18  ;;  %v88_v57 = vld [vmem:[%s21924_s0 + $0x148] sm:$0xff]  ;;  %v89_v58 = vld [vmem:[%s21924_s0 + $0x150] sm:$0xff]  ;;  %v90_v59 = vld [vmem:[%s21924_s0 + $0x158] sm:$0xff] }
  0x15   :  { %13522 = vmatprep.mubr.msk.f32.mxu1 %vm119_vm0, %v49_v18  ;;  %v91_v60 = vld [vmem:[%s21924_s0 + $0x160] sm:$0xff]  ;;  %v92_v61 = vld [vmem:[%s21924_s0 + $0x168] sm:$0xff]  ;;  %v93_v62 = vld [vmem:[%s21924_s0 + $0x170] sm:$0xff] }
  0x16   :  { %v94_v63 = vld [vmem:[%s21924_s0 + $0x178] sm:$0xff]  ;;  %v95_v0 = vld [vmem:[%s21924_s0 + $0x180] sm:$0xff]  ;;  %v96_v1 = vld [vmem:[%s21924_s0 + $0x188] sm:$0xff] }
  0x17   :  { %13411 = vmatmul.mubr.msk.f32.gmra.mxu0 %vm119_vm0, %v50_v19  ;;  %v97_v2 = vld [vmem:[%s21924_s0 + $0x190] sm:$0xff]  ;;  %v98_v3 = vld [vmem:[%s21924_s0 + $0x198] sm:$0xff]  ;;  %v99_v4 = vld [vmem:[%s21924_s0 + $0x1a0] sm:$0xff] }
  0x18   :  { %13523 = vmatmul.mubr.msk.f32.gmra.mxu1 %vm119_vm0, %v50_v19  ;;  %13413 = vmatprep.mubr.msk.f32.mxu0 %vm119_vm0, %v51_v20  ;;  %v100_v5 = vld [vmem:[%s21924_s0 + $0x1a8] sm:$0xff]  ;;  %v101_v6 = vld [vmem:[%s21924_s0 + $0x1b0] sm:$0xff]  ;;  %v102_v7 = vld [vmem:[%s21924_s0 + $0x1b8] sm:$0xff] }
  0x19   :  { %13525 = vmatprep.mubr.msk.f32.mxu1 %vm119_vm0, %v51_v20  ;;  %v103_v8 = vld [vmem:[%s21924_s0 + $0x1c0] sm:$0xff]  ;;  %v104_v9 = vld [vmem:[%s21924_s0 + $0x1c8] sm:$0xff]  ;;  %v105_v10 = vld [vmem:[%s21924_s0 + $0x1d0] sm:$0xff] }
  0x1a   :  { %v106_v11 = vld [vmem:[%s21924_s0 + $0x1d8] sm:$0xff]  ;;  %v107_v12 = vld [vmem:[%s21924_s0 + $0x1e0] sm:$0xff]  ;;  %v108_v13 = vld [vmem:[%s21924_s0 + $0x1e8] sm:$0xff] }
  0x1b   :  { %13414 = vmatmul.mubr.msk.f32.gmra.mxu0 %vm119_vm0, %v52_v21  ;;  %v109_v14 = vld [vmem:[%s21924_s0 + $0x1f0] sm:$0xff]  ;;  %v110_v15 = vld [vmem:[%s21924_s0 + $0x1f8] sm:$0xff]  ;;  %v1260_v16 = vld [vmem:[%s21925_s3 + $0x8] sm:$0xff] }
  0x1c   :  { %13526 = vmatmul.mubr.msk.f32.gmra.mxu1 %vm119_vm0, %v52_v21  ;;  %13416 = vmatprep.mubr.msk.f32.mxu0 %vm119_vm0, %v53_v22  ;;  %v11033_v17 = vld [vmem:[%s21925_s3 + $0x108] sm:$0xff] }
  0x1d   :  { %13528 = vmatprep.mubr.msk.f32.mxu1 %vm119_vm0, %v53_v22 }
  0x1f   :  { %13417 = vmatmul.mubr.msk.f32.gmra.mxu0 %vm119_vm0, %v54_v23 }
  0x20   :  { %13529 = vmatmul.mubr.msk.f32.gmra.mxu1 %vm119_vm0, %v54_v23  ;;  %13419 = vmatprep.mubr.msk.f32.mxu0 %vm119_vm0, %v55_v24 }
  0x21   :  { %13531 = vmatprep.mubr.msk.f32.mxu1 %vm119_vm0, %v55_v24 }
  0x23   :  { %13420 = vmatmul.mubr.msk.f32.gmra.mxu0 %vm119_vm0, %v56_v25 }
  0x24   :  { %13532 = vmatmul.mubr.msk.f32.gmra.mxu1 %vm119_vm0, %v56_v25  ;;  %13422 = vmatprep.mubr.msk.f32.mxu0 %vm119_vm0, %v57_v26 }
  0x25   :  { %13534 = vmatprep.mubr.msk.f32.mxu1 %vm119_vm0, %v57_v26 }
  0x27   :  { %13423 = vmatmul.mubr.msk.f32.gmra.mxu0 %vm119_vm0, %v58_v27 }
  0x28   :  { %13535 = vmatmul.mubr.msk.f32.gmra.mxu1 %vm119_vm0, %v58_v27  ;;  %13425 = vmatprep.mubr.msk.f32.mxu0 %vm119_vm0, %v59_v28 }
  0x29   :  { %13537 = vmatprep.mubr.msk.f32.mxu1 %vm119_vm0, %v59_v28 }
  0x2b   :  { %13426 = vmatmul.mubr.msk.f32.gmra.mxu0 %vm119_vm0, %v60_v29 }
  0x2c   :  { %13538 = vmatmul.mubr.msk.f32.gmra.mxu1 %vm119_vm0, %v60_v29  ;;  %13428 = vmatprep.mubr.msk.f32.mxu0 %vm119_vm0, %v61_v30 }
  0x2d   :  { %13540 = vmatprep.mubr.msk.f32.mxu1 %vm119_vm0, %v61_v30 }
  0x2f   :  { %13429 = vmatmul.mubr.msk.f32.gmra.mxu0 %vm119_vm0, %v62_v31 }
  0x30   :  { %13541 = vmatmul.mubr.msk.f32.gmra.mxu1 %vm119_vm0, %v62_v31  ;;  %13431 = vmatprep.mubr.msk.f32.mxu0 %vm119_vm0, %v63_v32 }
  0x31   :  { %13543 = vmatprep.mubr.msk.f32.mxu1 %vm119_vm0, %v63_v32 }
  0x33   :  { %13432 = vmatmul.mubr.msk.f32.gmra.mxu0 %vm119_vm0, %v64_v33 }
  0x34   :  { %13544 = vmatmul.mubr.msk.f32.gmra.mxu1 %vm119_vm0, %v64_v33  ;;  %13434 = vmatprep.mubr.msk.f32.mxu0 %vm119_vm0, %v65_v34 }
  0x35   :  { %13546 = vmatprep.mubr.msk.f32.mxu1 %vm119_vm0, %v65_v34 }
  0x37   :  { %13435 = vmatmul.mubr.msk.f32.gmra.mxu0 %vm119_vm0, %v66_v35 }
  0x38   :  { %13547 = vmatmul.mubr.msk.f32.gmra.mxu1 %vm119_vm0, %v66_v35  ;;  %13437 = vmatprep.mubr.msk.f32.mxu0 %vm119_vm0, %v67_v36 }
  0x39   :  { %13549 = vmatprep.mubr.msk.f32.mxu1 %vm119_vm0, %v67_v36 }
  0x3b   :  { %13438 = vmatmul.mubr.msk.f32.gmra.mxu0 %vm119_vm0, %v68_v37 }
  0x3c   :  { %13550 = vmatmul.mubr.msk.f32.gmra.mxu1 %vm119_vm0, %v68_v37  ;;  %13440 = vmatprep.mubr.msk.f32.mxu0 %vm119_vm0, %v69_v38 }
  0x3d   :  { %13552 = vmatprep.mubr.msk.f32.mxu1 %vm119_vm0, %v69_v38 }
  0x3f   :  { %13441 = vmatmul.mubr.msk.f32.gmra.mxu0 %vm119_vm0, %v70_v39 }
  0x40   :  { %13553 = vmatmul.mubr.msk.f32.gmra.mxu1 %vm119_vm0, %v70_v39  ;;  %13443 = vmatprep.mubr.msk.f32.mxu0 %vm119_vm0, %v71_v40 }
  0x41   :  { %13555 = vmatprep.mubr.msk.f32.mxu1 %vm119_vm0, %v71_v40 }
  0x43   :  { %13444 = vmatmul.mubr.msk.f32.gmra.mxu0 %vm119_vm0, %v72_v41 }
  0x44   :  { %13556 = vmatmul.mubr.msk.f32.gmra.mxu1 %vm119_vm0, %v72_v41  ;;  %13446 = vmatprep.mubr.msk.f32.mxu0 %vm119_vm0, %v73_v42 }
  0x45   :  { %13558 = vmatprep.mubr.msk.f32.mxu1 %vm119_vm0, %v73_v42 }
  0x47   :  { %13447 = vmatmul.mubr.msk.f32.gmra.mxu0 %vm119_vm0, %v74_v43 }
  0x48   :  { %13559 = vmatmul.mubr.msk.f32.gmra.mxu1 %vm119_vm0, %v74_v43  ;;  %13449 = vmatprep.mubr.msk.f32.mxu0 %vm119_vm0, %v75_v44 }
  0x49   :  { %13561 = vmatprep.mubr.msk.f32.mxu1 %vm119_vm0, %v75_v44 }
  0x4b   :  { %13450 = vmatmul.mubr.msk.f32.gmra.mxu0 %vm119_vm0, %v76_v45 }
  0x4c   :  { %13562 = vmatmul.mubr.msk.f32.gmra.mxu1 %vm119_vm0, %v76_v45  ;;  %13452 = vmatprep.mubr.msk.f32.mxu0 %vm119_vm0, %v77_v46 }
  0x4d   :  { %13564 = vmatprep.mubr.msk.f32.mxu1 %vm119_vm0, %v77_v46 }
  0x4f   :  { %13453 = vmatmul.mubr.msk.f32.gmra.mxu0 %vm119_vm0, %v78_v47 }
  0x50   :  { %13565 = vmatmul.mubr.msk.f32.gmra.mxu1 %vm119_vm0, %v78_v47  ;;  %13455 = vmatprep.mubr.msk.f32.mxu0 %vm119_vm0, %v79_v48 }
  0x51   :  { %13567 = vmatprep.mubr.msk.f32.mxu1 %vm119_vm0, %v79_v48 }
  0x53   :  { %13456 = vmatmul.mubr.msk.f32.gmra.mxu0 %vm119_vm0, %v80_v49 }
  0x54   :  { %13568 = vmatmul.mubr.msk.f32.gmra.mxu1 %vm119_vm0, %v80_v49  ;;  %13458 = vmatprep.mubr.msk.f32.mxu0 %vm119_vm0, %v81_v50 }
  0x55   :  { %13570 = vmatprep.mubr.msk.f32.mxu1 %vm119_vm0, %v81_v50 }
  0x57   :  { %13459 = vmatmul.mubr.msk.f32.gmra.mxu0 %vm119_vm0, %v82_v51 }
  0x58   :  { %13571 = vmatmul.mubr.msk.f32.gmra.mxu1 %vm119_vm0, %v82_v51  ;;  %13461 = vmatprep.mubr.msk.f32.mxu0 %vm119_vm0, %v83_v52 }
  0x59   :  { %13573 = vmatprep.mubr.msk.f32.mxu1 %vm119_vm0, %v83_v52 }
  0x5b   :  { %13462 = vmatmul.mubr.msk.f32.gmra.mxu0 %vm119_vm0, %v84_v53 }
  0x5c   :  { %13574 = vmatmul.mubr.msk.f32.gmra.mxu1 %vm119_vm0, %v84_v53  ;;  %13464 = vmatprep.mubr.msk.f32.mxu0 %vm119_vm0, %v85_v54 }
  0x5d   :  { %13576 = vmatprep.mubr.msk.f32.mxu1 %vm119_vm0, %v85_v54 }
  0x5f   :  { %13465 = vmatmul.mubr.msk.f32.gmra.mxu0 %vm119_vm0, %v86_v55 }
  0x60   :  { %13577 = vmatmul.mubr.msk.f32.gmra.mxu1 %vm119_vm0, %v86_v55  ;;  %13467 = vmatprep.mubr.msk.f32.mxu0 %vm119_vm0, %v87_v56 }
  0x61   :  { %13579 = vmatprep.mubr.msk.f32.mxu1 %vm119_vm0, %v87_v56 }
  0x63   :  { %13468 = vmatmul.mubr.msk.f32.gmra.mxu0 %vm119_vm0, %v88_v57 }
  0x64   :  { %13580 = vmatmul.mubr.msk.f32.gmra.mxu1 %vm119_vm0, %v88_v57  ;;  %13470 = vmatprep.mubr.msk.f32.mxu0 %vm119_vm0, %v89_v58 }
  0x65   :  { %13582 = vmatprep.mubr.msk.f32.mxu1 %vm119_vm0, %v89_v58 }
  0x67   :  { %13471 = vmatmul.mubr.msk.f32.gmra.mxu0 %vm119_vm0, %v90_v59 }
  0x68   :  { %13583 = vmatmul.mubr.msk.f32.gmra.mxu1 %vm119_vm0, %v90_v59  ;;  %13473 = vmatprep.mubr.msk.f32.mxu0 %vm119_vm0, %v91_v60 }
  0x69   :  { %13585 = vmatprep.mubr.msk.f32.mxu1 %vm119_vm0, %v91_v60 }
  0x6b   :  { %13474 = vmatmul.mubr.msk.f32.gmra.mxu0 %vm119_vm0, %v92_v61 }
  0x6c   :  { %13586 = vmatmul.mubr.msk.f32.gmra.mxu1 %vm119_vm0, %v92_v61  ;;  %13476 = vmatprep.mubr.msk.f32.mxu0 %vm119_vm0, %v93_v62 }
  0x6d   :  { %13588 = vmatprep.mubr.msk.f32.mxu1 %vm119_vm0, %v93_v62 }
  0x6f   :  { %13477 = vmatmul.mubr.msk.f32.gmra.mxu0 %vm119_vm0, %v94_v63 }
  0x70   :  { %13589 = vmatmul.mubr.msk.f32.gmra.mxu1 %vm119_vm0, %v94_v63  ;;  %13479 = vmatprep.mubr.msk.f32.mxu0 %vm119_vm0, %v95_v0 }
  0x71   :  { %13591 = vmatprep.mubr.msk.f32.mxu1 %vm119_vm0, %v95_v0 }
  0x73   :  { %13480 = vmatmul.mubr.msk.f32.gmra.mxu0 %vm119_vm0, %v96_v1 }
  0x74   :  { %13592 = vmatmul.mubr.msk.f32.gmra.mxu1 %vm119_vm0, %v96_v1  ;;  %13482 = vmatprep.mubr.msk.f32.mxu0 %vm119_vm0, %v97_v2 }
  0x75   :  { %13594 = vmatprep.mubr.msk.f32.mxu1 %vm119_vm0, %v97_v2 }
  0x77   :  { %13483 = vmatmul.mubr.msk.f32.gmra.mxu0 %vm119_vm0, %v98_v3 }
  0x78   :  { %13595 = vmatmul.mubr.msk.f32.gmra.mxu1 %vm119_vm0, %v98_v3  ;;  %13485 = vmatprep.mubr.msk.f32.mxu0 %vm119_vm0, %v99_v4 }
  0x79   :  { %13597 = vmatprep.mubr.msk.f32.mxu1 %vm119_vm0, %v99_v4 }
  0x7b   :  { %13486 = vmatmul.mubr.msk.f32.gmra.mxu0 %vm119_vm0, %v100_v5 }
  0x7c   :  { %13598 = vmatmul.mubr.msk.f32.gmra.mxu1 %vm119_vm0, %v100_v5  ;;  %13488 = vmatprep.mubr.msk.f32.mxu0 %vm119_vm0, %v101_v6 }
  0x7d   :  { %13600 = vmatprep.mubr.msk.f32.mxu1 %vm119_vm0, %v101_v6 }
  0x7f   :  { %13489 = vmatmul.mubr.msk.f32.gmra.mxu0 %vm119_vm0, %v102_v7 }
  0x80   :  { %13601 = vmatmul.mubr.msk.f32.gmra.mxu1 %vm119_vm0, %v102_v7  ;;  %13491 = vmatprep.mubr.msk.f32.mxu0 %vm119_vm0, %v103_v8 }
  0x81   :  { %13603 = vmatprep.mubr.msk.f32.mxu1 %vm119_vm0, %v103_v8 }
  0x83   :  { %13492 = vmatmul.mubr.msk.f32.gmra.mxu0 %vm119_vm0, %v104_v9 }
  0x84   :  { %13604 = vmatmul.mubr.msk.f32.gmra.mxu1 %vm119_vm0, %v104_v9  ;;  %13494 = vmatprep.mubr.msk.f32.mxu0 %vm119_vm0, %v105_v10 }
  0x85   :  { %13606 = vmatprep.mubr.msk.f32.mxu1 %vm119_vm0, %v105_v10 }
  0x87   :  { %13495 = vmatmul.mubr.msk.f32.gmra.mxu0 %vm119_vm0, %v106_v11 }
  0x88   :  { %13607 = vmatmul.mubr.msk.f32.gmra.mxu1 %vm119_vm0, %v106_v11  ;;  %13497 = vmatprep.mubr.msk.f32.mxu0 %vm119_vm0, %v107_v12 }
  0x89   :  { %13609 = vmatprep.mubr.msk.f32.mxu1 %vm119_vm0, %v107_v12 }
  0x8b   :  { %13498 = vmatmul.mubr.msk.f32.gmra.mxu0 %vm119_vm0, %v108_v13 }
  0x8c   :  { %13610 = vmatmul.mubr.msk.f32.gmra.mxu1 %vm119_vm0, %v108_v13  ;;  %13500 = vmatprep.mubr.msk.f32.mxu0 %vm119_vm0, %v109_v14 }
  0x8d   :  { %13612 = vmatprep.mubr.msk.f32.mxu1 %vm119_vm0, %v109_v14 }
  0x8f   :  { %13501 = vmatmul.mubr.msk.f32.gmra.mxu0 %vm119_vm0, %v110_v15 }
  0x90   :  { %13613 = vmatmul.mubr.msk.f32.gmra.mxu1 %vm119_vm0, %v110_v15  ;;  %1355 = vmatprep.mubr.f32.mxu0 %v1260_v16 }
  0x91   :  { %1533 = vmatprep.mubr.f32.mxu1 %v11033_v17 }
  0xd3   :  { %v13409_v18 = vpop.f32.mrf.mxu0 }
  0xd4   :  { %v13521_v19 = vpop.f32.mrf.mxu1 }
  0xd5   :  { %v1091_v20 = vmax.f32 %v13409_v18, %v13521_v19  ;;  %v378_v21 = vpop.f32.mrf.mxu0 }
  0xd6   :  { %v771_v22 = vpop.f32.mrf.mxu1 }
  0xd7   :  { %1156 = vst.msk [vmem:[#allocation2 + $0x8] sm:$0xff] %vm1154_vm1, %v1091_v20  ;;  %v1090_v23 = vmax.f32 %v378_v21, %v771_v22  ;;  %v13412_v24 = vpop.f32.mrf.mxu0 }
  0xd8   :  { %v13524_v25 = vpop.f32.mrf.mxu1 }
  0xd9   :  { %1155 = vst.msk [vmem:[#allocation2] sm:$0xff] %vm1154_vm1, %v1090_v23  ;;  %v1093_v26 = vmax.f32 %v13412_v24, %v13524_v25  ;;  %v388_v27 = vpop.f32.mrf.mxu0 }
  0xda   :  { %v781_v28 = vpop.f32.mrf.mxu1 }
  0xdb   :  { %1158 = vst.msk [vmem:[#allocation2 + $0x18] sm:$0xff] %vm1154_vm1, %v1093_v26  ;;  %v1092_v29 = vmax.f32 %v388_v27, %v781_v28  ;;  %v13415_v30 = vpop.f32.mrf.mxu0 }
  0xdc   :  { %v13527_v31 = vpop.f32.mrf.mxu1 }
  0xdd   :  { %1157 = vst.msk [vmem:[#allocation2 + $0x10] sm:$0xff] %vm1154_vm1, %v1092_v29  ;;  %v1095_v32 = vmax.f32 %v13415_v30, %v13527_v31  ;;  %v398_v33 = vpop.f32.mrf.mxu0 }
  0xde   :  { %v791_v34 = vpop.f32.mrf.mxu1 }
  0xdf   :  { %1160 = vst.msk [vmem:[#allocation2 + $0x28] sm:$0xff] %vm1154_vm1, %v1095_v32  ;;  %v1094_v35 = vmax.f32 %v398_v33, %v791_v34  ;;  %v13418_v36 = vpop.f32.mrf.mxu0 }
  0xe0   :  { %v13530_v37 = vpop.f32.mrf.mxu1 }
  0xe1   :  { %1159 = vst.msk [vmem:[#allocation2 + $0x20] sm:$0xff] %vm1154_vm1, %v1094_v35  ;;  %v1097_v38 = vmax.f32 %v13418_v36, %v13530_v37  ;;  %v408_v39 = vpop.f32.mrf.mxu0 }
  0xe2   :  { %v801_v40 = vpop.f32.mrf.mxu1 }
  0xe3   :  { %1162 = vst.msk [vmem:[#allocation2 + $0x38] sm:$0xff] %vm1154_vm1, %v1097_v38  ;;  %v1096_v41 = vmax.f32 %v408_v39, %v801_v40  ;;  %v13421_v42 = vpop.f32.mrf.mxu0 }
  0xe4   :  { %v13533_v43 = vpop.f32.mrf.mxu1 }
  0xe5   :  { %1161 = vst.msk [vmem:[#allocation2 + $0x30] sm:$0xff] %vm1154_vm1, %v1096_v41  ;;  %v1099_v44 = vmax.f32 %v13421_v42, %v13533_v43  ;;  %v418_v45 = vpop.f32.mrf.mxu0 }
  0xe6   :  { %v811_v46 = vpop.f32.mrf.mxu1 }
  0xe7   :  { %1164 = vst.msk [vmem:[#allocation2 + $0x48] sm:$0xff] %vm1154_vm1, %v1099_v44  ;;  %v1098_v47 = vmax.f32 %v418_v45, %v811_v46  ;;  %v13424_v48 = vpop.f32.mrf.mxu0 }
  0xe8   :  { %v13536_v49 = vpop.f32.mrf.mxu1 }
  0xe9   :  { %1163 = vst.msk [vmem:[#allocation2 + $0x40] sm:$0xff] %vm1154_vm1, %v1098_v47  ;;  %v1101_v50 = vmax.f32 %v13424_v48, %v13536_v49  ;;  %v428_v51 = vpop.f32.mrf.mxu0 }
  0xea   :  { %v821_v52 = vpop.f32.mrf.mxu1 }
  0xeb   :  { %1166 = vst.msk [vmem:[#allocation2 + $0x58] sm:$0xff] %vm1154_vm1, %v1101_v50  ;;  %v1100_v53 = vmax.f32 %v428_v51, %v821_v52  ;;  %v13427_v54 = vpop.f32.mrf.mxu0 }
  0xec   :  { %v13539_v55 = vpop.f32.mrf.mxu1 }
  0xed   :  { %1165 = vst.msk [vmem:[#allocation2 + $0x50] sm:$0xff] %vm1154_vm1, %v1100_v53  ;;  %v1103_v56 = vmax.f32 %v13427_v54, %v13539_v55  ;;  %v438_v57 = vpop.f32.mrf.mxu0 }
  0xee   :  { %v831_v58 = vpop.f32.mrf.mxu1 }
  0xef   :  { %1168 = vst.msk [vmem:[#allocation2 + $0x68] sm:$0xff] %vm1154_vm1, %v1103_v56  ;;  %v1102_v59 = vmax.f32 %v438_v57, %v831_v58  ;;  %v13430_v60 = vpop.f32.mrf.mxu0 }
  0xf0   :  { %v13542_v61 = vpop.f32.mrf.mxu1 }
  0xf1   :  { %1167 = vst.msk [vmem:[#allocation2 + $0x60] sm:$0xff] %vm1154_vm1, %v1102_v59  ;;  %v1105_v62 = vmax.f32 %v13430_v60, %v13542_v61  ;;  %v448_v63 = vpop.f32.mrf.mxu0 }
  0xf2   :  { %v841_v0 = vpop.f32.mrf.mxu1 }
  0xf3   :  { %1170 = vst.msk [vmem:[#allocation2 + $0x78] sm:$0xff] %vm1154_vm1, %v1105_v62  ;;  %v1104_v1 = vmax.f32 %v448_v63, %v841_v0  ;;  %v13433_v2 = vpop.f32.mrf.mxu0 }
  0xf4   :  { %v13545_v3 = vpop.f32.mrf.mxu1 }
  0xf5   :  { %1169 = vst.msk [vmem:[#allocation2 + $0x70] sm:$0xff] %vm1154_vm1, %v1104_v1  ;;  %v1107_v4 = vmax.f32 %v13433_v2, %v13545_v3  ;;  %v458_v5 = vpop.f32.mrf.mxu0 }
  0xf6   :  { %v851_v6 = vpop.f32.mrf.mxu1 }
  0xf7   :  { %1172 = vst.msk [vmem:[#allocation2 + $0x88] sm:$0xff] %vm1154_vm1, %v1107_v4  ;;  %v1106_v7 = vmax.f32 %v458_v5, %v851_v6  ;;  %v13436_v8 = vpop.f32.mrf.mxu0 }
  0xf8   :  { %v13548_v9 = vpop.f32.mrf.mxu1 }
  0xf9   :  { %1171 = vst.msk [vmem:[#allocation2 + $0x80] sm:$0xff] %vm1154_vm1, %v1106_v7  ;;  %v1109_v10 = vmax.f32 %v13436_v8, %v13548_v9  ;;  %v468_v11 = vpop.f32.mrf.mxu0  ;;  %v16102_v8 = vld [vmem:[#allocation2 + $0x68] sm:$0xff] }
  0xfa   :  { %v861_v12 = vpop.f32.mrf.mxu1  ;;  %v16084_v62 = vld [vmem:[#allocation2 + $0x78] sm:$0xff] }
  0xfb   :  { %1174 = vst.msk [vmem:[#allocation2 + $0x98] sm:$0xff] %vm1154_vm1, %v1109_v10  ;;  %v1108_v13 = vmax.f32 %v468_v11, %v861_v12  ;;  %v13439_v14 = vpop.f32.mrf.mxu0 }
  0xfc   :  { %v13551_v15 = vpop.f32.mrf.mxu1  ;;  %v16093_v3 = vld [vmem:[#allocation2 + $0x70] sm:$0xff] }
  0xfd   :  { %1173 = vst.msk [vmem:[#allocation2 + $0x90] sm:$0xff] %vm1154_vm1, %v1108_v13  ;;  %v1111_v16 = vmax.f32 %v13439_v14, %v13551_v15  ;;  %v478_v17 = vpop.f32.mrf.mxu0  ;;  %v16111_v13 = vld [vmem:[#allocation2 + $0x60] sm:$0xff] }
  0xfe   :  { %v871_v18 = vpop.f32.mrf.mxu1 }
  0xff   :  { %1176 = vst.msk [vmem:[#allocation2 + $0xa8] sm:$0xff] %vm1154_vm1, %v1111_v16  ;;  %v1110_v19 = vmax.f32 %v478_v17, %v871_v18  ;;  %v13442_v20 = vpop.f32.mrf.mxu0  ;;  %v16120_v18 = vld [vmem:[#allocation2 + $0x58] sm:$0xff] }
 0x100   :  { %v13554_v21 = vpop.f32.mrf.mxu1 }
 0x101   :  { %1175 = vst.msk [vmem:[#allocation2 + $0xa0] sm:$0xff] %vm1154_vm1, %v1110_v19  ;;  %v1113_v22 = vmax.f32 %v13442_v20, %v13554_v21  ;;  %v488_v23 = vpop.f32.mrf.mxu0 }
 0x102   :  { %v881_v24 = vpop.f32.mrf.mxu1 }
 0x103   :  { %1178 = vst.msk [vmem:[#allocation2 + $0xb8] sm:$0xff] %vm1154_vm1, %v1113_v22  ;;  %v1112_v25 = vmax.f32 %v488_v23, %v881_v24  ;;  %v13445_v26 = vpop.f32.mrf.mxu0  ;;  %v16129_v23 = vld [vmem:[#allocation2 + $0x50] sm:$0xff] }
 0x104   :  { %v13557_v27 = vpop.f32.mrf.mxu1 }
 0x105   :  { %1177 = vst.msk [vmem:[#allocation2 + $0xb0] sm:$0xff] %vm1154_vm1, %v1112_v25  ;;  %v1115_v28 = vmax.f32 %v13445_v26, %v13557_v27  ;;  %v498_v29 = vpop.f32.mrf.mxu0 }
 0x106   :  { %v891_v30 = vpop.f32.mrf.mxu1 }
 0x107   :  { %1180 = vst.msk [vmem:[#allocation2 + $0xc8] sm:$0xff] %vm1154_vm1, %v1115_v28  ;;  %v1114_v31 = vmax.f32 %v498_v29, %v891_v30  ;;  %v13448_v32 = vpop.f32.mrf.mxu0  ;;  %v16138_v28 = vld [vmem:[#allocation2 + $0x48] sm:$0xff] }
 0x108   :  { %v13560_v33 = vpop.f32.mrf.mxu1 }
 0x109   :  { %1179 = vst.msk [vmem:[#allocation2 + $0xc0] sm:$0xff] %vm1154_vm1, %v1114_v31  ;;  %v1117_v34 = vmax.f32 %v13448_v32, %v13560_v33  ;;  %v508_v35 = vpop.f32.mrf.mxu0  ;;  %v16147_v33 = vld [vmem:[#allocation2 + $0x40] sm:$0xff] }
 0x10a   :  { %v901_v36 = vpop.f32.mrf.mxu1 }
 0x10b   :  { %1182 = vst.msk [vmem:[#allocation2 + $0xd8] sm:$0xff] %vm1154_vm1, %v1117_v34  ;;  %v1116_v37 = vmax.f32 %v508_v35, %v901_v36  ;;  %v13451_v38 = vpop.f32.mrf.mxu0  ;;  %v16152_v35 = vld [vmem:[#allocation2 + $0xb8] sm:$0xff] }
 0x10c   :  { %v13563_v39 = vpop.f32.mrf.mxu1 }
 0x10d   :  { %1181 = vst.msk [vmem:[#allocation2 + $0xd0] sm:$0xff] %vm1154_vm1, %v1116_v37  ;;  %v1119_v40 = vmax.f32 %v13451_v38, %v13563_v39  ;;  %v518_v41 = vpop.f32.mrf.mxu0  ;;  %v16156_v38 = vld [vmem:[#allocation2 + $0x38] sm:$0xff] }
 0x10e   :  { %v911_v42 = vpop.f32.mrf.mxu1  ;;  %v16134_v25 = vld [vmem:[#allocation2 + $0xc8] sm:$0xff] }
 0x10f   :  { %1184 = vst.msk [vmem:[#allocation2 + $0xe8] sm:$0xff] %vm1154_vm1, %v1119_v40  ;;  %v1118_v43 = vmax.f32 %v518_v41, %v911_v42  ;;  %v13454_v44 = vpop.f32.mrf.mxu0  ;;  %v16161_v40 = vld [vmem:[#allocation2 + $0xb0] sm:$0xff] }
 0x110   :  { %v13566_v45 = vpop.f32.mrf.mxu1  ;;  %v16143_v30 = vld [vmem:[#allocation2 + $0xc0] sm:$0xff] }
 0x111   :  { %1183 = vst.msk [vmem:[#allocation2 + $0xe0] sm:$0xff] %vm1154_vm1, %v1118_v43  ;;  %v1121_v46 = vmax.f32 %v13454_v44, %v13566_v45  ;;  %v528_v47 = vpop.f32.mrf.mxu0  ;;  %v16165_v43 = vld [vmem:[#allocation2 + $0x30] sm:$0xff]  ;;  %v16170_v45 = vld [vmem:[#allocation2 + $0xa8] sm:$0xff] }
 0x112   :  { %v921_v48 = vpop.f32.mrf.mxu1  ;;  %v16116_v15 = vld [vmem:[#allocation2 + $0xd8] sm:$0xff] }
 0x113   :  { %1186 = vst.msk [vmem:[#allocation2 + $0xf8] sm:$0xff] %vm1154_vm1, %v1121_v46  ;;  %v1120_v49 = vmax.f32 %v528_v47, %v921_v48  ;;  %v13457_v50 = vpop.f32.mrf.mxu0  ;;  %v16174_v48 = vld [vmem:[#allocation2 + $0x28] sm:$0xff] }
 0x114   :  { %v13569_v51 = vpop.f32.mrf.mxu1  ;;  %v16125_v20 = vld [vmem:[#allocation2 + $0xd0] sm:$0xff] }
 0x115   :  { %1185 = vst.msk [vmem:[#allocation2 + $0xf0] sm:$0xff] %vm1154_vm1, %v1120_v49  ;;  %v1123_v52 = vmax.f32 %v13457_v50, %v13569_v51  ;;  %v538_v53 = vpop.f32.mrf.mxu0  ;;  %v16179_v50 = vld [vmem:[#allocation2 + $0xa0] sm:$0xff] }
 0x116   :  { %v931_v54 = vpop.f32.mrf.mxu1  ;;  %v16098_v5 = vld [vmem:[#allocation2 + $0xe8] sm:$0xff] }
 0x117   :  { %1188 = vst.msk [vmem:[#allocation2 + $0x108] sm:$0xff] %vm1154_vm1, %v1123_v52  ;;  %v1122_v55 = vmax.f32 %v538_v53, %v931_v54  ;;  %v13460_v56 = vpop.f32.mrf.mxu0  ;;  %v16183_v53 = vld [vmem:[#allocation2 + $0x20] sm:$0xff] }
 0x118   :  { %v13572_v57 = vpop.f32.mrf.mxu1  ;;  %v16107_v10 = vld [vmem:[#allocation2 + $0xe0] sm:$0xff] }
 0x119   :  { %1187 = vst.msk [vmem:[#allocation2 + $0x100] sm:$0xff] %vm1154_vm1, %v1122_v55  ;;  %v1125_v58 = vmax.f32 %v13460_v56, %v13572_v57  ;;  %v548_v60 = vpop.f32.mrf.mxu0  ;;  %v16188_v55 = vld [vmem:[#allocation2 + $0x98] sm:$0xff] }
 0x11a   :  { %v16080_v59 = vld [vmem:[#allocation2 + $0xf8] sm:$0xff]  ;;  %v941_v61 = vpop.f32.mrf.mxu1 }
 0x11b   :  { %12047 = vmatprep.subr.mxu0 %v16080_v59  ;;  %12127 = vmatprep.subr.mxu1 %v16080_v59  ;;  %1190 = vst.msk [vmem:[#allocation2 + $0x118] sm:$0xff] %vm1154_vm1, %v1125_v58  ;;  %v1124_v63 = vmax.f32 %v548_v60, %v941_v61  ;;  %v13463_v1 = vpop.f32.mrf.mxu0  ;;  %v16192_v58 = vld [vmem:[#allocation2 + $0x18] sm:$0xff]  ;;  %v16197_v61 = vld [vmem:[#allocation2 + $0x90] sm:$0xff] }
 0x11c   :  { %12048 = vmatpush3.msra.mxu0 %v16084_v62  ;;  %12128 = vmatpush3.msra.mxu1 %v16084_v62  ;;  %v16089_v0 = vld [vmem:[#allocation2 + $0xf0] sm:$0xff]  ;;  %v13575_v2 = vpop.f32.mrf.mxu1 }
 0x11d   :  { %12049 = vmatprep.subr.mxu0 %v16089_v0  ;;  %12129 = vmatprep.subr.mxu1 %v16089_v0  ;;  %1189 = vst.msk [vmem:[#allocation2 + $0x110] sm:$0xff] %vm1154_vm1, %v1124_v63  ;;  %v1127_v4 = vmax.f32 %v13463_v1, %v13575_v2  ;;  %v558_v6 = vpop.f32.mrf.mxu0  ;;  %v16201_v2 = vld [vmem:[#allocation2 + $0x10] sm:$0xff] }
 0x11e   :  { %12050 = vmatpush3.msra.mxu0 %v16093_v3  ;;  %12130 = vmatpush3.msra.mxu1 %v16093_v3  ;;  %v951_v7 = vpop.f32.mrf.mxu1 }
 0x11f   :  { %12051 = vmatprep.subr.mxu0 %v16098_v5  ;;  %12131 = vmatprep.subr.mxu1 %v16098_v5  ;;  %1192 = vst.msk [vmem:[#allocation2 + $0x128] sm:$0xff] %vm1154_vm1, %v1127_v4  ;;  %v1126_v9 = vmax.f32 %v558_v6, %v951_v7  ;;  %v13466_v11 = vpop.f32.mrf.mxu0  ;;  %v16206_v6 = vld [vmem:[#allocation2 + $0x88] sm:$0xff] }
 0x120   :  { %12052 = vmatpush3.msra.mxu0 %v16102_v8  ;;  %12132 = vmatpush3.msra.mxu1 %v16102_v8  ;;  %v13578_v12 = vpop.f32.mrf.mxu1 }
 0x121   :  { %12053 = vmatprep.subr.mxu0 %v16107_v10  ;;  %12133 = vmatprep.subr.mxu1 %v16107_v10  ;;  %1191 = vst.msk [vmem:[#allocation2 + $0x120] sm:$0xff] %vm1154_vm1, %v1126_v9  ;;  %v1129_v14 = vmax.f32 %v13466_v11, %v13578_v12  ;;  %v568_v16 = vpop.f32.mrf.mxu0  ;;  %v16210_v11 = vld [vmem:[#allocation2 + $0x8] sm:$0xff] }
 0x122   :  { %12054 = vmatpush3.msra.mxu0 %v16111_v13  ;;  %12134 = vmatpush3.msra.mxu1 %v16111_v13  ;;  %v961_v17 = vpop.f32.mrf.mxu1 }
 0x123   :  { %12055 = vmatprep.subr.mxu0 %v16116_v15  ;;  %12135 = vmatprep.subr.mxu1 %v16116_v15  ;;  %1194 = vst.msk [vmem:[#allocation2 + $0x138] sm:$0xff] %vm1154_vm1, %v1129_v14  ;;  %v1128_v19 = vmax.f32 %v568_v16, %v961_v17  ;;  %v13469_v21 = vpop.f32.mrf.mxu0  ;;  %v16215_v14 = vld [vmem:[#allocation2 + $0x80] sm:$0xff] }
 0x124   :  { %12056 = vmatpush3.msra.mxu0 %v16120_v18  ;;  %12136 = vmatpush3.msra.mxu1 %v16120_v18  ;;  %v13581_v22 = vpop.f32.mrf.mxu1  ;;  %v1259_v16 = vld [vmem:[%s21925_s3] sm:$0xff] }
 0x125   :  { %12057 = vmatprep.subr.mxu0 %v16125_v20  ;;  %12137 = vmatprep.subr.mxu1 %v16125_v20  ;;  %1193 = vst.msk [vmem:[#allocation2 + $0x130] sm:$0xff] %vm1154_vm1, %v1128_v19  ;;  %v1131_v24 = vmax.f32 %v13469_v21, %v13581_v22  ;;  %v578_v26 = vpop.f32.mrf.mxu0  ;;  %v11032_v17 = vld [vmem:[%s21925_s3 + $0x100] sm:$0xff] }
 0x126   :  { %12058 = vmatpush3.msra.mxu0 %v16129_v23  ;;  %12138 = vmatpush3.msra.mxu1 %v16129_v23  ;;  %v971_v27 = vpop.f32.mrf.mxu1  ;;  %v16225_v22 = vld [vmem:[#allocation2] sm:$0xff] }
 0x127   :  { %12059 = vmatprep.subr.mxu0 %v16134_v25  ;;  %12139 = vmatprep.subr.mxu1 %v16134_v25  ;;  %1196 = vst.msk [vmem:[#allocation2 + $0x148] sm:$0xff] %vm1154_vm1, %v1131_v24  ;;  %v1130_v29 = vmax.f32 %v578_v26, %v971_v27  ;;  %v13472_v31 = vpop.f32.mrf.mxu0 }
 0x128   :  { %12060 = vmatpush3.msra.mxu0 %v16138_v28  ;;  %12140 = vmatpush3.msra.mxu1 %v16138_v28  ;;  %v13584_v32 = vpop.f32.mrf.mxu1 }
 0x129   :  { %12061 = vmatprep.subr.mxu0 %v16143_v30  ;;  %12141 = vmatprep.subr.mxu1 %v16143_v30  ;;  %1195 = vst.msk [vmem:[#allocation2 + $0x140] sm:$0xff] %vm1154_vm1, %v1130_v29  ;;  %v1133_v34 = vmax.f32 %v13472_v31, %v13584_v32  ;;  %v588_v36 = vpop.f32.mrf.mxu0  ;;  %v1262_v31 = vld [vmem:[%s21925_s3 + $0x18] sm:$0xff] }
 0x12a   :  { %12062 = vmatpush3.msra.mxu0 %v16147_v33  ;;  %12142 = vmatpush3.msra.mxu1 %v16147_v33  ;;  %v981_v37 = vpop.f32.mrf.mxu1  ;;  %v11035_v32 = vld [vmem:[%s21925_s3 + $0x118] sm:$0xff] }
 0x12b   :  { %12063 = vmatprep.subr.mxu0 %v16152_v35  ;;  %12143 = vmatprep.subr.mxu1 %v16152_v35  ;;  %1198 = vst.msk [vmem:[#allocation2 + $0x158] sm:$0xff] %vm1154_vm1, %v1133_v34  ;;  %v1132_v39 = vmax.f32 %v588_v36, %v981_v37  ;;  %v13475_v41 = vpop.f32.mrf.mxu0 }
 0x12c   :  { %12064 = vmatpush3.msra.mxu0 %v16156_v38  ;;  %12144 = vmatpush3.msra.mxu1 %v16156_v38  ;;  %v13587_v42 = vpop.f32.mrf.mxu1 }
 0x12d   :  { %12065 = vmatprep.subr.mxu0 %v16161_v40  ;;  %12145 = vmatprep.subr.mxu1 %v16161_v40  ;;  %1197 = vst.msk [vmem:[#allocation2 + $0x150] sm:$0xff] %vm1154_vm1, %v1132_v39  ;;  %v1135_v44 = vmax.f32 %v13475_v41, %v13587_v42  ;;  %v598_v46 = vpop.f32.mrf.mxu0  ;;  %v11034_v39 = vld [vmem:[%s21925_s3 + $0x110] sm:$0xff] }
 0x12e   :  { %12066 = vmatpush3.msra.mxu0 %v16165_v43  ;;  %12146 = vmatpush3.msra.mxu1 %v16165_v43  ;;  %v991_v47 = vpop.f32.mrf.mxu1 }
 0x12f   :  { %12067 = vmatprep.subr.mxu0 %v16170_v45  ;;  %12147 = vmatprep.subr.mxu1 %v16170_v45  ;;  %1200 = vst.msk [vmem:[#allocation2 + $0x168] sm:$0xff] %vm1154_vm1, %v1135_v44  ;;  %v1134_v49 = vmax.f32 %v598_v46, %v991_v47  ;;  %v13478_v51 = vpop.f32.mrf.mxu0  ;;  %v1264_v47 = vld [vmem:[%s21925_s3 + $0x28] sm:$0xff] }
 0x130   :  { %12068 = vmatpush3.msra.mxu0 %v16174_v48  ;;  %12148 = vmatpush3.msra.mxu1 %v16174_v48  ;;  %v13590_v52 = vpop.f32.mrf.mxu1 }
 0x131   :  { %12069 = vmatprep.subr.mxu0 %v16179_v50  ;;  %12149 = vmatprep.subr.mxu1 %v16179_v50  ;;  %1199 = vst.msk [vmem:[#allocation2 + $0x160] sm:$0xff] %vm1154_vm1, %v1134_v49  ;;  %v1137_v54 = vmax.f32 %v13478_v51, %v13590_v52  ;;  %v608_v56 = vpop.f32.mrf.mxu0  ;;  %v11037_v49 = vld [vmem:[%s21925_s3 + $0x128] sm:$0xff] }
 0x132   :  { %12070 = vmatpush3.msra.mxu0 %v16183_v53  ;;  %12150 = vmatpush3.msra.mxu1 %v16183_v53  ;;  %v1001_v57 = vpop.f32.mrf.mxu1 }
 0x133   :  { %12071 = vmatprep.subr.mxu0 %v16188_v55  ;;  %12151 = vmatprep.subr.mxu1 %v16188_v55  ;;  %1202 = vst.msk [vmem:[#allocation2 + $0x178] sm:$0xff] %vm1154_vm1, %v1137_v54  ;;  %v1136_v60 = vmax.f32 %v608_v56, %v1001_v57  ;;  %v13481_v63 = vpop.f32.mrf.mxu0  ;;  %v11036_v54 = vld [vmem:[%s21925_s3 + $0x120] sm:$0xff] }
 0x134   :  { %12072 = vmatpush3.msra.mxu0 %v16192_v58  ;;  %12152 = vmatpush3.msra.mxu1 %v16192_v58  ;;  %v13593_v1 = vpop.f32.mrf.mxu1 }
 0x135   :  { %12073 = vmatprep.subr.mxu0 %v16197_v61  ;;  %12153 = vmatprep.subr.mxu1 %v16197_v61  ;;  %1201 = vst.msk [vmem:[#allocation2 + $0x170] sm:$0xff] %vm1154_vm1, %v1136_v60  ;;  %v1139_v4 = vmax.f32 %v13481_v63, %v13593_v1  ;;  %v618_v7 = vpop.f32.mrf.mxu0  ;;  %v1266_v1 = vld [vmem:[%s21925_s3 + $0x38] sm:$0xff] }
 0x136   :  { %12074 = vmatpush3.msra.mxu0 %v16201_v2  ;;  %12154 = vmatpush3.msra.mxu1 %v16201_v2  ;;  %v1011_v9 = vpop.f32.mrf.mxu1 }
 0x137   :  { %12075 = vmatprep.subr.mxu0 %v16206_v6  ;;  %12155 = vmatprep.subr.mxu1 %v16206_v6  ;;  %1204 = vst.msk [vmem:[#allocation2 + $0x188] sm:$0xff] %vm1154_vm1, %v1139_v4  ;;  %v1138_v12 = vmax.f32 %v618_v7, %v1011_v9  ;;  %v13484_v19 = vpop.f32.mrf.mxu0  ;;  %v11039_v4 = vld [vmem:[%s21925_s3 + $0x138] sm:$0xff] }
 0x138   :  { %12076 = vmatpush3.msra.mxu0 %v16210_v11  ;;  %12156 = vmatpush3.msra.mxu1 %v16210_v11  ;;  %v13596_v21 = vpop.f32.mrf.mxu1 }
 0x139   :  { %12077 = vmatprep.subr.mxu0 %v16215_v14  ;;  %12157 = vmatprep.subr.mxu1 %v16215_v14  ;;  %1203 = vst.msk [vmem:[#allocation2 + $0x180] sm:$0xff] %vm1154_vm1, %v1138_v12  ;;  %v1141_v24 = vmax.f32 %v13484_v19, %v13596_v21  ;;  %v628_v26 = vpop.f32.mrf.mxu0  ;;  %v11038_v12 = vld [vmem:[%s21925_s3 + $0x130] sm:$0xff] }
 0x13a   :  { %12078 = vmatpush3.msra.mxu0 %v16225_v22  ;;  %12158 = vmatpush3.msra.mxu1 %v16225_v22  ;;  %v1021_v27 = vpop.f32.mrf.mxu1 }
 0x13b   :  { %1356 = vmatmul.mubr.f32.vlgmr.msra.gmra.mxu0 %v1259_v16  ;;  %1534 = vmatmul.mubr.f32.vlgmr.msra.gmra.mxu1 %v11032_v17  ;;  %1206 = vst.msk [vmem:[#allocation2 + $0x198] sm:$0xff] %vm1154_vm1, %v1141_v24  ;;  %v1140_v29 = vmax.f32 %v628_v26, %v1021_v27  ;;  %v13487_v34 = vpop.f32.mrf.mxu0  ;;  %v16308_v24 = vld [vmem:[%s21925_s3 + $0x48] sm:$0xff] }
 0x13c   :  { %12207 = vmatprep.subr.mxu0 %v16080_v59  ;;  %12287 = vmatprep.subr.mxu1 %v16080_v59  ;;  %v13599_v36 = vpop.f32.mrf.mxu1  ;;  %v1261_v59 = vld [vmem:[%s21925_s3 + $0x10] sm:$0xff] }
 0x13d   :  { %12208 = vmatpush3.msra.mxu0 %v16084_v62  ;;  %12288 = vmatpush3.msra.mxu1 %v16084_v62  ;;  %1205 = vst.msk [vmem:[#allocation2 + $0x190] sm:$0xff] %vm1154_vm1, %v1140_v29  ;;  %v1143_v37 = vmax.f32 %v13487_v34, %v13599_v36  ;;  %v638_v41 = vpop.f32.mrf.mxu0 }
 0x13e   :  { %12209 = vmatprep.subr.mxu0 %v16089_v0  ;;  %12289 = vmatprep.subr.mxu1 %v16089_v0  ;;  %v1031_v42 = vpop.f32.mrf.mxu1 }
 0x13f   :  { %1360 = vmatprep.mubr.f32.mxu0 %v1262_v31  ;;  %1538 = vmatprep.mubr.f32.mxu1 %v11035_v32  ;;  %1208 = vst.msk [vmem:[#allocation2 + $0x1a8] sm:$0xff] %vm1154_vm1, %v1143_v37  ;;  %v1142_v62 = vmax.f32 %v638_v41, %v1031_v42  ;;  %v13490_v0 = vpop.f32.mrf.mxu0  ;;  %v16326_v31 = vld [vmem:[%s21925_s3 + $0x140] sm:$0xff]  ;;  %v16481_v42 = vld [vmem:[%s21925_s3 + $0x90] sm:$0xff] }
 0x140   :  { %12210 = vmatpush3.msra.mxu0 %v16093_v3  ;;  %12290 = vmatpush3.msra.mxu1 %v16093_v3  ;;  %v13602_v44 = vpop.f32.mrf.mxu1 }
 0x141   :  { %1361 = vmatmul.mubr.f32.gmra.mxu0 %v1261_v59  ;;  %1539 = vmatmul.mubr.f32.gmra.mxu1 %v11034_v39  ;;  %1207 = vst.msk [vmem:[#allocation2 + $0x1a0] sm:$0xff] %vm1154_vm1, %v1142_v62  ;;  %v1145_v46 = vmax.f32 %v13490_v0, %v13602_v44  ;;  %v648_v3 = vpop.f32.mrf.mxu0  ;;  %v16340_v59 = vld [vmem:[%s21925_s3 + $0x58] sm:$0xff]  ;;  %v16360_v39 = vld [vmem:[%s21925_s3 + $0x150] sm:$0xff]  ;;  %v16496_v0 = vld [vmem:[%s21925_s3 + $0x1a8] sm:$0xff] }
 0x142   :  { %12211 = vmatprep.subr.mxu0 %v16098_v5  ;;  %12291 = vmatprep.subr.mxu1 %v16098_v5  ;;  %v1041_v51 = vpop.f32.mrf.mxu1  ;;  %v1263_v5 = vld [vmem:[%s21925_s3 + $0x20] sm:$0xff]  ;;  %v16486_v62 = vld [vmem:[%s21925_s3 + $0x190] sm:$0xff] }
 0x143   :  { %12212 = vmatpush3.msra.mxu0 %v16102_v8  ;;  %12292 = vmatpush3.msra.mxu1 %v16102_v8  ;;  %1210 = vst.msk [vmem:[#allocation2 + $0x1b8] sm:$0xff] %vm1154_vm1, %v1145_v46  ;;  %v1144_v52 = vmax.f32 %v648_v3, %v1041_v51  ;;  %v13493_v56 = vpop.f32.mrf.mxu0  ;;  %v16507_v44 = vld [vmem:[%s21925_s3 + $0xa0] sm:$0xff]  ;;  %v16531_v3 = vld [vmem:[%s21925_s3 + $0xb0] sm:$0xff] }
 0x144   :  { %12213 = vmatprep.subr.mxu0 %v16107_v10  ;;  %12293 = vmatprep.subr.mxu1 %v16107_v10  ;;  %v13605_v57 = vpop.f32.mrf.mxu1  ;;  %22092 = vst [vmem:[#allocation5_spill] sm:$0xff] %v16507_v44  ;;  %v16512_v46 = vld [vmem:[%s21925_s3 + $0x1a0] sm:$0xff]  ;;  %22096 = vst [vmem:[#allocation9_spill] sm:$0xff] %v16531_v3  ;;  %v16536_v51 = vld [vmem:[%s21925_s3 + $0x1b0] sm:$0xff] }
 0x145   :  { %1365 = vmatprep.mubr.f32.mxu0 %v1264_v47  ;;  %1543 = vmatprep.mubr.f32.mxu1 %v11037_v49  ;;  %1209 = vst.msk [vmem:[#allocation2 + $0x1b0] sm:$0xff] %vm1154_vm1, %v1144_v52  ;;  %v1147_v8 = vmax.f32 %v13493_v56, %v13605_v57  ;;  %v658_v10 = vpop.f32.mrf.mxu0  ;;  %22093 = vst [vmem:[#allocation6_spill] sm:$0xff] %v16512_v46  ;;  %v16517_v47 = vld [vmem:[%s21925_s3 + $0xb8] sm:$0xff]  ;;  %v16541_v52 = vld [vmem:[%s21925_s3 + $0xc8] sm:$0xff] }
 0x146   :  { %12214 = vmatpush3.msra.mxu0 %v16111_v13  ;;  %12294 = vmatpush3.msra.mxu1 %v16111_v13  ;;  %v1051_v60 = vpop.f32.mrf.mxu1  ;;  %22094 = vst [vmem:[#allocation7_spill] sm:$0xff] %v16517_v47  ;;  %v16522_v49 = vld [vmem:[%s21925_s3 + $0x1b8] sm:$0xff]  ;;  %22097 = vst [vmem:[#allocation10_spill] sm:$0xff] %v16536_v51  ;;  %v16560_v56 = vld [vmem:[%s21925_s3 + $0x1c0] sm:$0xff] }
 0x147   :  { %1366 = vmatmul.mubr.f32.gmra.mxu0 %v1263_v5  ;;  %1544 = vmatmul.mubr.f32.gmra.mxu1 %v11036_v54  ;;  %1212 = vst.msk [vmem:[#allocation2 + $0x1c8] sm:$0xff] %vm1154_vm1, %v1147_v8  ;;  %v1146_v63 = vmax.f32 %v658_v10, %v1051_v60  ;;  %v13496_v13 = vpop.f32.mrf.mxu0  ;;  %22095 = vst [vmem:[#allocation8_spill] sm:$0xff] %v16522_v49  ;;  %v16546_v5 = vld [vmem:[%s21925_s3 + $0x1c8] sm:$0xff]  ;;  %v16555_v54 = vld [vmem:[%s21925_s3 + $0xc0] sm:$0xff] }
 0x148   :  { %12215 = vmatprep.subr.mxu0 %v16116_v15  ;;  %12295 = vmatprep.subr.mxu1 %v16116_v15  ;;  %v13608_v7 = vpop.f32.mrf.mxu1  ;;  %v16293_v15 = vld [vmem:[%s21925_s3 + $0x30] sm:$0xff]  ;;  %22098 = vst [vmem:[#allocation11_spill] sm:$0xff] %v16541_v52  ;;  %22099 = vst [vmem:[#allocation12_spill] sm:$0xff] %v16546_v5  ;;  %v16565_v57 = vld [vmem:[%s21925_s3 + $0xd8] sm:$0xff] }
 0x149   :  { %12216 = vmatpush3.msra.mxu0 %v16120_v18  ;;  %12296 = vmatpush3.msra.mxu1 %v16120_v18  ;;  %1211 = vst.msk [vmem:[#allocation2 + $0x1c0] sm:$0xff] %vm1154_vm1, %v1146_v63  ;;  %v1149_v9 = vmax.f32 %v13496_v13, %v13608_v7  ;;  %v668_v16 = vpop.f32.mrf.mxu0  ;;  %22100 = vst [vmem:[#allocation13_spill] sm:$0xff] %v16555_v54  ;;  %v16570_v8 = vld [vmem:[%s21925_s3 + $0x1d8] sm:$0xff]  ;;  %v16579_v10 = vld [vmem:[%s21925_s3 + $0xd0] sm:$0xff] }
 0x14a   :  { %12217 = vmatprep.subr.mxu0 %v16125_v20  ;;  %12297 = vmatprep.subr.mxu1 %v16125_v20  ;;  %v1061_v17 = vpop.f32.mrf.mxu1  ;;  %22101 = vst [vmem:[#allocation14_spill] sm:$0xff] %v16560_v56  ;;  %22102 = vst [vmem:[#allocation15_spill] sm:$0xff] %v16565_v57  ;;  %v16584_v60 = vld [vmem:[%s21925_s3 + $0x1d0] sm:$0xff]  ;;  %v16589_v63 = vld [vmem:[%s21925_s3 + $0xe8] sm:$0xff] }
 0x14b   :  { %1370 = vmatprep.mubr.f32.mxu0 %v1266_v1  ;;  %1548 = vmatprep.mubr.f32.mxu1 %v11039_v4  ;;  %1214 = vst.msk [vmem:[#allocation2 + $0x1d8] sm:$0xff] %vm1154_vm1, %v1149_v9  ;;  %v1148_v18 = vmax.f32 %v668_v16, %v1061_v17  ;;  %v13499_v20 = vpop.f32.mrf.mxu0  ;;  %22103 = vst [vmem:[#allocation16_spill] sm:$0xff] %v16570_v8  ;;  %v16594_v1 = vld [vmem:[%s21925_s3 + $0x1e8] sm:$0xff]  ;;  %v16603_v4 = vld [vmem:[%s21925_s3 + $0xe0] sm:$0xff] }
 0x14c   :  { %12218 = vmatpush3.msra.mxu0 %v16129_v23  ;;  %12298 = vmatpush3.msra.mxu1 %v16129_v23  ;;  %v13611_v19 = vpop.f32.mrf.mxu1  ;;  %v11041_v23 = vld [vmem:[%s21925_s3 + $0x148] sm:$0xff]  ;;  %22104 = vst [vmem:[#allocation17_spill] sm:$0xff] %v16579_v10  ;;  %22105 = vst [vmem:[#allocation18_spill] sm:$0xff] %v16584_v60  ;;  %v16608_v13 = vld [vmem:[%s21925_s3 + $0x1e0] sm:$0xff] }
 0x14d   :  { %1371 = vmatmul.mubr.f32.gmra.mxu0 %v16293_v15  ;;  %1549 = vmatmul.mubr.f32.gmra.mxu1 %v11038_v12  ;;  %1213 = vst.msk [vmem:[#allocation2 + $0x1d0] sm:$0xff] %vm1154_vm1, %v1148_v18  ;;  %v1151_v21 = vmax.f32 %v13499_v20, %v13611_v19  ;;  %v678_v26 = vpop.f32.mrf.mxu0  ;;  %22106 = vst [vmem:[#allocation19_spill] sm:$0xff] %v16589_v63  ;;  %v1290_v7 = vld [vmem:[%s21925_s3 + $0xf8] sm:$0x1]  ;;  %v1289_v12 = vld [vmem:[%s21925_s3 + $0xf0] sm:$0x1] }
 0x14e   :  { %12219 = vmatprep.subr.mxu0 %v16134_v25  ;;  %12299 = vmatprep.subr.mxu1 %v16134_v25  ;;  %v1071_v27 = vpop.f32.mrf.mxu1  ;;  %v16321_v25 = vld [vmem:[%s21925_s3 + $0x40] sm:$0xff]  ;;  %22107 = vst [vmem:[#allocation20_spill] sm:$0xff] %v16594_v1  ;;  %22108 = vst [vmem:[#allocation21_spill] sm:$0xff] %v16603_v4  ;;  %v11063_v9 = vld [vmem:[%s21925_s3 + $0x1f8] sm:$0x1] }
 0x14f   :  { %12220 = vmatpush3.msra.mxu0 %v16138_v28  ;;  %12300 = vmatpush3.msra.mxu1 %v16138_v28  ;;  %1216 = vst.msk [vmem:[#allocation2 + $0x1e8] sm:$0xff] %vm1154_vm1, %v1151_v21  ;;  %v1150_v29 = vmax.f32 %v678_v26, %v1071_v27  ;;  %v13502_v32 = vpop.f32.mrf.mxu0  ;;  %22109 = vst [vmem:[#allocation22_spill] sm:$0xff] %v16608_v13  ;;  %v11062_v16 = vld [vmem:[%s21925_s3 + $0x1f0] sm:$0x1]  ;;  %v16627_v17 = vld [vmem:[%s21925_s3 + $0x208] sm:$0xff] }
 0x150   :  { %12221 = vmatprep.subr.mxu0 %v16143_v30  ;;  %12301 = vmatprep.subr.mxu1 %v16143_v30  ;;  %v13614_v34 = vpop.f32.mrf.mxu1  ;;  %22110 = vst [vmem:[#allocation23_spill] sm:$0xff] %v16627_v17  ;;  %v16632_v18 = vld [vmem:[%s21925_s3 + $0x308] sm:$0xff]  ;;  %v16639_v20 = vld [vmem:[%s21925_s3 + $0x200] sm:$0xff]  ;;  %v16649_v21 = vld [vmem:[%s21925_s3 + $0x218] sm:$0xff] }
 0x151   :  { %1375 = vmatprep.mubr.f32.mxu0 %v16308_v24  ;;  %1553 = vmatprep.mubr.f32.mxu1 %v11041_v23  ;;  %1215 = vst.msk [vmem:[#allocation2 + $0x1e0] sm:$0xff] %vm1154_vm1, %v1150_v29  ;;  %v1153_v28 = vmax.f32 %v13502_v32, %v13614_v34  ;;  %v688_v30 = vpop.f32.mrf.mxu0  ;;  %22111 = vst [vmem:[#allocation24_spill] sm:$0xff] %v16632_v18  ;;  %v16644_v19 = vld [vmem:[%s21925_s3 + $0x300] sm:$0xff]  ;;  %v16654_v23 = vld [vmem:[%s21925_s3 + $0x318] sm:$0xff] }
 0x152   :  { %12222 = vmatpush3.msra.mxu0 %v16147_v33  ;;  %12302 = vmatpush3.msra.mxu1 %v16147_v33  ;;  %v1081_v36 = vpop.f32.mrf.mxu1  ;;  %v16345_v33 = vld [vmem:[%s21925_s3 + $0x158] sm:$0xff]  ;;  %22112 = vst [vmem:[#allocation25_spill] sm:$0xff] %v16639_v20  ;;  %22113 = vst [vmem:[#allocation26_spill] sm:$0xff] %v16644_v19  ;;  %v16667_v29 = vld [vmem:[%s21925_s3 + $0x210] sm:$0xff] }
 0x153   :  { %1376 = vmatmul.mubr.f32.gmra.mxu0 %v16321_v25  ;;  %1554 = vmatmul.mubr.f32.gmra.mxu1 %v16326_v31  ;;  %1218 = vst.msk [vmem:[#allocation2 + $0x1f8] sm:$0xff] %vm1154_vm1, %v1153_v28  ;;  %v1152_v37 = vmax.f32 %v688_v30, %v1081_v36  ;;  %22114 = vst [vmem:[#allocation27_spill] sm:$0xff] %v16649_v21  ;;  %v16656_v26 = vld [vmem:[#allocation2 + $0x178] sm:$0xff]  ;;  %v16672_v32 = vld [vmem:[%s21925_s3 + $0x310] sm:$0xff] }
 0x154   :  { %12223 = vmatprep.subr.mxu0 %v16152_v35  ;;  %12303 = vmatprep.subr.mxu1 %v16152_v35  ;;  %v16355_v35 = vld [vmem:[%s21925_s3 + $0x50] sm:$0xff]  ;;  %22115 = vst [vmem:[#allocation28_spill] sm:$0xff] %v16654_v23  ;;  %22116 = vst [vmem:[#allocation29_spill] sm:$0xff] %v16667_v29  ;;  %v16679_v34 = vld [vmem:[%s21925_s3 + $0x228] sm:$0xff] }
 0x155   :  { %12224 = vmatpush3.msra.mxu0 %v16156_v38  ;;  %12304 = vmatpush3.msra.mxu1 %v16156_v38  ;;  %1217 = vst.msk [vmem:[#allocation2 + $0x1f0] sm:$0xff] %vm1154_vm1, %v1152_v37  ;;  %v16373_v38 = vld [vmem:[%s21925_s3 + $0x68] sm:$0xff]  ;;  %22117 = vst [vmem:[#allocation30_spill] sm:$0xff] %v16672_v32  ;;  %v16697_v36 = vld [vmem:[%s21925_s3 + $0x220] sm:$0xff] }
 0x156   :  { %12225 = vmatprep.subr.mxu0 %v16161_v40  ;;  %12305 = vmatprep.subr.mxu1 %v16161_v40  ;;  %v16378_v40 = vld [vmem:[%s21925_s3 + $0x168] sm:$0xff]  ;;  %22118 = vst [vmem:[#allocation31_spill] sm:$0xff] %v16679_v34  ;;  %22120 = vst [vmem:[#allocation33_spill] sm:$0xff] %v16697_v36  ;;  %v16702_v37 = vld [vmem:[%s21925_s3 + $0x320] sm:$0xff] }
 0x157   :  { %1380 = vmatprep.mubr.f32.mxu0 %v16340_v59  ;;  %1558 = vmatprep.mubr.f32.mxu1 %v16345_v33  ;;  %v16684_v28 = vld [vmem:[%s21925_s3 + $0x328] sm:$0xff]  ;;  %22121 = vst [vmem:[#allocation34_spill] sm:$0xff] %v16702_v37 }
 0x158   :  { %12226 = vmatpush3.msra.mxu0 %v16165_v43  ;;  %12306 = vmatpush3.msra.mxu1 %v16165_v43  ;;  %v16387_v43 = vld [vmem:[%s21925_s3 + $0x60] sm:$0xff]  ;;  %22119 = vst [vmem:[#allocation32_spill] sm:$0xff] %v16684_v28  ;;  %v16690_v30 = vld [vmem:[#allocation2 + $0x1e8] sm:$0xff] }
 0x159   :  { %1381 = vmatmul.mubr.f32.gmra.mxu0 %v16355_v35  ;;  %1559 = vmatmul.mubr.f32.gmra.mxu1 %v16360_v39 }
 0x15a   :  { %12227 = vmatprep.subr.mxu0 %v16170_v45  ;;  %12307 = vmatprep.subr.mxu1 %v16170_v45  ;;  %v16392_v45 = vld [vmem:[%s21925_s3 + $0x160] sm:$0xff]  ;;  %v16472_v41 = vld [vmem:[#allocation2 + $0x1f8] sm:$0xff] }
 0x15b   :  { %12228 = vmatpush3.msra.mxu0 %v16174_v48  ;;  %12308 = vmatpush3.msra.mxu1 %v16174_v48  ;;  %v16405_v48 = vld [vmem:[%s21925_s3 + $0x78] sm:$0xff] }
 0x15c   :  { %12229 = vmatprep.subr.mxu0 %v16179_v50  ;;  %12309 = vmatprep.subr.mxu1 %v16179_v50  ;;  %v16410_v50 = vld [vmem:[%s21925_s3 + $0x178] sm:$0xff]  ;;  %v16660_v27 = vld [vmem:[#allocation2 + $0x1f0] sm:$0xff] }
 0x15d   :  { %1385 = vmatprep.mubr.f32.mxu0 %v16373_v38  ;;  %1563 = vmatprep.mubr.f32.mxu1 %v16378_v40 }
 0x15e   :  { %12230 = vmatpush3.msra.mxu0 %v16183_v53  ;;  %12310 = vmatpush3.msra.mxu1 %v16183_v53  ;;  %v16419_v53 = vld [vmem:[%s21925_s3 + $0x70] sm:$0xff] }
 0x15f   :  { %1386 = vmatmul.mubr.f32.gmra.mxu0 %v16387_v43  ;;  %1564 = vmatmul.mubr.f32.gmra.mxu1 %v16392_v45 }
 0x160   :  { %12231 = vmatprep.subr.mxu0 %v16188_v55  ;;  %12311 = vmatprep.subr.mxu1 %v16188_v55  ;;  %v16424_v55 = vld [vmem:[%s21925_s3 + $0x170] sm:$0xff] }
 0x161   :  { %12232 = vmatpush3.msra.mxu0 %v16192_v58  ;;  %12312 = vmatpush3.msra.mxu1 %v16192_v58  ;;  %v16437_v58 = vld [vmem:[%s21925_s3 + $0x88] sm:$0xff] }
 0x162   :  { %12233 = vmatprep.subr.mxu0 %v16197_v61  ;;  %12313 = vmatprep.subr.mxu1 %v16197_v61  ;;  %v16442_v61 = vld [vmem:[%s21925_s3 + $0x188] sm:$0xff] }
 0x163   :  { %1390 = vmatprep.mubr.f32.mxu0 %v16405_v48  ;;  %1568 = vmatprep.mubr.f32.mxu1 %v16410_v50 }
 0x164   :  { %12234 = vmatpush3.msra.mxu0 %v16201_v2  ;;  %12314 = vmatpush3.msra.mxu1 %v16201_v2  ;;  %v16451_v2 = vld [vmem:[%s21925_s3 + $0x80] sm:$0xff] }
 0x165   :  { %1391 = vmatmul.mubr.f32.gmra.mxu0 %v16419_v53  ;;  %1569 = vmatmul.mubr.f32.gmra.mxu1 %v16424_v55 }
 0x166   :  { %12235 = vmatprep.subr.mxu0 %v16206_v6  ;;  %12315 = vmatprep.subr.mxu1 %v16206_v6  ;;  %v16456_v6 = vld [vmem:[%s21925_s3 + $0x180] sm:$0xff] }
 0x167   :  { %12236 = vmatpush3.msra.mxu0 %v16210_v11  ;;  %12316 = vmatpush3.msra.mxu1 %v16210_v11  ;;  %v16463_v11 = vld [vmem:[%s21925_s3 + $0x98] sm:$0xff] }
 0x168   :  { %12237 = vmatprep.subr.mxu0 %v16215_v14  ;;  %12317 = vmatprep.subr.mxu1 %v16215_v14  ;;  %v16468_v14 = vld [vmem:[%s21925_s3 + $0x198] sm:$0xff] }
 0x169   :  { %1395 = vmatprep.mubr.f32.mxu0 %v16437_v58  ;;  %1573 = vmatprep.mubr.f32.mxu1 %v16442_v61 }
 0x16a   :  { %12238 = vmatpush3.msra.mxu0 %v16225_v22  ;;  %12318 = vmatpush3.msra.mxu1 %v16225_v22  ;;  %v16491_v22 = vld [vmem:[%s21925_s3 + $0xa8] sm:$0xff] }
 0x16b   :  { %1396 = vmatmul.mubr.f32.gmra.mxu0 %v16451_v2  ;;  %1574 = vmatmul.mubr.f32.gmra.mxu1 %v16456_v6 }
 0x16c   :  { %1400 = vmatprep.mubr.f32.mxu0 %v16463_v11  ;;  %1578 = vmatprep.mubr.f32.mxu1 %v16468_v14 }
 0x16d   :  { %12367 = vmatprep.subr.mxu0 %v16472_v41  ;;  %12447 = vmatprep.subr.mxu1 %v16472_v41 }
 0x16f   :  { %1401 = vmatmul.mubr.f32.gmra.mxu0 %v16481_v42  ;;  %1579 = vmatmul.mubr.f32.gmra.mxu1 %v16486_v62 }
 0x170   :  { %1405 = vmatprep.mubr.f32.mxu0 %v16491_v22  ;;  %1583 = vmatprep.mubr.f32.mxu1 %v16496_v0 }
 0x173   :  { %1406 = vmatmul.mubr.f32.gmra.mxu0 %v16507_v44  ;;  %1584 = vmatmul.mubr.f32.gmra.mxu1 %v16512_v46  ;;  %v16990_v46 = vld [vmem:[%s21925_s3 + $0x3a8] sm:$0xff]  ;;  %v17006_v44 = vld [vmem:[%s21925_s3 + $0x3a0] sm:$0xff] }
 0x174   :  { %1410 = vmatprep.mubr.f32.mxu0 %v16517_v47  ;;  %1588 = vmatprep.mubr.f32.mxu1 %v16522_v49  ;;  %v16978_v49 = vld [vmem:[#allocation2 + $0x180] sm:$0xff]  ;;  %v16985_v47 = vld [vmem:[%s21925_s3 + $0x2a8] sm:$0xff]  ;;  %22151 = vst [vmem:[#allocation64_spill] sm:$0xff] %v16990_v46  ;;  %22153 = vst [vmem:[#allocation66_spill] sm:$0xff] %v17006_v44 }
 0x175   :  { %22150 = vst [vmem:[#allocation63_spill] sm:$0xff] %v16985_v47 }
 0x177   :  { %1411 = vmatmul.mubr.f32.gmra.mxu0 %v16531_v3  ;;  %1589 = vmatmul.mubr.f32.gmra.mxu1 %v16536_v51  ;;  %v16948_v51 = vld [vmem:[#allocation2 + $0x188] sm:$0xff]  ;;  %v16974_v3 = vld [vmem:[%s21925_s3 + $0x390] sm:$0xff] }
 0x178   :  { %1415 = vmatprep.mubr.f32.mxu0 %v16541_v52  ;;  %1593 = vmatprep.mubr.f32.mxu1 %v16546_v5  ;;  %v16938_v5 = vld [vmem:[#allocation2 + $0x190] sm:$0xff]  ;;  %22149 = vst [vmem:[#allocation62_spill] sm:$0xff] %v16974_v3 }
 0x179   :  { %v16944_v52 = vld [vmem:[#allocation2 + $0x110] sm:$0xff] }
 0x17b   :  { %1416 = vmatmul.mubr.f32.gmra.mxu0 %v16555_v54  ;;  %1594 = vmatmul.mubr.f32.gmra.mxu1 %v16560_v56  ;;  %v16908_v56 = vld [vmem:[#allocation2 + $0x198] sm:$0xff]  ;;  %v16934_v54 = vld [vmem:[%s21925_s3 + $0x380] sm:$0xff] }
 0x17c   :  { %1420 = vmatprep.mubr.f32.mxu0 %v16565_v57  ;;  %1598 = vmatprep.mubr.f32.mxu1 %v16570_v8  ;;  %v16898_v8 = vld [vmem:[#allocation2 + $0x1a0] sm:$0xff]  ;;  %22145 = vst [vmem:[#allocation58_spill] sm:$0xff] %v16934_v54 }
 0x17d   :  { %v16904_v57 = vld [vmem:[#allocation2 + $0x120] sm:$0xff] }
 0x17f   :  { %1421 = vmatmul.mubr.f32.gmra.mxu0 %v16579_v10  ;;  %1599 = vmatmul.mubr.f32.gmra.mxu1 %v16584_v60  ;;  %v16868_v60 = vld [vmem:[#allocation2 + $0x1a8] sm:$0xff]  ;;  %v16894_v10 = vld [vmem:[%s21925_s3 + $0x370] sm:$0xff] }
 0x180   :  { %1425 = vmatprep.mubr.f32.mxu0 %v16589_v63  ;;  %1603 = vmatprep.mubr.f32.mxu1 %v16594_v1  ;;  %v16856_v1 = vld [vmem:[%s21925_s3 + $0x360] sm:$0xff]  ;;  %v16864_v63 = vld [vmem:[#allocation2 + $0x130] sm:$0xff]  ;;  %22141 = vst [vmem:[#allocation54_spill] sm:$0xff] %v16894_v10 }
 0x181   :  { %22137 = vst [vmem:[#allocation50_spill] sm:$0xff] %v16856_v1 }
 0x183   :  { %1426 = vmatmul.mubr.f32.gmra.mxu0 %v16603_v4  ;;  %1604 = vmatmul.mubr.f32.gmra.mxu1 %v16608_v13  ;;  %v16826_v13 = vld [vmem:[#allocation2 + $0x140] sm:$0xff] }
 0x184   :  { %1430 = vmatprep.mubr.f32.mxu0 %v1290_v7  ;;  %1608 = vmatprep.mubr.f32.mxu1 %v11063_v9  ;;  %v16704_v7 = vld [vmem:[#allocation2 + $0x170] sm:$0xff]  ;;  %v16713_v9 = vld [vmem:[%s21925_s3 + $0x238] sm:$0xff]  ;;  %v16851_v4 = vld [vmem:[%s21925_s3 + $0x260] sm:$0xff] }
 0x185   :  { %22122 = vst [vmem:[#allocation35_spill] sm:$0xff] %v16713_v9  ;;  %22136 = vst [vmem:[#allocation49_spill] sm:$0xff] %v16851_v4 }
 0x187   :  { %1431 = vmatmul.mubr.f32.gmra.mxu0 %v1289_v12  ;;  %1609 = vmatmul.mubr.f32.gmra.mxu1 %v11062_v16  ;;  %v16718_v12 = vld [vmem:[%s21925_s3 + $0x338] sm:$0xff]  ;;  %v16722_v16 = vld [vmem:[#allocation2 + $0x168] sm:$0xff] }
 0x188   :  { %1727 = vmatprep.mubr.f32.mxu0 %v16627_v17  ;;  %1921 = vmatprep.mubr.f32.mxu1 %v16632_v18  ;;  %22123 = vst [vmem:[#allocation36_spill] sm:$0xff] %v16718_v12  ;;  %v16816_v18 = vld [vmem:[%s21925_s3 + $0x350] sm:$0xff]  ;;  %v16822_v17 = vld [vmem:[#allocation2 + $0x1b8] sm:$0xff] }
 0x189   :  { %22133 = vst [vmem:[#allocation46_spill] sm:$0xff] %v16816_v18 }
 0x18b   :  { %1728 = vmatmul.mubr.f32.vlgmr.msra.gmra.mxu0 %v16639_v20  ;;  %1922 = vmatmul.mubr.f32.vlgmr.msra.gmra.mxu1 %v16644_v19  ;;  %v16786_v19 = vld [vmem:[#allocation2 + $0x150] sm:$0xff] }
 0x18c   :  { %1732 = vmatprep.mubr.f32.mxu0 %v16649_v21  ;;  %1926 = vmatprep.mubr.f32.mxu1 %v16654_v23  ;;  %v16776_v23 = vld [vmem:[%s21925_s3 + $0x340] sm:$0xff]  ;;  %v16782_v21 = vld [vmem:[#allocation2 + $0x1c8] sm:$0xff]  ;;  %v16811_v20 = vld [vmem:[%s21925_s3 + $0x250] sm:$0xff] }
 0x18d   :  { %12368 = vmatpush3.msra.mxu0 %v16656_v26  ;;  %12448 = vmatpush3.msra.mxu1 %v16656_v26  ;;  %22129 = vst [vmem:[#allocation42_spill] sm:$0xff] %v16776_v23  ;;  %22132 = vst [vmem:[#allocation45_spill] sm:$0xff] %v16811_v20 }
 0x18e   :  { %12369 = vmatprep.subr.mxu0 %v16660_v27  ;;  %12449 = vmatprep.subr.mxu1 %v16660_v27 }
 0x18f   :  { %1733 = vmatmul.mubr.f32.gmra.mxu0 %v16667_v29  ;;  %1927 = vmatmul.mubr.f32.gmra.mxu1 %v16672_v32  ;;  %v16736_v32 = vld [vmem:[%s21925_s3 + $0x330] sm:$0xff]  ;;  %v16771_v29 = vld [vmem:[%s21925_s3 + $0x240] sm:$0xff] }
 0x190   :  { %1737 = vmatprep.mubr.f32.mxu0 %v16679_v34  ;;  %1931 = vmatprep.mubr.f32.mxu1 %v16684_v28  ;;  %v16724_v28 = vld [vmem:[#allocation2 + $0x1e0] sm:$0xff]  ;;  %v16731_v34 = vld [vmem:[%s21925_s3 + $0x230] sm:$0xff]  ;;  %22125 = vst [vmem:[#allocation38_spill] sm:$0xff] %v16736_v32  ;;  %22128 = vst [vmem:[#allocation41_spill] sm:$0xff] %v16771_v29 }
 0x191   :  { %12370 = vmatpush3.msra.mxu0 %v16704_v7  ;;  %12450 = vmatpush3.msra.mxu1 %v16704_v7  ;;  %22124 = vst [vmem:[#allocation37_spill] sm:$0xff] %v16731_v34 }
 0x192   :  { %12371 = vmatprep.subr.mxu0 %v16690_v30  ;;  %12451 = vmatprep.subr.mxu1 %v16690_v30 }
 0x193   :  { %1738 = vmatmul.mubr.f32.gmra.mxu0 %v16697_v36  ;;  %1932 = vmatmul.mubr.f32.gmra.mxu1 %v16702_v37  ;;  %v16742_v37 = vld [vmem:[#allocation2 + $0x1d8] sm:$0xff]  ;;  %v16746_v36 = vld [vmem:[#allocation2 + $0x160] sm:$0xff] }
 0x194   :  { %12372 = vmatpush3.msra.mxu0 %v16722_v16  ;;  %12452 = vmatpush3.msra.mxu1 %v16722_v16 }
 0x195   :  { %1742 = vmatprep.mubr.f32.mxu0 %v16713_v9  ;;  %1936 = vmatprep.mubr.f32.mxu1 %v16718_v12  ;;  %v16753_v12 = vld [vmem:[%s21925_s3 + $0x248] sm:$0xff] }
 0x196   :  { %12373 = vmatprep.subr.mxu0 %v16724_v28  ;;  %12453 = vmatprep.subr.mxu1 %v16724_v28  ;;  %22126 = vst [vmem:[#allocation39_spill] sm:$0xff] %v16753_v12  ;;  %v16758_v9 = vld [vmem:[%s21925_s3 + $0x348] sm:$0xff] }
 0x197   :  { %1743 = vmatmul.mubr.f32.gmra.mxu0 %v16731_v34  ;;  %1937 = vmatmul.mubr.f32.gmra.mxu1 %v16736_v32  ;;  %22127 = vst [vmem:[#allocation40_spill] sm:$0xff] %v16758_v9  ;;  %v16762_v32 = vld [vmem:[#allocation2 + $0x158] sm:$0xff]  ;;  %v16764_v34 = vld [vmem:[#allocation2 + $0x1d0] sm:$0xff] }
 0x198   :  { %12374 = vmatpush3.msra.mxu0 %v16746_v36  ;;  %12454 = vmatpush3.msra.mxu1 %v16746_v36 }
 0x199   :  { %12375 = vmatprep.subr.mxu0 %v16742_v37  ;;  %12455 = vmatprep.subr.mxu1 %v16742_v37 }
 0x19a   :  { %12376 = vmatpush3.msra.mxu0 %v16762_v32  ;;  %12456 = vmatpush3.msra.mxu1 %v16762_v32 }
 0x19b   :  { %1747 = vmatprep.mubr.f32.mxu0 %v16753_v12  ;;  %1941 = vmatprep.mubr.f32.mxu1 %v16758_v9  ;;  %v16793_v9 = vld [vmem:[%s21925_s3 + $0x258] sm:$0xff] }
 0x19c   :  { %12377 = vmatprep.subr.mxu0 %v16764_v34  ;;  %12457 = vmatprep.subr.mxu1 %v16764_v34  ;;  %22130 = vst [vmem:[#allocation43_spill] sm:$0xff] %v16793_v9  ;;  %v16798_v12 = vld [vmem:[%s21925_s3 + $0x358] sm:$0xff] }
 0x19d   :  { %1748 = vmatmul.mubr.f32.gmra.mxu0 %v16771_v29  ;;  %1942 = vmatmul.mubr.f32.gmra.mxu1 %v16776_v23  ;;  %22131 = vst [vmem:[#allocation44_spill] sm:$0xff] %v16798_v12  ;;  %v16802_v23 = vld [vmem:[#allocation2 + $0x148] sm:$0xff]  ;;  %v16804_v29 = vld [vmem:[#allocation2 + $0x1c0] sm:$0xff] }
 0x19e   :  { %12378 = vmatpush3.msra.mxu0 %v16786_v19  ;;  %12458 = vmatpush3.msra.mxu1 %v16786_v19 }
 0x19f   :  { %12379 = vmatprep.subr.mxu0 %v16782_v21  ;;  %12459 = vmatprep.subr.mxu1 %v16782_v21 }
 0x1a0   :  { %12380 = vmatpush3.msra.mxu0 %v16802_v23  ;;  %12460 = vmatpush3.msra.mxu1 %v16802_v23 }
 0x1a1   :  { %1752 = vmatprep.mubr.f32.mxu0 %v16793_v9  ;;  %1946 = vmatprep.mubr.f32.mxu1 %v16798_v12  ;;  %v16833_v12 = vld [vmem:[%s21925_s3 + $0x268] sm:$0xff] }
 0x1a2   :  { %12381 = vmatprep.subr.mxu0 %v16804_v29  ;;  %12461 = vmatprep.subr.mxu1 %v16804_v29  ;;  %22134 = vst [vmem:[#allocation47_spill] sm:$0xff] %v16833_v12  ;;  %v16838_v9 = vld [vmem:[%s21925_s3 + $0x368] sm:$0xff] }
 0x1a3   :  { %1753 = vmatmul.mubr.f32.gmra.mxu0 %v16811_v20  ;;  %1947 = vmatmul.mubr.f32.gmra.mxu1 %v16816_v18  ;;  %22135 = vst [vmem:[#allocation48_spill] sm:$0xff] %v16838_v9  ;;  %v16842_v18 = vld [vmem:[#allocation2 + $0x138] sm:$0xff]  ;;  %v16844_v20 = vld [vmem:[#allocation2 + $0x1b0] sm:$0xff] }
 0x1a4   :  { %12382 = vmatpush3.msra.mxu0 %v16826_v13  ;;  %12462 = vmatpush3.msra.mxu1 %v16826_v13 }
 0x1a5   :  { %12383 = vmatprep.subr.mxu0 %v16822_v17  ;;  %12463 = vmatprep.subr.mxu1 %v16822_v17 }
 0x1a6   :  { %12384 = vmatpush3.msra.mxu0 %v16842_v18  ;;  %12464 = vmatpush3.msra.mxu1 %v16842_v18 }
 0x1a7   :  { %1757 = vmatprep.mubr.f32.mxu0 %v16833_v12  ;;  %1951 = vmatprep.mubr.f32.mxu1 %v16838_v9  ;;  %v16873_v9 = vld [vmem:[%s21925_s3 + $0x278] sm:$0xff] }
 0x1a8   :  { %12385 = vmatprep.subr.mxu0 %v16844_v20  ;;  %12465 = vmatprep.subr.mxu1 %v16844_v20  ;;  %22138 = vst [vmem:[#allocation51_spill] sm:$0xff] %v16873_v9  ;;  %v16878_v12 = vld [vmem:[%s21925_s3 + $0x378] sm:$0xff] }
 0x1a9   :  { %1758 = vmatmul.mubr.f32.gmra.mxu0 %v16851_v4  ;;  %1952 = vmatmul.mubr.f32.gmra.mxu1 %v16856_v1  ;;  %22139 = vst [vmem:[#allocation52_spill] sm:$0xff] %v16878_v12  ;;  %v16882_v1 = vld [vmem:[#allocation2 + $0x128] sm:$0xff]  ;;  %v16889_v4 = vld [vmem:[%s21925_s3 + $0x270] sm:$0xff] }
 0x1aa   :  { %12386 = vmatpush3.msra.mxu0 %v16864_v63  ;;  %12466 = vmatpush3.msra.mxu1 %v16864_v63  ;;  %22140 = vst [vmem:[#allocation53_spill] sm:$0xff] %v16889_v4 }
 0x1ab   :  { %12387 = vmatprep.subr.mxu0 %v16868_v60  ;;  %12467 = vmatprep.subr.mxu1 %v16868_v60 }
 0x1ac   :  { %12388 = vmatpush3.msra.mxu0 %v16882_v1  ;;  %12468 = vmatpush3.msra.mxu1 %v16882_v1 }
 0x1ad   :  { %1762 = vmatprep.mubr.f32.mxu0 %v16873_v9  ;;  %1956 = vmatprep.mubr.f32.mxu1 %v16878_v12  ;;  %v16913_v12 = vld [vmem:[%s21925_s3 + $0x288] sm:$0xff] }
 0x1ae   :  { %12389 = vmatprep.subr.mxu0 %v16898_v8  ;;  %12469 = vmatprep.subr.mxu1 %v16898_v8  ;;  %22142 = vst [vmem:[#allocation55_spill] sm:$0xff] %v16913_v12  ;;  %v16918_v9 = vld [vmem:[%s21925_s3 + $0x388] sm:$0xff] }
 0x1af   :  { %1763 = vmatmul.mubr.f32.gmra.mxu0 %v16889_v4  ;;  %1957 = vmatmul.mubr.f32.gmra.mxu1 %v16894_v10  ;;  %22143 = vst [vmem:[#allocation56_spill] sm:$0xff] %v16918_v9  ;;  %v16922_v10 = vld [vmem:[#allocation2 + $0x118] sm:$0xff]  ;;  %v16929_v4 = vld [vmem:[%s21925_s3 + $0x280] sm:$0xff] }
 0x1b0   :  { %12390 = vmatpush3.msra.mxu0 %v16904_v57  ;;  %12470 = vmatpush3.msra.mxu1 %v16904_v57  ;;  %22144 = vst [vmem:[#allocation57_spill] sm:$0xff] %v16929_v4 }
 0x1b1   :  { %12391 = vmatprep.subr.mxu0 %v16908_v56  ;;  %12471 = vmatprep.subr.mxu1 %v16908_v56 }
 0x1b2   :  { %12392 = vmatpush3.msra.mxu0 %v16922_v10  ;;  %12472 = vmatpush3.msra.mxu1 %v16922_v10 }
 0x1b3   :  { %1767 = vmatprep.mubr.f32.mxu0 %v16913_v12  ;;  %1961 = vmatprep.mubr.f32.mxu1 %v16918_v9  ;;  %v16953_v9 = vld [vmem:[%s21925_s3 + $0x298] sm:$0xff] }
 0x1b4   :  { %12393 = vmatprep.subr.mxu0 %v16938_v5  ;;  %12473 = vmatprep.subr.mxu1 %v16938_v5  ;;  %22146 = vst [vmem:[#allocation59_spill] sm:$0xff] %v16953_v9  ;;  %v16958_v12 = vld [vmem:[%s21925_s3 + $0x398] sm:$0xff] }
 0x1b5   :  { %1768 = vmatmul.mubr.f32.gmra.mxu0 %v16929_v4  ;;  %1962 = vmatmul.mubr.f32.gmra.mxu1 %v16934_v54  ;;  %22147 = vst [vmem:[#allocation60_spill] sm:$0xff] %v16958_v12  ;;  %v16962_v54 = vld [vmem:[#allocation2 + $0x108] sm:$0xff]  ;;  %v16969_v4 = vld [vmem:[%s21925_s3 + $0x290] sm:$0xff] }
 0x1b6   :  { %12394 = vmatpush3.msra.mxu0 %v16944_v52  ;;  %12474 = vmatpush3.msra.mxu1 %v16944_v52  ;;  %22148 = vst [vmem:[#allocation61_spill] sm:$0xff] %v16969_v4 }
 0x1b7   :  { %12395 = vmatprep.subr.mxu0 %v16948_v51  ;;  %12475 = vmatprep.subr.mxu1 %v16948_v51 }
 0x1b8   :  { %12396 = vmatpush3.msra.mxu0 %v16962_v54  ;;  %12476 = vmatpush3.msra.mxu1 %v16962_v54 }
 0x1b9   :  { %1772 = vmatprep.mubr.f32.mxu0 %v16953_v9  ;;  %1966 = vmatprep.mubr.f32.mxu1 %v16958_v12  ;;  %v16994_v12 = vld [vmem:[#allocation2 + $0x100] sm:$0xff] }
 0x1ba   :  { %12397 = vmatprep.subr.mxu0 %v16978_v49  ;;  %12477 = vmatprep.subr.mxu1 %v16978_v49  ;;  %v17001_v9 = vld [vmem:[%s21925_s3 + $0x2a0] sm:$0xff] }
 0x1bb   :  { %1773 = vmatmul.mubr.f32.gmra.mxu0 %v16969_v4  ;;  %1967 = vmatmul.mubr.f32.gmra.mxu1 %v16974_v3  ;;  %22152 = vst [vmem:[#allocation65_spill] sm:$0xff] %v17001_v9  ;;  %v17013_v3 = vld [vmem:[%s21925_s3 + $0x2b8] sm:$0xff] }
 0x1bc   :  { %12398 = vmatpush3.msra.mxu0 %v16994_v12  ;;  %12478 = vmatpush3.msra.mxu1 %v16994_v12  ;;  %22154 = vst [vmem:[#allocation67_spill] sm:$0xff] %v17013_v3  ;;  %v17018_v4 = vld [vmem:[%s21925_s3 + $0x3b8] sm:$0xff] }
 0x1bd   :  { %1777 = vmatprep.mubr.f32.mxu0 %v16985_v47  ;;  %1971 = vmatprep.mubr.f32.mxu1 %v16990_v46  ;;  %22155 = vst [vmem:[#allocation68_spill] sm:$0xff] %v17018_v4  ;;  %v17029_v46 = vld [vmem:[%s21925_s3 + $0x2b0] sm:$0xff] }
 0x1be   :  { %12527 = vmatprep.subr.mxu0 %v16472_v41  ;;  %12607 = vmatprep.subr.mxu1 %v16472_v41  ;;  %22156 = vst [vmem:[#allocation69_spill] sm:$0xff] %v17029_v46  ;;  %v17034_v47 = vld [vmem:[%s21925_s3 + $0x3b0] sm:$0xff]  ;;  %v17039_v41 = vld [vmem:[%s21925_s3 + $0x2c8] sm:$0xff] }
 0x1bf   :  { %1778 = vmatmul.mubr.f32.gmra.mxu0 %v17001_v9  ;;  %1972 = vmatmul.mubr.f32.gmra.mxu1 %v17006_v44  ;;  %22157 = vst [vmem:[#allocation70_spill] sm:$0xff] %v17034_v47  ;;  %22158 = vst [vmem:[#allocation71_spill] sm:$0xff] %v17039_v41  ;;  %v17058_v44 = vld [vmem:[%s21925_s3 + $0x3c0] sm:$0xff]  ;;  %v2068_v9 = vld [vmem:[%s21925_s3 + $0x8] sm:$0xff] }
 0x1c0   :  { %1782 = vmatprep.mubr.f32.mxu0 %v17013_v3  ;;  %1976 = vmatprep.mubr.f32.mxu1 %v17018_v4  ;;  %v17044_v3 = vld [vmem:[%s21925_s3 + $0x3c8] sm:$0xff]  ;;  %v17053_v4 = vld [vmem:[%s21925_s3 + $0x2c0] sm:$0xff]  ;;  %22161 = vst [vmem:[#allocation74_spill] sm:$0xff] %v17058_v44 }
 0x1c1   :  { %22159 = vst [vmem:[#allocation72_spill] sm:$0xff] %v17044_v3  ;;  %22160 = vst [vmem:[#allocation73_spill] sm:$0xff] %v17053_v4 }
 0x1c3   :  { %1783 = vmatmul.mubr.f32.gmra.mxu0 %v17029_v46  ;;  %1977 = vmatmul.mubr.f32.gmra.mxu1 %v17034_v47  ;;  %v17063_v46 = vld [vmem:[%s21925_s3 + $0x2d8] sm:$0xff]  ;;  %v17082_v47 = vld [vmem:[%s21925_s3 + $0x3d0] sm:$0xff] }
 0x1c4   :  { %1787 = vmatprep.mubr.f32.mxu0 %v17039_v41  ;;  %1981 = vmatprep.mubr.f32.mxu1 %v17044_v3  ;;  %22162 = vst [vmem:[#allocation75_spill] sm:$0xff] %v17063_v46  ;;  %v17068_v41 = vld [vmem:[%s21925_s3 + $0x3d8] sm:$0xff]  ;;  %v17077_v3 = vld [vmem:[%s21925_s3 + $0x2d0] sm:$0xff]  ;;  %22165 = vst [vmem:[#allocation78_spill] sm:$0xff] %v17082_v47 }
 0x1c5   :  { %22163 = vst [vmem:[#allocation76_spill] sm:$0xff] %v17068_v41  ;;  %22164 = vst [vmem:[#allocation77_spill] sm:$0xff] %v17077_v3 }
 0x1c7   :  { %1788 = vmatmul.mubr.f32.gmra.mxu0 %v17053_v4  ;;  %1982 = vmatmul.mubr.f32.gmra.mxu1 %v17058_v44  ;;  %v17087_v4 = vld [vmem:[%s21925_s3 + $0x2e8] sm:$0xff]  ;;  %v17106_v44 = vld [vmem:[%s21925_s3 + $0x3e0] sm:$0xff] }
 0x1c8   :  { %1792 = vmatprep.mubr.f32.mxu0 %v17063_v46  ;;  %1986 = vmatprep.mubr.f32.mxu1 %v17068_v41  ;;  %22166 = vst [vmem:[#allocation79_spill] sm:$0xff] %v17087_v4  ;;  %v17092_v46 = vld [vmem:[%s21925_s3 + $0x3e8] sm:$0xff]  ;;  %v17101_v41 = vld [vmem:[%s21925_s3 + $0x2e0] sm:$0xff] }
 0x1c9   :  { %22167 = vst [vmem:[#allocation80_spill] sm:$0xff] %v17092_v46  ;;  %22168 = vst [vmem:[#allocation81_spill] sm:$0xff] %v17101_v41 }
 0x1cb   :  { %1793 = vmatmul.mubr.f32.gmra.mxu0 %v17077_v3  ;;  %1987 = vmatmul.mubr.f32.gmra.mxu1 %v17082_v47  ;;  %v11095_v3 = vld [vmem:[%s21925_s3 + $0x2f8] sm:$0x1]  ;;  %v11126_v47 = vld [vmem:[%s21925_s3 + $0x3f0] sm:$0x1] }
 0x1cc   :  { %1797 = vmatprep.mubr.f32.mxu0 %v17087_v4  ;;  %1991 = vmatprep.mubr.f32.mxu1 %v17092_v46  ;;  %v11127_v4 = vld [vmem:[%s21925_s3 + $0x3f8] sm:$0x1]  ;;  %v11094_v46 = vld [vmem:[%s21925_s3 + $0x2f0] sm:$0x1] }
 0x1cf   :  { %1798 = vmatmul.mubr.f32.gmra.mxu0 %v17101_v41  ;;  %1992 = vmatmul.mubr.f32.gmra.mxu1 %v17106_v44  ;;  %v11129_v41 = vld [vmem:[%s21925_s3 + $0x108] sm:$0xff] }
 0x1d0   :  { %1802 = vmatprep.mubr.f32.mxu0 %v11095_v3  ;;  %1996 = vmatprep.mubr.f32.mxu1 %v11127_v4  ;;  %v2067_v3 = vld [vmem:[%s21925_s3] sm:$0xff] }
 0x1d1   :  { %v11128_v4 = vld [vmem:[%s21925_s3 + $0x100] sm:$0xff] }
 0x1d3   :  { %1803 = vmatmul.mubr.f32.gmra.mxu0 %v11094_v46  ;;  %1997 = vmatmul.mubr.f32.gmra.mxu1 %v11126_v47  ;;  %v2070_v46 = vld [vmem:[%s21925_s3 + $0x18] sm:$0xff]  ;;  %v2069_v47 = vld [vmem:[%s21925_s3 + $0x10] sm:$0xff] }
 0x1d4   :  { %2163 = vmatprep.mubr.f32.mxu0 %v2068_v9  ;;  %2340 = vmatprep.mubr.f32.mxu1 %v11129_v41  ;;  %v11133_v9 = vld [vmem:[%s21925_s3 + $0x128] sm:$0xff]  ;;  %v22185_v41 = vld [vmem:[#allocation21_spill] sm:$0xff] }
 0x1d7   :  { %2164 = vmatmul.mubr.f32.vlgmr.msra.gmra.mxu0 %v2067_v3  ;;  %2341 = vmatmul.mubr.f32.vlgmr.msra.gmra.mxu1 %v11128_v4  ;;  %v22186_v4 = vld [vmem:[#allocation22_spill] sm:$0xff] }
 0x1d8   :  { %12528 = vmatpush3.msra.mxu0 %v16656_v26  ;;  %12608 = vmatpush3.msra.mxu1 %v16656_v26  ;;  %v11131_v26 = vld [vmem:[%s21925_s3 + $0x118] sm:$0xff] }
 0x1d9   :  { %12529 = vmatprep.subr.mxu0 %v16660_v27  ;;  %12609 = vmatprep.subr.mxu1 %v16660_v27  ;;  %v11130_v27 = vld [vmem:[%s21925_s3 + $0x110] sm:$0xff] }
 0x1da   :  { %12530 = vmatpush3.msra.mxu0 %v16704_v7  ;;  %12610 = vmatpush3.msra.mxu1 %v16704_v7  ;;  %v2072_v7 = vld [vmem:[%s21925_s3 + $0x28] sm:$0xff] }
 0x1db   :  { %2168 = vmatprep.mubr.f32.mxu0 %v2070_v46  ;;  %12531 = vmatprep.subr.mxu0 %v16690_v30  ;;  %v2097_v46 = vld [vmem:[%s21925_s3 + $0xf0] sm:$0x1] }
 0x1dc   :  { %12611 = vmatprep.subr.mxu1 %v16690_v30  ;;  %2169 = vmatmul.mubr.f32.gmra.mxu0 %v2069_v47  ;;  %v2071_v30 = vld [vmem:[%s21925_s3 + $0x20] sm:$0xff] }
 0x1dd   :  { %12532 = vmatpush3.msra.mxu0 %v16722_v16  ;;  %12612 = vmatpush3.msra.mxu1 %v16722_v16  ;;  %v11159_v16 = vld [vmem:[%s21925_s3 + $0x1f8] sm:$0x1] }
 0x1de   :  { %2345 = vmatprep.mubr.f32.mxu1 %v11131_v26  ;;  %12533 = vmatprep.subr.mxu0 %v16724_v28 }
 0x1df   :  { %12613 = vmatprep.subr.mxu1 %v16724_v28  ;;  %2346 = vmatmul.mubr.f32.gmra.mxu1 %v11130_v27  ;;  %v11132_v28 = vld [vmem:[%s21925_s3 + $0x120] sm:$0xff]  ;;  %v11158_v27 = vld [vmem:[%s21925_s3 + $0x1f0] sm:$0x1] }
 0x1e0   :  { %12534 = vmatpush3.msra.mxu0 %v16746_v36  ;;  %12614 = vmatpush3.msra.mxu1 %v16746_v36  ;;  %v2074_v36 = vld [vmem:[%s21925_s3 + $0x38] sm:$0xff] }
 0x1e1   :  { %2173 = vmatprep.mubr.f32.mxu0 %v2072_v7  ;;  %12535 = vmatprep.subr.mxu0 %v16742_v37 }
 0x1e2   :  { %12615 = vmatprep.subr.mxu1 %v16742_v37  ;;  %2174 = vmatmul.mubr.f32.gmra.mxu0 %v2071_v30  ;;  %v22014_v37 = vmov 0.0  }
 0x1e3   :  { %12536 = vmatpush3.msra.mxu0 %v16762_v32  ;;  %12616 = vmatpush3.msra.mxu1 %v16762_v32  ;;  %v11135_v32 = vld [vmem:[%s21925_s3 + $0x138] sm:$0xff]  ;;  %1219 = vst.msk [vmem:[#allocation3] sm:$0xff] %vm1154_vm1, %v22014_v37  ;;  %1220 = vst.msk [vmem:[#allocation3 + $0x8] sm:$0xff] %vm1154_vm1, %v22014_v37 }
 0x1e4   :  { %2350 = vmatprep.mubr.f32.mxu1 %v11133_v9  ;;  %12537 = vmatprep.subr.mxu0 %v16764_v34  ;;  %1221 = vst.msk [vmem:[#allocation3 + $0x102] sm:$0xff] %vm1154_vm1, %v22014_v37  ;;  %1222 = vst.msk [vmem:[#allocation3 + $0x10a] sm:$0xff] %vm1154_vm1, %v22014_v37 }
 0x1e5   :  { %12617 = vmatprep.subr.mxu1 %v16764_v34  ;;  %2351 = vmatmul.mubr.f32.gmra.mxu1 %v11132_v28  ;;  %v11134_v34 = vld [vmem:[%s21925_s3 + $0x130] sm:$0xff]  ;;  %1223 = vst.msk [vmem:[#allocation4] sm:$0xff] %vm1154_vm1, %v22014_v37  ;;  %1224 = vst.msk [vmem:[#allocation4 + $0x8] sm:$0xff] %vm1154_vm1, %v22014_v37 }
 0x1e6   :  { %12538 = vmatpush3.msra.mxu0 %v16786_v19  ;;  %12618 = vmatpush3.msra.mxu1 %v16786_v19  ;;  %1225 = vst.msk [vmem:[#allocation4 + $0x102] sm:$0xff] %vm1154_vm1, %v22014_v37  ;;  %1226 = vst.msk [vmem:[#allocation4 + $0x10a] sm:$0xff] %vm1154_vm1, %v22014_v37 }
 0x1e7   :  { %2178 = vmatprep.mubr.f32.mxu0 %v2074_v36  ;;  %12539 = vmatprep.subr.mxu0 %v16782_v21  ;;  %v22187_v36 = vld [vmem:[#allocation23_spill] sm:$0xff] }
 0x1e8   :  { %12619 = vmatprep.subr.mxu1 %v16782_v21  ;;  %2179 = vmatmul.mubr.f32.gmra.mxu0 %v16293_v15  ;;  %v11137_v15 = vld [vmem:[%s21925_s3 + $0x148] sm:$0xff] }
 0x1e9   :  { %12540 = vmatpush3.msra.mxu0 %v16802_v23  ;;  %12620 = vmatpush3.msra.mxu1 %v16802_v23  ;;  %v22184_v21 = vld [vmem:[#allocation20_spill] sm:$0xff]  ;;  %v2098_v23 = vld [vmem:[%s21925_s3 + $0xf8] sm:$0x1] }
 0x1ea   :  { %2355 = vmatprep.mubr.f32.mxu1 %v11135_v32  ;;  %12541 = vmatprep.subr.mxu0 %v16804_v29  ;;  %v22188_v32 = vld [vmem:[#allocation24_spill] sm:$0xff] }
 0x1eb   :  { %12621 = vmatprep.subr.mxu1 %v16804_v29  ;;  %2356 = vmatmul.mubr.f32.gmra.mxu1 %v11134_v34 }
 0x1ec   :  { %12542 = vmatpush3.msra.mxu0 %v16826_v13  ;;  %12622 = vmatpush3.msra.mxu1 %v16826_v13  ;;  %v22181_v13 = vld [vmem:[#allocation17_spill] sm:$0xff] }
 0x1ed   :  { %2183 = vmatprep.mubr.f32.mxu0 %v16308_v24  ;;  %12543 = vmatprep.subr.mxu0 %v16822_v17 }
 0x1ee   :  { %12623 = vmatprep.subr.mxu1 %v16822_v17  ;;  %2184 = vmatmul.mubr.f32.gmra.mxu0 %v16321_v25  ;;  %v22182_v17 = vld [vmem:[#allocation18_spill] sm:$0xff] }
 0x1ef   :  { %12544 = vmatpush3.msra.mxu0 %v16842_v18  ;;  %12624 = vmatpush3.msra.mxu1 %v16842_v18  ;;  %v22183_v18 = vld [vmem:[#allocation19_spill] sm:$0xff] }
 0x1f0   :  { %2360 = vmatprep.mubr.f32.mxu1 %v11137_v15  ;;  %12545 = vmatprep.subr.mxu0 %v16844_v20 }
 0x1f1   :  { %12625 = vmatprep.subr.mxu1 %v16844_v20  ;;  %2361 = vmatmul.mubr.f32.gmra.mxu1 %v16326_v31 }
 0x1f2   :  { %12546 = vmatpush3.msra.mxu0 %v16864_v63  ;;  %12626 = vmatpush3.msra.mxu1 %v16864_v63 }
 0x1f3   :  { %2188 = vmatprep.mubr.f32.mxu0 %v16340_v59  ;;  %12547 = vmatprep.subr.mxu0 %v16868_v60 }
 0x1f4   :  { %12627 = vmatprep.subr.mxu1 %v16868_v60  ;;  %2189 = vmatmul.mubr.f32.gmra.mxu0 %v16355_v35 }
 0x1f5   :  { %12548 = vmatpush3.msra.mxu0 %v16882_v1  ;;  %12628 = vmatpush3.msra.mxu1 %v16882_v1 }
 0x1f6   :  { %2365 = vmatprep.mubr.f32.mxu1 %v16345_v33  ;;  %12549 = vmatprep.subr.mxu0 %v16898_v8 }
 0x1f7   :  { %12629 = vmatprep.subr.mxu1 %v16898_v8  ;;  %2366 = vmatmul.mubr.f32.gmra.mxu1 %v16360_v39  ;;  %v22179_v8 = vld [vmem:[#allocation15_spill] sm:$0xff] }
 0x1f8   :  { %12550 = vmatpush3.msra.mxu0 %v16904_v57  ;;  %12630 = vmatpush3.msra.mxu1 %v16904_v57  ;;  %v22178_v57 = vld [vmem:[#allocation14_spill] sm:$0xff] }
 0x1f9   :  { %2193 = vmatprep.mubr.f32.mxu0 %v16373_v38  ;;  %12551 = vmatprep.subr.mxu0 %v16908_v56 }
 0x1fa   :  { %12631 = vmatprep.subr.mxu1 %v16908_v56  ;;  %2194 = vmatmul.mubr.f32.gmra.mxu0 %v16387_v43 }
 0x1fb   :  { %12552 = vmatpush3.msra.mxu0 %v16922_v10  ;;  %12632 = vmatpush3.msra.mxu1 %v16922_v10  ;;  %v17246_v24 = vpop.f32.mrf.mxu0  ;;  %v17248_v25 = vpop.f32.mrf.mxu1  ;;  %v22180_v10 = vld [vmem:[#allocation16_spill] sm:$0xff] }
 0x1fc   :  { %2370 = vmatprep.mubr.f32.mxu1 %v16378_v40  ;;  %12553 = vmatprep.subr.mxu0 %v16938_v5 }
 0x1fd   :  { %12633 = vmatprep.subr.mxu1 %v16938_v5  ;;  %2371 = vmatmul.mubr.f32.gmra.mxu1 %v16392_v45  ;;  %v17254_v31 = vpop.f32.mrf.mxu0  ;;  %v17256_v59 = vpop.f32.mrf.mxu1  ;;  %v22177_v5 = vld [vmem:[#allocation13_spill] sm:$0xff] }
 0x1fe   :  { %12554 = vmatpush3.msra.mxu0 %v16944_v52  ;;  %12634 = vmatpush3.msra.mxu1 %v16944_v52 }
 0x1ff   :  { %2198 = vmatprep.mubr.f32.mxu0 %v16405_v48  ;;  %12555 = vmatprep.subr.mxu0 %v16948_v51 }
 0x200   :  { %12635 = vmatprep.subr.mxu1 %v16948_v51  ;;  %2199 = vmatmul.mubr.f32.gmra.mxu0 %v16419_v53 }
 0x201   :  { %12556 = vmatpush3.msra.mxu0 %v16962_v54  ;;  %12636 = vmatpush3.msra.mxu1 %v16962_v54  ;;  %v17266_v33 = vpop.f32.mrf.mxu0  ;;  %v17268_v35 = vpop.f32.mrf.mxu1 }
 0x202   :  { %2375 = vmatprep.mubr.f32.mxu1 %v16410_v50  ;;  %12557 = vmatprep.subr.mxu0 %v16978_v49 }
 0x203   :  { %12637 = vmatprep.subr.mxu1 %v16978_v49  ;;  %2376 = vmatmul.mubr.f32.gmra.mxu1 %v16424_v55  ;;  %v17274_v39 = vpop.f32.mrf.mxu0  ;;  %v17276_v38 = vpop.f32.mrf.mxu1  ;;  %v22169_v55 = vld [vmem:[#allocation5_spill] sm:$0xff]  ;;  %v22176_v49 = vld [vmem:[#allocation12_spill] sm:$0xff] }
 0x204   :  { %12558 = vmatpush3.msra.mxu0 %v16994_v12  ;;  %12638 = vmatpush3.msra.mxu1 %v16994_v12 }
 0x205   :  { %2203 = vmatprep.mubr.f32.mxu0 %v16437_v58  ;;  %2380 = vmatprep.mubr.f32.mxu1 %v16442_v61  ;;  %v22170_v58 = vld [vmem:[#allocation6_spill] sm:$0xff]  ;;  %v22171_v61 = vld [vmem:[#allocation7_spill] sm:$0xff] }
 0x206   :  { %2204 = vmatmul.mubr.f32.gmra.mxu0 %v16451_v2  ;;  %13615 = vmatprep.subr.mxu0 %v22014_v37 }
 0x207   :  { %2381 = vmatmul.mubr.f32.gmra.mxu1 %v16456_v6  ;;  %2208 = vmatprep.mubr.f32.mxu0 %v16463_v11  ;;  %v17286_v40 = vpop.f32.mrf.mxu0  ;;  %v17288_v43 = vpop.f32.mrf.mxu1  ;;  %v22172_v11 = vld [vmem:[#allocation8_spill] sm:$0xff] }
 0x208   :  { %2385 = vmatprep.mubr.f32.mxu1 %v16468_v14  ;;  %13720 = vmatprep.subr.mxu1 %v22014_v37  ;;  %v22173_v14 = vld [vmem:[#allocation9_spill] sm:$0xff] }
 0x209   :  { %v17292_v45 = vpop.f32.mrf.mxu0  ;;  %v17294_v48 = vpop.f32.mrf.mxu1 }
 0x20a   :  { %2209 = vmatmul.mubr.f32.gmra.mxu0 %v16481_v42  ;;  %v22174_v42 = vld [vmem:[#allocation10_spill] sm:$0xff] }
 0x20b   :  { %2386 = vmatmul.mubr.f32.gmra.mxu1 %v16486_v62  ;;  %2213 = vmatprep.mubr.f32.mxu0 %v16491_v22  ;;  %v22175_v62 = vld [vmem:[#allocation11_spill] sm:$0xff] }
 0x20c   :  { %2390 = vmatprep.mubr.f32.mxu1 %v16496_v0 }
 0x20d   :  { %v17300_v50 = vpop.f32.mrf.mxu0  ;;  %v17302_v53 = vpop.f32.mrf.mxu1 }
 0x20e   :  { %2214 = vmatmul.mubr.f32.gmra.mxu0 %v22169_v55 }
 0x20f   :  { %2391 = vmatmul.mubr.f32.gmra.mxu1 %v22170_v58  ;;  %2218 = vmatprep.mubr.f32.mxu0 %v22171_v61  ;;  %v17307_v2 = vpop.f32.mrf.mxu0  ;;  %v17309_v6 = vpop.f32.mrf.mxu1  ;;  %v11229_v58 = vld [vmem:[%s21926_s4 + $0x58] sm:$0xf]  ;;  %v22189_v61 = vld [vmem:[#allocation25_spill] sm:$0xff] }
 0x210   :  { %2395 = vmatprep.mubr.f32.mxu1 %v22172_v11  ;;  %v2906_v11 = vld [vmem:[%s21926_s4 + $0x28] sm:$0xf] }
 0x212   :  { %2219 = vmatmul.mubr.f32.gmra.mxu0 %v22173_v14  ;;  %v22190_v14 = vld [vmem:[#allocation26_spill] sm:$0xff] }
 0x213   :  { %2396 = vmatmul.mubr.f32.gmra.mxu1 %v22174_v42  ;;  %2223 = vmatprep.mubr.f32.mxu0 %v22175_v62  ;;  %v12091_v22 = vpop.f32.mrf.mxu0  ;;  %v12171_v0 = vpop.f32.mrf.mxu1  ;;  %v22191_v42 = vld [vmem:[#allocation27_spill] sm:$0xff] }
 0x214   :  { %2400 = vmatprep.mubr.f32.mxu1 %v22176_v49 }
 0x215   :  { %v12092_v51 = vpop.f32.mrf.mxu0  ;;  %v12172_v52 = vpop.f32.mrf.mxu1 }
 0x216   :  { %2224 = vmatmul.mubr.f32.gmra.mxu0 %v22177_v5  ;;  %v17317_v54 = vadd.f32 %v12092_v51, %v12091_v22  ;;  %v17319_v56 = vadd.f32 %v12172_v52, %v12171_v0  ;;  %v22192_v0 = vld [vmem:[#allocation28_spill] sm:$0xff]  ;;  %v11228_v52 = vld [vmem:[%s21926_s4 + $0x50] sm:$0xff] }
 0x217   :  { %2401 = vmatmul.mubr.f32.gmra.mxu1 %v22178_v57  ;;  %2228 = vmatprep.mubr.f32.mxu0 %v22179_v8  ;;  %v22193_v5 = vld [vmem:[#allocation29_spill] sm:$0xff]  ;;  %v2905_v8 = vld [vmem:[%s21926_s4 + $0x20] sm:$0xff] }
 0x218   :  { %2405 = vmatprep.mubr.f32.mxu1 %v22180_v10  ;;  %v1618_v60 = vmax.f32 %v17317_v54, %v17319_v56  ;;  %v22194_v10 = vld [vmem:[#allocation30_spill] sm:$0xff] }
 0x219   :  { %v12094_v63 = vpop.f32.mrf.mxu0  ;;  %v12174_v1 = vpop.f32.mrf.mxu1 }
 0x21a   :  { %2229 = vmatmul.mubr.f32.gmra.mxu0 %v22181_v13 }
 0x21b   :  { %2406 = vmatmul.mubr.f32.gmra.mxu1 %v22182_v17  ;;  %2233 = vmatprep.mubr.f32.mxu0 %v22183_v18  ;;  %v12095_v20 = vpop.f32.mrf.mxu0  ;;  %v12175_v19 = vpop.f32.mrf.mxu1  ;;  %v22196_v17 = vld [vmem:[#allocation32_spill] sm:$0xff] }
 0x21c   :  { %2410 = vmatprep.mubr.f32.mxu1 %v22184_v21  ;;  %v17333_v29 = vadd.f32 %v12095_v20, %v12094_v63  ;;  %v17335_v12 = vadd.f32 %v12175_v19, %v12174_v1  ;;  %v22195_v63 = vld [vmem:[#allocation31_spill] sm:$0xff]  ;;  %v11227_v19 = vld [vmem:[%s21926_s4 + $0x48] sm:$0xff]  ;;  %v22197_v21 = vld [vmem:[#allocation33_spill] sm:$0xff] }
 0x21e   :  { %2234 = vmatmul.mubr.f32.gmra.mxu0 %v22185_v41  ;;  %v1619_v3 = vmax.f32 %v17333_v29, %v17335_v12  ;;  %v2904_v41 = vld [vmem:[%s21926_s4 + $0x18] sm:$0xff] }
 0x21f   :  { %2411 = vmatmul.mubr.f32.gmra.mxu1 %v22186_v4  ;;  %2238 = vmatprep.mubr.f32.mxu0 %v2098_v23  ;;  %v12097_v47 = vpop.f32.mrf.mxu0  ;;  %v12177_v26 = vpop.f32.mrf.mxu1  ;;  %v22198_v4 = vld [vmem:[#allocation34_spill] sm:$0xff] }
 0x220   :  { %2415 = vmatprep.mubr.f32.mxu1 %v11159_v16 }
 0x221   :  { %v12098_v7 = vpop.f32.mrf.mxu0  ;;  %v12178_v30 = vpop.f32.mrf.mxu1 }
 0x222   :  { %2239 = vmatmul.mubr.f32.gmra.mxu0 %v2097_v46  ;;  %v17350_v9 = vadd.f32 %v12098_v7, %v12097_v47  ;;  %v17352_v28 = vadd.f32 %v12178_v30, %v12177_v26  ;;  %v22199_v46 = vld [vmem:[#allocation35_spill] sm:$0xff] }
 0x223   :  { %2416 = vmatmul.mubr.f32.gmra.mxu1 %v11158_v27  ;;  %2533 = vmatprep.mubr.f32.mxu0 %v22187_v36  ;;  %v22200_v27 = vld [vmem:[#allocation36_spill] sm:$0xff] }
 0x224   :  { %2726 = vmatprep.mubr.f32.mxu1 %v22188_v32  ;;  %v1620_v34 = vmax.f32 %v17350_v9, %v17352_v28  ;;  %v11226_v32 = vld [vmem:[%s21926_s4 + $0x40] sm:$0xff] }
 0x225   :  { %v12100_v15 = vpop.f32.mrf.mxu0  ;;  %v12180_v55 = vpop.f32.mrf.mxu1 }
 0x226   :  { %2534 = vmatmul.mubr.f32.vlgmr.msra.gmra.mxu0 %v22189_v61  ;;  %v2903_v61 = vld [vmem:[%s21926_s4 + $0x10] sm:$0xff] }
 0x227   :  { %2727 = vmatmul.mubr.f32.vlgmr.msra.gmra.mxu1 %v22190_v14  ;;  %2538 = vmatprep.mubr.f32.mxu0 %v22191_v42  ;;  %v12101_v62 = vpop.f32.mrf.mxu0  ;;  %v12181_v22 = vpop.f32.mrf.mxu1  ;;  %v22203_v14 = vld [vmem:[#allocation39_spill] sm:$0xff] }
 0x228   :  { %2731 = vmatprep.mubr.f32.mxu1 %v22192_v0  ;;  %v17368_v49 = vadd.f32 %v12101_v62, %v12100_v15  ;;  %v17370_v51 = vadd.f32 %v12181_v22, %v12180_v55  ;;  %13616 = vmatpush3.msk.msra.mxu0 %vm3038_vm2, %v11229_v58  ;;  %v22201_v15 = vld [vmem:[#allocation37_spill] sm:$0xff]  ;;  %v22204_v22 = vld [vmem:[#allocation40_spill] sm:$0xff] }
 0x229   :  { %13721 = vmatpush3.msk.msra.mxu1 %vm3038_vm2, %v2906_v11  ;;  %13617 = vmatprep.subr.mxu0 %v22014_v37  ;;  %v22202_v11 = vld [vmem:[#allocation38_spill] sm:$0xff] }
 0x22a   :  { %2539 = vmatmul.mubr.f32.gmra.mxu0 %v22193_v5  ;;  %v1621_v57 = vmax.f32 %v17368_v49, %v17370_v51  ;;  %13722 = vmatprep.subr.mxu1 %v22014_v37 }
 0x22b   :  { %2732 = vmatmul.mubr.f32.gmra.mxu1 %v22194_v10  ;;  %2543 = vmatprep.mubr.f32.mxu0 %v22195_v63  ;;  %v12103_v1 = vpop.f32.mrf.mxu0  ;;  %v12183_v13 = vpop.f32.mrf.mxu1  ;;  %v22205_v10 = vld [vmem:[#allocation41_spill] sm:$0xff] }
 0x22c   :  { %2736 = vmatprep.mubr.f32.mxu1 %v22196_v17  ;;  %13618 = vmatpush3.msra.mxu0 %v11228_v52  ;;  %v22206_v17 = vld [vmem:[#allocation42_spill] sm:$0xff] }
 0x22d   :  { %v12104_v18 = vpop.f32.mrf.mxu0  ;;  %v12184_v20 = vpop.f32.mrf.mxu1  ;;  %13723 = vmatpush3.msra.mxu1 %v2905_v8  ;;  %13619 = vmatprep.subr.mxu0 %v22014_v37  ;;  %v11225_v8 = vld [vmem:[%s21926_s4 + $0x38] sm:$0xff] }
 0x22e   :  { %2544 = vmatmul.mubr.f32.gmra.mxu0 %v22197_v21  ;;  %v17393_v23 = vadd.f32 %v12104_v18, %v12103_v1  ;;  %v17395_v16 = vadd.f32 %v12184_v20, %v12183_v13  ;;  %13724 = vmatprep.subr.mxu1 %v22014_v37  ;;  %v2902_v13 = vld [vmem:[%s21926_s4 + $0x8] sm:$0xff]  ;;  %v22207_v18 = vld [vmem:[#allocation43_spill] sm:$0xff] }
 0x22f   :  { %2737 = vmatmul.mubr.f32.gmra.mxu1 %v22198_v4  ;;  %2548 = vmatprep.mubr.f32.mxu0 %v22199_v46  ;;  %v12106_v47 = vpop.f32.mrf.mxu0  ;;  %v12186_v26 = vpop.f32.mrf.mxu1  ;;  %v22208_v21 = vld [vmem:[#allocation44_spill] sm:$0xff] }
 0x230   :  { %2741 = vmatprep.mubr.f32.mxu1 %v22200_v27  ;;  %v1622_v7 = vmax.f32 %v17393_v23, %v17395_v16  ;;  %13620 = vmatpush3.msra.mxu0 %v11227_v19 }
 0x231   :  { %v12107_v30 = vpop.f32.mrf.mxu0  ;;  %v12187_v36 = vpop.f32.mrf.mxu1  ;;  %13725 = vmatpush3.msra.mxu1 %v2904_v41  ;;  %13621 = vmatprep.subr.mxu0 %v22014_v37 }
 0x232   :  { %2549 = vmatmul.mubr.f32.gmra.mxu0 %v22201_v15  ;;  %v17411_v55 = vadd.f32 %v12107_v30, %v12106_v47  ;;  %v17413_v58 = vadd.f32 %v12187_v36, %v12186_v26  ;;  %13726 = vmatprep.subr.mxu1 %v22014_v37  ;;  %v11224_v47 = vld [vmem:[%s21926_s4 + $0x30] sm:$0xff]  ;;  %v2901_v36 = vld [vmem:[%s21926_s4] sm:$0xff] }
 0x233   :  { %2742 = vmatmul.mubr.f32.gmra.mxu1 %v22202_v11  ;;  %2553 = vmatprep.mubr.f32.mxu0 %v22203_v14  ;;  %v12109_v42 = vpop.f32.mrf.mxu0  ;;  %v12189_v62 = vpop.f32.mrf.mxu1  ;;  %v22209_v26 = vld [vmem:[#allocation45_spill] sm:$0xff]  ;;  %v22211_v15 = vld [vmem:[#allocation47_spill] sm:$0xff]  ;;  %v22212_v14 = vld [vmem:[#allocation48_spill] sm:$0xff] }
 0x234   :  { %2746 = vmatprep.mubr.f32.mxu1 %v22204_v22  ;;  %v1623_v0 = vmax.f32 %v17411_v55, %v17413_v58  ;;  %13622 = vmatpush3.msra.mxu0 %v11226_v32  ;;  %v22210_v32 = vld [vmem:[#allocation46_spill] sm:$0xff] }
 0x235   :  { %v12110_v52 = vpop.f32.mrf.mxu0  ;;  %v12190_v5 = vpop.f32.mrf.mxu1  ;;  %13727 = vmatpush3.msra.mxu1 %v2903_v61  ;;  %13623 = vmatprep.subr.mxu0 %v22014_v37 }
 0x236   :  { %2554 = vmatmul.mubr.f32.gmra.mxu0 %v22205_v10  ;;  %v17429_v63 = vadd.f32 %v12110_v52, %v12109_v42  ;;  %v17431_v1 = vadd.f32 %v12190_v5, %v12189_v62  ;;  %13728 = vmatprep.subr.mxu1 %v22014_v37  ;;  %v22213_v52 = vld [vmem:[#allocation49_spill] sm:$0xff]  ;;  %v22214_v10 = vld [vmem:[#allocation50_spill] sm:$0xff] }
 0x237   :  { %2747 = vmatmul.mubr.f32.gmra.mxu1 %v22206_v17  ;;  %2558 = vmatprep.mubr.f32.mxu0 %v22207_v18  ;;  %v12112_v20 = vpop.f32.mrf.mxu0  ;;  %v12192_v19 = vpop.f32.mrf.mxu1 }
 0x238   :  { %2751 = vmatprep.mubr.f32.mxu1 %v22208_v21  ;;  %v1624_v41 = vmax.f32 %v17429_v63, %v17431_v1  ;;  %13624 = vmatpush3.msra.mxu0 %v11225_v8 }
 0x239   :  { %v12113_v4 = vpop.f32.mrf.mxu0  ;;  %v12193_v46 = vpop.f32.mrf.mxu1  ;;  %13729 = vmatpush3.msra.mxu1 %v2902_v13  ;;  %13625 = vmatprep.subr.mxu0 %v22014_v37  ;;  %v22215_v13 = vld [vmem:[#allocation51_spill] sm:$0xff] }
 0x23a   :  { %2559 = vmatmul.mubr.f32.gmra.mxu0 %v22209_v26  ;;  %v17447_v27 = vadd.f32 %v12113_v4, %v12112_v20  ;;  %v17449_v30 = vadd.f32 %v12193_v46, %v12192_v19  ;;  %13730 = vmatprep.subr.mxu1 %v22014_v37  ;;  %v22216_v20 = vld [vmem:[#allocation52_spill] sm:$0xff]  ;;  %v22217_v46 = vld [vmem:[#allocation53_spill] sm:$0xff] }
 0x23b   :  { %2752 = vmatmul.mubr.f32.gmra.mxu1 %v22210_v32  ;;  %2563 = vmatprep.mubr.f32.mxu0 %v22211_v15  ;;  %v12115_v61 = vpop.f32.mrf.mxu0  ;;  %v12195_v11 = vpop.f32.mrf.mxu1  ;;  %v22219_v32 = vld [vmem:[#allocation55_spill] sm:$0xff] }
 0x23c   :  { %2756 = vmatprep.mubr.f32.mxu1 %v22212_v14  ;;  %v1625_v42 = vmax.f32 %v17447_v27, %v17449_v30  ;;  %13626 = vmatpush3.msra.mxu0 %v11224_v47 }
 0x23d   :  { %v12116_v62 = vpop.f32.mrf.mxu0  ;;  %v12196_v22 = vpop.f32.mrf.mxu1  ;;  %13731 = vmatpush3.msra.mxu1 %v2901_v36  ;;  %13825 = vmatprep.subr.mxu0 %v22014_v37  ;;  %v22218_v36 = vld [vmem:[#allocation54_spill] sm:$0xff] }
 0x23e   :  { %2564 = vmatmul.mubr.f32.gmra.mxu0 %v22213_v52  ;;  %v17462_v5 = vadd.f32 %v12116_v62, %v12115_v61  ;;  %v17464_v8 = vadd.f32 %v12196_v22, %v12195_v11  ;;  %13930 = vmatprep.subr.mxu1 %v22014_v37  ;;  %v22220_v11 = vld [vmem:[#allocation56_spill] sm:$0xff]  ;;  %v22221_v52 = vld [vmem:[#allocation57_spill] sm:$0xff] }
 0x23f   :  { %2757 = vmatmul.mubr.f32.gmra.mxu1 %v22214_v10  ;;  %2568 = vmatprep.mubr.f32.mxu0 %v22215_v13  ;;  %v12118_v17 = vpop.f32.mrf.mxu0  ;;  %v12198_v18 = vpop.f32.mrf.mxu1 }
 0x240   :  { %2761 = vmatprep.mubr.f32.mxu1 %v22216_v20  ;;  %v22246_v30 = vmax.f32 %v17462_v5, %v17464_v8 }
 0x241   :  { %v12119_v21 = vpop.f32.mrf.mxu0  ;;  %v12199_v4 = vpop.f32.mrf.mxu1 }
 0x242   :  { %2569 = vmatmul.mubr.f32.gmra.mxu0 %v22217_v46  ;;  %v17473_v47 = vadd.f32 %v12119_v21, %v12118_v17  ;;  %v17475_v26 = vadd.f32 %v12199_v4, %v12198_v18  ;;  %v22222_v17 = vld [vmem:[#allocation58_spill] sm:$0xff]  ;;  %v22223_v18 = vld [vmem:[#allocation59_spill] sm:$0xff]  ;;  %v22224_v4 = vld [vmem:[#allocation60_spill] sm:$0xff] }
 0x243   :  { %2762 = vmatmul.mubr.f32.gmra.mxu1 %v22218_v36  ;;  %2573 = vmatprep.mubr.f32.mxu0 %v22219_v32  ;;  %v12121_v15 = vpop.f32.mrf.mxu0  ;;  %v12201_v61 = vpop.f32.mrf.mxu1  ;;  %v22228_v46 = vld [vmem:[#allocation64_spill] sm:$0xff] }
 0x244   :  { %2766 = vmatprep.mubr.f32.mxu1 %v22220_v11  ;;  %v12081_v11 = vadd.f32 %v17254_v31, %v17246_v24  ;;  %v22247_v8 = vmax.f32 %v17473_v47, %v17475_v26 }
 0x245   :  { %v12122_v62 = vpop.f32.mrf.mxu0  ;;  %v12202_v22 = vpop.f32.mrf.mxu1 }
 0x246   :  { %2574 = vmatmul.mubr.f32.gmra.mxu0 %v22221_v52  ;;  %v17483_v10 = vadd.f32 %v12122_v62, %v12121_v15  ;;  %v17485_v13 = vadd.f32 %v12202_v22, %v12201_v61  ;;  %v12161_v15 = vadd.f32 %v17256_v59, %v17248_v25  ;;  %v22225_v61 = vld [vmem:[#allocation61_spill] sm:$0xff]  ;;  %v22226_v52 = vld [vmem:[#allocation62_spill] sm:$0xff]  ;;  %v12084_v59 = vadd.f32 %v17274_v39, %v17266_v33 }
 0x247   :  { %2767 = vmatmul.mubr.f32.gmra.mxu1 %v22222_v17  ;;  %2578 = vmatprep.mubr.f32.mxu0 %v22223_v18  ;;  %v12124_v20 = vpop.f32.mrf.mxu0  ;;  %v12204_v21 = vpop.f32.mrf.mxu1  ;;  %v22227_v17 = vld [vmem:[#allocation63_spill] sm:$0xff]  ;;  %v12167_v33 = vadd.f32 %v17294_v48, %v17288_v43 }
 0x248   :  { %2771 = vmatprep.mubr.f32.mxu1 %v22224_v4  ;;  %v1614_v25 = vmax.f32 %v12081_v11, %v12161_v15  ;;  %v12087_v11 = vadd.f32 %v17292_v45, %v17286_v40  ;;  %v22233_v15 = vld [vmem:[#allocation69_spill] sm:$0xff]  ;;  %v22248_v26 = vmax.f32 %v17483_v10, %v17485_v13 }
 0x249   :  { %v12125_v36 = vpop.f32.mrf.mxu0  ;;  %v12205_v32 = vpop.f32.mrf.mxu1 }
 0x24a   :  { %2579 = vmatmul.mubr.f32.gmra.mxu0 %v22225_v61  ;;  %v17497_v62 = vadd.f32 %v12125_v36, %v12124_v20  ;;  %v17499_v22 = vadd.f32 %v12205_v32, %v12204_v21  ;;  %v12164_v20 = vadd.f32 %v17276_v38, %v17268_v35  ;;  %v22229_v21 = vld [vmem:[#allocation65_spill] sm:$0xff]  ;;  %v22230_v32 = vld [vmem:[#allocation66_spill] sm:$0xff]  ;;  %v22231_v61 = vld [vmem:[#allocation67_spill] sm:$0xff]  ;;  %v1616_v43 = vmax.f32 %v12087_v11, %v12167_v33 }
 0x24b   :  { %2772 = vmatmul.mubr.f32.gmra.mxu1 %v22226_v52  ;;  %2583 = vmatprep.mubr.f32.mxu0 %v22227_v17  ;;  %v12239_v18 = vpop.f32.mrf.mxu0  ;;  %v12319_v4 = vpop.f32.mrf.mxu1  ;;  %v22232_v17 = vld [vmem:[#allocation68_spill] sm:$0xff] }
 0x24c   :  { %2776 = vmatprep.mubr.f32.mxu1 %v22228_v46  ;;  %v1615_v38 = vmax.f32 %v12084_v59, %v12164_v20  ;;  %v12090_v59 = vadd.f32 %v17307_v2, %v17300_v50  ;;  %v22249_v13 = vmax.f32 %v17497_v62, %v17499_v22  ;;  %v11299_v22 = vld [vmem:[%s21926_s4 + $0x88] sm:$0xf] }
 0x24d   :  { %v12240_v31 = vpop.f32.mrf.mxu0  ;;  %v12320_v14 = vpop.f32.mrf.mxu1 }
 0x24e   :  { %2584 = vmatmul.mubr.f32.gmra.mxu0 %v22229_v21  ;;  %v12241_v36 = vadd.f32 %v12240_v31, %v12239_v18  ;;  %v12321_v19 = vadd.f32 %v12320_v14, %v12319_v4  ;;  %v22234_v21 = vld [vmem:[#allocation70_spill] sm:$0xff]  ;;  %v22236_v14 = vld [vmem:[#allocation72_spill] sm:$0xff] }
 0x24f   :  { %2777 = vmatmul.mubr.f32.gmra.mxu1 %v22230_v32  ;;  %2588 = vmatprep.mubr.f32.mxu0 %v22231_v61  ;;  %v12242_v46 = vpop.f32.mrf.mxu0  ;;  %v12322_v52 = vpop.f32.mrf.mxu1  ;;  %v22235_v32 = vld [vmem:[#allocation71_spill] sm:$0xff] }
 0x250   :  { %2781 = vmatprep.mubr.f32.mxu1 %v22232_v17  ;;  %v1808_v24 = vmax.f32 %v1614_v25, %v12241_v36  ;;  %v22239_v17 = vld [vmem:[#allocation75_spill] sm:$0xff] }
 0x251   :  { %v12243_v35 = vpop.f32.mrf.mxu0  ;;  %v12323_v39 = vpop.f32.mrf.mxu1 }
 0x252   :  { %2589 = vmatmul.mubr.f32.gmra.mxu0 %v22233_v15  ;;  %v2002_v18 = vmax.f32 %v1808_v24, %v12321_v19  ;;  %v12244_v31 = vadd.f32 %v12243_v35, %v12242_v46  ;;  %v12324_v45 = vadd.f32 %v12323_v39, %v12322_v52  ;;  %v12170_v19 = vadd.f32 %v17309_v6, %v17302_v53  ;;  %v22237_v24 = vld [vmem:[#allocation73_spill] sm:$0xff]  ;;  %v22238_v46 = vld [vmem:[#allocation74_spill] sm:$0xff]  ;;  %v22240_v52 = vld [vmem:[#allocation76_spill] sm:$0xff] }
 0x253   :  { %2782 = vmatmul.mubr.f32.gmra.mxu1 %v22234_v21  ;;  %2593 = vmatprep.mubr.f32.mxu0 %v22235_v32  ;;  %v12245_v61 = vpop.f32.mrf.mxu0  ;;  %v12325_v25 = vpop.f32.mrf.mxu1  ;;  %v22241_v53 = vld [vmem:[#allocation77_spill] sm:$0xff] }
 0x254   :  { %2786 = vmatprep.mubr.f32.mxu1 %v22236_v14  ;;  %2018 = vst.msk [vmem:[#allocation3 + $0x10] sm:$0xff] %vm1154_vm1, %v2002_v18  ;;  %v1809_v40 = vmax.f32 %v1615_v38, %v12244_v31  ;;  %v1617_v39 = vmax.f32 %v12090_v59, %v12170_v19  ;;  %v22242_v18 = vld [vmem:[#allocation78_spill] sm:$0xff]  ;;  %v22243_v31 = vld [vmem:[#allocation79_spill] sm:$0xff]  ;;  %v11190_v19 = vld [vmem:[%s21925_s3 + $0x2f0] sm:$0x1] }
 0x255   :  { %v12246_v48 = vpop.f32.mrf.mxu0  ;;  %v12326_v4 = vpop.f32.mrf.mxu1 }
 0x256   :  { %2594 = vmatmul.mubr.f32.gmra.mxu0 %v22237_v24  ;;  %v2003_v20 = vmax.f32 %v1809_v40, %v12324_v45  ;;  %v12247_v36 = vadd.f32 %v12246_v48, %v12245_v61  ;;  %v12327_v33 = vadd.f32 %v12326_v4, %v12325_v25  ;;  %v22244_v61 = vld [vmem:[#allocation80_spill] sm:$0xff]  ;;  %v11191_v25 = vld [vmem:[%s21925_s3 + $0x2f8] sm:$0x1]  ;;  %v22245_v48 = vld [vmem:[#allocation81_spill] sm:$0xff] }
 0x257   :  { %2787 = vmatmul.mubr.f32.gmra.mxu1 %v22238_v46  ;;  %2598 = vmatprep.mubr.f32.mxu0 %v22239_v17  ;;  %v12248_v35 = vpop.f32.mrf.mxu0  ;;  %v12328_v38 = vpop.f32.mrf.mxu1  ;;  %v11223_v45 = vld [vmem:[%s21925_s3 + $0x3f8] sm:$0x1] }
 0x258   :  { %2791 = vmatprep.mubr.f32.mxu1 %v22240_v52  ;;  %2019 = vst.msk [vmem:[#allocation3 + $0x18] sm:$0xff] %vm1154_vm1, %v2003_v20  ;;  %v1810_v11 = vmax.f32 %v1616_v43, %v12247_v36  ;;  %v11222_v20 = vld [vmem:[%s21925_s3 + $0x3f0] sm:$0x1]  ;;  %v2870_v52 = vld [vmem:[#allocation3 + $0x4] sm:$0xff] }
 0x259   :  { %v12249_v50 = vpop.f32.mrf.mxu0  ;;  %v12329_v2 = vpop.f32.mrf.mxu1 }
 0x25a   :  { %2599 = vmatmul.mubr.f32.gmra.mxu0 %v22241_v53  ;;  %v2004_v6 = vmax.f32 %v1810_v11, %v12327_v33  ;;  %v12250_v15 = vadd.f32 %v12249_v50, %v12248_v35  ;;  %v12330_v32 = vadd.f32 %v12329_v2, %v12328_v38  ;;  %v2907_v35 = vld [vmem:[#allocation3 + $0x5] sm:$0xff] }
 0x25b   :  { %2792 = vmatmul.mubr.f32.gmra.mxu1 %v22242_v18  ;;  %2603 = vmatprep.mubr.f32.mxu0 %v22243_v31  ;;  %v2908_v56 = vld [vmem:[#allocation3 + $0xd] sm:$0xff] }
 0x25c   :  { %2020 = vst.msk [vmem:[#allocation3 + $0x20] sm:$0xff] %vm1154_vm1, %v2004_v6  ;;  %v1811_v21 = vmax.f32 %v1617_v39, %v12250_v15  ;;  %2796 = vmatprep.mubr.f32.mxu1 %v22244_v61  ;;  %v2871_v2 = vld [vmem:[#allocation3 + $0xc] sm:$0xff] }
 0x25d   :  { %v12251_v14 = vpop.f32.mrf.mxu0  ;;  %v12331_v40 = vpop.f32.mrf.mxu1 }
 0x25e   :  { %v2005_v43 = vmax.f32 %v1811_v21, %v12330_v32  ;;  %2604 = vmatmul.mubr.f32.gmra.mxu0 %v22245_v48 }
 0x25f   :  { %v12252_v4 = vpop.f32.mrf.mxu0  ;;  %v12332_v59 = vpop.f32.mrf.mxu1  ;;  %2797 = vmatmul.mubr.f32.gmra.mxu1 %v17106_v44  ;;  %2608 = vmatprep.mubr.f32.mxu0 %v11191_v25  ;;  %v2909_v31 = vld [vmem:[#allocation3 + $0x15] sm:$0xff] }
 0x260   :  { %2021 = vst.msk [vmem:[#allocation3 + $0x28] sm:$0xff] %vm1154_vm1, %v2005_v43  ;;  %v12253_v24 = vadd.f32 %v12252_v4, %v12251_v14  ;;  %2801 = vmatprep.mubr.f32.mxu1 %v11223_v45  ;;  %v12333_v46 = vadd.f32 %v12332_v59, %v12331_v40  ;;  %v2872_v12 = vld [vmem:[#allocation3 + $0x14] sm:$0xff] }
 0x262   :  { %v1812_v36 = vmax.f32 %v1618_v60, %v12253_v24  ;;  %2609 = vmatmul.mubr.f32.gmra.mxu0 %v11190_v19 }
 0x263   :  { %v12254_v44 = vpop.f32.mrf.mxu0  ;;  %v12334_v17 = vpop.f32.mrf.mxu1  ;;  %2802 = vmatmul.mubr.f32.gmra.mxu1 %v11222_v20  ;;  %13627 = vmatprep.mubr.msk.f32.mxu0 %vm15595_vm3, %v22014_v37  ;;  %v2910_v25 = vld [vmem:[#allocation3 + $0x1d] sm:$0xff] }
 0x264   :  { %v2006_v38 = vmax.f32 %v1812_v36, %v12333_v46  ;;  %13732 = vmatprep.mubr.msk.f32.mxu1 %vm15595_vm3, %v22014_v37  ;;  %v2873_v40 = vld [vmem:[#allocation3 + $0x1c] sm:$0xff] }
 0x265   :  { %v12255_v11 = vpop.f32.mrf.mxu0  ;;  %v12335_v33 = vpop.f32.mrf.mxu1 }
 0x266   :  { %2022 = vst.msk [vmem:[#allocation3 + $0x30] sm:$0xff] %vm1154_vm1, %v2006_v38  ;;  %v12256_v54 = vadd.f32 %v12255_v11, %v12254_v44  ;;  %13628 = vmatmul.mubr.msk.f32.vlgmr.msra.gmra.mxu0 %vm1154_vm1, %v2907_v35  ;;  %v12336_v50 = vadd.f32 %v12335_v33, %v12334_v17 }
 0x267   :  { %13733 = vmatmul.mubr.msk.f32.vlgmr.msra.gmra.mxu1 %vm1154_vm1, %v2870_v52  ;;  %13630 = vmatprep.mubr.msk.f32.mxu0 %vm15595_vm3, %v22014_v37  ;;  %v2911_v28 = vld [vmem:[#allocation3 + $0x25] sm:$0xff] }
 0x268   :  { %v1813_v60 = vmax.f32 %v1619_v3, %v12256_v54  ;;  %13735 = vmatprep.mubr.msk.f32.mxu1 %vm15595_vm3, %v22014_v37  ;;  %v2874_v4 = vld [vmem:[#allocation3 + $0x24] sm:$0xff]  ;;  %13826 = vmatpush3.msk.msra.mxu0 %vm3038_vm2, %v11299_v22 }
 0x269   :  { %v12257_v39 = vpop.f32.mrf.mxu0  ;;  %v12337_v53 = vpop.f32.mrf.mxu1  ;;  %13827 = vmatprep.subr.mxu0 %v22014_v37 }
 0x26a   :  { %v2007_v6 = vmax.f32 %v1813_v60, %v12336_v50  ;;  %13631 = vmatmul.mubr.msk.f32.gmra.mxu0 %vm1154_vm1, %v2908_v56 }
 0x26b   :  { %v12258_v15 = vpop.f32.mrf.mxu0  ;;  %v12338_v18 = vpop.f32.mrf.mxu1  ;;  %13736 = vmatmul.mubr.msk.f32.gmra.mxu1 %vm1154_vm1, %v2871_v2  ;;  %13633 = vmatprep.mubr.msk.f32.mxu0 %vm15595_vm3, %v22014_v37 }
 0x26c   :  { %2023 = vst.msk [vmem:[#allocation3 + $0x38] sm:$0xff] %vm1154_vm1, %v2007_v6  ;;  %v12259_v29 = vadd.f32 %v12258_v15, %v12257_v39  ;;  %13738 = vmatprep.mubr.msk.f32.mxu1 %vm15595_vm3, %v22014_v37  ;;  %v12339_v21 = vadd.f32 %v12338_v18, %v12337_v53 }
 0x26d   :  { %v2912_v46 = vld [vmem:[#allocation3 + $0x2d] sm:$0xff] }
 0x26e   :  { %v1814_v3 = vmax.f32 %v1620_v34, %v12259_v29  ;;  %13634 = vmatmul.mubr.msk.f32.gmra.mxu0 %vm1154_vm1, %v2909_v31  ;;  %v2875_v51 = vld [vmem:[#allocation3 + $0x2c] sm:$0xff] }
 0x26f   :  { %v12260_v32 = vpop.f32.mrf.mxu0  ;;  %v12340_v61 = vpop.f32.mrf.mxu1  ;;  %13739 = vmatmul.mubr.msk.f32.gmra.mxu1 %vm1154_vm1, %v2872_v12  ;;  %13636 = vmatprep.mubr.msk.f32.mxu0 %vm15595_vm3, %v22014_v37 }
 0x270   :  { %v2008_v14 = vmax.f32 %v1814_v3, %v12339_v21  ;;  %13741 = vmatprep.mubr.msk.f32.mxu1 %vm15595_vm3, %v22014_v37 }
 0x271   :  { %v12261_v45 = vpop.f32.mrf.mxu0  ;;  %v12341_v43 = vpop.f32.mrf.mxu1 }
 0x272   :  { %2024 = vst.msk [vmem:[#allocation3 + $0x40] sm:$0xff] %vm1154_vm1, %v2008_v14  ;;  %v12262_v9 = vadd.f32 %v12261_v45, %v12260_v32  ;;  %13637 = vmatmul.mubr.msk.f32.gmra.mxu0 %vm1154_vm1, %v2910_v25  ;;  %v12342_v48 = vadd.f32 %v12341_v43, %v12340_v61 }
 0x273   :  { %13742 = vmatmul.mubr.msk.f32.gmra.mxu1 %vm1154_vm1, %v2873_v40  ;;  %13639 = vmatprep.mubr.msk.f32.mxu0 %vm15595_vm3, %v22014_v37  ;;  %v2913_v38 = vld [vmem:[#allocation3 + $0x35] sm:$0xff] }
 0x274   :  { %v1815_v34 = vmax.f32 %v1621_v57, %v12262_v9  ;;  %13744 = vmatprep.mubr.msk.f32.mxu1 %vm15595_vm3, %v22014_v37  ;;  %v2876_v11 = vld [vmem:[#allocation3 + $0x34] sm:$0xff] }
 0x275   :  { %v12263_v59 = vpop.f32.mrf.mxu0  ;;  %v12343_v19 = vpop.f32.mrf.mxu1 }
 0x276   :  { %v2009_v24 = vmax.f32 %v1815_v34, %v12342_v48  ;;  %13640 = vmatmul.mubr.msk.f32.gmra.mxu0 %vm1154_vm1, %v2911_v28 }
 0x277   :  { %v12264_v20 = vpop.f32.mrf.mxu0  ;;  %v12344_v36 = vpop.f32.mrf.mxu1  ;;  %13745 = vmatmul.mubr.msk.f32.gmra.mxu1 %vm1154_vm1, %v2874_v4  ;;  %13642 = vmatprep.mubr.msk.f32.mxu0 %vm15595_vm3, %v22014_v37 }
 0x278   :  { %2025 = vst.msk [vmem:[#allocation3 + $0x48] sm:$0xff] %vm1154_vm1, %v2009_v24  ;;  %v12265_v49 = vadd.f32 %v12264_v20, %v12263_v59  ;;  %13747 = vmatprep.mubr.msk.f32.mxu1 %vm15595_vm3, %v22014_v37  ;;  %v12345_v44 = vadd.f32 %v12344_v36, %v12343_v19 }
 0x279   :  { %v2914_v56 = vld [vmem:[#allocation3 + $0x3d] sm:$0xff] }
 0x27a   :  { %v1816_v57 = vmax.f32 %v1622_v7, %v12265_v49  ;;  %13643 = vmatmul.mubr.msk.f32.gmra.mxu0 %vm1154_vm1, %v2912_v46  ;;  %v2877_v2 = vld [vmem:[#allocation3 + $0x3c] sm:$0xff] }
 0x27b   :  { %v12266_v17 = vpop.f32.mrf.mxu0  ;;  %v12346_v35 = vpop.f32.mrf.mxu1  ;;  %13748 = vmatmul.mubr.msk.f32.gmra.mxu1 %vm1154_vm1, %v2875_v51  ;;  %13645 = vmatprep.mubr.msk.f32.mxu0 %vm15595_vm3, %v22014_v37 }
 0x27c   :  { %v2010_v52 = vmax.f32 %v1816_v57, %v12345_v44  ;;  %13750 = vmatprep.mubr.msk.f32.mxu1 %vm15595_vm3, %v22014_v37 }
 0x27d   :  { %v12267_v33 = vpop.f32.mrf.mxu0  ;;  %v12347_v54 = vpop.f32.mrf.mxu1 }
 0x27e   :  { %2026 = vst.msk [vmem:[#allocation3 + $0x50] sm:$0xff] %vm1154_vm1, %v2010_v52  ;;  %v12268_v23 = vadd.f32 %v12267_v33, %v12266_v17  ;;  %13646 = vmatmul.mubr.msk.f32.gmra.mxu0 %vm1154_vm1, %v2913_v38  ;;  %v12348_v50 = vadd.f32 %v12347_v54, %v12346_v35 }
 0x27f   :  { %v12269_v16 = vpop.f32.mrf.mxu0  ;;  %v12349_v7 = vpop.f32.mrf.mxu1  ;;  %13751 = vmatmul.mubr.msk.f32.gmra.mxu1 %vm1154_vm1, %v2876_v11  ;;  %13648 = vmatprep.mubr.msk.f32.mxu0 %vm15595_vm3, %v22014_v37  ;;  %v2915_v55 = vld [vmem:[#allocation3 + $0x45] sm:$0xff] }
 0x280   :  { %v1817_v60 = vmax.f32 %v1623_v0, %v12268_v23  ;;  %13753 = vmatprep.mubr.msk.f32.mxu1 %vm15595_vm3, %v22014_v37  ;;  %v2878_v29 = vld [vmem:[#allocation3 + $0x44] sm:$0xff] }
 0x281   :  { %v12270_v39 = vpop.f32.mrf.mxu0  ;;  %v12350_v53 = vpop.f32.mrf.mxu1 }
 0x282   :  { %v2011_v6 = vmax.f32 %v1817_v60, %v12348_v50  ;;  %v12271_v15 = vadd.f32 %v12270_v39, %v12269_v16  ;;  %13649 = vmatmul.mubr.msk.f32.gmra.mxu0 %vm1154_vm1, %v2914_v56  ;;  %v12351_v0 = vadd.f32 %v12350_v53, %v12349_v7 }
 0x283   :  { %v12272_v18 = vpop.f32.mrf.mxu0  ;;  %v12352_v31 = vpop.f32.mrf.mxu1  ;;  %13754 = vmatmul.mubr.msk.f32.gmra.mxu1 %vm1154_vm1, %v2877_v2  ;;  %13651 = vmatprep.mubr.msk.f32.mxu0 %vm15595_vm3, %v22014_v37 }
 0x284   :  { %2027 = vst.msk [vmem:[#allocation3 + $0x58] sm:$0xff] %vm1154_vm1, %v2011_v6  ;;  %v1818_v58 = vmax.f32 %v1624_v41, %v12271_v15  ;;  %13756 = vmatprep.mubr.msk.f32.mxu1 %vm15595_vm3, %v22014_v37 }
 0x285   :  { %v12273_v12 = vpop.f32.mrf.mxu0  ;;  %v12353_v3 = vpop.f32.mrf.mxu1  ;;  %v2916_v63 = vld [vmem:[#allocation3 + $0x4d] sm:$0xff] }
 0x286   :  { %v2012_v21 = vmax.f32 %v1818_v58, %v12351_v0  ;;  %v12274_v32 = vadd.f32 %v12273_v12, %v12272_v18  ;;  %13652 = vmatmul.mubr.msk.f32.gmra.mxu0 %vm1154_vm1, %v2915_v55  ;;  %v12354_v41 = vadd.f32 %v12353_v3, %v12352_v31  ;;  %v2879_v14 = vld [vmem:[#allocation3 + $0x4c] sm:$0xff] }
 0x287   :  { %v12275_v61 = vpop.f32.mrf.mxu0  ;;  %v12355_v25 = vpop.f32.mrf.mxu1  ;;  %13757 = vmatmul.mubr.msk.f32.gmra.mxu1 %vm1154_vm1, %v2878_v29  ;;  %13654 = vmatprep.mubr.msk.f32.mxu0 %vm15595_vm3, %v22014_v37 }
 0x288   :  { %2028 = vst.msk [vmem:[#allocation3 + $0x60] sm:$0xff] %vm1154_vm1, %v2012_v21  ;;  %v1819_v1 = vmax.f32 %v1625_v42, %v12274_v32  ;;  %13759 = vmatprep.mubr.msk.f32.mxu1 %vm15595_vm3, %v22014_v37 }
 0x289   :  { %v12276_v40 = vpop.f32.mrf.mxu0  ;;  %v12356_v45 = vpop.f32.mrf.mxu1 }
 0x28a   :  { %v2013_v43 = vmax.f32 %v1819_v1, %v12354_v41  ;;  %v12277_v9 = vadd.f32 %v12276_v40, %v12275_v61  ;;  %13655 = vmatmul.mubr.msk.f32.gmra.mxu0 %vm1154_vm1, %v2916_v63  ;;  %v12357_v48 = vadd.f32 %v12356_v45, %v12355_v25  ;;  %v11337_v1 = vld [vmem:[%s21926_s4 + $0xb8] sm:$0xf]  ;;  %v11336_v40 = vld [vmem:[%s21926_s4 + $0xb0] sm:$0xff] }
 0x28b   :  { %v12278_v28 = vpop.f32.mrf.mxu0  ;;  %v12358_v34 = vpop.f32.mrf.mxu1  ;;  %13760 = vmatmul.mubr.msk.f32.gmra.mxu1 %vm1154_vm1, %v2879_v14  ;;  %13657 = vmatprep.mubr.msk.f32.mxu0 %vm15595_vm3, %v22014_v37  ;;  %v2917_v27 = vld [vmem:[#allocation3 + $0x55] sm:$0xff]  ;;  %v11298_v14 = vld [vmem:[%s21926_s4 + $0x80] sm:$0xff] }
 0x28c   :  { %2029 = vst.msk [vmem:[#allocation3 + $0x68] sm:$0xff] %vm1154_vm1, %v2013_v43  ;;  %v1820_v42 = vmax.f32 %v22246_v30, %v12277_v9  ;;  %13762 = vmatprep.mubr.msk.f32.mxu1 %vm15595_vm3, %v22014_v37  ;;  %v2880_v4 = vld [vmem:[#allocation3 + $0x54] sm:$0xff]  ;;  %13931 = vmatpush3.msk.msra.mxu1 %vm3038_vm2, %v11337_v1 }
 0x28d   :  { %v12279_v59 = vpop.f32.mrf.mxu0  ;;  %v12359_v19 = vpop.f32.mrf.mxu1  ;;  %13932 = vmatprep.subr.mxu1 %v22014_v37  ;;  %13828 = vmatpush3.msra.mxu0 %v11298_v14  ;;  %v11297_v9 = vld [vmem:[%s21926_s4 + $0x78] sm:$0xff] }
 0x28e   :  { %v2014_v24 = vmax.f32 %v1820_v42, %v12357_v48  ;;  %v12280_v20 = vadd.f32 %v12279_v59, %v12278_v28  ;;  %13658 = vmatmul.mubr.msk.f32.gmra.mxu0 %vm1154_vm1, %v2917_v27  ;;  %v12360_v51 = vadd.f32 %v12359_v19, %v12358_v34  ;;  %13933 = vmatpush3.msra.mxu1 %v11336_v40  ;;  %v11335_v28 = vld [vmem:[%s21926_s4 + $0xa8] sm:$0xff]  ;;  %v11296_v34 = vld [vmem:[%s21926_s4 + $0x70] sm:$0xff]  ;;  %v11334_v27 = vld [vmem:[%s21926_s4 + $0xa0] sm:$0xff] }
 0x28f   :  { %v12281_v36 = vpop.f32.mrf.mxu0  ;;  %v12361_v46 = vpop.f32.mrf.mxu1  ;;  %13763 = vmatmul.mubr.msk.f32.gmra.mxu1 %vm1154_vm1, %v2880_v4  ;;  %13660 = vmatprep.mubr.msk.f32.mxu0 %vm15595_vm3, %v22014_v37  ;;  %v2918_v5 = vld [vmem:[#allocation3 + $0x5d] sm:$0xff]  ;;  %v11295_v48 = vld [vmem:[%s21926_s4 + $0x68] sm:$0xff] }
 0x290   :  { %2030 = vst.msk [vmem:[#allocation3 + $0x70] sm:$0xff] %vm1154_vm1, %v2014_v24  ;;  %v1821_v49 = vmax.f32 %v22247_v8, %v12280_v20  ;;  %13765 = vmatprep.mubr.msk.f32.mxu1 %vm15595_vm3, %v22014_v37  ;;  %v2881_v57 = vld [vmem:[#allocation3 + $0x5c] sm:$0xff]  ;;  %13829 = vmatprep.subr.mxu0 %v22014_v37  ;;  %v11332_v24 = vld [vmem:[%s21926_s4 + $0x90] sm:$0xff] }
 0x291   :  { %v12282_v44 = vpop.f32.mrf.mxu0  ;;  %v12362_v17 = vpop.f32.mrf.mxu1  ;;  %13934 = vmatprep.subr.mxu1 %v22014_v37  ;;  %13830 = vmatpush3.msra.mxu0 %v11297_v9  ;;  %v11333_v4 = vld [vmem:[%s21926_s4 + $0x98] sm:$0xff]  ;;  %v11294_v59 = vld [vmem:[%s21926_s4 + $0x60] sm:$0xff] }
 0x292   :  { %v2015_v35 = vmax.f32 %v1821_v49, %v12360_v51  ;;  %v12283_v38 = vadd.f32 %v12282_v44, %v12281_v36  ;;  %13661 = vmatmul.mubr.msk.f32.gmra.mxu0 %vm1154_vm1, %v2918_v5  ;;  %v12363_v54 = vadd.f32 %v12362_v17, %v12361_v46  ;;  %13935 = vmatpush3.msra.mxu1 %v11335_v28 }
 0x293   :  { %v12284_v52 = vpop.f32.mrf.mxu0  ;;  %v12364_v11 = vpop.f32.mrf.mxu1  ;;  %13766 = vmatmul.mubr.msk.f32.gmra.mxu1 %vm1154_vm1, %v2881_v57  ;;  %13663 = vmatprep.mubr.msk.f32.mxu0 %vm15595_vm3, %v22014_v37  ;;  %v2919_v47 = vld [vmem:[#allocation3 + $0x65] sm:$0xff] }
 0x294   :  { %2031 = vst.msk [vmem:[#allocation3 + $0x78] sm:$0xff] %vm1154_vm1, %v2015_v35  ;;  %v1822_v33 = vmax.f32 %v22248_v26, %v12283_v38  ;;  %13768 = vmatprep.mubr.msk.f32.mxu1 %vm15595_vm3, %v22014_v37  ;;  %v2882_v23 = vld [vmem:[#allocation3 + $0x64] sm:$0xff]  ;;  %13831 = vmatprep.subr.mxu0 %v22014_v37 }
 0x295   :  { %v12285_v16 = vpop.f32.mrf.mxu0  ;;  %v12365_v7 = vpop.f32.mrf.mxu1  ;;  %13936 = vmatprep.subr.mxu1 %v22014_v37  ;;  %13832 = vmatpush3.msra.mxu0 %v11296_v34 }
 0x296   :  { %v2016_v56 = vmax.f32 %v1822_v33, %v12363_v54  ;;  %v12286_v60 = vadd.f32 %v12285_v16, %v12284_v52  ;;  %13664 = vmatmul.mubr.msk.f32.gmra.mxu0 %vm1154_vm1, %v2919_v47  ;;  %v12366_v53 = vadd.f32 %v12365_v7, %v12364_v11  ;;  %13937 = vmatpush3.msra.mxu1 %v11334_v27 }
 0x297   :  { %v17672_v50 = vpop.f32.mrf.mxu0  ;;  %v17674_v2 = vpop.f32.mrf.mxu1  ;;  %13769 = vmatmul.mubr.msk.f32.gmra.mxu1 %vm1154_vm1, %v2882_v23  ;;  %13666 = vmatprep.mubr.msk.f32.mxu0 %vm15595_vm3, %v22014_v37  ;;  %v2920_v10 = vld [vmem:[#allocation3 + $0x6d] sm:$0xff] }
 0x298   :  { %2032 = vst.msk [vmem:[#allocation3 + $0x80] sm:$0xff] %vm1154_vm1, %v2016_v56  ;;  %v1823_v39 = vmax.f32 %v22249_v13, %v12286_v60  ;;  %13771 = vmatprep.mubr.msk.f32.mxu1 %vm15595_vm3, %v22014_v37  ;;  %v2883_v6 = vld [vmem:[#allocation3 + $0x6c] sm:$0xff]  ;;  %13833 = vmatprep.subr.mxu0 %v22014_v37 }
 0x299   :  { %v17685_v15 = vpop.f32.mrf.mxu0  ;;  %v17688_v31 = vpop.f32.mrf.mxu1  ;;  %13938 = vmatprep.subr.mxu1 %v22014_v37  ;;  %13834 = vmatpush3.msra.mxu0 %v11295_v48 }
 0x29a   :  { %v2017_v18 = vmax.f32 %v1823_v39, %v12366_v53  ;;  %13667 = vmatmul.mubr.msk.f32.gmra.mxu0 %vm1154_vm1, %v2920_v10  ;;  %13939 = vmatpush3.msra.mxu1 %v11333_v4 }
 0x29b   :  { %13772 = vmatmul.mubr.msk.f32.gmra.mxu1 %vm1154_vm1, %v2883_v6  ;;  %13669 = vmatprep.mubr.msk.f32.mxu0 %vm15595_vm3, %v22014_v37  ;;  %v2921_v62 = vld [vmem:[#allocation3 + $0x75] sm:$0xff] }
 0x29c   :  { %2034 = vst.msk [vmem:[#allocation3 + $0x88] sm:$0x1] %vm2033_vm4, %v2017_v18  ;;  %v17697_v55 = vpop.f32.mrf.mxu0  ;;  %13774 = vmatprep.mubr.msk.f32.mxu1 %vm15595_vm3, %v22014_v37  ;;  %v2884_v58 = vld [vmem:[#allocation3 + $0x74] sm:$0xff]  ;;  %13835 = vmatprep.subr.mxu0 %v22014_v37 }
 0x29d   :  { %13940 = vmatprep.subr.mxu1 %v22014_v37  ;;  %13836 = vmatpush3.msra.mxu0 %v11294_v59 }
 0x29e   :  { %v17703_v0 = vpop.f32.mrf.mxu0  ;;  %13670 = vmatmul.mubr.msk.f32.gmra.mxu0 %vm1154_vm1, %v2921_v62  ;;  %13941 = vmatpush3.msra.mxu1 %v11332_v24 }
 0x29f   :  { %v17706_v29 = vpop.f32.mrf.mxu1  ;;  %13775 = vmatmul.mubr.msk.f32.gmra.mxu1 %vm1154_vm1, %v2884_v58  ;;  %13672 = vmatprep.mubr.msk.f32.mxu0 %vm15595_vm3, %v22014_v37  ;;  %v2922_v12 = vld [vmem:[#allocation3 + $0x7d] sm:$0xff] }
 0x2a0   :  { %13777 = vmatprep.mubr.msk.f32.mxu1 %vm15595_vm3, %v22014_v37  ;;  %v2885_v3 = vld [vmem:[#allocation3 + $0x7c] sm:$0xff]  ;;  %14035 = vmatprep.subr.mxu0 %v22014_v37 }
 0x2a1   :  { %v17713_v21 = vpop.f32.mrf.mxu1  ;;  %14140 = vmatprep.subr.mxu1 %v22014_v37 }
 0x2a2   :  { %v17715_v32 = vpop.f32.mrf.mxu0  ;;  %13673 = vmatmul.mubr.msk.f32.gmra.mxu0 %vm1154_vm1, %v2922_v12 }
 0x2a3   :  { %13778 = vmatmul.mubr.msk.f32.gmra.mxu1 %vm1154_vm1, %v2885_v3  ;;  %13675 = vmatprep.mubr.msk.f32.mxu0 %vm15595_vm3, %v22014_v37 }
 0x2a4   :  { %v17721_v61 = vpop.f32.mrf.mxu0  ;;  %13780 = vmatprep.mubr.msk.f32.mxu1 %vm15595_vm3, %v22014_v37  ;;  %v12401_v37 = vadd.f32 %v17685_v15, %v17672_v50 }
 0x2a5   :  { %v17725_v25 = vpop.f32.mrf.mxu1 }
 0x2a7   :  { %v17727_v63 = vpop.f32.mrf.mxu1 }
 0x2a8   :  { %v17732_v41 = vpop.f32.mrf.mxu0 }
 0x2aa   :  { %v17742_v45 = vpop.f32.mrf.mxu0 }
 0x2ab   :  { %v17745_v43 = vpop.f32.mrf.mxu1 }
 0x2ad   :  { %v17760_v30 = vpop.f32.mrf.mxu1 }
 0x2ae   :  { %v17764_v42 = vpop.f32.mrf.mxu0 }
 0x2b0   :  { %v17777_v19 = vpop.f32.mrf.mxu0 }
 0x2b1   :  { %v17782_v20 = vpop.f32.mrf.mxu1 }
 0x2b3   :  { %v17786_v36 = vpop.f32.mrf.mxu1 }
 0x2b4   :  { %v17790_v46 = vpop.f32.mrf.mxu0 }
 0x2b6   :  { %v17792_v5 = vpop.f32.mrf.mxu0 }
 0x2b7   :  { %v17794_v8 = vpop.f32.mrf.mxu1 }
 0x2b9   :  { %v17796_v49 = vpop.f32.mrf.mxu1 }
 0x2ba   :  { %v17798_v51 = vpop.f32.mrf.mxu0 }
 0x2bc   :  { %v17800_v57 = vpop.f32.mrf.mxu0 }
 0x2bd   :  { %v17802_v44 = vpop.f32.mrf.mxu1 }
 0x2bf   :  { %v17804_v17 = vpop.f32.mrf.mxu1 }
 0x2c0   :  { %v17806_v35 = vpop.f32.mrf.mxu0 }
 0x2c2   :  { %v17808_v38 = vpop.f32.mrf.mxu0 }
 0x2c3   :  { %v17810_v52 = vpop.f32.mrf.mxu1 }
 0x2c5   :  { %v17812_v11 = vpop.f32.mrf.mxu1 }
 0x2c6   :  { %v17814_v47 = vpop.f32.mrf.mxu0 }
 0x2c7   :  { %v17816_v26 = vpop.f32.mrf.mxu1 }
 0x2c8   :  { %v17818_v33 = vpop.f32.mrf.mxu0 }
 0x2c9   :  { %v17820_v54 = vpop.f32.mrf.mxu1 }
 0x2ca   :  { %v17822_v23 = vpop.f32.mrf.mxu0 }
 0x2cb   :  { %v17824_v16 = vpop.f32.mrf.mxu1 }
 0x2cc   :  { %v17826_v7 = vpop.f32.mrf.mxu0 }
 0x2cd   :  { %v17828_v56 = vpop.f32.mrf.mxu1 }
 0x2ce   :  { %v17830_v60 = vpop.f32.mrf.mxu0 }
 0x2cf   :  { %v17832_v10 = vpop.f32.mrf.mxu1 }
 0x2d0   :  { %v17834_v13 = vpop.f32.mrf.mxu0 }
 0x2d1   :  { %v17836_v39 = vpop.f32.mrf.mxu1 }
 0x2d2   :  { %v17838_v53 = vpop.f32.mrf.mxu0 }
 0x2d3   :  { %v17840_v6 = vpop.f32.mrf.mxu1 }
 0x2d4   :  { %v17842_v18 = vpop.f32.mrf.mxu0 }
 0x2d5   :  { %v17844_v62 = vpop.f32.mrf.mxu1 }
 0x2d6   :  { %v17846_v22 = vpop.f32.mrf.mxu0 }
 0x2d7   :  { %v17848_v58 = vpop.f32.mrf.mxu1 }
 0x2d8   :  { %22250 = vst [vmem:[#allocation5_spill] sm:$0xff] %v17848_v58  ;;  %v17850_v12 = vpop.f32.mrf.mxu0 }
 0x2d9   :  { %v17852_v3 = vpop.f32.mrf.mxu1 }
 0x2da   :  { %22251 = vst [vmem:[#allocation6_spill] sm:$0xff] %v17852_v3  ;;  %v17854_v1 = vpop.f32.mrf.mxu0 }
 0x2db   :  { %22252 = vst [vmem:[#allocation7_spill] sm:$0xff] %v17854_v1  ;;  %v17856_v14 = vpop.f32.mrf.mxu1 }
 0x2dc   :  { %22253 = vst [vmem:[#allocation8_spill] sm:$0xff] %v17856_v14  ;;  %v17858_v40 = vpop.f32.mrf.mxu0 }
 0x2dd   :  { %22254 = vst [vmem:[#allocation9_spill] sm:$0xff] %v17858_v40  ;;  %v17860_v9 = vpop.f32.mrf.mxu1 }
 0x2de   :  { %22255 = vst [vmem:[#allocation10_spill] sm:$0xff] %v17860_v9  ;;  %v17862_v28 = vpop.f32.mrf.mxu0  ;;  %v12481_v9 = vadd.f32 %v17688_v31, %v17674_v2  ;;  %v12407_v2 = vadd.f32 %v17721_v61, %v17715_v32  ;;  %v12487_v31 = vadd.f32 %v17727_v63, %v17725_v25  ;;  %v12490_v32 = vadd.f32 %v17760_v30, %v17745_v43 }
 0x2df   :  { %22256 = vst [vmem:[#allocation11_spill] sm:$0xff] %v17862_v28  ;;  %v17864_v34 = vpop.f32.mrf.mxu1 }
 0x2e0   :  { %22257 = vst [vmem:[#allocation12_spill] sm:$0xff] %v17864_v34  ;;  %v17866_v27 = vpop.f32.mrf.mxu0 }
 0x2e1   :  { %22258 = vst [vmem:[#allocation13_spill] sm:$0xff] %v17866_v27  ;;  %v17868_v48 = vpop.f32.mrf.mxu1  ;;  %v2421_v27 = vmax.f32 %v12401_v37, %v12481_v9 }
 0x2e2   :  { %22259 = vst [vmem:[#allocation14_spill] sm:$0xff] %v17868_v48  ;;  %v17870_v4 = vpop.f32.mrf.mxu0  ;;  %v12404_v48 = vadd.f32 %v17703_v0, %v17697_v55 }
 0x2e3   :  { %22260 = vst [vmem:[#allocation15_spill] sm:$0xff] %v17870_v4  ;;  %v17872_v59 = vpop.f32.mrf.mxu1 }
 0x2e4   :  { %22261 = vst [vmem:[#allocation16_spill] sm:$0xff] %v17872_v59  ;;  %v17874_v24 = vpop.f32.mrf.mxu0  ;;  %v12484_v59 = vadd.f32 %v17713_v21, %v17706_v29 }
 0x2e5   :  { %22262 = vst [vmem:[#allocation17_spill] sm:$0xff] %v17874_v24  ;;  %v17880_v14 = vpop.f32.mrf.mxu1 }
 0x2e6   :  { %22263 = vst [vmem:[#allocation18_spill] sm:$0xff] %v17880_v14  ;;  %v12559_v28 = vpop.f32.mrf.mxu0  ;;  %v2422_v37 = vmax.f32 %v12404_v48, %v12484_v59 }
 0x2e7   :  { %v12639_v34 = vpop.f32.mrf.mxu1 }
 0x2e8   :  { %v12560_v40 = vpop.f32.mrf.mxu0 }
 0x2e9   :  { %v12561_v4 = vadd.f32 %v12560_v40, %v12559_v28  ;;  %v12640_v24 = vpop.f32.mrf.mxu1  ;;  %v2423_v28 = vmax.f32 %v12407_v2, %v12487_v31 }
 0x2ea   :  { %v12562_v1 = vpop.f32.mrf.mxu0  ;;  %v12641_v50 = vadd.f32 %v12640_v24, %v12639_v34 }
 0x2eb   :  { %v2614_v3 = vmax.f32 %v2421_v27, %v12561_v4  ;;  %v12642_v15 = vpop.f32.mrf.mxu1  ;;  %v12410_v27 = vadd.f32 %v17742_v45, %v17732_v41  ;;  %v12493_v4 = vadd.f32 %v17786_v36, %v17782_v20  ;;  %v22264_v20 = vmov 0.0  }
 0x2ec   :  { %v12563_v14 = vpop.f32.mrf.mxu0  ;;  %v12416_v36 = vadd.f32 %v17792_v5, %v17790_v46  ;;  %v12419_v46 = vadd.f32 %v17800_v57, %v17798_v51  ;;  %v12499_v5 = vadd.f32 %v17804_v17, %v17802_v44 }
 0x2ed   :  { %v2807_v9 = vmax.f32 %v2614_v3, %v12641_v50  ;;  %v12564_v58 = vadd.f32 %v12563_v14, %v12562_v1  ;;  %v12643_v55 = vpop.f32.mrf.mxu1  ;;  %v2424_v41 = vmax.f32 %v12410_v27, %v12490_v32 }
 0x2ee   :  { %v12565_v0 = vpop.f32.mrf.mxu0  ;;  %v12644_v21 = vadd.f32 %v12643_v55, %v12642_v15  ;;  %v2427_v17 = vmax.f32 %v12419_v46, %v12499_v5 }
 0x2ef   :  { %2823 = vst.msk [vmem:[#allocation3 + $0x89] sm:$0xff] %vm1154_vm1, %v2807_v9  ;;  %v2615_v29 = vmax.f32 %v2422_v37, %v12564_v58  ;;  %v12645_v40 = vpop.f32.mrf.mxu1  ;;  %v12413_v58 = vadd.f32 %v17777_v19, %v17764_v42  ;;  %v12496_v9 = vadd.f32 %v17796_v49, %v17794_v8 }
 0x2f0   :  { %v12566_v34 = vpop.f32.mrf.mxu0 }
 0x2f1   :  { %v2808_v61 = vmax.f32 %v2615_v29, %v12644_v21  ;;  %v12567_v25 = vadd.f32 %v12566_v34, %v12565_v0  ;;  %v12646_v63 = vpop.f32.mrf.mxu1  ;;  %v2425_v19 = vmax.f32 %v12413_v58, %v12493_v4  ;;  %v2426_v49 = vmax.f32 %v12416_v36, %v12496_v9 }
 0x2f2   :  { %v12568_v3 = vpop.f32.mrf.mxu0  ;;  %v12647_v14 = vadd.f32 %v12646_v63, %v12645_v40  ;;  %v12422_v58 = vadd.f32 %v17808_v38, %v17806_v35  ;;  %v12502_v4 = vadd.f32 %v17812_v11, %v17810_v52  ;;  %v12425_v35 = vadd.f32 %v17818_v33, %v17814_v47 }
 0x2f3   :  { %2824 = vst.msk [vmem:[#allocation3 + $0x91] sm:$0xff] %vm1154_vm1, %v2808_v61  ;;  %v2616_v1 = vmax.f32 %v2423_v28, %v12567_v25  ;;  %v12648_v48 = vpop.f32.mrf.mxu1  ;;  %v12505_v38 = vadd.f32 %v17820_v54, %v17816_v26 }
 0x2f4   :  { %v12569_v59 = vpop.f32.mrf.mxu0  ;;  %v2428_v11 = vmax.f32 %v12422_v58, %v12502_v4 }
 0x2f5   :  { %v2809_v45 = vmax.f32 %v2616_v1, %v12647_v14  ;;  %v12570_v24 = vadd.f32 %v12569_v59, %v12568_v3  ;;  %v12649_v43 = vpop.f32.mrf.mxu1  ;;  %v2429_v54 = vmax.f32 %v12425_v35, %v12505_v38 }
 0x2f6   :  { %v12571_v30 = vpop.f32.mrf.mxu0  ;;  %v2923_v50 = vld [vmem:[#allocation3 + $0x85] sm:$0xff]  ;;  %v12650_v31 = vadd.f32 %v12649_v43, %v12648_v48 }
 0x2f7   :  { %v2886_v15 = vld [vmem:[#allocation3 + $0x84] sm:$0xff]  ;;  %2825 = vst.msk [vmem:[#allocation3 + $0x99] sm:$0xff] %vm1154_vm1, %v2809_v45  ;;  %v2617_v2 = vmax.f32 %v2424_v41, %v12570_v24  ;;  %13676 = vmatmul.mubr.msk.f32.gmra.mxu0 %vm1154_vm1, %v2923_v50  ;;  %v12651_v42 = vpop.f32.mrf.mxu1 }
 0x2f8   :  { %13781 = vmatmul.mubr.msk.f32.gmra.mxu1 %vm1154_vm1, %v2886_v15  ;;  %v12572_v37 = vpop.f32.mrf.mxu0  ;;  %13678 = vmatprep.mubr.msk.f32.mxu0 %vm15595_vm3, %v22264_v20 }
 0x2f9   :  { %13783 = vmatprep.mubr.msk.f32.mxu1 %vm15595_vm3, %v22264_v20  ;;  %v2810_v55 = vmax.f32 %v2617_v2, %v12650_v31  ;;  %v12573_v0 = vadd.f32 %v12572_v37, %v12571_v30  ;;  %v12652_v29 = vpop.f32.mrf.mxu1 }
 0x2fa   :  { %v12574_v21 = vpop.f32.mrf.mxu0  ;;  %v2924_v40 = vld [vmem:[#allocation3 + $0x8d] sm:$0xff]  ;;  %v12653_v27 = vadd.f32 %v12652_v29, %v12651_v42  ;;  %v12508_v29 = vadd.f32 %v17828_v56, %v17824_v16  ;;  %v12511_v16 = vadd.f32 %v17836_v39, %v17832_v10 }
 0x2fb   :  { %v2887_v28 = vld [vmem:[#allocation3 + $0x8c] sm:$0xff]  ;;  %2826 = vst.msk [vmem:[#allocation3 + $0xa1] sm:$0xff] %vm1154_vm1, %v2810_v55  ;;  %v2618_v34 = vmax.f32 %v2425_v19, %v12573_v0  ;;  %13679 = vmatmul.mubr.msk.f32.gmra.mxu0 %vm1154_vm1, %v2924_v40  ;;  %v12654_v32 = vpop.f32.mrf.mxu1  ;;  %v12428_v0 = vadd.f32 %v17826_v7, %v17822_v23  ;;  %v12431_v23 = vadd.f32 %v17834_v13, %v17830_v60 }
 0x2fc   :  { %13784 = vmatmul.mubr.msk.f32.gmra.mxu1 %vm1154_vm1, %v2887_v28  ;;  %v12575_v8 = vpop.f32.mrf.mxu0  ;;  %13681 = vmatprep.mubr.msk.f32.mxu0 %vm15595_vm3, %v22264_v20 }
 0x2fd   :  { %13786 = vmatprep.mubr.msk.f32.mxu1 %vm15595_vm3, %v22264_v20  ;;  %v2811_v61 = vmax.f32 %v2618_v34, %v12653_v27  ;;  %v12576_v25 = vadd.f32 %v12575_v8, %v12574_v21  ;;  %v12655_v63 = vpop.f32.mrf.mxu1  ;;  %v2430_v56 = vmax.f32 %v12428_v0, %v12508_v29  ;;  %v2431_v39 = vmax.f32 %v12431_v23, %v12511_v16 }
 0x2fe   :  { %v12577_v3 = vpop.f32.mrf.mxu0  ;;  %v2925_v1 = vld [vmem:[#allocation3 + $0x95] sm:$0xff]  ;;  %v12656_v57 = vadd.f32 %v12655_v63, %v12654_v32 }
 0x2ff   :  { %v2888_v14 = vld [vmem:[#allocation3 + $0x94] sm:$0xff]  ;;  %2827 = vst.msk [vmem:[#allocation3 + $0xa9] sm:$0xff] %vm1154_vm1, %v2811_v61  ;;  %v2619_v51 = vmax.f32 %v2426_v49, %v12576_v25  ;;  %13682 = vmatmul.mubr.msk.f32.gmra.mxu0 %vm1154_vm1, %v2925_v1  ;;  %v12657_v44 = vpop.f32.mrf.mxu1 }
 0x300   :  { %13787 = vmatmul.mubr.msk.f32.gmra.mxu1 %vm1154_vm1, %v2888_v14  ;;  %v12578_v48 = vpop.f32.mrf.mxu0  ;;  %13684 = vmatprep.mubr.msk.f32.mxu0 %vm15595_vm3, %v22264_v20 }
 0x301   :  { %13789 = vmatprep.mubr.msk.f32.mxu1 %vm15595_vm3, %v22264_v20  ;;  %v2812_v59 = vmax.f32 %v2619_v51, %v12656_v57  ;;  %v12579_v41 = vadd.f32 %v12578_v48, %v12577_v3  ;;  %v12658_v45 = vpop.f32.mrf.mxu1  ;;  %v12434_v51 = vadd.f32 %v17842_v18, %v17838_v53  ;;  %v12514_v57 = vadd.f32 %v17844_v62, %v17840_v6  ;;  %v22265_v18 = vld [vmem:[#allocation5_spill] sm:$0xff]  ;;  %v22266_v6 = vld [vmem:[#allocation6_spill] sm:$0xff] }
 0x302   :  { %v12580_v24 = vpop.f32.mrf.mxu0  ;;  %v2926_v43 = vld [vmem:[#allocation3 + $0x9d] sm:$0xff]  ;;  %v12659_v15 = vadd.f32 %v12658_v45, %v12657_v44  ;;  %v12437_v53 = vadd.f32 %v17850_v12, %v17846_v22  ;;  %v12517_v62 = vadd.f32 %v22266_v6, %v22265_v18 }
 0x303   :  { %v2889_v30 = vld [vmem:[#allocation3 + $0x9c] sm:$0xff]  ;;  %2828 = vst.msk [vmem:[#allocation3 + $0xb1] sm:$0xff] %vm1154_vm1, %v2812_v59  ;;  %v2620_v50 = vmax.f32 %v2427_v17, %v12579_v41  ;;  %13685 = vmatmul.mubr.msk.f32.gmra.mxu0 %vm1154_vm1, %v2926_v43  ;;  %v12660_v2 = vpop.f32.mrf.mxu1 }
 0x304   :  { %13790 = vmatmul.mubr.msk.f32.gmra.mxu1 %vm1154_vm1, %v2889_v30  ;;  %v12581_v52 = vpop.f32.mrf.mxu0  ;;  %13687 = vmatprep.mubr.msk.f32.mxu0 %vm15595_vm3, %v22264_v20  ;;  %v2432_v30 = vmax.f32 %v12434_v51, %v12514_v57  ;;  %v22276_v51 = vld [vmem:[#allocation17_spill] sm:$0xff] }
 0x305   :  { %13792 = vmatprep.mubr.msk.f32.mxu1 %vm15595_vm3, %v22264_v20  ;;  %v2813_v31 = vmax.f32 %v2620_v50, %v12659_v15  ;;  %v12582_v42 = vadd.f32 %v12581_v52, %v12580_v24  ;;  %v12661_v19 = vpop.f32.mrf.mxu1 }
 0x306   :  { %v12583_v37 = vpop.f32.mrf.mxu0  ;;  %v2927_v36 = vld [vmem:[#allocation3 + $0xa5] sm:$0xff]  ;;  %v12662_v33 = vadd.f32 %v12661_v19, %v12660_v2 }
 0x307   :  { %v2890_v9 = vld [vmem:[#allocation3 + $0xa4] sm:$0xff]  ;;  %2829 = vst.msk [vmem:[#allocation3 + $0xb9] sm:$0xff] %vm1154_vm1, %v2813_v31  ;;  %v2621_v47 = vmax.f32 %v2428_v11, %v12582_v42  ;;  %13688 = vmatmul.mubr.msk.f32.gmra.mxu0 %vm1154_vm1, %v2927_v36  ;;  %v12663_v26 = vpop.f32.mrf.mxu1  ;;  %v2433_v31 = vmax.f32 %v12437_v53, %v12517_v62 }
 0x308   :  { %13793 = vmatmul.mubr.msk.f32.gmra.mxu1 %vm1154_vm1, %v2890_v9  ;;  %v12584_v55 = vpop.f32.mrf.mxu0  ;;  %13690 = vmatprep.mubr.msk.f32.mxu0 %vm15595_vm3, %v22264_v20  ;;  %v22267_v19 = vld [vmem:[#allocation7_spill] sm:$0xff]  ;;  %v22269_v9 = vld [vmem:[#allocation8_spill] sm:$0xff] }
 0x309   :  { %13795 = vmatprep.mubr.msk.f32.mxu1 %vm15595_vm3, %v22264_v20  ;;  %v2814_v21 = vmax.f32 %v2621_v47, %v12662_v33  ;;  %v12585_v40 = vadd.f32 %v12584_v55, %v12583_v37  ;;  %v12664_v28 = vpop.f32.mrf.mxu1  ;;  %v22268_v37 = vld [vmem:[#allocation9_spill] sm:$0xff]  ;;  %v22270_v47 = vld [vmem:[#allocation10_spill] sm:$0xff] }
 0x30a   :  { %v12586_v34 = vpop.f32.mrf.mxu0  ;;  %v2928_v27 = vld [vmem:[#allocation3 + $0xad] sm:$0xff]  ;;  %v12665_v5 = vadd.f32 %v12664_v28, %v12663_v26  ;;  %v12440_v36 = vadd.f32 %v22268_v37, %v22267_v19  ;;  %v12520_v33 = vadd.f32 %v22270_v47, %v22269_v9 }
 0x30b   :  { %v2891_v32 = vld [vmem:[#allocation3 + $0xac] sm:$0xff]  ;;  %2830 = vst.msk [vmem:[#allocation3 + $0xc1] sm:$0xff] %vm1154_vm1, %v2814_v21  ;;  %v2622_v46 = vmax.f32 %v2429_v54, %v12585_v40  ;;  %13691 = vmatmul.mubr.msk.f32.gmra.mxu0 %vm1154_vm1, %v2928_v27  ;;  %v12666_v8 = vpop.f32.mrf.mxu1  ;;  %v22271_v27 = vld [vmem:[#allocation11_spill] sm:$0xff] }
 0x30c   :  { %13796 = vmatmul.mubr.msk.f32.gmra.mxu1 %vm1154_vm1, %v2891_v32  ;;  %v12587_v7 = vpop.f32.mrf.mxu0  ;;  %13693 = vmatprep.mubr.msk.f32.mxu0 %vm15595_vm3, %v22264_v20  ;;  %v22272_v32 = vld [vmem:[#allocation13_spill] sm:$0xff] }
 0x30d   :  { %13798 = vmatprep.mubr.msk.f32.mxu1 %vm15595_vm3, %v22264_v20  ;;  %v2815_v49 = vmax.f32 %v2622_v46, %v12665_v5  ;;  %v12588_v61 = vadd.f32 %v12587_v7, %v12586_v34  ;;  %v12667_v25 = vpop.f32.mrf.mxu1  ;;  %v12443_v46 = vadd.f32 %v22272_v32, %v22271_v27  ;;  %v22273_v5 = vld [vmem:[#allocation12_spill] sm:$0xff]  ;;  %v2434_v7 = vmax.f32 %v12440_v36, %v12520_v33 }
 0x30e   :  { %v12589_v63 = vpop.f32.mrf.mxu0  ;;  %v2929_v3 = vld [vmem:[#allocation3 + $0xb5] sm:$0xff]  ;;  %v12668_v13 = vadd.f32 %v12667_v25, %v12666_v8 }
 0x30f   :  { %v2892_v1 = vld [vmem:[#allocation3 + $0xb4] sm:$0xff]  ;;  %2831 = vst.msk [vmem:[#allocation3 + $0xc9] sm:$0xff] %vm1154_vm1, %v2815_v49  ;;  %v2623_v60 = vmax.f32 %v2430_v56, %v12588_v61  ;;  %13694 = vmatmul.mubr.msk.f32.gmra.mxu0 %vm1154_vm1, %v2929_v3  ;;  %v12669_v10 = vpop.f32.mrf.mxu1 }
 0x310   :  { %13799 = vmatmul.mubr.msk.f32.gmra.mxu1 %vm1154_vm1, %v2892_v1  ;;  %v12590_v14 = vpop.f32.mrf.mxu0  ;;  %13696 = vmatprep.mubr.msk.f32.mxu0 %vm15595_vm3, %v22264_v20  ;;  %v22274_v8 = vld [vmem:[#allocation14_spill] sm:$0xff]  ;;  %v3963_v32 = vld [vmem:[#allocation3 + $0xf] sm:$0xff] }
 0x311   :  { %13801 = vmatprep.mubr.msk.f32.mxu1 %vm15595_vm3, %v22264_v20  ;;  %v2816_v44 = vmax.f32 %v2623_v60, %v12668_v13  ;;  %v12591_v17 = vadd.f32 %v12590_v14, %v12589_v63  ;;  %v12670_v48 = vpop.f32.mrf.mxu1  ;;  %v12523_v23 = vadd.f32 %v22274_v8, %v22273_v5  ;;  %v22275_v14 = vld [vmem:[#allocation15_spill] sm:$0xff]  ;;  %v11375_v5 = vld [vmem:[%s21926_s4 + $0xe8] sm:$0xf]  ;;  %v11413_v8 = vld [vmem:[%s21926_s4 + $0x118] sm:$0xf] }
 0x312   :  { %v12592_v58 = vpop.f32.mrf.mxu0  ;;  %v2930_v4 = vld [vmem:[#allocation3 + $0xbd] sm:$0xff]  ;;  %v12671_v45 = vadd.f32 %v12670_v48, %v12669_v10  ;;  %v12446_v57 = vadd.f32 %v22276_v51, %v22275_v14 }
 0x313   :  { %v2893_v59 = vld [vmem:[#allocation3 + $0xbc] sm:$0xff]  ;;  %2832 = vst.msk [vmem:[#allocation3 + $0xd1] sm:$0xff] %vm1154_vm1, %v2816_v44  ;;  %v2624_v41 = vmax.f32 %v2431_v39, %v12591_v17  ;;  %13697 = vmatmul.mubr.msk.f32.gmra.mxu0 %vm1154_vm1, %v2930_v4  ;;  %v12672_v24 = vpop.f32.mrf.mxu1  ;;  %v2435_v10 = vmax.f32 %v12443_v46, %v12523_v23  ;;  %v22277_v44 = vld [vmem:[#allocation16_spill] sm:$0xff] }
 0x314   :  { %13802 = vmatmul.mubr.msk.f32.gmra.mxu1 %vm1154_vm1, %v2893_v59  ;;  %v12593_v43 = vpop.f32.mrf.mxu0  ;;  %13699 = vmatprep.mubr.msk.f32.mxu0 %vm15595_vm3, %v22264_v20  ;;  %v22278_v17 = vld [vmem:[#allocation18_spill] sm:$0xff] }
 0x315   :  { %13804 = vmatprep.mubr.msk.f32.mxu1 %vm15595_vm3, %v22264_v20  ;;  %v2817_v50 = vmax.f32 %v2624_v41, %v12671_v45  ;;  %v12594_v15 = vadd.f32 %v12593_v43, %v12592_v58  ;;  %v12673_v2 = vpop.f32.mrf.mxu1  ;;  %v12526_v48 = vadd.f32 %v22278_v17, %v22277_v44  ;;  %v3965_v14 = vld [vmem:[#allocation3 + $0x1f] sm:$0xff]  ;;  %v11411_v44 = vld [vmem:[%s21926_s4 + $0x108] sm:$0xff] }
 0x316   :  { %v12595_v35 = vpop.f32.mrf.mxu0  ;;  %v2931_v38 = vld [vmem:[#allocation3 + $0xc5] sm:$0xff]  ;;  %v12674_v12 = vadd.f32 %v12673_v2, %v12672_v24 }
 0x317   :  { %v2894_v52 = vld [vmem:[#allocation3 + $0xc4] sm:$0xff]  ;;  %2833 = vst.msk [vmem:[#allocation3 + $0xd9] sm:$0xff] %vm1154_vm1, %v2817_v50  ;;  %v2625_v22 = vmax.f32 %v2432_v30, %v12594_v15  ;;  %13700 = vmatmul.mubr.msk.f32.gmra.mxu0 %vm1154_vm1, %v2931_v38  ;;  %v12675_v11 = vpop.f32.mrf.mxu1  ;;  %v2436_v43 = vmax.f32 %v12446_v57, %v12526_v48  ;;  %v11373_v57 = vld [vmem:[%s21926_s4 + $0xd8] sm:$0xff] }
 0x318   :  { %13805 = vmatmul.mubr.msk.f32.gmra.mxu1 %vm1154_vm1, %v2894_v52  ;;  %v12596_v42 = vpop.f32.mrf.mxu0  ;;  %13702 = vmatprep.mubr.msk.f32.mxu0 %vm15595_vm3, %v22264_v20 }
 0x319   :  { %13807 = vmatprep.mubr.msk.f32.mxu1 %vm15595_vm3, %v22264_v20  ;;  %v2818_v26 = vmax.f32 %v2625_v22, %v12674_v12  ;;  %v12597_v54 = vadd.f32 %v12596_v42, %v12595_v35  ;;  %v12676_v55 = vpop.f32.mrf.mxu1 }
 0x31a   :  { %v12598_v0 = vpop.f32.mrf.mxu0  ;;  %v2932_v29 = vld [vmem:[#allocation3 + $0xcd] sm:$0xff]  ;;  %v12677_v28 = vadd.f32 %v12676_v55, %v12675_v11 }
 0x31b   :  { %v2895_v21 = vld [vmem:[#allocation3 + $0xcc] sm:$0xff]  ;;  %2834 = vst.msk [vmem:[#allocation3 + $0xe1] sm:$0xff] %vm1154_vm1, %v2818_v26  ;;  %v2626_v40 = vmax.f32 %v2433_v31, %v12597_v54  ;;  %13703 = vmatmul.mubr.msk.f32.gmra.mxu0 %vm1154_vm1, %v2932_v29  ;;  %v12678_v34 = vpop.f32.mrf.mxu1 }
 0x31c   :  { %13808 = vmatmul.mubr.msk.f32.gmra.mxu1 %vm1154_vm1, %v2895_v21  ;;  %v12599_v16 = vpop.f32.mrf.mxu0  ;;  %13705 = vmatprep.mubr.msk.f32.mxu0 %vm15595_vm3, %v22264_v20 }
 0x31d   :  { %13810 = vmatprep.mubr.msk.f32.mxu1 %vm15595_vm3, %v22264_v20  ;;  %v2819_v56 = vmax.f32 %v2626_v40, %v12677_v28  ;;  %v12600_v49 = vadd.f32 %v12599_v16, %v12598_v0  ;;  %v12679_v61 = vpop.f32.mrf.mxu1  ;;  %v3578_v40 = vld [vmem:[#allocation3 + $0x6] sm:$0xff] }
 0x31e   :  { %v2933_v25 = vld [vmem:[#allocation3 + $0xd5] sm:$0xff]  ;;  %v12601_v3 = vpop.f32.mrf.mxu0  ;;  %v12680_v60 = vadd.f32 %v12679_v61, %v12678_v34 }
 0x31f   :  { %v2896_v63 = vld [vmem:[#allocation3 + $0xd4] sm:$0xff]  ;;  %2835 = vst.msk [vmem:[#allocation3 + $0xe9] sm:$0xff] %vm1154_vm1, %v2819_v56  ;;  %v2627_v1 = vmax.f32 %v2434_v7, %v12600_v49  ;;  %13706 = vmatmul.mubr.msk.f32.gmra.mxu0 %vm1154_vm1, %v2933_v25  ;;  %v12681_v13 = vpop.f32.mrf.mxu1 }
 0x320   :  { %13811 = vmatmul.mubr.msk.f32.gmra.mxu1 %vm1154_vm1, %v2896_v63  ;;  %13708 = vmatprep.mubr.msk.f32.mxu0 %vm15595_vm3, %v22264_v20  ;;  %v12602_v39 = vpop.f32.mrf.mxu0  ;;  %v3579_v56 = vld [vmem:[#allocation3 + $0xe] sm:$0xff]  ;;  %v3964_v61 = vld [vmem:[#allocation3 + $0x17] sm:$0xff]  ;;  %v11374_v63 = vld [vmem:[%s21926_s4 + $0xe0] sm:$0xff] }
 0x321   :  { %13813 = vmatprep.mubr.msk.f32.mxu1 %vm15595_vm3, %v22264_v20  ;;  %v2820_v58 = vmax.f32 %v2627_v1, %v12680_v60  ;;  %v12603_v4 = vadd.f32 %v12602_v39, %v12601_v3  ;;  %v12682_v59 = vpop.f32.mrf.mxu1  ;;  %v11412_v3 = vld [vmem:[%s21926_s4 + $0x110] sm:$0xff] }
 0x322   :  { %v2934_v41 = vld [vmem:[#allocation3 + $0xdd] sm:$0xff]  ;;  %v12604_v24 = vpop.f32.mrf.mxu0  ;;  %v12683_v53 = vadd.f32 %v12682_v59, %v12681_v13 }
 0x323   :  { %v2897_v45 = vld [vmem:[#allocation3 + $0xdc] sm:$0xff]  ;;  %2836 = vst.msk [vmem:[#allocation3 + $0xf1] sm:$0xff] %vm1154_vm1, %v2820_v58  ;;  %13709 = vmatmul.mubr.msk.f32.gmra.mxu0 %vm1154_vm1, %v2934_v41  ;;  %v2628_v18 = vmax.f32 %v2435_v10, %v12603_v4  ;;  %v12684_v6 = vpop.f32.mrf.mxu1  ;;  %v3966_v41 = vld [vmem:[#allocation3 + $0x27] sm:$0xff] }
 0x324   :  { %13814 = vmatmul.mubr.msk.f32.gmra.mxu1 %vm1154_vm1, %v2897_v45  ;;  %13711 = vmatprep.mubr.msk.f32.mxu0 %vm15595_vm3, %v22264_v20  ;;  %v12605_v62 = vpop.f32.mrf.mxu0  ;;  %v3580_v10 = vld [vmem:[#allocation3 + $0x16] sm:$0xff]  ;;  %v3581_v4 = vld [vmem:[#allocation3 + $0x1e] sm:$0xff] }
 0x325   :  { %13816 = vmatprep.mubr.msk.f32.mxu1 %vm15595_vm3, %v22264_v20  ;;  %v2821_v30 = vmax.f32 %v2628_v18, %v12683_v53  ;;  %v12606_v50 = vadd.f32 %v12605_v62, %v12604_v24  ;;  %v12685_v15 = vpop.f32.mrf.mxu1  ;;  %v11372_v24 = vld [vmem:[%s21926_s4 + $0xd0] sm:$0xff]  ;;  %v11410_v53 = vld [vmem:[%s21926_s4 + $0x100] sm:$0xff] }
 0x326   :  { %v2935_v2 = vld [vmem:[#allocation3 + $0xe5] sm:$0xff]  ;;  %v12686_v38 = vadd.f32 %v12685_v15, %v12684_v6  ;;  %v3108_v52 = vpop.f32.mrf.mxu0 }
 0x327   :  { %v2898_v35 = vld [vmem:[#allocation3 + $0xe4] sm:$0xff]  ;;  %13712 = vmatmul.mubr.msk.f32.gmra.mxu0 %vm1154_vm1, %v2935_v2  ;;  %2837 = vst.msk [vmem:[#allocation3 + $0xf9] sm:$0xff] %vm1154_vm1, %v2821_v30  ;;  %v2629_v22 = vmax.f32 %v2436_v43, %v12606_v50  ;;  %v3424_v12 = vpop.f32.mrf.mxu1  ;;  %v3967_v50 = vld [vmem:[#allocation3 + $0x2f] sm:$0xff] }
 0x328   :  { %13817 = vmatmul.mubr.msk.f32.gmra.mxu1 %vm1154_vm1, %v2898_v35  ;;  %13714 = vmatprep.mubr.msk.f32.mxu0 %vm15595_vm3, %v22264_v20  ;;  %v18035_v11 = vadd.f32 %v3424_v12, %v3108_v52  ;;  %v13629_v31 = vpop.f32.mrf.mxu0  ;;  %v3582_v43 = vld [vmem:[#allocation3 + $0x26] sm:$0xff]  ;;  %v11409_v35 = vld [vmem:[%s21926_s4 + $0xf8] sm:$0xff]  ;;  %v3583_v12 = vld [vmem:[#allocation3 + $0x2e] sm:$0xff] }
 0x329   :  { %13819 = vmatprep.mubr.msk.f32.mxu1 %vm15595_vm3, %v22264_v20  ;;  %v2822_v42 = vmax.f32 %v2629_v22, %v12686_v38  ;;  %v13734_v19 = vpop.f32.mrf.mxu1  ;;  %v11371_v2 = vld [vmem:[%s21926_s4 + $0xc8] sm:$0xff] }
 0x32a   :  { %v2936_v37 = vld [vmem:[#allocation3 + $0xed] sm:$0xff]  ;;  %v3113_v9 = vpop.f32.mrf.mxu0  ;;  %v2937_v55 = vld [vmem:[#allocation3 + $0xf5] sm:$0x3] }
 0x32b   :  { %v2899_v36 = vld [vmem:[#allocation3 + $0xec] sm:$0xff]  ;;  %13715 = vmatmul.mubr.msk.f32.gmra.mxu0 %vm1154_vm1, %v2936_v37  ;;  %2838 = vst.msk [vmem:[#allocation3 + $0x101] sm:$0x1] %vm2033_vm4, %v2822_v42  ;;  %v3429_v47 = vpop.f32.mrf.mxu1  ;;  %v2900_v0 = vld [vmem:[#allocation3 + $0xf4] sm:$0x3]  ;;  %v3968_v42 = vld [vmem:[#allocation3 + $0x37] sm:$0xff] }
 0x32c   :  { %13820 = vmatmul.mubr.msk.f32.gmra.mxu1 %vm1154_vm1, %v2899_v36  ;;  %13717 = vmatprep.mubr.msk.f32.mxu0 %vm15595_vm3, %v22264_v20  ;;  %v18044_v33 = vadd.f32 %v3429_v47, %v3113_v9  ;;  %v13632_v26 = vpop.f32.mrf.mxu0  ;;  %v11370_v37 = vld [vmem:[%s21926_s4 + $0xc0] sm:$0xff]  ;;  %v11408_v36 = vld [vmem:[%s21926_s4 + $0xf0] sm:$0xff] }
 0x32d   :  { %13822 = vmatprep.mubr.msk.f32.mxu1 %vm15595_vm3, %v22264_v20  ;;  %v13737_v54 = vpop.f32.mrf.mxu1 }
 0x32e   :  { %v3118_v29 = vpop.f32.mrf.mxu0 }
 0x32f   :  { %13718 = vmatmul.mubr.msk.f32.gmra.mxu0 %vm1154_vm1, %v2937_v55  ;;  %v3434_v21 = vpop.f32.mrf.mxu1  ;;  %v3584_v55 = vld [vmem:[#allocation3 + $0x36] sm:$0xff] }
 0x330   :  { %13823 = vmatmul.mubr.msk.f32.gmra.mxu1 %vm1154_vm1, %v2900_v0  ;;  %13837 = vmatprep.mubr.msk.f32.mxu0 %vm15595_vm3, %v22264_v20  ;;  %v18052_v28 = vadd.f32 %v3434_v21, %v3118_v29  ;;  %v13635_v34 = vpop.f32.mrf.mxu0  ;;  %v3969_v0 = vld [vmem:[#allocation3 + $0x3f] sm:$0xff] }
 0x331   :  { %13942 = vmatprep.mubr.msk.f32.mxu1 %vm15595_vm3, %v22264_v20  ;;  %v13740_v27 = vpop.f32.mrf.mxu1 }
 0x332   :  { %v3123_v46 = vpop.f32.mrf.mxu0 }
 0x333   :  { %13838 = vmatmul.mubr.msk.f32.vlgmr.msra.gmra.mxu0 %vm1154_vm1, %v3578_v40  ;;  %v3439_v23 = vpop.f32.mrf.mxu1 }
 0x334   :  { %13943 = vmatmul.mubr.msk.f32.vlgmr.msra.gmra.mxu1 %vm1154_vm1, %v3963_v32  ;;  %13840 = vmatprep.mubr.msk.f32.mxu0 %vm15595_vm3, %v22264_v20  ;;  %v18066_v16 = vadd.f32 %v3439_v23, %v3123_v46  ;;  %v13638_v7 = vpop.f32.mrf.mxu0  ;;  %v3585_v32 = vld [vmem:[#allocation3 + $0x3e] sm:$0xff]  ;;  %v3970_v46 = vld [vmem:[#allocation3 + $0x47] sm:$0xff] }
 0x335   :  { %13945 = vmatprep.mubr.msk.f32.mxu1 %vm15595_vm3, %v22264_v20  ;;  %v13743_v49 = vpop.f32.mrf.mxu1  ;;  %14036 = vmatpush3.msk.msra.mxu0 %vm3038_vm2, %v11375_v5 }
 0x336   :  { %14141 = vmatpush3.msk.msra.mxu1 %vm3038_vm2, %v11413_v8  ;;  %v3128_v25 = vpop.f32.mrf.mxu0  ;;  %14037 = vmatprep.subr.mxu0 %v22264_v20  ;;  %v3586_v49 = vld [vmem:[#allocation3 + $0x46] sm:$0xff] }
 0x337   :  { %14142 = vmatprep.subr.mxu1 %v22264_v20  ;;  %13841 = vmatmul.mubr.msk.f32.gmra.mxu0 %vm1154_vm1, %v3579_v56  ;;  %v3444_v1 = vpop.f32.mrf.mxu1 }
 0x338   :  { %13946 = vmatmul.mubr.msk.f32.gmra.mxu1 %vm1154_vm1, %v3964_v61  ;;  %13843 = vmatprep.mubr.msk.f32.mxu0 %vm15595_vm3, %v22264_v20  ;;  %v18084_v60 = vadd.f32 %v3444_v1, %v3128_v25  ;;  %v13641_v13 = vpop.f32.mrf.mxu0  ;;  %v3971_v61 = vld [vmem:[#allocation3 + $0x4f] sm:$0xff] }
 0x339   :  { %13948 = vmatprep.mubr.msk.f32.mxu1 %vm15595_vm3, %v22264_v20  ;;  %v13746_v39 = vpop.f32.mrf.mxu1  ;;  %14038 = vmatpush3.msra.mxu0 %v11374_v63 }
 0x33a   :  { %14143 = vmatpush3.msra.mxu1 %v11412_v3  ;;  %v3133_v51 = vpop.f32.mrf.mxu0  ;;  %14039 = vmatprep.subr.mxu0 %v22264_v20  ;;  %v3972_v39 = vld [vmem:[#allocation3 + $0x57] sm:$0xff] }
 0x33b   :  { %14144 = vmatprep.subr.mxu1 %v22264_v20  ;;  %13844 = vmatmul.mubr.msk.f32.gmra.mxu0 %vm1154_vm1, %v3580_v10  ;;  %v3449_v17 = vpop.f32.mrf.mxu1  ;;  %v3587_v10 = vld [vmem:[#allocation3 + $0x4e] sm:$0xff] }
 0x33c   :  { %13949 = vmatmul.mubr.msk.f32.gmra.mxu1 %vm1154_vm1, %v3965_v14  ;;  %13846 = vmatprep.mubr.msk.f32.mxu0 %vm15595_vm3, %v22264_v20  ;;  %v18100_v48 = vadd.f32 %v3449_v17, %v3133_v51  ;;  %v13644_v58 = vpop.f32.mrf.mxu0 }
 0x33d   :  { %13951 = vmatprep.mubr.msk.f32.mxu1 %vm15595_vm3, %v22264_v20  ;;  %v13749_v59 = vpop.f32.mrf.mxu1  ;;  %14040 = vmatpush3.msra.mxu0 %v11373_v57  ;;  %v3588_v58 = vld [vmem:[#allocation3 + $0x56] sm:$0xff] }
 0x33e   :  { %14145 = vmatpush3.msra.mxu1 %v11411_v44  ;;  %v3138_v45 = vpop.f32.mrf.mxu0  ;;  %14041 = vmatprep.subr.mxu0 %v22264_v20 }
 0x33f   :  { %14146 = vmatprep.subr.mxu1 %v22264_v20  ;;  %13847 = vmatmul.mubr.msk.f32.gmra.mxu0 %vm1154_vm1, %v3581_v4  ;;  %v3454_v18 = vpop.f32.mrf.mxu1  ;;  %v3973_v4 = vld [vmem:[#allocation3 + $0x5f] sm:$0xff] }
 0x340   :  { %13952 = vmatmul.mubr.msk.f32.gmra.mxu1 %vm1154_vm1, %v3966_v41  ;;  %13849 = vmatprep.mubr.msk.f32.mxu0 %vm15595_vm3, %v22264_v20  ;;  %v18116_v6 = vadd.f32 %v3454_v18, %v3138_v45  ;;  %v13647_v62 = vpop.f32.mrf.mxu0  ;;  %v3589_v18 = vld [vmem:[#allocation3 + $0x5e] sm:$0xff] }
 0x341   :  { %13954 = vmatprep.mubr.msk.f32.mxu1 %vm15595_vm3, %v22264_v20  ;;  %v13752_v30 = vpop.f32.mrf.mxu1  ;;  %14042 = vmatpush3.msra.mxu0 %v11372_v24  ;;  %v3974_v62 = vld [vmem:[#allocation3 + $0x67] sm:$0xff] }
 0x342   :  { %14147 = vmatpush3.msra.mxu1 %v11410_v53  ;;  %v3143_v15 = vpop.f32.mrf.mxu0  ;;  %14043 = vmatprep.subr.mxu0 %v22264_v20 }
 0x343   :  { %14148 = vmatprep.subr.mxu1 %v22264_v20  ;;  %13850 = vmatmul.mubr.msk.f32.gmra.mxu0 %vm1154_vm1, %v3582_v43  ;;  %v3459_v38 = vpop.f32.mrf.mxu1 }
 0x344   :  { %13955 = vmatmul.mubr.msk.f32.gmra.mxu1 %vm1154_vm1, %v3967_v50  ;;  %13852 = vmatprep.mubr.msk.f32.mxu0 %vm15595_vm3, %v22264_v20  ;;  %v18132_v52 = vadd.f32 %v3459_v38, %v3143_v15  ;;  %v13650_v22 = vpop.f32.mrf.mxu0  ;;  %v3975_v38 = vld [vmem:[#allocation3 + $0x6f] sm:$0xff] }
 0x345   :  { %13957 = vmatprep.mubr.msk.f32.mxu1 %vm15595_vm3, %v22264_v20  ;;  %v13755_v31 = vpop.f32.mrf.mxu1  ;;  %14044 = vmatpush3.msra.mxu0 %v11371_v2 }
 0x346   :  { %14149 = vmatpush3.msra.mxu1 %v11409_v35  ;;  %v3148_v19 = vpop.f32.mrf.mxu0  ;;  %14045 = vmatprep.subr.mxu0 %v22264_v20  ;;  %v3590_v35 = vld [vmem:[#allocation3 + $0x66] sm:$0xff] }
 0x347   :  { %14150 = vmatprep.subr.mxu1 %v22264_v20  ;;  %13853 = vmatmul.mubr.msk.f32.gmra.mxu0 %vm1154_vm1, %v3583_v12  ;;  %v3464_v9 = vpop.f32.mrf.mxu1 }
 0x348   :  { %13958 = vmatmul.mubr.msk.f32.gmra.mxu1 %vm1154_vm1, %v3968_v42  ;;  %13855 = vmatprep.mubr.msk.f32.mxu0 %vm15595_vm3, %v22264_v20  ;;  %v18148_v47 = vadd.f32 %v3464_v9, %v3148_v19  ;;  %v13653_v26 = vpop.f32.mrf.mxu0  ;;  %v3592_v9 = vld [vmem:[#allocation3 + $0x76] sm:$0xff] }
 0x349   :  { %13960 = vmatprep.mubr.msk.f32.mxu1 %vm15595_vm3, %v22264_v20  ;;  %v13758_v54 = vpop.f32.mrf.mxu1  ;;  %14046 = vmatpush3.msra.mxu0 %v11370_v37  ;;  %v3591_v37 = vld [vmem:[#allocation3 + $0x6e] sm:$0xff]  ;;  %v3977_v26 = vld [vmem:[#allocation3 + $0x7f] sm:$0xff] }
 0x34a   :  { %14151 = vmatpush3.msra.mxu1 %v11408_v36  ;;  %v3153_v29 = vpop.f32.mrf.mxu0  ;;  %14245 = vmatprep.subr.mxu0 %v22264_v20  ;;  %v3976_v36 = vld [vmem:[#allocation3 + $0x77] sm:$0xff] }
 0x34b   :  { %14350 = vmatprep.subr.mxu1 %v22264_v20  ;;  %13856 = vmatmul.mubr.msk.f32.gmra.mxu0 %vm1154_vm1, %v3584_v55  ;;  %v3469_v21 = vpop.f32.mrf.mxu1  ;;  %v3593_v54 = vld [vmem:[#allocation3 + $0x7e] sm:$0xff]  ;;  %v3978_v55 = vld [vmem:[#allocation3 + $0x87] sm:$0xff] }
 0x34c   :  { %13961 = vmatmul.mubr.msk.f32.gmra.mxu1 %vm1154_vm1, %v3969_v0  ;;  %13858 = vmatprep.mubr.msk.f32.mxu0 %vm15595_vm3, %v22264_v20  ;;  %v18158_v40 = vadd.f32 %v3469_v21, %v3153_v29  ;;  %v13656_v34 = vpop.f32.mrf.mxu0  ;;  %v3594_v0 = vld [vmem:[#allocation3 + $0x86] sm:$0xff]  ;;  %v3979_v29 = vld [vmem:[#allocation3 + $0x8f] sm:$0xff] }
 0x34d   :  { %13963 = vmatprep.mubr.msk.f32.mxu1 %vm15595_vm3, %v22264_v20  ;;  %v13761_v27 = vpop.f32.mrf.mxu1  ;;  %v3595_v21 = vld [vmem:[#allocation3 + $0x8e] sm:$0xff]  ;;  %v3980_v34 = vld [vmem:[#allocation3 + $0x97] sm:$0xff] }
 0x34e   :  { %v3158_v5 = vpop.f32.mrf.mxu0  ;;  %v3596_v27 = vld [vmem:[#allocation3 + $0x96] sm:$0xff] }
 0x34f   :  { %13859 = vmatmul.mubr.msk.f32.gmra.mxu0 %vm1154_vm1, %v3585_v32  ;;  %v3474_v8 = vpop.f32.mrf.mxu1  ;;  %v3981_v32 = vld [vmem:[#allocation3 + $0x9f] sm:$0xff] }
 0x350   :  { %13964 = vmatmul.mubr.msk.f32.gmra.mxu1 %vm1154_vm1, %v3970_v46  ;;  %13861 = vmatprep.mubr.msk.f32.mxu0 %vm15595_vm3, %v22264_v20  ;;  %v18166_v23 = vadd.f32 %v3474_v8, %v3158_v5  ;;  %v13659_v7 = vpop.f32.mrf.mxu0  ;;  %v3597_v46 = vld [vmem:[#allocation3 + $0x9e] sm:$0xff]  ;;  %v3982_v5 = vld [vmem:[#allocation3 + $0xa7] sm:$0xff] }
 0x351   :  { %13966 = vmatprep.mubr.msk.f32.mxu1 %vm15595_vm3, %v22264_v20  ;;  %v13764_v56 = vpop.f32.mrf.mxu1  ;;  %v3598_v8 = vld [vmem:[#allocation3 + $0xa6] sm:$0xff]  ;;  %v3983_v7 = vld [vmem:[#allocation3 + $0xaf] sm:$0xff] }
 0x352   :  { %v3163_v25 = vpop.f32.mrf.mxu0  ;;  %v3599_v56 = vld [vmem:[#allocation3 + $0xae] sm:$0xff] }
 0x353   :  { %13862 = vmatmul.mubr.msk.f32.gmra.mxu0 %vm1154_vm1, %v3586_v49  ;;  %v3479_v63 = vpop.f32.mrf.mxu1  ;;  %v3984_v49 = vld [vmem:[#allocation3 + $0xb7] sm:$0xff] }
 0x354   :  { %13967 = vmatmul.mubr.msk.f32.gmra.mxu1 %vm1154_vm1, %v3971_v61  ;;  %13864 = vmatprep.mubr.msk.f32.mxu0 %vm15595_vm3, %v22264_v20  ;;  %v18174_v3 = vadd.f32 %v3479_v63, %v3163_v25  ;;  %v13662_v1 = vpop.f32.mrf.mxu0  ;;  %v3600_v61 = vld [vmem:[#allocation3 + $0xb6] sm:$0xff]  ;;  %v3985_v25 = vld [vmem:[#allocation3 + $0xbf] sm:$0xff] }
 0x355   :  { %13969 = vmatprep.mubr.msk.f32.mxu1 %vm15595_vm3, %v22264_v20  ;;  %v13767_v13 = vpop.f32.mrf.mxu1  ;;  %v3601_v63 = vld [vmem:[#allocation3 + $0xbe] sm:$0xff]  ;;  %v3986_v1 = vld [vmem:[#allocation3 + $0xc7] sm:$0xff] }
 0x356   :  { %v3168_v14 = vpop.f32.mrf.mxu0  ;;  %v3602_v13 = vld [vmem:[#allocation3 + $0xc6] sm:$0xff] }
 0x357   :  { %13865 = vmatmul.mubr.msk.f32.gmra.mxu0 %vm1154_vm1, %v3587_v10  ;;  %v3484_v51 = vpop.f32.mrf.mxu1  ;;  %v3987_v10 = vld [vmem:[#allocation3 + $0xcf] sm:$0xff] }
 0x358   :  { %13970 = vmatmul.mubr.msk.f32.gmra.mxu1 %vm1154_vm1, %v3972_v39  ;;  %13867 = vmatprep.mubr.msk.f32.mxu0 %vm15595_vm3, %v22264_v20  ;;  %v18182_v57 = vadd.f32 %v3484_v51, %v3168_v14  ;;  %v13665_v44 = vpop.f32.mrf.mxu0  ;;  %v3603_v39 = vld [vmem:[#allocation3 + $0xce] sm:$0xff]  ;;  %v3988_v14 = vld [vmem:[#allocation3 + $0xd7] sm:$0xff] }
 0x359   :  { %13972 = vmatprep.mubr.msk.f32.mxu1 %vm15595_vm3, %v22264_v20  ;;  %v13770_v17 = vpop.f32.mrf.mxu1  ;;  %v3604_v51 = vld [vmem:[#allocation3 + $0xd6] sm:$0xff]  ;;  %v3989_v44 = vld [vmem:[#allocation3 + $0xdf] sm:$0xff] }
 0x35a   :  { %v3173_v59 = vpop.f32.mrf.mxu0  ;;  %v3605_v17 = vld [vmem:[#allocation3 + $0xde] sm:$0xff] }
 0x35b   :  { %13868 = vmatmul.mubr.msk.f32.gmra.mxu0 %vm1154_vm1, %v3588_v58  ;;  %v3489_v41 = vpop.f32.mrf.mxu1  ;;  %v3990_v58 = vld [vmem:[#allocation3 + $0xe7] sm:$0xff] }
 0x35c   :  { %13973 = vmatmul.mubr.msk.f32.gmra.mxu1 %vm1154_vm1, %v3973_v4  ;;  %13870 = vmatprep.mubr.msk.f32.mxu0 %vm15595_vm3, %v22264_v20  ;;  %v18190_v45 = vadd.f32 %v3489_v41, %v3173_v59  ;;  %v13668_v24 = vpop.f32.mrf.mxu0  ;;  %v3606_v4 = vld [vmem:[#allocation3 + $0xe6] sm:$0xff]  ;;  %v3991_v59 = vld [vmem:[#allocation3 + $0xef] sm:$0xff] }
 0x35d   :  { %13975 = vmatprep.mubr.msk.f32.mxu1 %vm15595_vm3, %v22264_v20  ;;  %v13773_v53 = vpop.f32.mrf.mxu1  ;;  %v3607_v41 = vld [vmem:[#allocation3 + $0xee] sm:$0xff]  ;;  %v3992_v24 = vld [vmem:[#allocation3 + $0xf7] sm:$0xff] }
 0x35e   :  { %v3178_v43 = vpop.f32.mrf.mxu0  ;;  %v3608_v53 = vld [vmem:[#allocation3 + $0xf6] sm:$0x3] }
 0x35f   :  { %13871 = vmatmul.mubr.msk.f32.gmra.mxu0 %vm1154_vm1, %v3589_v18  ;;  %v3494_v30 = vpop.f32.mrf.mxu1  ;;  %v3993_v18 = vld [vmem:[#allocation3 + $0xff] sm:$0x3] }
 0x360   :  { %13976 = vmatmul.mubr.msk.f32.gmra.mxu1 %vm1154_vm1, %v3974_v62  ;;  %13873 = vmatprep.mubr.msk.f32.mxu0 %vm15595_vm3, %v22264_v20  ;;  %v18198_v50 = vadd.f32 %v3494_v30, %v3178_v43  ;;  %v13671_v15 = vpop.f32.mrf.mxu0  ;;  %v4348_v62 = vld [vmem:[#allocation3 + $0x10] sm:$0xff]  ;;  %v11451_v30 = vld [vmem:[%s21926_s4 + $0x148] sm:$0xf] }
 0x361   :  { %13978 = vmatprep.mubr.msk.f32.mxu1 %vm15595_vm3, %v22264_v20  ;;  %v13776_v2 = vpop.f32.mrf.mxu1  ;;  %v4733_v43 = vld [vmem:[#allocation3 + $0x11] sm:$0xff] }
 0x362   :  { %v3183_v22 = vpop.f32.mrf.mxu0  ;;  %v11489_v15 = vld [vmem:[%s21926_s4 + $0x178] sm:$0xf] }
 0x363   :  { %13874 = vmatmul.mubr.msk.f32.gmra.mxu0 %vm1154_vm1, %v3590_v35  ;;  %v3499_v12 = vpop.f32.mrf.mxu1  ;;  %v4349_v2 = vld [vmem:[#allocation3 + $0x18] sm:$0xff] }
 0x364   :  { %13979 = vmatmul.mubr.msk.f32.gmra.mxu1 %vm1154_vm1, %v3975_v38  ;;  %13876 = vmatprep.mubr.msk.f32.mxu0 %vm15595_vm3, %v22264_v20  ;;  %v18206_v31 = vadd.f32 %v3499_v12, %v3183_v22  ;;  %v13674_v42 = vpop.f32.mrf.mxu0  ;;  %v4734_v35 = vld [vmem:[#allocation3 + $0x19] sm:$0xff]  ;;  %v11488_v22 = vld [vmem:[%s21926_s4 + $0x170] sm:$0xff] }
 0x365   :  { %13981 = vmatprep.mubr.msk.f32.mxu1 %vm15595_vm3, %v22264_v20  ;;  %v13779_v19 = vpop.f32.mrf.mxu1  ;;  %v11450_v38 = vld [vmem:[%s21926_s4 + $0x140] sm:$0xff] }
 0x366   :  { %v4350_v12 = vld [vmem:[#allocation3 + $0x20] sm:$0xff]  ;;  %v11449_v19 = vld [vmem:[%s21926_s4 + $0x138] sm:$0xff] }
 0x367   :  { %13877 = vmatmul.mubr.msk.f32.gmra.mxu0 %vm1154_vm1, %v3591_v37  ;;  %v4735_v42 = vld [vmem:[#allocation3 + $0x21] sm:$0xff] }
 0x368   :  { %13982 = vmatmul.mubr.msk.f32.gmra.mxu1 %vm1154_vm1, %v3976_v36  ;;  %13879 = vmatprep.mubr.msk.f32.mxu0 %vm15595_vm3, %v22264_v20  ;;  %v11487_v37 = vld [vmem:[%s21926_s4 + $0x168] sm:$0xff] }
 0x369   :  { %13984 = vmatprep.mubr.msk.f32.mxu1 %vm15595_vm3, %v22264_v20 }
 0x36b   :  { %13880 = vmatmul.mubr.msk.f32.gmra.mxu0 %vm1154_vm1, %v3592_v9 }
 0x36c   :  { %13985 = vmatmul.mubr.msk.f32.gmra.mxu1 %vm1154_vm1, %v3977_v26  ;;  %13882 = vmatprep.mubr.msk.f32.mxu0 %vm15595_vm3, %v22264_v20 }
 0x36d   :  { %13987 = vmatprep.mubr.msk.f32.mxu1 %vm15595_vm3, %v22264_v20 }
 0x36f   :  { %13883 = vmatmul.mubr.msk.f32.gmra.mxu0 %vm1154_vm1, %v3593_v54 }
 0x370   :  { %13988 = vmatmul.mubr.msk.f32.gmra.mxu1 %vm1154_vm1, %v3978_v55  ;;  %13885 = vmatprep.mubr.msk.f32.mxu0 %vm15595_vm3, %v22264_v20 }
 0x371   :  { %13990 = vmatprep.mubr.msk.f32.mxu1 %vm15595_vm3, %v22264_v20 }
 0x373   :  { %13886 = vmatmul.mubr.msk.f32.gmra.mxu0 %vm1154_vm1, %v3594_v0  ;;  %v4351_v0 = vld [vmem:[#allocation3 + $0x28] sm:$0xff] }
 0x374   :  { %13991 = vmatmul.mubr.msk.f32.gmra.mxu1 %vm1154_vm1, %v3979_v29  ;;  %13888 = vmatprep.mubr.msk.f32.mxu0 %vm15595_vm3, %v22264_v20  ;;  %v4736_v29 = vld [vmem:[#allocation3 + $0x29] sm:$0xff] }
 0x375   :  { %13993 = vmatprep.mubr.msk.f32.mxu1 %vm15595_vm3, %v22264_v20 }
 0x377   :  { %13889 = vmatmul.mubr.msk.f32.gmra.mxu0 %vm1154_vm1, %v3595_v21  ;;  %v11448_v21 = vld [vmem:[%s21926_s4 + $0x130] sm:$0xff] }
 0x378   :  { %13994 = vmatmul.mubr.msk.f32.gmra.mxu1 %vm1154_vm1, %v3980_v34  ;;  %13891 = vmatprep.mubr.msk.f32.mxu0 %vm15595_vm3, %v22264_v20  ;;  %v11486_v34 = vld [vmem:[%s21926_s4 + $0x160] sm:$0xff] }
 0x379   :  { %13996 = vmatprep.mubr.msk.f32.mxu1 %vm15595_vm3, %v22264_v20 }
 0x37b   :  { %13892 = vmatmul.mubr.msk.f32.gmra.mxu0 %vm1154_vm1, %v3596_v27 }
 0x37c   :  { %13997 = vmatmul.mubr.msk.f32.gmra.mxu1 %vm1154_vm1, %v3981_v32  ;;  %13894 = vmatprep.mubr.msk.f32.mxu0 %vm15595_vm3, %v22264_v20 }
 0x37d   :  { %13999 = vmatprep.mubr.msk.f32.mxu1 %vm15595_vm3, %v22264_v20 }
 0x37f   :  { %13895 = vmatmul.mubr.msk.f32.gmra.mxu0 %vm1154_vm1, %v3597_v46 }
 0x380   :  { %14000 = vmatmul.mubr.msk.f32.gmra.mxu1 %vm1154_vm1, %v3982_v5  ;;  %13897 = vmatprep.mubr.msk.f32.mxu0 %vm15595_vm3, %v22264_v20 }
 0x381   :  { %14002 = vmatprep.mubr.msk.f32.mxu1 %vm15595_vm3, %v22264_v20 }
 0x383   :  { %13898 = vmatmul.mubr.msk.f32.gmra.mxu0 %vm1154_vm1, %v3598_v8 }
 0x384   :  { %14003 = vmatmul.mubr.msk.f32.gmra.mxu1 %vm1154_vm1, %v3983_v7  ;;  %13900 = vmatprep.mubr.msk.f32.mxu0 %vm15595_vm3, %v22264_v20  ;;  %v4352_v7 = vld [vmem:[#allocation3 + $0x30] sm:$0xff] }
 0x385   :  { %14005 = vmatprep.mubr.msk.f32.mxu1 %vm15595_vm3, %v22264_v20 }
 0x387   :  { %13901 = vmatmul.mubr.msk.f32.gmra.mxu0 %vm1154_vm1, %v3599_v56  ;;  %v4737_v56 = vld [vmem:[#allocation3 + $0x31] sm:$0xff] }
 0x388   :  { %14006 = vmatmul.mubr.msk.f32.gmra.mxu1 %vm1154_vm1, %v3984_v49  ;;  %13903 = vmatprep.mubr.msk.f32.mxu0 %vm15595_vm3, %v22264_v20  ;;  %v11447_v49 = vld [vmem:[%s21926_s4 + $0x128] sm:$0xff] }
 0x389   :  { %14008 = vmatprep.mubr.msk.f32.mxu1 %vm15595_vm3, %v22264_v20 }
 0x38b   :  { %13904 = vmatmul.mubr.msk.f32.gmra.mxu0 %vm1154_vm1, %v3600_v61  ;;  %v11485_v61 = vld [vmem:[%s21926_s4 + $0x158] sm:$0xff] }
 0x38c   :  { %14009 = vmatmul.mubr.msk.f32.gmra.mxu1 %vm1154_vm1, %v3985_v25  ;;  %13906 = vmatprep.mubr.msk.f32.mxu0 %vm15595_vm3, %v22264_v20 }
 0x38d   :  { %14011 = vmatprep.mubr.msk.f32.mxu1 %vm15595_vm3, %v22264_v20 }
 0x38f   :  { %13907 = vmatmul.mubr.msk.f32.gmra.mxu0 %vm1154_vm1, %v3601_v63 }
 0x390   :  { %14012 = vmatmul.mubr.msk.f32.gmra.mxu1 %vm1154_vm1, %v3986_v1  ;;  %13909 = vmatprep.mubr.msk.f32.mxu0 %vm15595_vm3, %v22264_v20 }
 0x391   :  { %14014 = vmatprep.mubr.msk.f32.mxu1 %vm15595_vm3, %v22264_v20 }
 0x393   :  { %13910 = vmatmul.mubr.msk.f32.gmra.mxu0 %vm1154_vm1, %v3602_v13 }
 0x394   :  { %14015 = vmatmul.mubr.msk.f32.gmra.mxu1 %vm1154_vm1, %v3987_v10  ;;  %13912 = vmatprep.mubr.msk.f32.mxu0 %vm15595_vm3, %v22264_v20 }
 0x395   :  { %14017 = vmatprep.mubr.msk.f32.mxu1 %vm15595_vm3, %v22264_v20 }
 0x397   :  { %13913 = vmatmul.mubr.msk.f32.gmra.mxu0 %vm1154_vm1, %v3603_v39  ;;  %v4353_v39 = vld [vmem:[#allocation3 + $0x38] sm:$0xff] }
 0x398   :  { %14018 = vmatmul.mubr.msk.f32.gmra.mxu1 %vm1154_vm1, %v3988_v14  ;;  %13915 = vmatprep.mubr.msk.f32.mxu0 %vm15595_vm3, %v22264_v20  ;;  %v4738_v14 = vld [vmem:[#allocation3 + $0x39] sm:$0xff] }
 0x399   :  { %14020 = vmatprep.mubr.msk.f32.mxu1 %vm15595_vm3, %v22264_v20 }
 0x39b   :  { %13916 = vmatmul.mubr.msk.f32.gmra.mxu0 %vm1154_vm1, %v3604_v51  ;;  %v11446_v51 = vld [vmem:[%s21926_s4 + $0x120] sm:$0xff] }
 0x39c   :  { %14021 = vmatmul.mubr.msk.f32.gmra.mxu1 %vm1154_vm1, %v3989_v44  ;;  %13918 = vmatprep.mubr.msk.f32.mxu0 %vm15595_vm3, %v22264_v20  ;;  %v11484_v44 = vld [vmem:[%s21926_s4 + $0x150] sm:$0xff] }
 0x39d   :  { %14023 = vmatprep.mubr.msk.f32.mxu1 %vm15595_vm3, %v22264_v20 }
 0x39f   :  { %13919 = vmatmul.mubr.msk.f32.gmra.mxu0 %vm1154_vm1, %v3605_v17 }
 0x3a0   :  { %14024 = vmatmul.mubr.msk.f32.gmra.mxu1 %vm1154_vm1, %v3990_v58  ;;  %13921 = vmatprep.mubr.msk.f32.mxu0 %vm15595_vm3, %v22264_v20 }
 0x3a1   :  { %14026 = vmatprep.mubr.msk.f32.mxu1 %vm15595_vm3, %v22264_v20 }
 0x3a3   :  { %13922 = vmatmul.mubr.msk.f32.gmra.mxu0 %vm1154_vm1, %v3606_v4 }
 0x3a4   :  { %14027 = vmatmul.mubr.msk.f32.gmra.mxu1 %vm1154_vm1, %v3991_v59  ;;  %13924 = vmatprep.mubr.msk.f32.mxu0 %vm15595_vm3, %v22264_v20 }
 0x3a5   :  { %14029 = vmatprep.mubr.msk.f32.mxu1 %vm15595_vm3, %v22264_v20 }
 0x3a7   :  { %13925 = vmatmul.mubr.msk.f32.gmra.mxu0 %vm1154_vm1, %v3607_v41 }
 0x3a8   :  { %14030 = vmatmul.mubr.msk.f32.gmra.mxu1 %vm1154_vm1, %v3992_v24  ;;  %13927 = vmatprep.mubr.msk.f32.mxu0 %vm15595_vm3, %v22264_v20  ;;  %v4354_v24 = vld [vmem:[#allocation3 + $0x40] sm:$0xff] }
 0x3a9   :  { %14032 = vmatprep.mubr.msk.f32.mxu1 %vm15595_vm3, %v22264_v20 }
 0x3ab   :  { %13928 = vmatmul.mubr.msk.f32.gmra.mxu0 %vm1154_vm1, %v3608_v53  ;;  %v4739_v53 = vld [vmem:[#allocation3 + $0x41] sm:$0xff] }
 0x3ac   :  { %14033 = vmatmul.mubr.msk.f32.gmra.mxu1 %vm1154_vm1, %v3993_v18  ;;  %14047 = vmatprep.mubr.msk.f32.mxu0 %vm15595_vm3, %v22264_v20 }
 0x3ad   :  { %14152 = vmatprep.mubr.msk.f32.mxu1 %vm15595_vm3, %v22264_v20 }
 0x3af   :  { %14048 = vmatmul.mubr.msk.f32.vlgmr.msra.gmra.mxu0 %vm1154_vm1, %v4348_v62 }
 0x3b0   :  { %14153 = vmatmul.mubr.msk.f32.vlgmr.msra.gmra.mxu1 %vm1154_vm1, %v4733_v43  ;;  %14050 = vmatprep.mubr.msk.f32.mxu0 %vm15595_vm3, %v22264_v20 }
 0x3b1   :  { %14155 = vmatprep.mubr.msk.f32.mxu1 %vm15595_vm3, %v22264_v20  ;;  %14246 = vmatpush3.msk.msra.mxu0 %vm3038_vm2, %v11451_v30 }
 0x3b2   :  { %14351 = vmatpush3.msk.msra.mxu1 %vm3038_vm2, %v11489_v15  ;;  %14247 = vmatprep.subr.mxu0 %v22264_v20 }
 0x3b3   :  { %14352 = vmatprep.subr.mxu1 %v22264_v20  ;;  %14051 = vmatmul.mubr.msk.f32.gmra.mxu0 %vm1154_vm1, %v4349_v2  ;;  %v4355_v2 = vld [vmem:[#allocation3 + $0x48] sm:$0xff] }
 0x3b4   :  { %14156 = vmatmul.mubr.msk.f32.gmra.mxu1 %vm1154_vm1, %v4734_v35  ;;  %14053 = vmatprep.mubr.msk.f32.mxu0 %vm15595_vm3, %v22264_v20  ;;  %v4740_v35 = vld [vmem:[#allocation3 + $0x49] sm:$0xff] }
 0x3b5   :  { %14158 = vmatprep.mubr.msk.f32.mxu1 %vm15595_vm3, %v22264_v20  ;;  %14248 = vmatpush3.msra.mxu0 %v11450_v38 }
 0x3b6   :  { %14353 = vmatpush3.msra.mxu1 %v11488_v22  ;;  %14249 = vmatprep.subr.mxu0 %v22264_v20 }
 0x3b7   :  { %14354 = vmatprep.subr.mxu1 %v22264_v20  ;;  %v3188_v36 = vpop.f32.mrf.mxu0  ;;  %14054 = vmatmul.mubr.msk.f32.gmra.mxu0 %vm1154_vm1, %v4350_v12 }
 0x3b8   :  { %v3504_v9 = vpop.f32.mrf.mxu1  ;;  %14159 = vmatmul.mubr.msk.f32.gmra.mxu1 %vm1154_vm1, %v4735_v42  ;;  %14056 = vmatprep.mubr.msk.f32.mxu0 %vm15595_vm3, %v22264_v20 }
 0x3b9   :  { %v18354_v26 = vadd.f32 %v3504_v9, %v3188_v36  ;;  %14161 = vmatprep.mubr.msk.f32.mxu1 %vm15595_vm3, %v22264_v20  ;;  %v13677_v54 = vpop.f32.mrf.mxu0  ;;  %14250 = vmatpush3.msra.mxu0 %v11449_v19  ;;  %v4741_v36 = vld [vmem:[#allocation3 + $0x51] sm:$0xff] }
 0x3ba   :  { %v13782_v55 = vpop.f32.mrf.mxu1  ;;  %14355 = vmatpush3.msra.mxu1 %v11487_v37  ;;  %14251 = vmatprep.subr.mxu0 %v22264_v20  ;;  %v4356_v37 = vld [vmem:[#allocation3 + $0x50] sm:$0xff] }
 0x3bb   :  { %14356 = vmatprep.subr.mxu1 %v22264_v20  ;;  %v3193_v27 = vpop.f32.mrf.mxu0  ;;  %14057 = vmatmul.mubr.msk.f32.gmra.mxu0 %vm1154_vm1, %v4351_v0 }
 0x3bc   :  { %v3509_v32 = vpop.f32.mrf.mxu1  ;;  %14162 = vmatmul.mubr.msk.f32.gmra.mxu1 %vm1154_vm1, %v4736_v29  ;;  %14059 = vmatprep.mubr.msk.f32.mxu0 %vm15595_vm3, %v22264_v20 }
 0x3bd   :  { %v18370_v46 = vadd.f32 %v3509_v32, %v3193_v27  ;;  %14164 = vmatprep.mubr.msk.f32.mxu1 %vm15595_vm3, %v22264_v20  ;;  %v13680_v5 = vpop.f32.mrf.mxu0  ;;  %14252 = vmatpush3.msra.mxu0 %v11448_v21  ;;  %v4357_v21 = vld [vmem:[#allocation3 + $0x58] sm:$0xff] }
 0x3be   :  { %v13785_v8 = vpop.f32.mrf.mxu1  ;;  %14357 = vmatpush3.msra.mxu1 %v11486_v34  ;;  %14253 = vmatprep.subr.mxu0 %v22264_v20  ;;  %v4742_v34 = vld [vmem:[#allocation3 + $0x59] sm:$0xff] }
 0x3bf   :  { %14358 = vmatprep.subr.mxu1 %v22264_v20  ;;  %v3198_v25 = vpop.f32.mrf.mxu0  ;;  %14060 = vmatmul.mubr.msk.f32.gmra.mxu0 %vm1154_vm1, %v4352_v7 }
 0x3c0   :  { %v3514_v63 = vpop.f32.mrf.mxu1  ;;  %14165 = vmatmul.mubr.msk.f32.gmra.mxu1 %vm1154_vm1, %v4737_v56  ;;  %14062 = vmatprep.mubr.msk.f32.mxu0 %vm15595_vm3, %v22264_v20  ;;  %v4358_v56 = vld [vmem:[#allocation3 + $0x60] sm:$0xff] }
 0x3c1   :  { %v18386_v1 = vadd.f32 %v3514_v63, %v3198_v25  ;;  %14167 = vmatprep.mubr.msk.f32.mxu1 %vm15595_vm3, %v22264_v20  ;;  %v13683_v13 = vpop.f32.mrf.mxu0  ;;  %14254 = vmatpush3.msra.mxu0 %v11447_v49  ;;  %v4743_v49 = vld [vmem:[#allocation3 + $0x61] sm:$0xff] }
 0x3c2   :  { %v13788_v10 = vpop.f32.mrf.mxu1  ;;  %14359 = vmatpush3.msra.mxu1 %v11485_v61  ;;  %14255 = vmatprep.subr.mxu0 %v22264_v20 }
 0x3c3   :  { %14360 = vmatprep.subr.mxu1 %v22264_v20  ;;  %v3203_v17 = vpop.f32.mrf.mxu0  ;;  %14063 = vmatmul.mubr.msk.f32.gmra.mxu0 %vm1154_vm1, %v4353_v39  ;;  %v4359_v39 = vld [vmem:[#allocation3 + $0x68] sm:$0xff] }
 0x3c4   :  { %v3519_v58 = vpop.f32.mrf.mxu1  ;;  %14168 = vmatmul.mubr.msk.f32.gmra.mxu1 %vm1154_vm1, %v4738_v14  ;;  %14065 = vmatprep.mubr.msk.f32.mxu0 %vm15595_vm3, %v22264_v20  ;;  %v4744_v14 = vld [vmem:[#allocation3 + $0x69] sm:$0xff] }
 0x3c5   :  { %v18402_v4 = vadd.f32 %v3519_v58, %v3203_v17  ;;  %14170 = vmatprep.mubr.msk.f32.mxu1 %vm15595_vm3, %v22264_v20  ;;  %v13686_v59 = vpop.f32.mrf.mxu0  ;;  %14256 = vmatpush3.msra.mxu0 %v11446_v51 }
 0x3c6   :  { %v13791_v41 = vpop.f32.mrf.mxu1  ;;  %14361 = vmatpush3.msra.mxu1 %v11484_v44  ;;  %14455 = vmatprep.subr.mxu0 %v22264_v20 }
 0x3c7   :  { %14560 = vmatprep.subr.mxu1 %v22264_v20  ;;  %v3208_v18 = vpop.f32.mrf.mxu0  ;;  %14066 = vmatmul.mubr.msk.f32.gmra.mxu0 %vm1154_vm1, %v4354_v24  ;;  %v4360_v41 = vld [vmem:[#allocation3 + $0x70] sm:$0xff] }
 0x3c8   :  { %v3524_v62 = vpop.f32.mrf.mxu1  ;;  %14171 = vmatmul.mubr.msk.f32.gmra.mxu1 %vm1154_vm1, %v4739_v53  ;;  %14068 = vmatprep.mubr.msk.f32.mxu0 %vm15595_vm3, %v22264_v20  ;;  %v4745_v24 = vld [vmem:[#allocation3 + $0x71] sm:$0xff] }
 0x3c9   :  { %v18412_v43 = vadd.f32 %v3524_v62, %v3208_v18  ;;  %14173 = vmatprep.mubr.msk.f32.mxu1 %vm15595_vm3, %v22264_v20  ;;  %v13689_v30 = vpop.f32.mrf.mxu0 }
 0x3ca   :  { %v13794_v15 = vpop.f32.mrf.mxu1 }
 0x3cb   :  { %v3213_v38 = vpop.f32.mrf.mxu0  ;;  %14069 = vmatmul.mubr.msk.f32.gmra.mxu0 %vm1154_vm1, %v4355_v2  ;;  %v4361_v2 = vld [vmem:[#allocation3 + $0x78] sm:$0xff] }
 0x3cc   :  { %v3529_v22 = vpop.f32.mrf.mxu1  ;;  %14174 = vmatmul.mubr.msk.f32.gmra.mxu1 %vm1154_vm1, %v4740_v35  ;;  %14071 = vmatprep.mubr.msk.f32.mxu0 %vm15595_vm3, %v22264_v20  ;;  %v4746_v35 = vld [vmem:[#allocation3 + $0x79] sm:$0xff] }
 0x3cd   :  { %v18420_v12 = vadd.f32 %v3529_v22, %v3213_v38  ;;  %14176 = vmatprep.mubr.msk.f32.mxu1 %vm15595_vm3, %v22264_v20  ;;  %v13692_v42 = vpop.f32.mrf.mxu0 }
 0x3ce   :  { %v13797_v19 = vpop.f32.mrf.mxu1 }
 0x3cf   :  { %v3218_v9 = vpop.f32.mrf.mxu0  ;;  %14072 = vmatmul.mubr.msk.f32.gmra.mxu0 %vm1154_vm1, %v4356_v37 }
 0x3d0   :  { %v3534_v54 = vpop.f32.mrf.mxu1  ;;  %14177 = vmatmul.mubr.msk.f32.gmra.mxu1 %vm1154_vm1, %v4741_v36  ;;  %14074 = vmatprep.mubr.msk.f32.mxu0 %vm15595_vm3, %v22264_v20  ;;  %v4362_v36 = vld [vmem:[#allocation3 + $0x80] sm:$0xff] }
 0x3d1   :  { %v18428_v55 = vadd.f32 %v3534_v54, %v3218_v9  ;;  %14179 = vmatprep.mubr.msk.f32.mxu1 %vm15595_vm3, %v22264_v20  ;;  %v13695_v0 = vpop.f32.mrf.mxu0  ;;  %v4747_v9 = vld [vmem:[#allocation3 + $0x81] sm:$0xff] }
 0x3d2   :  { %v13800_v29 = vpop.f32.mrf.mxu1 }
 0x3d3   :  { %v3223_v27 = vpop.f32.mrf.mxu0  ;;  %14075 = vmatmul.mubr.msk.f32.gmra.mxu0 %vm1154_vm1, %v4357_v21 }
 0x3d4   :  { %v3539_v32 = vpop.f32.mrf.mxu1  ;;  %14180 = vmatmul.mubr.msk.f32.gmra.mxu1 %vm1154_vm1, %v4742_v34  ;;  %14077 = vmatprep.mubr.msk.f32.mxu0 %vm15595_vm3, %v22264_v20 }
 0x3d5   :  { %v18436_v5 = vadd.f32 %v3539_v32, %v3223_v27  ;;  %14182 = vmatprep.mubr.msk.f32.mxu1 %vm15595_vm3, %v22264_v20  ;;  %v13698_v8 = vpop.f32.mrf.mxu0  ;;  %v4363_v27 = vld [vmem:[#allocation3 + $0x88] sm:$0xff] }
 0x3d6   :  { %v13803_v7 = vpop.f32.mrf.mxu1  ;;  %v4748_v32 = vld [vmem:[#allocation3 + $0x89] sm:$0xff] }
 0x3d7   :  { %v3228_v61 = vpop.f32.mrf.mxu0  ;;  %14078 = vmatmul.mubr.msk.f32.gmra.mxu0 %vm1154_vm1, %v4358_v56 }
 0x3d8   :  { %v3544_v25 = vpop.f32.mrf.mxu1  ;;  %14183 = vmatmul.mubr.msk.f32.gmra.mxu1 %vm1154_vm1, %v4743_v49  ;;  %14080 = vmatprep.mubr.msk.f32.mxu0 %vm15595_vm3, %v22264_v20 }
 0x3d9   :  { %v18444_v63 = vadd.f32 %v3544_v25, %v3228_v61  ;;  %14185 = vmatprep.mubr.msk.f32.mxu1 %vm15595_vm3, %v22264_v20  ;;  %v13701_v13 = vpop.f32.mrf.mxu0  ;;  %v4364_v25 = vld [vmem:[#allocation3 + $0x90] sm:$0xff] }
 0x3da   :  { %v13806_v10 = vpop.f32.mrf.mxu1  ;;  %v4749_v13 = vld [vmem:[#allocation3 + $0x91] sm:$0xff] }
 0x3db   :  { %v3233_v51 = vpop.f32.mrf.mxu0  ;;  %14081 = vmatmul.mubr.msk.f32.gmra.mxu0 %vm1154_vm1, %v4359_v39 }
 0x3dc   :  { %v3549_v44 = vpop.f32.mrf.mxu1  ;;  %14186 = vmatmul.mubr.msk.f32.gmra.mxu1 %vm1154_vm1, %v4744_v14  ;;  %14083 = vmatprep.mubr.msk.f32.mxu0 %vm15595_vm3, %v22264_v20 }
 0x3dd   :  { %v18452_v17 = vadd.f32 %v3549_v44, %v3233_v51  ;;  %14188 = vmatprep.mubr.msk.f32.mxu1 %vm15595_vm3, %v22264_v20  ;;  %v13704_v58 = vpop.f32.mrf.mxu0 }
 0x3de   :  { %v13809_v59 = vpop.f32.mrf.mxu1  ;;  %v4365_v58 = vld [vmem:[#allocation3 + $0x98] sm:$0xff] }
 0x3df   :  { %v3238_v53 = vpop.f32.mrf.mxu0  ;;  %14084 = vmatmul.mubr.msk.f32.gmra.mxu0 %vm1154_vm1, %v4360_v41  ;;  %v4750_v59 = vld [vmem:[#allocation3 + $0x99] sm:$0xff] }
 0x3e0   :  { %v3554_v18 = vpop.f32.mrf.mxu1  ;;  %14189 = vmatmul.mubr.msk.f32.gmra.mxu1 %vm1154_vm1, %v4745_v24  ;;  %14086 = vmatprep.mubr.msk.f32.mxu0 %vm15595_vm3, %v22264_v20 }
 0x3e1   :  { %v18460_v62 = vadd.f32 %v3554_v18, %v3238_v53  ;;  %14191 = vmatprep.mubr.msk.f32.mxu1 %vm15595_vm3, %v22264_v20  ;;  %v13707_v30 = vpop.f32.mrf.mxu0 }
 0x3e2   :  { %v13812_v15 = vpop.f32.mrf.mxu1 }
 0x3e3   :  { %v3243_v38 = vpop.f32.mrf.mxu0  ;;  %14087 = vmatmul.mubr.msk.f32.gmra.mxu0 %vm1154_vm1, %v4361_v2  ;;  %v4366_v2 = vld [vmem:[#allocation3 + $0xa0] sm:$0xff] }
 0x3e4   :  { %v3559_v22 = vpop.f32.mrf.mxu1  ;;  %14192 = vmatmul.mubr.msk.f32.gmra.mxu1 %vm1154_vm1, %v4746_v35  ;;  %14089 = vmatprep.mubr.msk.f32.mxu0 %vm15595_vm3, %v22264_v20  ;;  %v4751_v35 = vld [vmem:[#allocation3 + $0xa1] sm:$0xff] }
 0x3e5   :  { %v18468_v42 = vadd.f32 %v3559_v22, %v3243_v38  ;;  %14194 = vmatprep.mubr.msk.f32.mxu1 %vm15595_vm3, %v22264_v20  ;;  %v13710_v19 = vpop.f32.mrf.mxu0 }
 0x3e6   :  { %v13815_v37 = vpop.f32.mrf.mxu1 }
 0x3e7   :  { %v3248_v54 = vpop.f32.mrf.mxu0  ;;  %14090 = vmatmul.mubr.msk.f32.gmra.mxu0 %vm1154_vm1, %v4362_v36 }
 0x3e8   :  { %v3564_v0 = vpop.f32.mrf.mxu1  ;;  %14195 = vmatmul.mubr.msk.f32.gmra.mxu1 %vm1154_vm1, %v4747_v9  ;;  %14092 = vmatprep.mubr.msk.f32.mxu0 %vm15595_vm3, %v22264_v20  ;;  %v4367_v9 = vld [vmem:[#allocation3 + $0xa8] sm:$0xff] }
 0x3e9   :  { %v18476_v29 = vadd.f32 %v3564_v0, %v3248_v54  ;;  %14197 = vmatprep.mubr.msk.f32.mxu1 %vm15595_vm3, %v22264_v20  ;;  %v13713_v21 = vpop.f32.mrf.mxu0  ;;  %v4752_v54 = vld [vmem:[#allocation3 + $0xa9] sm:$0xff] }
 0x3ea   :  { %v13818_v34 = vpop.f32.mrf.mxu1 }
 0x3eb   :  { %v3253_v8 = vpop.f32.mrf.mxu0  ;;  %14093 = vmatmul.mubr.msk.f32.gmra.mxu0 %vm1154_vm1, %v4363_v27 }
 0x3ec   :  { %v3569_v7 = vpop.f32.mrf.mxu1  ;;  %14198 = vmatmul.mubr.msk.f32.gmra.mxu1 %vm1154_vm1, %v4748_v32  ;;  %14095 = vmatprep.mubr.msk.f32.mxu0 %vm15595_vm3, %v22264_v20 }
 0x3ed   :  { %v18484_v56 = vadd.f32 %v3569_v7, %v3253_v8  ;;  %14200 = vmatprep.mubr.msk.f32.mxu1 %vm15595_vm3, %v22264_v20  ;;  %v13716_v49 = vpop.f32.mrf.mxu0  ;;  %v4368_v8 = vld [vmem:[#allocation3 + $0xb0] sm:$0xff] }
 0x3ee   :  { %v13821_v61 = vpop.f32.mrf.mxu1  ;;  %v4753_v7 = vld [vmem:[#allocation3 + $0xb1] sm:$0xff] }
 0x3ef   :  { %v3258_v10 = vpop.f32.mrf.mxu0  ;;  %14096 = vmatmul.mubr.msk.f32.gmra.mxu0 %vm1154_vm1, %v4364_v25 }
 0x3f0   :  { %v3574_v39 = vpop.f32.mrf.mxu1  ;;  %14201 = vmatmul.mubr.msk.f32.gmra.mxu1 %vm1154_vm1, %v4749_v13  ;;  %14098 = vmatprep.mubr.msk.f32.mxu0 %vm15595_vm3, %v22264_v20 }
 0x3f1   :  { %v18492_v14 = vadd.f32 %v3574_v39, %v3258_v10  ;;  %14203 = vmatprep.mubr.msk.f32.mxu1 %vm15595_vm3, %v22264_v20  ;;  %v13719_v51 = vpop.f32.mrf.mxu0  ;;  %v4369_v39 = vld [vmem:[#allocation3 + $0xb8] sm:$0xff] }
 0x3f2   :  { %v13824_v44 = vpop.f32.mrf.mxu1  ;;  %v4754_v51 = vld [vmem:[#allocation3 + $0xb9] sm:$0xff] }
 0x3f3   :  { %v3778_v41 = vpop.f32.mrf.mxu0  ;;  %14099 = vmatmul.mubr.msk.f32.gmra.mxu0 %vm1154_vm1, %v4365_v58 }
 0x3f4   :  { %v4163_v24 = vpop.f32.mrf.mxu1  ;;  %14204 = vmatmul.mubr.msk.f32.gmra.mxu1 %vm1154_vm1, %v4750_v59  ;;  %v3932_v53 = vadd.f32 %v3778_v41, %v18035_v11  ;;  %14101 = vmatprep.mubr.msk.f32.mxu0 %vm15595_vm3, %v22264_v20 }
 0x3f5   :  { %14206 = vmatprep.mubr.msk.f32.mxu1 %vm15595_vm3, %v22264_v20  ;;  %v13839_v18 = vpop.f32.mrf.mxu0 }
 0x3f6   :  { %v13944_v30 = vpop.f32.mrf.mxu1  ;;  %v18505_v15 = vadd.f32 %v4163_v24, %v3932_v53  ;;  %v4370_v53 = vld [vmem:[#allocation3 + $0xc0] sm:$0xff] }
 0x3f7   :  { %v3783_v38 = vpop.f32.mrf.mxu0  ;;  %14102 = vmatmul.mubr.msk.f32.gmra.mxu0 %vm1154_vm1, %v4366_v2  ;;  %v4755_v18 = vld [vmem:[#allocation3 + $0xc1] sm:$0xff] }
 0x3f8   :  { %v4168_v22 = vpop.f32.mrf.mxu1  ;;  %14207 = vmatmul.mubr.msk.f32.gmra.mxu1 %vm1154_vm1, %v4751_v35  ;;  %v3933_v11 = vadd.f32 %v3783_v38, %v18044_v33  ;;  %14104 = vmatprep.mubr.msk.f32.mxu0 %vm15595_vm3, %v22264_v20 }
 0x3f9   :  { %14209 = vmatprep.mubr.msk.f32.mxu1 %vm15595_vm3, %v22264_v20  ;;  %v13842_v19 = vpop.f32.mrf.mxu0 }
 0x3fa   :  { %v13947_v37 = vpop.f32.mrf.mxu1  ;;  %v18514_v36 = vadd.f32 %v4168_v22, %v3933_v11  ;;  %v4371_v11 = vld [vmem:[#allocation3 + $0xc8] sm:$0xff] }
 0x3fb   :  { %v3788_v0 = vpop.f32.mrf.mxu0  ;;  %14105 = vmatmul.mubr.msk.f32.gmra.mxu0 %vm1154_vm1, %v4367_v9  ;;  %v4756_v19 = vld [vmem:[#allocation3 + $0xc9] sm:$0xff] }
 0x3fc   :  { %v4173_v21 = vpop.f32.mrf.mxu1  ;;  %14210 = vmatmul.mubr.msk.f32.gmra.mxu1 %vm1154_vm1, %v4752_v54  ;;  %v3934_v33 = vadd.f32 %v3788_v0, %v18052_v28  ;;  %14107 = vmatprep.mubr.msk.f32.mxu0 %vm15595_vm3, %v22264_v20 }
 0x3fd   :  { %14212 = vmatprep.mubr.msk.f32.mxu1 %vm15595_vm3, %v22264_v20  ;;  %v13845_v34 = vpop.f32.mrf.mxu0 }
 0x3fe   :  { %v13950_v27 = vpop.f32.mrf.mxu1  ;;  %v18523_v32 = vadd.f32 %v4173_v21, %v3934_v33  ;;  %v4372_v33 = vld [vmem:[#allocation3 + $0xd0] sm:$0xff] }
 0x3ff   :  { %v3793_v49 = vpop.f32.mrf.mxu0  ;;  %14108 = vmatmul.mubr.msk.f32.gmra.mxu0 %vm1154_vm1, %v4368_v8  ;;  %v4757_v34 = vld [vmem:[#allocation3 + $0xd1] sm:$0xff] }
 0x400   :  { %v4178_v61 = vpop.f32.mrf.mxu1  ;;  %14213 = vmatmul.mubr.msk.f32.gmra.mxu1 %vm1154_vm1, %v4753_v7  ;;  %v3935_v28 = vadd.f32 %v3793_v49, %v18066_v16  ;;  %14110 = vmatprep.mubr.msk.f32.mxu0 %vm15595_vm3, %v22264_v20 }
 0x401   :  { %14215 = vmatprep.mubr.msk.f32.mxu1 %vm15595_vm3, %v22264_v20  ;;  %v13848_v25 = vpop.f32.mrf.mxu0 }
 0x402   :  { %v13953_v13 = vpop.f32.mrf.mxu1  ;;  %v18532_v10 = vadd.f32 %v4178_v61, %v3935_v28  ;;  %v4373_v28 = vld [vmem:[#allocation3 + $0xd8] sm:$0xff] }
 0x403   :  { %v3798_v44 = vpop.f32.mrf.mxu0  ;;  %14111 = vmatmul.mubr.msk.f32.gmra.mxu0 %vm1154_vm1, %v4369_v39  ;;  %v4758_v25 = vld [vmem:[#allocation3 + $0xd9] sm:$0xff] }
 0x404   :  { %v4183_v58 = vpop.f32.mrf.mxu1  ;;  %14216 = vmatmul.mubr.msk.f32.gmra.mxu1 %vm1154_vm1, %v4754_v51  ;;  %v3936_v16 = vadd.f32 %v3798_v44, %v18084_v60  ;;  %14113 = vmatprep.mubr.msk.f32.mxu0 %vm15595_vm3, %v22264_v20 }
 0x405   :  { %14218 = vmatprep.mubr.msk.f32.mxu1 %vm15595_vm3, %v22264_v20  ;;  %v13851_v59 = vpop.f32.mrf.mxu0 }
 0x406   :  { %v13956_v41 = vpop.f32.mrf.mxu1  ;;  %v18541_v24 = vadd.f32 %v4183_v58, %v3936_v16  ;;  %v4374_v16 = vld [vmem:[#allocation3 + $0xe0] sm:$0xff] }
 0x407   :  { %v3803_v30 = vpop.f32.mrf.mxu0  ;;  %14114 = vmatmul.mubr.msk.f32.gmra.mxu0 %vm1154_vm1, %v4370_v53  ;;  %v4759_v59 = vld [vmem:[#allocation3 + $0xe1] sm:$0xff] }
 0x408   :  { %v4188_v2 = vpop.f32.mrf.mxu1  ;;  %14219 = vmatmul.mubr.msk.f32.gmra.mxu1 %vm1154_vm1, %v4755_v18  ;;  %v3937_v60 = vadd.f32 %v3803_v30, %v18100_v48  ;;  %14116 = vmatprep.mubr.msk.f32.mxu0 %vm15595_vm3, %v22264_v20 }
 0x409   :  { %14221 = vmatprep.mubr.msk.f32.mxu1 %vm15595_vm3, %v22264_v20  ;;  %v13854_v35 = vpop.f32.mrf.mxu0 }
 0x40a   :  { %v13959_v38 = vpop.f32.mrf.mxu1  ;;  %v18550_v22 = vadd.f32 %v4188_v2, %v3937_v60  ;;  %v4375_v60 = vld [vmem:[#allocation3 + $0xe8] sm:$0xff] }
 0x40b   :  { %v3808_v37 = vpop.f32.mrf.mxu0  ;;  %14117 = vmatmul.mubr.msk.f32.gmra.mxu0 %vm1154_vm1, %v4371_v11  ;;  %v4760_v35 = vld [vmem:[#allocation3 + $0xe9] sm:$0xff] }
 0x40c   :  { %v4193_v9 = vpop.f32.mrf.mxu1  ;;  %14222 = vmatmul.mubr.msk.f32.gmra.mxu1 %vm1154_vm1, %v4756_v19  ;;  %v3938_v48 = vadd.f32 %v3808_v37, %v18116_v6  ;;  %14119 = vmatprep.mubr.msk.f32.mxu0 %vm15595_vm3, %v22264_v20 }
 0x40d   :  { %14224 = vmatprep.mubr.msk.f32.mxu1 %vm15595_vm3, %v22264_v20  ;;  %v13857_v54 = vpop.f32.mrf.mxu0 }
 0x40e   :  { %v13962_v0 = vpop.f32.mrf.mxu1  ;;  %v18559_v21 = vadd.f32 %v4193_v9, %v3938_v48  ;;  %v4376_v48 = vld [vmem:[#allocation3 + $0xf0] sm:$0xff] }
 0x40f   :  { %v3813_v27 = vpop.f32.mrf.mxu0  ;;  %14120 = vmatmul.mubr.msk.f32.gmra.mxu0 %vm1154_vm1, %v4372_v33  ;;  %v4761_v54 = vld [vmem:[#allocation3 + $0xf1] sm:$0xff] }
 0x410   :  { %v4198_v8 = vpop.f32.mrf.mxu1  ;;  %14225 = vmatmul.mubr.msk.f32.gmra.mxu1 %vm1154_vm1, %v4757_v34  ;;  %v3939_v6 = vadd.f32 %v3813_v27, %v18132_v52  ;;  %14122 = vmatprep.mubr.msk.f32.mxu0 %vm15595_vm3, %v22264_v20 }
 0x411   :  { %14227 = vmatprep.mubr.msk.f32.mxu1 %vm15595_vm3, %v22264_v20  ;;  %v13860_v7 = vpop.f32.mrf.mxu0 }
 0x412   :  { %v13965_v49 = vpop.f32.mrf.mxu1  ;;  %v18568_v61 = vadd.f32 %v4198_v8, %v3939_v6  ;;  %v4377_v6 = vld [vmem:[#allocation3 + $0xf8] sm:$0xff] }
 0x413   :  { %v3818_v13 = vpop.f32.mrf.mxu0  ;;  %14123 = vmatmul.mubr.msk.f32.gmra.mxu0 %vm1154_vm1, %v4373_v28  ;;  %v4762_v7 = vld [vmem:[#allocation3 + $0xf9] sm:$0xff] }
 0x414   :  { %v4203_v39 = vpop.f32.mrf.mxu1  ;;  %14228 = vmatmul.mubr.msk.f32.gmra.mxu1 %vm1154_vm1, %v4758_v25  ;;  %v3940_v52 = vadd.f32 %v3818_v13, %v18148_v47  ;;  %14125 = vmatprep.mubr.msk.f32.mxu0 %vm15595_vm3, %v22264_v20 }
 0x415   :  { %14230 = vmatprep.mubr.msk.f32.mxu1 %vm15595_vm3, %v22264_v20  ;;  %v13863_v51 = vpop.f32.mrf.mxu0 }
 0x416   :  { %v13968_v44 = vpop.f32.mrf.mxu1  ;;  %v18577_v58 = vadd.f32 %v4203_v39, %v3940_v52  ;;  %v4378_v52 = vld [vmem:[#allocation3 + $0x100] sm:$0x3] }
 0x417   :  { %v3823_v41 = vpop.f32.mrf.mxu0  ;;  %14126 = vmatmul.mubr.msk.f32.gmra.mxu0 %vm1154_vm1, %v4374_v16  ;;  %v4763_v51 = vld [vmem:[#allocation3 + $0x101] sm:$0x3] }
 0x418   :  { %v4208_v53 = vpop.f32.mrf.mxu1  ;;  %14231 = vmatmul.mubr.msk.f32.gmra.mxu1 %vm1154_vm1, %v4759_v59  ;;  %v3941_v47 = vadd.f32 %v3823_v41, %v18158_v40  ;;  %14128 = vmatprep.mubr.msk.f32.mxu0 %vm15595_vm3, %v22264_v20 }
 0x419   :  { %14233 = vmatprep.mubr.msk.f32.mxu1 %vm15595_vm3, %v22264_v20  ;;  %v13866_v18 = vpop.f32.mrf.mxu0 }
 0x41a   :  { %v13971_v30 = vpop.f32.mrf.mxu1  ;;  %v18586_v2 = vadd.f32 %v4208_v53, %v3941_v47  ;;  %v5118_v47 = vld [vmem:[#allocation3 + $0x1a] sm:$0xff] }
 0x41b   :  { %v3828_v38 = vpop.f32.mrf.mxu0  ;;  %14129 = vmatmul.mubr.msk.f32.gmra.mxu0 %vm1154_vm1, %v4375_v60  ;;  %v5503_v18 = vld [vmem:[#allocation3 + $0x1b] sm:$0xff]  ;;  %v11527_v30 = vld [vmem:[%s21926_s4 + $0x1a8] sm:$0xf] }
 0x41c   :  { %v4213_v11 = vpop.f32.mrf.mxu1  ;;  %14234 = vmatmul.mubr.msk.f32.gmra.mxu1 %vm1154_vm1, %v4760_v35  ;;  %v3942_v40 = vadd.f32 %v3828_v38, %v18166_v23  ;;  %14131 = vmatprep.mubr.msk.f32.mxu0 %vm15595_vm3, %v22264_v20 }
 0x41d   :  { %14236 = vmatprep.mubr.msk.f32.mxu1 %vm15595_vm3, %v22264_v20  ;;  %v13869_v19 = vpop.f32.mrf.mxu0 }
 0x41e   :  { %v13974_v37 = vpop.f32.mrf.mxu1  ;;  %v18595_v9 = vadd.f32 %v4213_v11, %v3942_v40  ;;  %v5119_v19 = vld [vmem:[#allocation3 + $0x22] sm:$0xff] }
 0x41f   :  { %v3833_v0 = vpop.f32.mrf.mxu0  ;;  %14132 = vmatmul.mubr.msk.f32.gmra.mxu0 %vm1154_vm1, %v4376_v48  ;;  %v5504_v37 = vld [vmem:[#allocation3 + $0x23] sm:$0xff] }
 0x420   :  { %v4218_v33 = vpop.f32.mrf.mxu1  ;;  %14237 = vmatmul.mubr.msk.f32.gmra.mxu1 %vm1154_vm1, %v4761_v54  ;;  %v3943_v23 = vadd.f32 %v3833_v0, %v18174_v3  ;;  %14134 = vmatprep.mubr.msk.f32.mxu0 %vm15595_vm3, %v22264_v20 }
 0x421   :  { %14239 = vmatprep.mubr.msk.f32.mxu1 %vm15595_vm3, %v22264_v20  ;;  %v13872_v34 = vpop.f32.mrf.mxu0 }
 0x422   :  { %v13977_v27 = vpop.f32.mrf.mxu1  ;;  %v18604_v8 = vadd.f32 %v4218_v33, %v3943_v23 }
 0x423   :  { %v3838_v49 = vpop.f32.mrf.mxu0  ;;  %14135 = vmatmul.mubr.msk.f32.gmra.mxu0 %vm1154_vm1, %v4377_v6  ;;  %v5120_v27 = vld [vmem:[#allocation3 + $0x2a] sm:$0xff] }
 0x424   :  { %v4223_v28 = vpop.f32.mrf.mxu1  ;;  %14240 = vmatmul.mubr.msk.f32.gmra.mxu1 %vm1154_vm1, %v4762_v7  ;;  %v3944_v3 = vadd.f32 %v3838_v49, %v18182_v57  ;;  %14137 = vmatprep.mubr.msk.f32.mxu0 %vm15595_vm3, %v22264_v20  ;;  %v5505_v6 = vld [vmem:[#allocation3 + $0x2b] sm:$0xff]  ;;  %v11525_v7 = vld [vmem:[%s21926_s4 + $0x198] sm:$0xff] }
 0x425   :  { %14242 = vmatprep.mubr.msk.f32.mxu1 %vm15595_vm3, %v22264_v20  ;;  %v13875_v25 = vpop.f32.mrf.mxu0 }
 0x426   :  { %v13980_v13 = vpop.f32.mrf.mxu1  ;;  %v18613_v39 = vadd.f32 %v4223_v28, %v3944_v3 }
 0x427   :  { %v3843_v44 = vpop.f32.mrf.mxu0  ;;  %14138 = vmatmul.mubr.msk.f32.gmra.mxu0 %vm1154_vm1, %v4378_v52  ;;  %v5121_v52 = vld [vmem:[#allocation3 + $0x32] sm:$0xff] }
 0x428   :  { %v4228_v16 = vpop.f32.mrf.mxu1  ;;  %14243 = vmatmul.mubr.msk.f32.gmra.mxu1 %vm1154_vm1, %v4763_v51  ;;  %v3945_v57 = vadd.f32 %v3843_v44, %v18190_v45  ;;  %14257 = vmatprep.mubr.msk.f32.mxu0 %vm15595_vm3, %v22264_v20  ;;  %v5506_v51 = vld [vmem:[#allocation3 + $0x33] sm:$0xff] }
 0x429   :  { %14362 = vmatprep.mubr.msk.f32.mxu1 %vm15595_vm3, %v22264_v20  ;;  %v13878_v59 = vpop.f32.mrf.mxu0  ;;  %v11524_v44 = vld [vmem:[%s21926_s4 + $0x190] sm:$0xff] }
 0x42a   :  { %v13983_v41 = vpop.f32.mrf.mxu1  ;;  %v18622_v53 = vadd.f32 %v4228_v16, %v3945_v57 }
 0x42b   :  { %v3848_v60 = vpop.f32.mrf.mxu0  ;;  %14258 = vmatmul.mubr.msk.f32.vlgmr.msra.gmra.mxu0 %vm1154_vm1, %v5118_v47 }
 0x42c   :  { %v4233_v35 = vpop.f32.mrf.mxu1  ;;  %14363 = vmatmul.mubr.msk.f32.vlgmr.msra.gmra.mxu1 %vm1154_vm1, %v5503_v18  ;;  %v3946_v45 = vadd.f32 %v3848_v60, %v18198_v50  ;;  %14260 = vmatprep.mubr.msk.f32.mxu0 %vm15595_vm3, %v22264_v20  ;;  %v11526_v50 = vld [vmem:[%s21926_s4 + $0x1a0] sm:$0xff]  ;;  %v11523_v60 = vld [vmem:[%s21926_s4 + $0x188] sm:$0xff] }
 0x42d   :  { %14365 = vmatprep.mubr.msk.f32.mxu1 %vm15595_vm3, %v22264_v20  ;;  %v13881_v38 = vpop.f32.mrf.mxu0  ;;  %14456 = vmatpush3.msk.msra.mxu0 %vm3038_vm2, %v11527_v30  ;;  %v5122_v18 = vld [vmem:[#allocation3 + $0x3a] sm:$0xff] }
 0x42e   :  { %v13986_v11 = vpop.f32.mrf.mxu1  ;;  %v18635_v40 = vadd.f32 %v4233_v35, %v3946_v45  ;;  %14457 = vmatprep.subr.mxu0 %v22264_v20  ;;  %v5507_v30 = vld [vmem:[#allocation3 + $0x3b] sm:$0xff] }
 0x42f   :  { %v3853_v48 = vpop.f32.mrf.mxu0  ;;  %14261 = vmatmul.mubr.msk.f32.gmra.mxu0 %vm1154_vm1, %v5119_v19 }
 0x430   :  { %v4238_v54 = vpop.f32.mrf.mxu1  ;;  %14366 = vmatmul.mubr.msk.f32.gmra.mxu1 %vm1154_vm1, %v5504_v37  ;;  %v3947_v0 = vadd.f32 %v3853_v48, %v18206_v31  ;;  %14263 = vmatprep.mubr.msk.f32.mxu0 %vm15595_vm3, %v22264_v20  ;;  %v5123_v37 = vld [vmem:[#allocation3 + $0x42] sm:$0xff] }
 0x431   :  { %14368 = vmatprep.mubr.msk.f32.mxu1 %vm15595_vm3, %v22264_v20  ;;  %v13884_v33 = vpop.f32.mrf.mxu0  ;;  %14458 = vmatpush3.msra.mxu0 %v11526_v50  ;;  %v5508_v50 = vld [vmem:[#allocation3 + $0x43] sm:$0xff] }
 0x432   :  { %v13989_v23 = vpop.f32.mrf.mxu1  ;;  %v18648_v34 = vadd.f32 %v4238_v54, %v3947_v0  ;;  %14459 = vmatprep.subr.mxu0 %v22264_v20  ;;  %v11522_v48 = vld [vmem:[%s21926_s4 + $0x180] sm:$0xff] }
 0x433   :  { %v3858_v31 = vpop.f32.mrf.mxu0  ;;  %14264 = vmatmul.mubr.msk.f32.gmra.mxu0 %vm1154_vm1, %v5120_v27 }
 0x434   :  { %v4243_v49 = vpop.f32.mrf.mxu1  ;;  %14369 = vmatmul.mubr.msk.f32.gmra.mxu1 %vm1154_vm1, %v5505_v6  ;;  %v3948_v28 = vadd.f32 %v3858_v31, %v18354_v26  ;;  %14266 = vmatprep.mubr.msk.f32.mxu0 %vm15595_vm3, %v22264_v20  ;;  %v5124_v6 = vld [vmem:[#allocation3 + $0x4a] sm:$0xff] }
 0x435   :  { %14371 = vmatprep.mubr.msk.f32.mxu1 %vm15595_vm3, %v22264_v20  ;;  %v13887_v3 = vpop.f32.mrf.mxu0  ;;  %14460 = vmatpush3.msra.mxu0 %v11525_v7  ;;  %v5509_v7 = vld [vmem:[#allocation3 + $0x4b] sm:$0xff] }
 0x436   :  { %v13992_v25 = vpop.f32.mrf.mxu1  ;;  %v18661_v13 = vadd.f32 %v4243_v49, %v3948_v28  ;;  %14461 = vmatprep.subr.mxu0 %v22264_v20 }
 0x437   :  { %v3863_v26 = vpop.f32.mrf.mxu0  ;;  %14267 = vmatmul.mubr.msk.f32.gmra.mxu0 %vm1154_vm1, %v5121_v52  ;;  %v5125_v52 = vld [vmem:[#allocation3 + $0x52] sm:$0xff] }
 0x438   :  { %v4248_v16 = vpop.f32.mrf.mxu1  ;;  %14372 = vmatmul.mubr.msk.f32.gmra.mxu1 %vm1154_vm1, %v5506_v51  ;;  %v3949_v57 = vadd.f32 %v3863_v26, %v18370_v46  ;;  %14269 = vmatprep.mubr.msk.f32.mxu0 %vm15595_vm3, %v22264_v20  ;;  %v5510_v51 = vld [vmem:[#allocation3 + $0x53] sm:$0xff] }
 0x439   :  { %14374 = vmatprep.mubr.msk.f32.mxu1 %vm15595_vm3, %v22264_v20  ;;  %v13890_v59 = vpop.f32.mrf.mxu0  ;;  %14462 = vmatpush3.msra.mxu0 %v11524_v44 }
 0x43a   :  { %v13995_v41 = vpop.f32.mrf.mxu1  ;;  %v18674_v47 = vadd.f32 %v4248_v16, %v3949_v57  ;;  %14463 = vmatprep.subr.mxu0 %v22264_v20 }
 0x43b   :  { %v3868_v46 = vpop.f32.mrf.mxu0  ;;  %14270 = vmatmul.mubr.msk.f32.gmra.mxu0 %vm1154_vm1, %v5122_v18  ;;  %v5126_v41 = vld [vmem:[#allocation3 + $0x5a] sm:$0xff] }
 0x43c   :  { %v4253_v35 = vpop.f32.mrf.mxu1  ;;  %14375 = vmatmul.mubr.msk.f32.gmra.mxu1 %vm1154_vm1, %v5507_v30  ;;  %v3950_v45 = vadd.f32 %v3868_v46, %v18386_v1  ;;  %14272 = vmatprep.mubr.msk.f32.mxu0 %vm15595_vm3, %v22264_v20  ;;  %v5511_v18 = vld [vmem:[#allocation3 + $0x5b] sm:$0xff] }
 0x43d   :  { %14377 = vmatprep.mubr.msk.f32.mxu1 %vm15595_vm3, %v22264_v20  ;;  %v13893_v38 = vpop.f32.mrf.mxu0  ;;  %14464 = vmatpush3.msra.mxu0 %v11523_v60 }
 0x43e   :  { %v13998_v11 = vpop.f32.mrf.mxu1  ;;  %v18687_v19 = vadd.f32 %v4253_v35, %v3950_v45  ;;  %14465 = vmatprep.subr.mxu0 %v22264_v20  ;;  %v5127_v38 = vld [vmem:[#allocation3 + $0x62] sm:$0xff] }
 0x43f   :  { %v3873_v1 = vpop.f32.mrf.mxu0  ;;  %14273 = vmatmul.mubr.msk.f32.gmra.mxu0 %vm1154_vm1, %v5123_v37  ;;  %v5512_v11 = vld [vmem:[#allocation3 + $0x63] sm:$0xff] }
 0x440   :  { %v4258_v54 = vpop.f32.mrf.mxu1  ;;  %14378 = vmatmul.mubr.msk.f32.gmra.mxu1 %vm1154_vm1, %v5508_v50  ;;  %v3951_v0 = vadd.f32 %v3873_v1, %v18402_v4  ;;  %14275 = vmatprep.mubr.msk.f32.mxu0 %vm15595_vm3, %v22264_v20 }
 0x441   :  { %14380 = vmatprep.mubr.msk.f32.mxu1 %vm15595_vm3, %v22264_v20  ;;  %v13896_v33 = vpop.f32.mrf.mxu0  ;;  %14466 = vmatpush3.msra.mxu0 %v11522_v48 }
 0x442   :  { %v14001_v23 = vpop.f32.mrf.mxu1  ;;  %v18700_v27 = vadd.f32 %v4258_v54, %v3951_v0  ;;  %14695 = vmatprep.subr.mxu0 %v22264_v20  ;;  %v5128_v0 = vld [vmem:[#allocation3 + $0x6a] sm:$0xff] }
 0x443   :  { %v3878_v31 = vpop.f32.mrf.mxu0  ;;  %14276 = vmatmul.mubr.msk.f32.gmra.mxu0 %vm1154_vm1, %v5124_v6  ;;  %v5513_v33 = vld [vmem:[#allocation3 + $0x6b] sm:$0xff] }
 0x444   :  { %v4263_v49 = vpop.f32.mrf.mxu1  ;;  %14381 = vmatmul.mubr.msk.f32.gmra.mxu1 %vm1154_vm1, %v5509_v7  ;;  %v3952_v4 = vadd.f32 %v3878_v31, %v18412_v43  ;;  %14278 = vmatprep.mubr.msk.f32.mxu0 %vm15595_vm3, %v22264_v20 }
 0x445   :  { %14383 = vmatprep.mubr.msk.f32.mxu1 %vm15595_vm3, %v22264_v20  ;;  %v13899_v28 = vpop.f32.mrf.mxu0 }
 0x446   :  { %v14004_v3 = vpop.f32.mrf.mxu1  ;;  %v18710_v25 = vadd.f32 %v4263_v49, %v3952_v4  ;;  %v5129_v4 = vld [vmem:[#allocation3 + $0x72] sm:$0xff] }
 0x447   :  { %v3883_v44 = vpop.f32.mrf.mxu0  ;;  %14279 = vmatmul.mubr.msk.f32.gmra.mxu0 %vm1154_vm1, %v5125_v52  ;;  %v5514_v28 = vld [vmem:[#allocation3 + $0x73] sm:$0xff] }
 0x448   :  { %v4268_v26 = vpop.f32.mrf.mxu1  ;;  %14384 = vmatmul.mubr.msk.f32.gmra.mxu1 %vm1154_vm1, %v5510_v51  ;;  %v3953_v43 = vadd.f32 %v3883_v44, %v18420_v12  ;;  %14281 = vmatprep.mubr.msk.f32.mxu0 %vm15595_vm3, %v22264_v20 }
 0x449   :  { %14386 = vmatprep.mubr.msk.f32.mxu1 %vm15595_vm3, %v22264_v20  ;;  %v13902_v16 = vpop.f32.mrf.mxu0 }
 0x44a   :  { %v14007_v57 = vpop.f32.mrf.mxu1  ;;  %v18719_v59 = vadd.f32 %v4268_v26, %v3953_v43  ;;  %v5130_v43 = vld [vmem:[#allocation3 + $0x7a] sm:$0xff] }
 0x44b   :  { %v3888_v30 = vpop.f32.mrf.mxu0  ;;  %14282 = vmatmul.mubr.msk.f32.gmra.mxu0 %vm1154_vm1, %v5126_v41  ;;  %v5515_v16 = vld [vmem:[#allocation3 + $0x7b] sm:$0xff] }
 0x44c   :  { %v4273_v60 = vpop.f32.mrf.mxu1  ;;  %14387 = vmatmul.mubr.msk.f32.gmra.mxu1 %vm1154_vm1, %v5511_v18  ;;  %v3954_v12 = vadd.f32 %v3888_v30, %v18428_v55  ;;  %14284 = vmatprep.mubr.msk.f32.mxu0 %vm15595_vm3, %v22264_v20 }
 0x44d   :  { %14389 = vmatprep.mubr.msk.f32.mxu1 %vm15595_vm3, %v22264_v20  ;;  %v13905_v46 = vpop.f32.mrf.mxu0 }
 0x44e   :  { %v14010_v35 = vpop.f32.mrf.mxu1  ;;  %v18728_v45 = vadd.f32 %v4273_v60, %v3954_v12  ;;  %v5131_v12 = vld [vmem:[#allocation3 + $0x82] sm:$0xff] }
 0x44f   :  { %v3893_v37 = vpop.f32.mrf.mxu0  ;;  %14285 = vmatmul.mubr.msk.f32.gmra.mxu0 %vm1154_vm1, %v5127_v38  ;;  %v5516_v46 = vld [vmem:[#allocation3 + $0x83] sm:$0xff] }
 0x450   :  { %v4278_v50 = vpop.f32.mrf.mxu1  ;;  %14390 = vmatmul.mubr.msk.f32.gmra.mxu1 %vm1154_vm1, %v5512_v11  ;;  %v3955_v55 = vadd.f32 %v3893_v37, %v18436_v5  ;;  %14287 = vmatprep.mubr.msk.f32.mxu0 %vm15595_vm3, %v22264_v20 }
 0x451   :  { %14392 = vmatprep.mubr.msk.f32.mxu1 %vm15595_vm3, %v22264_v20  ;;  %v13908_v48 = vpop.f32.mrf.mxu0 }
 0x452   :  { %v14013_v1 = vpop.f32.mrf.mxu1  ;;  %v18737_v54 = vadd.f32 %v4278_v50, %v3955_v55  ;;  %v5132_v55 = vld [vmem:[#allocation3 + $0x8a] sm:$0xff] }
 0x453   :  { %v3898_v23 = vpop.f32.mrf.mxu0  ;;  %14288 = vmatmul.mubr.msk.f32.gmra.mxu0 %vm1154_vm1, %v5128_v0  ;;  %v5517_v48 = vld [vmem:[#allocation3 + $0x8b] sm:$0xff] }
 0x454   :  { %v4283_v6 = vpop.f32.mrf.mxu1  ;;  %14393 = vmatmul.mubr.msk.f32.gmra.mxu1 %vm1154_vm1, %v5513_v33  ;;  %v3956_v5 = vadd.f32 %v3898_v23, %v18444_v63  ;;  %14290 = vmatprep.mubr.msk.f32.mxu0 %vm15595_vm3, %v22264_v20 }
 0x455   :  { %14395 = vmatprep.mubr.msk.f32.mxu1 %vm15595_vm3, %v22264_v20  ;;  %v13911_v7 = vpop.f32.mrf.mxu0 }
 0x456   :  { %v14016_v31 = vpop.f32.mrf.mxu1  ;;  %v18746_v49 = vadd.f32 %v4283_v6, %v3956_v5  ;;  %v5133_v5 = vld [vmem:[#allocation3 + $0x92] sm:$0xff] }
 0x457   :  { %v3903_v3 = vpop.f32.mrf.mxu0  ;;  %14291 = vmatmul.mubr.msk.f32.gmra.mxu0 %vm1154_vm1, %v5129_v4  ;;  %v5518_v7 = vld [vmem:[#allocation3 + $0x93] sm:$0xff] }
 0x458   :  { %v4288_v52 = vpop.f32.mrf.mxu1  ;;  %14396 = vmatmul.mubr.msk.f32.gmra.mxu1 %vm1154_vm1, %v5514_v28  ;;  %v3957_v63 = vadd.f32 %v3903_v3, %v18452_v17  ;;  %14293 = vmatprep.mubr.msk.f32.mxu0 %vm15595_vm3, %v22264_v20 }
 0x459   :  { %14398 = vmatprep.mubr.msk.f32.mxu1 %vm15595_vm3, %v22264_v20  ;;  %v13914_v51 = vpop.f32.mrf.mxu0 }
 0x45a   :  { %v14019_v44 = vpop.f32.mrf.mxu1  ;;  %v18755_v26 = vadd.f32 %v4288_v52, %v3957_v63  ;;  %v5134_v63 = vld [vmem:[#allocation3 + $0x9a] sm:$0xff] }
 0x45b   :  { %v3908_v57 = vpop.f32.mrf.mxu0  ;;  %14294 = vmatmul.mubr.msk.f32.gmra.mxu0 %vm1154_vm1, %v5130_v43  ;;  %v5519_v51 = vld [vmem:[#allocation3 + $0x9b] sm:$0xff] }
 0x45c   :  { %v4293_v41 = vpop.f32.mrf.mxu1  ;;  %14399 = vmatmul.mubr.msk.f32.gmra.mxu1 %vm1154_vm1, %v5515_v16  ;;  %v3958_v17 = vadd.f32 %v3908_v57, %v18460_v62  ;;  %14296 = vmatprep.mubr.msk.f32.mxu0 %vm15595_vm3, %v22264_v20 }
 0x45d   :  { %14401 = vmatprep.mubr.msk.f32.mxu1 %vm15595_vm3, %v22264_v20  ;;  %v13917_v18 = vpop.f32.mrf.mxu0 }
 0x45e   :  { %v14022_v30 = vpop.f32.mrf.mxu1  ;;  %v18764_v60 = vadd.f32 %v4293_v41, %v3958_v17  ;;  %v5135_v17 = vld [vmem:[#allocation3 + $0xa2] sm:$0xff] }
 0x45f   :  { %v3913_v35 = vpop.f32.mrf.mxu0  ;;  %14297 = vmatmul.mubr.msk.f32.gmra.mxu0 %vm1154_vm1, %v5131_v12  ;;  %v5520_v18 = vld [vmem:[#allocation3 + $0xa3] sm:$0xff] }
 0x460   :  { %v4298_v38 = vpop.f32.mrf.mxu1  ;;  %14402 = vmatmul.mubr.msk.f32.gmra.mxu1 %vm1154_vm1, %v5516_v46  ;;  %v3959_v62 = vadd.f32 %v3913_v35, %v18468_v42  ;;  %14299 = vmatprep.mubr.msk.f32.mxu0 %vm15595_vm3, %v22264_v20 }
 0x461   :  { %14404 = vmatprep.mubr.msk.f32.mxu1 %vm15595_vm3, %v22264_v20  ;;  %v13920_v11 = vpop.f32.mrf.mxu0 }
 0x462   :  { %v14025_v37 = vpop.f32.mrf.mxu1  ;;  %v18773_v50 = vadd.f32 %v4298_v38, %v3959_v62  ;;  %v15596_v62 = vmov 0  }
 0x463   :  { %v3918_v1 = vpop.f32.mrf.mxu0  ;;  %14300 = vmatmul.mubr.msk.f32.gmra.mxu0 %vm1154_vm1, %v5132_v55  ;;  %15588 = vset.pattern.permute.xlu0 %v15596_v62  ;;  %v5136_v37 = vld [vmem:[#allocation3 + $0xaa] sm:$0xff] }
 0x464   :  { %v4303_v0 = vpop.f32.mrf.mxu1  ;;  %14405 = vmatmul.mubr.msk.f32.gmra.mxu1 %vm1154_vm1, %v5517_v48  ;;  %v3960_v42 = vadd.f32 %v3918_v1, %v18476_v29  ;;  %14302 = vmatprep.mubr.msk.f32.mxu0 %vm15595_vm3, %v22264_v20  ;;  %v5521_v55 = vld [vmem:[#allocation3 + $0xab] sm:$0xff] }
 0x465   :  { %14407 = vmatprep.mubr.msk.f32.mxu1 %vm15595_vm3, %v22264_v20  ;;  %v13923_v33 = vpop.f32.mrf.mxu0  ;;  %15589 = vset.pattern.permute.xlu1 %v15596_v62 }
 0x466   :  { %v14028_v23 = vpop.f32.mrf.mxu1  ;;  %v18782_v6 = vadd.f32 %v4303_v0, %v3960_v42 }
 0x467   :  { %v3923_v31 = vpop.f32.mrf.mxu0  ;;  %14303 = vmatmul.mubr.msk.f32.gmra.mxu0 %vm1154_vm1, %v5133_v5  ;;  %v5137_v5 = vld [vmem:[#allocation3 + $0xb2] sm:$0xff] }
 0x468   :  { %v4308_v4 = vpop.f32.mrf.mxu1  ;;  %14408 = vmatmul.mubr.msk.f32.gmra.mxu1 %vm1154_vm1, %v5518_v7  ;;  %v3961_v29 = vadd.f32 %v3923_v31, %v18484_v56  ;;  %14305 = vmatprep.mubr.msk.f32.mxu0 %vm15595_vm3, %v22264_v20  ;;  %v5522_v7 = vld [vmem:[#allocation3 + $0xb3] sm:$0xff] }
 0x469   :  { %14410 = vmatprep.mubr.msk.f32.mxu1 %vm15595_vm3, %v22264_v20  ;;  %v13926_v28 = vpop.f32.mrf.mxu0  ;;  %v2841_v31 = vld [vmem:[%s21927_s12 + $0x10] sm:$0xff] }
 0x46a   :  { %v14031_v3 = vpop.f32.mrf.mxu1  ;;  %v18791_v52 = vadd.f32 %v4308_v4, %v3961_v29  ;;  %6285 = vperm.xlu1 %15589, %v2841_v31  }
 0x46b   :  { %v3928_v44 = vpop.f32.mrf.mxu0  ;;  %14306 = vmatmul.mubr.msk.f32.gmra.mxu0 %vm1154_vm1, %v5134_v63  ;;  %v2843_v63 = vld [vmem:[%s21927_s12 + $0x20] sm:$0xff] }
 0x46c   :  { %v4313_v43 = vpop.f32.mrf.mxu1  ;;  %14411 = vmatmul.mubr.msk.f32.gmra.mxu1 %vm1154_vm1, %v5519_v51  ;;  %v3962_v56 = vadd.f32 %v3928_v44, %v18492_v14  ;;  %14308 = vmatprep.mubr.msk.f32.mxu0 %vm15595_vm3, %v22264_v20  ;;  %v2839_v14 = vld [vmem:[%s21927_s12] sm:$0xff] }
 0x46d   :  { %14413 = vmatprep.mubr.msk.f32.mxu1 %vm15595_vm3, %v22264_v20  ;;  %v13929_v16 = vpop.f32.mrf.mxu0  ;;  %6275 = vperm.xlu0 %15588, %v2839_v14   ;;  %v5138_v44 = vld [vmem:[#allocation3 + $0xba] sm:$0xff]  ;;  %v5139_v14 = vld [vmem:[#allocation3 + $0xc2] sm:$0xff] }
 0x46e   :  { %v14034_v57 = vpop.f32.mrf.mxu1  ;;  %v18800_v41 = vadd.f32 %v4313_v43, %v3962_v56  ;;  %v5523_v43 = vld [vmem:[#allocation3 + $0xbb] sm:$0xff] }
 0x46f   :  { %v4548_v30 = vpop.f32.mrf.mxu0  ;;  %14309 = vmatmul.mubr.msk.f32.gmra.mxu0 %vm1154_vm1, %v5135_v17 }
 0x470   :  { %v4933_v12 = vpop.f32.mrf.mxu1  ;;  %14414 = vmatmul.mubr.msk.f32.gmra.mxu1 %vm1154_vm1, %v5520_v18  ;;  %v4702_v46 = vadd.f32 %v4548_v30, %v18505_v15  ;;  %14311 = vmatprep.mubr.msk.f32.mxu0 %vm15595_vm3, %v22264_v20  ;;  %v2840_v15 = vld [vmem:[%s21927_s12 + $0x8] sm:$0xff]  ;;  %v2845_v30 = vld [vmem:[%s21927_s12 + $0x30] sm:$0xff] }
 0x471   :  { %14416 = vmatprep.mubr.msk.f32.mxu1 %vm15595_vm3, %v22264_v20  ;;  %v14049_v35 = vpop.f32.mrf.mxu0  ;;  %6280 = vperm.xlu0 %15588, %v2840_v15   ;;  %v5525_v15 = vld [vmem:[#allocation3 + $0xcb] sm:$0xff] }
 0x472   :  { %v14154_v38 = vpop.f32.mrf.mxu1  ;;  %v18812_v11 = vadd.f32 %v4933_v12, %v4702_v46  ;;  %v5524_v46 = vld [vmem:[#allocation3 + $0xc3] sm:$0xff] }
 0x473   :  { %v4553_v48 = vpop.f32.mrf.mxu0  ;;  %14312 = vmatmul.mubr.msk.f32.gmra.mxu0 %vm1154_vm1, %v5136_v37 }
 0x474   :  { %v4938_v1 = vpop.f32.mrf.mxu1  ;;  %14417 = vmatmul.mubr.msk.f32.gmra.mxu1 %vm1154_vm1, %v5521_v55  ;;  %v4703_v0 = vadd.f32 %v4553_v48, %v18514_v36  ;;  %14314 = vmatprep.mubr.msk.f32.mxu0 %vm15595_vm3, %v22264_v20  ;;  %v2844_v55 = vld [vmem:[%s21927_s12 + $0x28] sm:$0xff] }
 0x475   :  { %14419 = vmatprep.mubr.msk.f32.mxu1 %vm15595_vm3, %v22264_v20  ;;  %v14052_v42 = vpop.f32.mrf.mxu0  ;;  %6295 = vperm.xlu0 %15588, %v2843_v63  }
 0x476   :  { %v14157_v33 = vpop.f32.mrf.mxu1  ;;  %v18824_v23 = vadd.f32 %v4938_v1, %v4703_v0  ;;  %v5140_v1 = vld [vmem:[#allocation3 + $0xca] sm:$0xff] }
 0x477   :  { %v4558_v4 = vpop.f32.mrf.mxu0  ;;  %14315 = vmatmul.mubr.msk.f32.gmra.mxu0 %vm1154_vm1, %v5137_v5 }
 0x478   :  { %v4943_v29 = vpop.f32.mrf.mxu1  ;;  %14420 = vmatmul.mubr.msk.f32.gmra.mxu1 %vm1154_vm1, %v5522_v7  ;;  %v4704_v36 = vadd.f32 %v4558_v4, %v18523_v32  ;;  %14317 = vmatprep.mubr.msk.f32.mxu0 %vm15595_vm3, %v22264_v20  ;;  %v2842_v32 = vld [vmem:[%s21927_s12 + $0x18] sm:$0xff] }
 0x479   :  { %14422 = vmatprep.mubr.msk.f32.mxu1 %vm15595_vm3, %v22264_v20  ;;  %v14055_v28 = vpop.f32.mrf.mxu0  ;;  %6290 = vperm.xlu1 %15589, %v2842_v32   ;;  %v2846_v7 = vld [vmem:[%s21927_s12 + $0x38] sm:$0xff] }
 0x47a   :  { %v14160_v3 = vpop.f32.mrf.mxu1  ;;  %v18839_v51 = vadd.f32 %v4943_v29, %v4704_v36  ;;  %6305 = vperm.xlu0 %15588, %v2845_v30   ;;  %v5141_v4 = vld [vmem:[#allocation3 + $0xd2] sm:$0xff]  ;;  %v5142_v32 = vld [vmem:[#allocation3 + $0xda] sm:$0xff] }
 0x47b   :  { %v4563_v56 = vpop.f32.mrf.mxu0  ;;  %14318 = vmatmul.mubr.msk.f32.gmra.mxu0 %vm1154_vm1, %v5138_v44  ;;  %v5526_v29 = vld [vmem:[#allocation3 + $0xd3] sm:$0xff] }
 0x47c   :  { %v4948_v16 = vpop.f32.mrf.mxu1  ;;  %14423 = vmatmul.mubr.msk.f32.gmra.mxu1 %vm1154_vm1, %v5523_v43  ;;  %v4705_v57 = vadd.f32 %v4563_v56, %v18532_v10  ;;  %14320 = vmatprep.mubr.msk.f32.mxu0 %vm15595_vm3, %v22264_v20  ;;  %v5527_v56 = vld [vmem:[#allocation3 + $0xdb] sm:$0xff] }
 0x47d   :  { %14425 = vmatprep.mubr.msk.f32.mxu1 %vm15595_vm3, %v22264_v20  ;;  %v14058_v17 = vpop.f32.mrf.mxu0  ;;  %6300 = vperm.xlu1 %15589, %v2844_v55  }
 0x47e   :  { %v14163_v18 = vpop.f32.mrf.mxu1  ;;  %v18854_v12 = vadd.f32 %v4948_v16, %v4705_v57  ;;  %v2849_v16 = vld [vmem:[%s21927_s12 + $0x50] sm:$0xff] }
 0x47f   :  { %v4568_v35 = vpop.f32.mrf.mxu0  ;;  %14321 = vmatmul.mubr.msk.f32.gmra.mxu0 %vm1154_vm1, %v5139_v14  ;;  %v5143_v14 = vld [vmem:[#allocation3 + $0xe2] sm:$0xff] }
 0x480   :  { %v4953_v10 = vpop.f32.mrf.mxu1  ;;  %14426 = vmatmul.mubr.msk.f32.gmra.mxu1 %vm1154_vm1, %v5524_v46  ;;  %v4706_v38 = vadd.f32 %v4568_v35, %v18541_v24  ;;  %14323 = vmatprep.mubr.msk.f32.mxu0 %vm15595_vm3, %v22264_v20  ;;  %v5528_v35 = vld [vmem:[#allocation3 + $0xe3] sm:$0xff] }
 0x481   :  { %14428 = vmatprep.mubr.msk.f32.mxu1 %vm15595_vm3, %v22264_v20  ;;  %v14061_v62 = vpop.f32.mrf.mxu0  ;;  %6310 = vperm.xlu1 %15589, %v2846_v7  }
 0x482   :  { %v14166_v37 = vpop.f32.mrf.mxu1  ;;  %v18866_v48 = vadd.f32 %v4953_v10, %v4706_v38  ;;  %v2848_v10 = vld [vmem:[%s21927_s12 + $0x48] sm:$0xff] }
 0x483   :  { %v4573_v0 = vpop.f32.mrf.mxu0  ;;  %14324 = vmatmul.mubr.msk.f32.gmra.mxu0 %vm1154_vm1, %v5140_v1 }
 0x484   :  { %v4958_v42 = vpop.f32.mrf.mxu1  ;;  %14429 = vmatmul.mubr.msk.f32.gmra.mxu1 %vm1154_vm1, %v5525_v15  ;;  %v4707_v24 = vadd.f32 %v4573_v0, %v18550_v22  ;;  %14326 = vmatprep.mubr.msk.f32.mxu0 %vm15595_vm3, %v22264_v20  ;;  %v2847_v22 = vld [vmem:[%s21927_s12 + $0x40] sm:$0xff]  ;;  %v5144_v15 = vld [vmem:[#allocation3 + $0xea] sm:$0xff] }
 0x485   :  { %14431 = vmatprep.mubr.msk.f32.mxu1 %vm15595_vm3, %v22264_v20  ;;  %v14064_v33 = vpop.f32.mrf.mxu0  ;;  %6315 = vperm.xlu0 %15588, %v2847_v22   ;;  %v5145_v22 = vld [vmem:[#allocation3 + $0xf2] sm:$0xff] }
 0x486   :  { %v14169_v5 = vpop.f32.mrf.mxu1  ;;  %v18878_v31 = vadd.f32 %v4958_v42, %v4707_v24  ;;  %6320 = vperm.xlu1 %15589, %v2848_v10   ;;  %v5529_v42 = vld [vmem:[#allocation3 + $0xeb] sm:$0xff]  ;;  %v2850_v24 = vld [vmem:[%s21927_s12 + $0x58] sm:$0xff]  ;;  %v5147_v10 = vld [vmem:[#allocation3 + $0x102] sm:$0xff] }
 0x487   :  { %v4578_v36 = vpop.f32.mrf.mxu0  ;;  %14327 = vmatmul.mubr.msk.f32.gmra.mxu0 %vm1154_vm1, %v5141_v4 }
 0x488   :  { %v4963_v28 = vpop.f32.mrf.mxu1  ;;  %14432 = vmatmul.mubr.msk.f32.gmra.mxu1 %vm1154_vm1, %v5526_v29  ;;  %v4708_v3 = vadd.f32 %v4578_v36, %v18559_v21  ;;  %14329 = vmatprep.mubr.msk.f32.mxu0 %vm15595_vm3, %v22264_v20 }
 0x489   :  { %14434 = vmatprep.mubr.msk.f32.mxu1 %vm15595_vm3, %v22264_v20  ;;  %v14067_v63 = vpop.f32.mrf.mxu0  ;;  %6325 = vperm.xlu0 %15588, %v2849_v16  }
 0x48a   :  { %v14172_v44 = vpop.f32.mrf.mxu1  ;;  %v18890_v43 = vadd.f32 %v4963_v28, %v4708_v3  ;;  %6330 = vperm.xlu1 %15589, %v2850_v24   ;;  %v5530_v28 = vld [vmem:[#allocation3 + $0xf3] sm:$0xff]  ;;  %v2852_v3 = vld [vmem:[%s21927_s12 + $0x68] sm:$0xff] }
 0x48b   :  { %v4583_v57 = vpop.f32.mrf.mxu0  ;;  %14330 = vmatmul.mubr.msk.f32.gmra.mxu0 %vm1154_vm1, %v5142_v32  ;;  %v5148_v24 = vld [vmem:[#allocation3 + $0x10a] sm:$0x3] }
 0x48c   :  { %v4968_v17 = vpop.f32.mrf.mxu1  ;;  %14435 = vmatmul.mubr.msk.f32.gmra.mxu1 %vm1154_vm1, %v5527_v56  ;;  %v4709_v21 = vadd.f32 %v4583_v57, %v18568_v61  ;;  %14332 = vmatprep.mubr.msk.f32.mxu0 %vm15595_vm3, %v22264_v20  ;;  %v2851_v61 = vld [vmem:[%s21927_s12 + $0x60] sm:$0xff] }
 0x48d   :  { %14437 = vmatprep.mubr.msk.f32.mxu1 %vm15595_vm3, %v22264_v20  ;;  %v14070_v18 = vpop.f32.mrf.mxu0  ;;  %6335 = vperm.xlu0 %15588, %v2851_v61   ;;  %v5146_v57 = vld [vmem:[#allocation3 + $0xfa] sm:$0xff]  ;;  %v5532_v61 = vld [vmem:[#allocation3 + $0x103] sm:$0xff] }
 0x48e   :  { %v14175_v30 = vpop.f32.mrf.mxu1  ;;  %v18902_v46 = vadd.f32 %v4968_v17, %v4709_v21  ;;  %6340 = vperm.xlu1 %15589, %v2852_v3   ;;  %v5531_v21 = vld [vmem:[#allocation3 + $0xfb] sm:$0xff] }
 0x48f   :  { %v4588_v38 = vpop.f32.mrf.mxu0  ;;  %14333 = vmatmul.mubr.msk.f32.gmra.mxu0 %vm1154_vm1, %v5143_v14  ;;  %v2854_v18 = vld [vmem:[%s21927_s12 + $0x78] sm:$0xff] }
 0x490   :  { %v4973_v62 = vpop.f32.mrf.mxu1  ;;  %14438 = vmatmul.mubr.msk.f32.gmra.mxu1 %vm1154_vm1, %v5528_v35  ;;  %v4710_v37 = vadd.f32 %v4588_v38, %v18577_v58  ;;  %14335 = vmatprep.mubr.msk.f32.mxu0 %vm15595_vm3, %v22264_v20  ;;  %v2853_v58 = vld [vmem:[%s21927_s12 + $0x70] sm:$0xff] }
 0x491   :  { %14440 = vmatprep.mubr.msk.f32.mxu1 %vm15595_vm3, %v22264_v20  ;;  %v14073_v55 = vpop.f32.mrf.mxu0  ;;  %6345 = vperm.xlu0 %15588, %v2853_v58   ;;  %v5533_v58 = vld [vmem:[#allocation3 + $0x10b] sm:$0x3] }
 0x492   :  { %v14178_v1 = vpop.f32.mrf.mxu1  ;;  %v18917_v0 = vadd.f32 %v4973_v62, %v4710_v37  ;;  %6350 = vperm.xlu1 %15589, %v2854_v18   ;;  %v2856_v55 = vld [vmem:[%s21927_s12 + $0x88] sm:$0xff] }
 0x493   :  { %v4593_v33 = vpop.f32.mrf.mxu0  ;;  %14336 = vmatmul.mubr.msk.f32.gmra.mxu0 %vm1154_vm1, %v5144_v15 }
 0x494   :  { %v4978_v5 = vpop.f32.mrf.mxu1  ;;  %14441 = vmatmul.mubr.msk.f32.gmra.mxu1 %vm1154_vm1, %v5529_v42  ;;  %v4711_v7 = vadd.f32 %v4593_v33, %v18586_v2  ;;  %14338 = vmatprep.mubr.msk.f32.mxu0 %vm15595_vm3, %v22264_v20  ;;  %v2855_v2 = vld [vmem:[%s21927_s12 + $0x80] sm:$0xff] }
 0x495   :  { %14443 = vmatprep.mubr.msk.f32.mxu1 %vm15595_vm3, %v22264_v20  ;;  %v14076_v4 = vpop.f32.mrf.mxu0  ;;  %6355 = vperm.xlu0 %15588, %v2855_v2  }
 0x496   :  { %v14181_v29 = vpop.f32.mrf.mxu1  ;;  %v18932_v36 = vadd.f32 %v4978_v5, %v4711_v7  ;;  %6360 = vperm.xlu1 %15589, %v2856_v55   ;;  %v2858_v4 = vld [vmem:[%s21927_s12 + $0x98] sm:$0xff] }
 0x497   :  { %v4598_v63 = vpop.f32.mrf.mxu0  ;;  %14339 = vmatmul.mubr.msk.f32.gmra.mxu0 %vm1154_vm1, %v5145_v22 }
 0x498   :  { %v4983_v44 = vpop.f32.mrf.mxu1  ;;  %14444 = vmatmul.mubr.msk.f32.gmra.mxu1 %vm1154_vm1, %v5530_v28  ;;  %v4712_v32 = vadd.f32 %v4598_v63, %v18595_v9  ;;  %14341 = vmatprep.mubr.msk.f32.mxu0 %vm15595_vm3, %v22264_v20  ;;  %v2857_v9 = vld [vmem:[%s21927_s12 + $0x90] sm:$0xff] }
 0x499   :  { %14446 = vmatprep.mubr.msk.f32.mxu1 %vm15595_vm3, %v22264_v20  ;;  %v14079_v56 = vpop.f32.mrf.mxu0  ;;  %6365 = vperm.xlu0 %15588, %v2857_v9  }
 0x49a   :  { %v14184_v16 = vpop.f32.mrf.mxu1  ;;  %v18947_v17 = vadd.f32 %v4983_v44, %v4712_v32  ;;  %6370 = vperm.xlu1 %15589, %v2858_v4   ;;  %v5888_v44 = vld [vmem:[#allocation3 + $0x1c] sm:$0xff]  ;;  %v2860_v32 = vld [vmem:[%s21927_s12 + $0xa8] sm:$0xff]  ;;  %v5891_v4 = vld [vmem:[#allocation3 + $0x34] sm:$0xff] }
 0x49b   :  { %v4603_v30 = vpop.f32.mrf.mxu0  ;;  %14342 = vmatmul.mubr.msk.f32.gmra.mxu0 %vm1154_vm1, %v5146_v57 }
 0x49c   :  { %v4988_v14 = vpop.f32.mrf.mxu1  ;;  %14447 = vmatmul.mubr.msk.f32.gmra.mxu1 %vm1154_vm1, %v5531_v21  ;;  %v4713_v35 = vadd.f32 %v4603_v30, %v18604_v8  ;;  %14344 = vmatprep.mubr.msk.f32.mxu0 %vm15595_vm3, %v22264_v20  ;;  %v2859_v8 = vld [vmem:[%s21927_s12 + $0xa0] sm:$0xff] }
 0x49d   :  { %14449 = vmatprep.mubr.msk.f32.mxu1 %vm15595_vm3, %v22264_v20  ;;  %v14082_v38 = vpop.f32.mrf.mxu0  ;;  %6375 = vperm.xlu0 %15588, %v2859_v8   ;;  %v5889_v30 = vld [vmem:[#allocation3 + $0x24] sm:$0xff]  ;;  %v5890_v8 = vld [vmem:[#allocation3 + $0x2c] sm:$0xff] }
 0x49e   :  { %v14187_v62 = vpop.f32.mrf.mxu1  ;;  %v18962_v37 = vadd.f32 %v4988_v14, %v4713_v35  ;;  %6380 = vperm.xlu1 %15589, %v2860_v32   ;;  %v2862_v14 = vld [vmem:[%s21927_s12 + $0xb8] sm:$0xff]  ;;  %v2865_v35 = vld [vmem:[%s21927_s12 + $0xd0] sm:$0xff] }
 0x49f   :  { %v4608_v1 = vpop.f32.mrf.mxu0  ;;  %14345 = vmatmul.mubr.msk.f32.gmra.mxu0 %vm1154_vm1, %v5147_v10  ;;  %v5892_v32 = vld [vmem:[#allocation3 + $0x3c] sm:$0xff] }
 0x4a0   :  { %v4993_v15 = vpop.f32.mrf.mxu1  ;;  %14450 = vmatmul.mubr.msk.f32.gmra.mxu1 %vm1154_vm1, %v5532_v61  ;;  %v4714_v42 = vadd.f32 %v4608_v1, %v18613_v39  ;;  %14347 = vmatprep.mubr.msk.f32.mxu0 %vm15595_vm3, %v22264_v20  ;;  %v2861_v39 = vld [vmem:[%s21927_s12 + $0xb0] sm:$0xff]  ;;  %v2864_v1 = vld [vmem:[%s21927_s12 + $0xc8] sm:$0xff] }
 0x4a1   :  { %14452 = vmatprep.mubr.msk.f32.mxu1 %vm15595_vm3, %v22264_v20  ;;  %v14085_v33 = vpop.f32.mrf.mxu0  ;;  %6385 = vperm.xlu0 %15588, %v2861_v39   ;;  %v2866_v39 = vld [vmem:[%s21927_s12 + $0xd8] sm:$0xff] }
 0x4a2   :  { %v14190_v5 = vpop.f32.mrf.mxu1  ;;  %v18977_v7 = vadd.f32 %v4993_v15, %v4714_v42  ;;  %6390 = vperm.xlu1 %15589, %v2862_v14   ;;  %v2867_v15 = vld [vmem:[%s21927_s12 + $0xe0] sm:$0xff] }
 0x4a3   :  { %v4613_v29 = vpop.f32.mrf.mxu0  ;;  %14348 = vmatmul.mubr.msk.f32.gmra.mxu0 %vm1154_vm1, %v5148_v24 }
 0x4a4   :  { %v4998_v22 = vpop.f32.mrf.mxu1  ;;  %14453 = vmatmul.mubr.msk.f32.gmra.mxu1 %vm1154_vm1, %v5533_v58  ;;  %v4715_v28 = vadd.f32 %v4613_v29, %v18622_v53  ;;  %14467 = vmatprep.mubr.msk.f32.mxu0 %vm15595_vm3, %v22264_v20  ;;  %v2863_v53 = vld [vmem:[%s21927_s12 + $0xc0] sm:$0xff]  ;;  %v2869_v29 = vld [vmem:[%s21927_s12 + $0xf0] sm:$0x3] }
 0x4a5   :  { %14572 = vmatprep.mubr.msk.f32.mxu1 %vm15595_vm3, %v22264_v20  ;;  %v14088_v3 = vpop.f32.mrf.mxu0  ;;  %6395 = vperm.xlu0 %15588, %v2863_v53   ;;  %v2868_v53 = vld [vmem:[%s21927_s12 + $0xe8] sm:$0xff] }
 0x4a6   :  { %v14193_v2 = vpop.f32.mrf.mxu1  ;;  %v18992_v63 = vadd.f32 %v4998_v22, %v4715_v28  ;;  %6400 = vperm.xlu1 %15589, %v2864_v1  }
 0x4a7   :  { %v4618_v56 = vpop.f32.mrf.mxu0  ;;  %14468 = vmatmul.mubr.msk.f32.vlgmr.msra.gmra.mxu0 %vm1154_vm1, %v5888_v44 }
 0x4a8   :  { %v5003_v16 = vpop.f32.mrf.mxu1  ;;  %v4716_v57 = vadd.f32 %v4618_v56, %v18635_v40  ;;  %14470 = vmatprep.mubr.msk.f32.mxu0 %vm15595_vm3, %v22264_v20 }
 0x4a9   :  { %v14091_v21 = vpop.f32.mrf.mxu0  ;;  %6405 = vperm.xlu0 %15588, %v2865_v35  }
 0x4aa   :  { %v14196_v18 = vpop.f32.mrf.mxu1  ;;  %v19004_v9 = vadd.f32 %v5003_v16, %v4716_v57  ;;  %6410 = vperm.xlu1 %15589, %v2866_v39  }
 0x4ab   :  { %v4623_v10 = vpop.f32.mrf.mxu0  ;;  %14471 = vmatmul.mubr.msk.f32.gmra.mxu0 %vm1154_vm1, %v5889_v30  ;;  %v5893_v30 = vld [vmem:[#allocation3 + $0x44] sm:$0xff] }
 0x4ac   :  { %v5008_v40 = vpop.f32.mrf.mxu1  ;;  %v4717_v61 = vadd.f32 %v4623_v10, %v18648_v34  ;;  %14473 = vmatprep.mubr.msk.f32.mxu0 %vm15595_vm3, %v22264_v20 }
 0x4ad   :  { %v14094_v38 = vpop.f32.mrf.mxu0  ;;  %6415 = vperm.xlu0 %15588, %v2867_v15  }
 0x4ae   :  { %v14199_v62 = vpop.f32.mrf.mxu1  ;;  %v19016_v55 = vadd.f32 %v5008_v40, %v4717_v61  ;;  %6420 = vperm.xlu1 %15589, %v2868_v53   ;;  %v5894_v38 = vld [vmem:[#allocation3 + $0x4c] sm:$0xff] }
 0x4af   :  { %v4628_v42 = vpop.f32.mrf.mxu0  ;;  %14474 = vmatmul.mubr.msk.f32.gmra.mxu0 %vm1154_vm1, %v5890_v8 }
 0x4b0   :  { %v5013_v34 = vpop.f32.mrf.mxu1  ;;  %v4718_v24 = vadd.f32 %v4628_v42, %v18661_v13  ;;  %14476 = vmatprep.mubr.msk.f32.mxu0 %vm15595_vm3, %v22264_v20 }
 0x4b1   :  { %v14097_v58 = vpop.f32.mrf.mxu0  ;;  %6425 = vperm.xlu0 %15588, %v2869_v29   ;;  %v5896_v29 = vld [vmem:[#allocation3 + $0x5c] sm:$0xff] }
 0x4b2   :  { %v14202_v33 = vpop.f32.mrf.mxu1  ;;  %v19028_v5 = vadd.f32 %v5013_v34, %v4718_v24  ;;  %v5895_v34 = vld [vmem:[#allocation3 + $0x54] sm:$0xff] }
 0x4b3   :  { %v4633_v22 = vpop.f32.mrf.mxu0  ;;  %14477 = vmatmul.mubr.msk.f32.gmra.mxu0 %vm1154_vm1, %v5891_v4 }
 0x4b4   :  { %v5018_v13 = vpop.f32.mrf.mxu1  ;;  %v4719_v28 = vadd.f32 %v4633_v22, %v18674_v47  ;;  %14479 = vmatprep.mubr.msk.f32.mxu0 %vm15595_vm3, %v22264_v20 }
 0x4b5   :  { %v14100_v3 = vpop.f32.mrf.mxu0 }
 0x4b6   :  { %v14205_v2 = vpop.f32.mrf.mxu1  ;;  %v19040_v44 = vadd.f32 %v5018_v13, %v4719_v28 }
 0x4b7   :  { %v4638_v56 = vpop.f32.mrf.mxu0  ;;  %14480 = vmatmul.mubr.msk.f32.gmra.mxu0 %vm1154_vm1, %v5892_v32  ;;  %v5897_v32 = vld [vmem:[#allocation3 + $0x64] sm:$0xff] }
 0x4b8   :  { %v5023_v16 = vpop.f32.mrf.mxu1  ;;  %v4720_v47 = vadd.f32 %v4638_v56, %v18687_v19  ;;  %14482 = vmatprep.mubr.msk.f32.mxu0 %vm15595_vm3, %v22264_v20 }
 0x4b9   :  { %v14103_v57 = vpop.f32.mrf.mxu0 }
 0x4ba   :  { %v14208_v21 = vpop.f32.mrf.mxu1  ;;  %v19049_v18 = vadd.f32 %v5023_v16, %v4720_v47 }
 0x4bb   :  { %v4643_v14 = vpop.f32.mrf.mxu0  ;;  %14483 = vmatmul.mubr.msk.f32.gmra.mxu0 %vm1154_vm1, %v5893_v30  ;;  %v5898_v21 = vld [vmem:[#allocation3 + $0x6c] sm:$0xff] }
 0x4bc   :  { %v5028_v35 = vpop.f32.mrf.mxu1  ;;  %v4721_v10 = vadd.f32 %v4643_v14, %v18700_v27  ;;  %14485 = vmatprep.mubr.msk.f32.mxu0 %vm15595_vm3, %v22264_v20 }
 0x4bd   :  { %v14106_v40 = vpop.f32.mrf.mxu0 }
 0x4be   :  { %v14211_v19 = vpop.f32.mrf.mxu1  ;;  %v19055_v61 = vadd.f32 %v5028_v35, %v4721_v10 }
 0x4bf   :  { %v4648_v62 = vpop.f32.mrf.mxu0  ;;  %14486 = vmatmul.mubr.msk.f32.gmra.mxu0 %vm1154_vm1, %v5894_v38  ;;  %v5899_v19 = vld [vmem:[#allocation3 + $0x74] sm:$0xff] }
 0x4c0   :  { %v5033_v8 = vpop.f32.mrf.mxu1  ;;  %v4722_v1 = vadd.f32 %v4648_v62, %v18710_v25  ;;  %14488 = vmatprep.mubr.msk.f32.mxu0 %vm15595_vm3, %v22264_v20 }
 0x4c1   :  { %v14109_v15 = vpop.f32.mrf.mxu0 }
 0x4c2   :  { %v14214_v42 = vpop.f32.mrf.mxu1  ;;  %v19061_v27 = vadd.f32 %v5033_v8, %v4722_v1 }
 0x4c3   :  { %v4653_v24 = vpop.f32.mrf.mxu0  ;;  %14489 = vmatmul.mubr.msk.f32.gmra.mxu0 %vm1154_vm1, %v5895_v34  ;;  %v5900_v42 = vld [vmem:[#allocation3 + $0x7c] sm:$0xff] }
 0x4c4   :  { %v5038_v58 = vpop.f32.mrf.mxu1  ;;  %v4723_v33 = vadd.f32 %v4653_v24, %v18719_v59  ;;  %14491 = vmatprep.mubr.msk.f32.mxu0 %vm15595_vm3, %v22264_v20 }
 0x4c5   :  { %v14112_v4 = vpop.f32.mrf.mxu0 }
 0x4c6   :  { %v14217_v39 = vpop.f32.mrf.mxu1  ;;  %v19067_v25 = vadd.f32 %v5038_v58, %v4723_v33 }
 0x4c7   :  { %v4658_v22 = vpop.f32.mrf.mxu0  ;;  %14492 = vmatmul.mubr.msk.f32.gmra.mxu0 %vm1154_vm1, %v5896_v29  ;;  %v5901_v39 = vld [vmem:[#allocation3 + $0x84] sm:$0xff] }
 0x4c8   :  { %v5043_v13 = vpop.f32.mrf.mxu1  ;;  %v4724_v28 = vadd.f32 %v4658_v22, %v18728_v45  ;;  %14494 = vmatprep.mubr.msk.f32.mxu0 %vm15595_vm3, %v22264_v20 }
 0x4c9   :  { %v14115_v3 = vpop.f32.mrf.mxu0 }
 0x4ca   :  { %v14220_v2 = vpop.f32.mrf.mxu1  ;;  %v19073_v59 = vadd.f32 %v5043_v13, %v4724_v28 }
 0x4cb   :  { %v4663_v53 = vpop.f32.mrf.mxu0  ;;  %14495 = vmatmul.mubr.msk.f32.gmra.mxu0 %vm1154_vm1, %v5897_v32  ;;  %v5902_v2 = vld [vmem:[#allocation3 + $0x8c] sm:$0xff] }
 0x4cc   :  { %v5048_v56 = vpop.f32.mrf.mxu1  ;;  %v4725_v16 = vadd.f32 %v4663_v53, %v18737_v54  ;;  %14497 = vmatprep.mubr.msk.f32.mxu0 %vm15595_vm3, %v22264_v20 }
 0x4cd   :  { %v14118_v47 = vpop.f32.mrf.mxu0 }
 0x4ce   :  { %v14223_v57 = vpop.f32.mrf.mxu1  ;;  %v19079_v45 = vadd.f32 %v5048_v56, %v4725_v16 }
 0x4cf   :  { %v4668_v30 = vpop.f32.mrf.mxu0  ;;  %14498 = vmatmul.mubr.msk.f32.gmra.mxu0 %vm1154_vm1, %v5898_v21  ;;  %v5903_v57 = vld [vmem:[#allocation3 + $0x94] sm:$0xff] }
 0x4d0   :  { %v5053_v14 = vpop.f32.mrf.mxu1  ;;  %v4726_v35 = vadd.f32 %v4668_v30, %v18746_v49  ;;  %14500 = vmatprep.mubr.msk.f32.mxu0 %vm15595_vm3, %v22264_v20 }
 0x4d1   :  { %v14121_v10 = vpop.f32.mrf.mxu0 }
 0x4d2   :  { %v14226_v40 = vpop.f32.mrf.mxu1  ;;  %v19085_v54 = vadd.f32 %v5053_v14, %v4726_v35 }
 0x4d3   :  { %v4673_v38 = vpop.f32.mrf.mxu0  ;;  %14501 = vmatmul.mubr.msk.f32.gmra.mxu0 %vm1154_vm1, %v5899_v19  ;;  %v5904_v40 = vld [vmem:[#allocation3 + $0x9c] sm:$0xff] }
 0x4d4   :  { %v5058_v62 = vpop.f32.mrf.mxu1  ;;  %v4727_v8 = vadd.f32 %v4673_v38, %v18755_v26  ;;  %14503 = vmatprep.mubr.msk.f32.mxu0 %vm15595_vm3, %v22264_v20 }
 0x4d5   :  { %v14124_v1 = vpop.f32.mrf.mxu0 }
 0x4d6   :  { %v14229_v15 = vpop.f32.mrf.mxu1  ;;  %v19091_v49 = vadd.f32 %v5058_v62, %v4727_v8 }
 0x4d7   :  { %v4678_v34 = vpop.f32.mrf.mxu0  ;;  %14504 = vmatmul.mubr.msk.f32.gmra.mxu0 %vm1154_vm1, %v5900_v42  ;;  %v5905_v15 = vld [vmem:[#allocation3 + $0xa4] sm:$0xff] }
 0x4d8   :  { %v5063_v24 = vpop.f32.mrf.mxu1  ;;  %v4728_v58 = vadd.f32 %v4678_v34, %v18764_v60  ;;  %14506 = vmatprep.mubr.msk.f32.mxu0 %vm15595_vm3, %v22264_v20 }
 0x4d9   :  { %v14127_v33 = vpop.f32.mrf.mxu0 }
 0x4da   :  { %v14232_v4 = vpop.f32.mrf.mxu1  ;;  %v19097_v26 = vadd.f32 %v5063_v24, %v4728_v58 }
 0x4db   :  { %v4683_v29 = vpop.f32.mrf.mxu0  ;;  %14507 = vmatmul.mubr.msk.f32.gmra.mxu0 %vm1154_vm1, %v5901_v39  ;;  %v5906_v4 = vld [vmem:[#allocation3 + $0xac] sm:$0xff] }
 0x4dc   :  { %v5068_v22 = vpop.f32.mrf.mxu1  ;;  %v4729_v13 = vadd.f32 %v4683_v29, %v18773_v50  ;;  %14509 = vmatprep.mubr.msk.f32.mxu0 %vm15595_vm3, %v22264_v20 }
 0x4dd   :  { %v14130_v28 = vpop.f32.mrf.mxu0 }
 0x4de   :  { %v14235_v3 = vpop.f32.mrf.mxu1  ;;  %v19103_v60 = vadd.f32 %v5068_v22, %v4729_v13 }
 0x4df   :  { %v4688_v32 = vpop.f32.mrf.mxu0  ;;  %14510 = vmatmul.mubr.msk.f32.gmra.mxu0 %vm1154_vm1, %v5902_v2  ;;  %v5907_v3 = vld [vmem:[#allocation3 + $0xb4] sm:$0xff] }
 0x4e0   :  { %v5073_v53 = vpop.f32.mrf.mxu1  ;;  %v4730_v56 = vadd.f32 %v4688_v32, %v18782_v6  ;;  %14512 = vmatprep.mubr.msk.f32.mxu0 %vm15595_vm3, %v22264_v20 }
 0x4e1   :  { %v14133_v16 = vpop.f32.mrf.mxu0 }
 0x4e2   :  { %v14238_v47 = vpop.f32.mrf.mxu1  ;;  %v19109_v50 = vadd.f32 %v5073_v53, %v4730_v56 }
 0x4e3   :  { %v4693_v21 = vpop.f32.mrf.mxu0  ;;  %14513 = vmatmul.mubr.msk.f32.gmra.mxu0 %vm1154_vm1, %v5903_v57  ;;  %v5908_v47 = vld [vmem:[#allocation3 + $0xbc] sm:$0xff] }
 0x4e4   :  { %v5078_v30 = vpop.f32.mrf.mxu1  ;;  %v4731_v14 = vadd.f32 %v4693_v21, %v18791_v52  ;;  %14515 = vmatprep.mubr.msk.f32.mxu0 %vm15595_vm3, %v22264_v20 }
 0x4e5   :  { %v14136_v35 = vpop.f32.mrf.mxu0 }
 0x4e6   :  { %v14241_v10 = vpop.f32.mrf.mxu1  ;;  %v19115_v6 = vadd.f32 %v5078_v30, %v4731_v14 }
 0x4e7   :  { %v4698_v19 = vpop.f32.mrf.mxu0  ;;  %14516 = vmatmul.mubr.msk.f32.gmra.mxu0 %vm1154_vm1, %v5904_v40  ;;  %v5909_v10 = vld [vmem:[#allocation3 + $0xc4] sm:$0xff] }
 0x4e8   :  { %v5083_v38 = vpop.f32.mrf.mxu1  ;;  %v4732_v62 = vadd.f32 %v4698_v19, %v18800_v41  ;;  %14518 = vmatprep.mubr.msk.f32.mxu0 %vm15595_vm3, %v22264_v20 }
 0x4e9   :  { %v14139_v8 = vpop.f32.mrf.mxu0 }
 0x4ea   :  { %v14244_v1 = vpop.f32.mrf.mxu1  ;;  %v19121_v52 = vadd.f32 %v5083_v38, %v4732_v62 }
 0x4eb   :  { %v5318_v42 = vpop.f32.mrf.mxu0  ;;  %14519 = vmatmul.mubr.msk.f32.gmra.mxu0 %vm1154_vm1, %v5905_v15  ;;  %v5910_v1 = vld [vmem:[#allocation3 + $0xcc] sm:$0xff] }
 0x4ec   :  { %v5703_v34 = vpop.f32.mrf.mxu1  ;;  %v5472_v24 = vadd.f32 %v5318_v42, %v18812_v11  ;;  %14521 = vmatprep.mubr.msk.f32.mxu0 %vm15595_vm3, %v22264_v20 }
 0x4ed   :  { %v14259_v58 = vpop.f32.mrf.mxu0 }
 0x4ee   :  { %v14364_v33 = vpop.f32.mrf.mxu1  ;;  %v19127_v41 = vadd.f32 %v5703_v34, %v5472_v24 }
 0x4ef   :  { %v5323_v39 = vpop.f32.mrf.mxu0  ;;  %14522 = vmatmul.mubr.msk.f32.gmra.mxu0 %vm1154_vm1, %v5906_v4  ;;  %v5911_v33 = vld [vmem:[#allocation3 + $0xd4] sm:$0xff] }
 0x4f0   :  { %v5708_v29 = vpop.f32.mrf.mxu1  ;;  %v5473_v22 = vadd.f32 %v5323_v39, %v18824_v23  ;;  %14524 = vmatprep.mubr.msk.f32.mxu0 %vm15595_vm3, %v22264_v20 }
 0x4f1   :  { %v14262_v13 = vpop.f32.mrf.mxu0 }
 0x4f2   :  { %v14367_v28 = vpop.f32.mrf.mxu1  ;;  %v19133_v11 = vadd.f32 %v5708_v29, %v5473_v22 }
 0x4f3   :  { %v5328_v2 = vpop.f32.mrf.mxu0  ;;  %14525 = vmatmul.mubr.msk.f32.gmra.mxu0 %vm1154_vm1, %v5907_v3  ;;  %v5912_v28 = vld [vmem:[#allocation3 + $0xdc] sm:$0xff] }
 0x4f4   :  { %v5713_v32 = vpop.f32.mrf.mxu1  ;;  %v5474_v53 = vadd.f32 %v5328_v2, %v18839_v51  ;;  %14527 = vmatprep.mubr.msk.f32.mxu0 %vm15595_vm3, %v22264_v20 }
 0x4f5   :  { %v14265_v56 = vpop.f32.mrf.mxu0 }
 0x4f6   :  { %v14370_v16 = vpop.f32.mrf.mxu1  ;;  %v19139_v23 = vadd.f32 %v5713_v32, %v5474_v53 }
 0x4f7   :  { %v5333_v57 = vpop.f32.mrf.mxu0  ;;  %14528 = vmatmul.mubr.msk.f32.gmra.mxu0 %vm1154_vm1, %v5908_v47  ;;  %v5913_v16 = vld [vmem:[#allocation3 + $0xe4] sm:$0xff] }
 0x4f8   :  { %v5718_v21 = vpop.f32.mrf.mxu1  ;;  %v5475_v30 = vadd.f32 %v5333_v57, %v18854_v12  ;;  %14530 = vmatprep.mubr.msk.f32.mxu0 %vm15595_vm3, %v22264_v20 }
 0x4f9   :  { %v14268_v14 = vpop.f32.mrf.mxu0 }
 0x4fa   :  { %v14373_v35 = vpop.f32.mrf.mxu1  ;;  %v19145_v51 = vadd.f32 %v5718_v21, %v5475_v30 }
 0x4fb   :  { %v5338_v40 = vpop.f32.mrf.mxu0  ;;  %14531 = vmatmul.mubr.msk.f32.gmra.mxu0 %vm1154_vm1, %v5909_v10  ;;  %v5914_v35 = vld [vmem:[#allocation3 + $0xec] sm:$0xff] }
 0x4fc   :  { %v5723_v19 = vpop.f32.mrf.mxu1  ;;  %v5476_v38 = vadd.f32 %v5338_v40, %v18866_v48  ;;  %14533 = vmatprep.mubr.msk.f32.mxu0 %vm15595_vm3, %v22264_v20 }
 0x4fd   :  { %v14271_v62 = vpop.f32.mrf.mxu0 }
 0x4fe   :  { %v14376_v8 = vpop.f32.mrf.mxu1  ;;  %v19151_v12 = vadd.f32 %v5723_v19, %v5476_v38 }
 0x4ff   :  { %v5343_v15 = vpop.f32.mrf.mxu0  ;;  %14534 = vmatmul.mubr.msk.f32.gmra.mxu0 %vm1154_vm1, %v5910_v1  ;;  %v5915_v8 = vld [vmem:[#allocation3 + $0xf4] sm:$0xff] }
 0x500   :  { %v5728_v42 = vpop.f32.mrf.mxu1  ;;  %v5477_v34 = vadd.f32 %v5343_v15, %v18878_v31  ;;  %14536 = vmatprep.mubr.msk.f32.mxu0 %vm15595_vm3, %v22264_v20 }
 0x501   :  { %v14274_v24 = vpop.f32.mrf.mxu0 }
 0x502   :  { %v14379_v58 = vpop.f32.mrf.mxu1  ;;  %v19157_v48 = vadd.f32 %v5728_v42, %v5477_v34 }
 0x503   :  { %v5348_v4 = vpop.f32.mrf.mxu0  ;;  %14537 = vmatmul.mubr.msk.f32.gmra.mxu0 %vm1154_vm1, %v5911_v33  ;;  %v5916_v58 = vld [vmem:[#allocation3 + $0xfc] sm:$0xff] }
 0x504   :  { %v5733_v39 = vpop.f32.mrf.mxu1  ;;  %v5478_v29 = vadd.f32 %v5348_v4, %v18890_v43  ;;  %14539 = vmatprep.mubr.msk.f32.mxu0 %vm15595_vm3, %v22264_v20 }
 0x505   :  { %v14277_v22 = vpop.f32.mrf.mxu0 }
 0x506   :  { %v14382_v13 = vpop.f32.mrf.mxu1  ;;  %v19163_v31 = vadd.f32 %v5733_v39, %v5478_v29  ;;  %v5917_v29 = vld [vmem:[#allocation3 + $0x104] sm:$0xff] }
 0x507   :  { %v5353_v3 = vpop.f32.mrf.mxu0  ;;  %14540 = vmatmul.mubr.msk.f32.gmra.mxu0 %vm1154_vm1, %v5912_v28 }
 0x508   :  { %v5738_v2 = vpop.f32.mrf.mxu1  ;;  %v5479_v32 = vadd.f32 %v5353_v3, %v18902_v46  ;;  %14542 = vmatprep.mubr.msk.f32.mxu0 %vm15595_vm3, %v22264_v20 }
 0x509   :  { %v14280_v53 = vpop.f32.mrf.mxu0 }
 0x50a   :  { %v14385_v56 = vpop.f32.mrf.mxu1  ;;  %v19169_v43 = vadd.f32 %v5738_v2, %v5479_v32  ;;  %v5918_v32 = vld [vmem:[#allocation3 + $0x10c] sm:$0x3] }
 0x50b   :  { %v5358_v47 = vpop.f32.mrf.mxu0  ;;  %14543 = vmatmul.mubr.msk.f32.gmra.mxu0 %vm1154_vm1, %v5913_v16 }
 0x50c   :  { %v5743_v57 = vpop.f32.mrf.mxu1  ;;  %v5480_v21 = vadd.f32 %v5358_v47, %v18917_v0  ;;  %14545 = vmatprep.mubr.msk.f32.mxu0 %vm15595_vm3, %v22264_v20 }
 0x50d   :  { %v14283_v30 = vpop.f32.mrf.mxu0 }
 0x50e   :  { %v14388_v14 = vpop.f32.mrf.mxu1  ;;  %v19175_v46 = vadd.f32 %v5743_v57, %v5480_v21 }
 0x50f   :  { %v5363_v10 = vpop.f32.mrf.mxu0  ;;  %14546 = vmatmul.mubr.msk.f32.gmra.mxu0 %vm1154_vm1, %v5914_v35 }
 0x510   :  { %v5748_v40 = vpop.f32.mrf.mxu1  ;;  %v5481_v19 = vadd.f32 %v5363_v10, %v18932_v36  ;;  %14548 = vmatprep.mubr.msk.f32.mxu0 %vm15595_vm3, %v22264_v20 }
 0x511   :  { %v14286_v38 = vpop.f32.mrf.mxu0 }
 0x512   :  { %v14391_v62 = vpop.f32.mrf.mxu1  ;;  %v19181_v0 = vadd.f32 %v5748_v40, %v5481_v19 }
 0x513   :  { %v5368_v1 = vpop.f32.mrf.mxu0  ;;  %14549 = vmatmul.mubr.msk.f32.gmra.mxu0 %vm1154_vm1, %v5915_v8 }
 0x514   :  { %v5753_v15 = vpop.f32.mrf.mxu1  ;;  %v5482_v42 = vadd.f32 %v5368_v1, %v18947_v17  ;;  %14551 = vmatprep.mubr.msk.f32.mxu0 %vm15595_vm3, %v22264_v20 }
 0x515   :  { %v14289_v34 = vpop.f32.mrf.mxu0 }
 0x516   :  { %v14394_v24 = vpop.f32.mrf.mxu1  ;;  %v19187_v36 = vadd.f32 %v5753_v15, %v5482_v42 }
 0x517   :  { %v5373_v33 = vpop.f32.mrf.mxu0  ;;  %14552 = vmatmul.mubr.msk.f32.gmra.mxu0 %vm1154_vm1, %v5916_v58 }
 0x518   :  { %v5758_v4 = vpop.f32.mrf.mxu1  ;;  %v5483_v39 = vadd.f32 %v5373_v33, %v18962_v37  ;;  %14554 = vmatprep.mubr.msk.f32.mxu0 %vm15595_vm3, %v22264_v20 }
 0x519   :  { %v14292_v22 = vpop.f32.mrf.mxu0 }
 0x51a   :  { %v14397_v17 = vpop.f32.mrf.mxu1  ;;  %v19193_v13 = vadd.f32 %v5758_v4, %v5483_v39 }
 0x51b   :  { %v5378_v28 = vpop.f32.mrf.mxu0  ;;  %14555 = vmatmul.mubr.msk.f32.gmra.mxu0 %vm1154_vm1, %v5917_v29 }
 0x51c   :  { %v5763_v3 = vpop.f32.mrf.mxu1  ;;  %v5484_v2 = vadd.f32 %v5378_v28, %v18977_v7  ;;  %14557 = vmatprep.mubr.msk.f32.mxu0 %vm15595_vm3, %v22264_v20 }
 0x51d   :  { %v14295_v53 = vpop.f32.mrf.mxu0 }
 0x51e   :  { %v14400_v37 = vpop.f32.mrf.mxu1  ;;  %v19199_v56 = vadd.f32 %v5763_v3, %v5484_v2 }
 0x51f   :  { %v5383_v16 = vpop.f32.mrf.mxu0  ;;  %14558 = vmatmul.mubr.msk.f32.gmra.mxu0 %vm1154_vm1, %v5918_v32 }
 0x520   :  { %v5768_v47 = vpop.f32.mrf.mxu1  ;;  %v5485_v57 = vadd.f32 %v5383_v16, %v18992_v63  ;;  %14707 = vmatprep.mubr.msk.f32.mxu0 %vm15595_vm3, %v22264_v20 }
 0x521   :  { %v14298_v21 = vpop.f32.mrf.mxu0 }
 0x522   :  { %v14403_v30 = vpop.f32.mrf.mxu1  ;;  %v19205_v7 = vadd.f32 %v5768_v47, %v5485_v57 }
 0x523   :  { %v5388_v14 = vpop.f32.mrf.mxu0 }
 0x524   :  { %v5773_v35 = vpop.f32.mrf.mxu1  ;;  %v5486_v10 = vadd.f32 %v5388_v14, %v19004_v9 }
 0x525   :  { %v14301_v40 = vpop.f32.mrf.mxu0 }
 0x526   :  { %v14406_v19 = vpop.f32.mrf.mxu1  ;;  %v19208_v38 = vadd.f32 %v5773_v35, %v5486_v10 }
 0x527   :  { %v5393_v62 = vpop.f32.mrf.mxu0 }
 0x528   :  { %v5778_v8 = vpop.f32.mrf.mxu1  ;;  %v5487_v1 = vadd.f32 %v5393_v62, %v19016_v55 }
 0x529   :  { %v14304_v63 = vpop.f32.mrf.mxu0 }
 0x52a   :  { %v14409_v15 = vpop.f32.mrf.mxu1  ;;  %v19211_v42 = vadd.f32 %v5778_v8, %v5487_v1 }
 0x52b   :  { %v5398_v34 = vpop.f32.mrf.mxu0 }
 0x52c   :  { %v5783_v24 = vpop.f32.mrf.mxu1  ;;  %v5488_v58 = vadd.f32 %v5398_v34, %v19028_v5 }
 0x52d   :  { %v14307_v33 = vpop.f32.mrf.mxu0 }
 0x52e   :  { %v14412_v4 = vpop.f32.mrf.mxu1  ;;  %v19214_v39 = vadd.f32 %v5783_v24, %v5488_v58 }
 0x52f   :  { %v5403_v9 = vpop.f32.mrf.mxu0 }
 0x530   :  { %v5788_v29 = vpop.f32.mrf.mxu1  ;;  %v5489_v22 = vadd.f32 %v5403_v9, %v19040_v44 }
 0x531   :  { %v14310_v17 = vpop.f32.mrf.mxu0 }
 0x532   :  { %v14415_v28 = vpop.f32.mrf.mxu1  ;;  %v19217_v3 = vadd.f32 %v5788_v29, %v5489_v22 }
 0x533   :  { %v5408_v55 = vpop.f32.mrf.mxu0 }
 0x534   :  { %v5793_v2 = vpop.f32.mrf.mxu1  ;;  %v5490_v32 = vadd.f32 %v5408_v55, %v19049_v18 }
 0x535   :  { %v14313_v53 = vpop.f32.mrf.mxu0 }
 0x536   :  { %v14418_v37 = vpop.f32.mrf.mxu1  ;;  %v19220_v16 = vadd.f32 %v5793_v2, %v5490_v32 }
 0x537   :  { %v5413_v5 = vpop.f32.mrf.mxu0 }
 0x538   :  { %v5798_v47 = vpop.f32.mrf.mxu1  ;;  %v5491_v57 = vadd.f32 %v5413_v5, %v19055_v61 }
 0x539   :  { %v14316_v21 = vpop.f32.mrf.mxu0 }
 0x53a   :  { %v14421_v30 = vpop.f32.mrf.mxu1  ;;  %v19223_v14 = vadd.f32 %v5798_v47, %v5491_v57 }
 0x53b   :  { %v5418_v44 = vpop.f32.mrf.mxu0 }
 0x53c   :  { %v5803_v35 = vpop.f32.mrf.mxu1  ;;  %v5492_v10 = vadd.f32 %v5418_v44, %v19061_v27 }
 0x53d   :  { %v14319_v40 = vpop.f32.mrf.mxu0 }
 0x53e   :  { %v14424_v19 = vpop.f32.mrf.mxu1  ;;  %v19226_v62 = vadd.f32 %v5803_v35, %v5492_v10 }
 0x53f   :  { %v5423_v18 = vpop.f32.mrf.mxu0 }
 0x540   :  { %v5808_v8 = vpop.f32.mrf.mxu1  ;;  %v5493_v1 = vadd.f32 %v5423_v18, %v19067_v25 }
 0x541   :  { %v14322_v63 = vpop.f32.mrf.mxu0 }
 0x542   :  { %v14427_v15 = vpop.f32.mrf.mxu1  ;;  %v19229_v34 = vadd.f32 %v5808_v8, %v5493_v1 }
 0x543   :  { %v5428_v61 = vpop.f32.mrf.mxu0 }
 0x544   :  { %v5813_v24 = vpop.f32.mrf.mxu1  ;;  %v5494_v58 = vadd.f32 %v5428_v61, %v19073_v59 }
 0x545   :  { %v14325_v33 = vpop.f32.mrf.mxu0 }
 0x546   :  { %v14430_v4 = vpop.f32.mrf.mxu1  ;;  %v19232_v9 = vadd.f32 %v5813_v24, %v5494_v58 }
 0x547   :  { %v5433_v27 = vpop.f32.mrf.mxu0 }
 0x548   :  { %v5818_v29 = vpop.f32.mrf.mxu1  ;;  %v5495_v22 = vadd.f32 %v5433_v27, %v19079_v45 }
 0x549   :  { %v14328_v17 = vpop.f32.mrf.mxu0 }
 0x54a   :  { %v14433_v28 = vpop.f32.mrf.mxu1  ;;  %v19235_v55 = vadd.f32 %v5818_v29, %v5495_v22 }
 0x54b   :  { %v5438_v25 = vpop.f32.mrf.mxu0 }
 0x54c   :  { %v5823_v2 = vpop.f32.mrf.mxu1  ;;  %v5496_v32 = vadd.f32 %v5438_v25, %v19085_v54 }
 0x54d   :  { %v14331_v53 = vpop.f32.mrf.mxu0 }
 0x54e   :  { %v14436_v37 = vpop.f32.mrf.mxu1  ;;  %v19238_v5 = vadd.f32 %v5823_v2, %v5496_v32 }
 0x54f   :  { %v5443_v59 = vpop.f32.mrf.mxu0 }
 0x550   :  { %v5828_v47 = vpop.f32.mrf.mxu1  ;;  %v5497_v57 = vadd.f32 %v5443_v59, %v19091_v49 }
 0x551   :  { %v14334_v21 = vpop.f32.mrf.mxu0 }
 0x552   :  { %v14439_v30 = vpop.f32.mrf.mxu1  ;;  %v19241_v44 = vadd.f32 %v5828_v47, %v5497_v57 }
 0x553   :  { %v5448_v45 = vpop.f32.mrf.mxu0 }
 0x554   :  { %v5833_v35 = vpop.f32.mrf.mxu1  ;;  %v5498_v10 = vadd.f32 %v5448_v45, %v19097_v26  ;;  %v19253_v26 = vld [vmem:[%s21928_s6 + $0x28] sm:$0xf] }
 0x555   :  { %v14337_v40 = vpop.f32.mrf.mxu0  ;;  %22279 = vst [vmem:[#allocation19_spill] sm:$0xff] %v19253_v26  ;;  %14561 = vmatpush3.msk.msra.mxu1 %vm3038_vm2, %v19253_v26 }
 0x556   :  { %v14442_v19 = vpop.f32.mrf.mxu1  ;;  %v19244_v18 = vadd.f32 %v5833_v35, %v5498_v10  ;;  %14562 = vmatprep.subr.mxu1 %v22264_v20 }
 0x557   :  { %v5453_v54 = vpop.f32.mrf.mxu0  ;;  %v19281_v19 = vld [vmem:[%s21928_s6 + $0x10] sm:$0xff] }
 0x558   :  { %v5838_v8 = vpop.f32.mrf.mxu1  ;;  %v5499_v1 = vadd.f32 %v5453_v54, %v19103_v60  ;;  %22283 = vst [vmem:[#allocation23_spill] sm:$0xff] %v19281_v19 }
 0x559   :  { %v14340_v63 = vpop.f32.mrf.mxu0 }
 0x55a   :  { %v14445_v15 = vpop.f32.mrf.mxu1  ;;  %v19247_v61 = vadd.f32 %v5838_v8, %v5499_v1  ;;  %v19288_v8 = vld [vmem:[%s21928_s6 + $0x8] sm:$0xff]  ;;  %v19295_v63 = vld [vmem:[%s21928_s6] sm:$0xff] }
 0x55b   :  { %v5458_v49 = vpop.f32.mrf.mxu0  ;;  %22284 = vst [vmem:[#allocation24_spill] sm:$0xff] %v19288_v8  ;;  %22285 = vst [vmem:[#allocation25_spill] sm:$0xff] %v19295_v63 }
 0x55c   :  { %v5843_v24 = vpop.f32.mrf.mxu1  ;;  %v5500_v58 = vadd.f32 %v5458_v49, %v19109_v50 }
 0x55d   :  { %v14343_v33 = vpop.f32.mrf.mxu0 }
 0x55e   :  { %v14448_v4 = vpop.f32.mrf.mxu1  ;;  %v19257_v27 = vadd.f32 %v5843_v24, %v5500_v58 }
 0x55f   :  { %v5463_v60 = vpop.f32.mrf.mxu0  ;;  %v19301_v4 = vpop.permute.xlu0 %6275 }
 0x560   :  { %v5848_v29 = vpop.f32.mrf.mxu1  ;;  %v5501_v22 = vadd.f32 %v5463_v60, %v19115_v6  ;;  %v19269_v6 = vld [vmem:[%s21928_s6 + $0x20] sm:$0xff]  ;;  %22286 = vst [vmem:[#allocation26_spill] sm:$0xff] %v19301_v4 }
 0x561   :  { %v14346_v17 = vpop.f32.mrf.mxu0  ;;  %22281 = vst [vmem:[#allocation21_spill] sm:$0xff] %v19269_v6  ;;  %14563 = vmatpush3.msra.mxu1 %v19269_v6 }
 0x562   :  { %v14451_v50 = vpop.f32.mrf.mxu1  ;;  %v19261_v28 = vadd.f32 %v5848_v29, %v5501_v22  ;;  %14564 = vmatprep.subr.mxu1 %v22264_v20  ;;  %v19303_v29 = vpop.permute.xlu1 %6285 }
 0x563   :  { %v5468_v25 = vpop.f32.mrf.mxu0  ;;  %22287 = vst [vmem:[#allocation27_spill] sm:$0xff] %v19303_v29  ;;  %v19305_v50 = vpop.permute.xlu0 %6280 }
 0x564   :  { %v5853_v2 = vpop.f32.mrf.mxu1  ;;  %v5502_v32 = vadd.f32 %v5468_v25, %v19121_v52  ;;  %v19274_v52 = vld [vmem:[%s21928_s6 + $0x18] sm:$0xff]  ;;  %22288 = vst [vmem:[#allocation28_spill] sm:$0xff] %v19305_v50 }
 0x565   :  { %v14349_v53 = vpop.f32.mrf.mxu0  ;;  %22282 = vst [vmem:[#allocation22_spill] sm:$0xff] %v19274_v52  ;;  %14565 = vmatpush3.msra.mxu1 %v19274_v52 }
 0x566   :  { %v14454_v37 = vpop.f32.mrf.mxu1  ;;  %v19264_v59 = vadd.f32 %v5853_v2, %v5502_v32  ;;  %14566 = vmatprep.subr.mxu1 %v22264_v20  ;;  %v19309_v2 = vpop.permute.xlu1 %6290 }
 0x567   :  { %v6088_v47 = vpop.f32.mrf.mxu0  ;;  %14567 = vmatpush3.msra.mxu1 %v19281_v19  ;;  %22289 = vst [vmem:[#allocation29_spill] sm:$0xff] %v19309_v2  ;;  %v19313_v37 = vpop.permute.xlu0 %6295 }
 0x568   :  { %22280 = vst [vmem:[#allocation20_spill] sm:$0xff] %v19264_v59  ;;  %14568 = vmatprep.subr.mxu1 %v22264_v20  ;;  %22290 = vst [vmem:[#allocation30_spill] sm:$0xff] %v19313_v37 }
 0x569   :  { %v14469_v57 = vpop.f32.mrf.mxu0  ;;  %14569 = vmatpush3.msra.mxu1 %v19288_v8 }
 0x56a   :  { %14570 = vmatprep.subr.mxu1 %v22264_v20 }
 0x56b   :  { %v6093_v21 = vpop.f32.mrf.mxu0  ;;  %14571 = vmatpush3.msra.mxu1 %v19295_v63 }
 0x56c   :  { %14575 = vmatprep.subr.mxu1 %v22264_v20  ;;  %v19330_v8 = vadd.f32 %v6093_v21, %v19133_v11 }
 0x56d   :  { %v14472_v30 = vpop.f32.mrf.mxu0 }
 0x56e   :  { %v19315_v30 = vpop.permute.xlu1 %6300  ;;  %22295 = vst [vmem:[#allocation35_spill] sm:$0xff] %v19330_v8 }
 0x56f   :  { %v6098_v45 = vpop.f32.mrf.mxu0  ;;  %22291 = vst [vmem:[#allocation31_spill] sm:$0xff] %v19315_v30 }
 0x570   :  { %v19340_v52 = vadd.f32 %v6098_v45, %v19139_v23 }
 0x571   :  { %v14475_v35 = vpop.f32.mrf.mxu0 }
 0x572   :  { %22298 = vst [vmem:[#allocation38_spill] sm:$0xff] %v19340_v52 }
 0x573   :  { %v6103_v10 = vpop.f32.mrf.mxu0 }
 0x575   :  { %v14478_v40 = vpop.f32.mrf.mxu0 }
 0x577   :  { %v6108_v54 = vpop.f32.mrf.mxu0 }
 0x578   :  { %v19356_v23 = vadd.f32 %v6108_v54, %v19151_v12 }
 0x579   :  { %v14481_v1 = vpop.f32.mrf.mxu0 }
 0x57a   :  { %v19319_v1 = vpop.permute.xlu0 %6305  ;;  %22301 = vst [vmem:[#allocation41_spill] sm:$0xff] %v19356_v23 }
 0x57b   :  { %v6113_v15 = vpop.f32.mrf.mxu0  ;;  %22292 = vst [vmem:[#allocation32_spill] sm:$0xff] %v19319_v1 }
 0x57d   :  { %v14484_v49 = vpop.f32.mrf.mxu0 }
 0x57f   :  { %v6118_v24 = vpop.f32.mrf.mxu0 }
 0x580   :  { %v19368_v20 = vadd.f32 %v6118_v24, %v19163_v31 }
 0x581   :  { %v14487_v58 = vpop.f32.mrf.mxu0 }
 0x582   :  { %v19323_v58 = vpop.permute.xlu1 %6310 }
 0x583   :  { %v6123_v33 = vpop.f32.mrf.mxu0  ;;  %22293 = vst [vmem:[#allocation33_spill] sm:$0xff] %v19323_v58 }
 0x585   :  { %v14490_v60 = vpop.f32.mrf.mxu0 }
 0x586   :  { %v19335_v19 = vpop.permute.xlu1 %6320 }
 0x587   :  { %v6128_v22 = vpop.f32.mrf.mxu0  ;;  %22297 = vst [vmem:[#allocation37_spill] sm:$0xff] %v19335_v19 }
 0x589   :  { %v14493_v17 = vpop.f32.mrf.mxu0 }
 0x58a   :  { %v19360_v45 = vpop.permute.xlu1 %6330 }
 0x58b   :  { %v19307_v25 = vpop.f32.mrf.mxu0  ;;  %22302 = vst [vmem:[#allocation42_spill] sm:$0xff] %v19360_v45 }
 0x58d   :  { %v14496_v32 = vpop.f32.mrf.mxu0 }
 0x58e   :  { %v19327_v32 = vpop.permute.xlu0 %6315 }
 0x58f   :  { %v19311_v53 = vpop.f32.mrf.mxu0  ;;  %22294 = vst [vmem:[#allocation34_spill] sm:$0xff] %v19327_v32 }
 0x591   :  { %v14499_v57 = vpop.f32.mrf.mxu0 }
 0x592   :  { %v19333_v57 = vadd.f32 %v6088_v47, %v19127_v41  ;;  %v19349_v21 = vpop.permute.xlu0 %6325  ;;  %v6430_v47 = vmul.f32 %v19303_v29, %v19340_v52 }
 0x593   :  { %v19317_v35 = vpop.f32.mrf.mxu0  ;;  %22300 = vst [vmem:[#allocation40_spill] sm:$0xff] %v19349_v21 }
 0x594   :  { %22296 = vst [vmem:[#allocation36_spill] sm:$0xff] %v19333_v57  ;;  %v6428_v11 = vmul.f32 %v19301_v4, %v19333_v57  ;;  %v6611_v54 = vmul.f32 %v6430_v47, %v19340_v52  ;;  %v6462_v31 = vsel %vm1154_vm1, %v6430_v47, 0.0 }
 0x595   :  { %v14502_v40 = vpop.f32.mrf.mxu0 }
 0x596   :  { %v6609_v4 = vmul.f32 %v6428_v11, %v19333_v57 }
 0x597   :  { %v19321_v49 = vpop.f32.mrf.mxu0 }
 0x598   :  { %v6640_v52 = vsel %vm1154_vm1, %v6609_v4, 0.0 }
 0x599   :  { %v14505_v60 = vpop.f32.mrf.mxu0 }
 0x59a   :  { %v19343_v60 = vadd.f32 %v6103_v10, %v19145_v51 }
 0x59b   :  { %v19325_v17 = vpop.f32.mrf.mxu0 }
 0x59c   :  { %22299 = vst [vmem:[#allocation39_spill] sm:$0xff] %v19343_v60  ;;  %v6431_v51 = vmul.f32 %v19309_v2, %v19343_v60  ;;  %v6432_v2 = vmul.f32 %v19313_v37, %v19356_v23 }
 0x59d   :  { %v14508_v63 = vpop.f32.mrf.mxu0 }
 0x59e   :  { %v6429_v63 = vmul.f32 %v19305_v50, %v19330_v8  ;;  %v19364_v50 = vadd.f32 %v6113_v15, %v19157_v48  ;;  %v19378_v48 = vpop.permute.xlu0 %6335  ;;  %v6464_v47 = vsel %vm1154_vm1, %v6431_v51, 0.0 }
 0x59f   :  { %v19337_v40 = vpop.f32.mrf.mxu0  ;;  %22303 = vst [vmem:[#allocation43_spill] sm:$0xff] %v19378_v48 }
 0x5a0   :  { %v6460_v12 = vsel %vm1154_vm1, %v6429_v63, 0.0  ;;  %v6433_v24 = vmul.f32 %v19315_v30, %v19364_v50  ;;  %v19398_v30 = vadd.f32 %v6128_v22, %v19175_v46 }
 0x5a1   :  { %v14511_v6 = vpop.f32.mrf.mxu0 }
 0x5a2   :  { %v6610_v6 = vmul.f32 %v6429_v63, %v19330_v8  ;;  %v6612_v8 = vmul.f32 %v6431_v51, %v19343_v60  ;;  %v19385_v63 = vadd.f32 %v6123_v33, %v19169_v43  ;;  %v19390_v60 = vpop.permute.xlu1 %6340  ;;  %v19407_v51 = vadd.f32 %v19307_v25, %v19181_v0 }
 0x5a3   :  { %v19351_v41 = vpop.f32.mrf.mxu0  ;;  %22304 = vst [vmem:[#allocation44_spill] sm:$0xff] %v19390_v60 }
 0x5a4   :  { %v6641_v57 = vsel %vm1154_vm1, %v6610_v6, 0.0  ;;  %v6643_v6 = vsel %vm1154_vm1, %v6611_v54, 0.0  ;;  %v6645_v4 = vsel %vm1154_vm1, %v6612_v8, 0.0  ;;  %v6435_v59 = vmul.f32 %v19323_v58, %v19385_v63 }
 0x5a5   :  { %v14514_v10 = vpop.f32.mrf.mxu0  ;;  %v6642_v43 = vadd.f32 %v6641_v57, %v6640_v52  ;;  %v19410_v52 = vpop.permute.xlu0 %6345  ;;  %v19420_v57 = vadd.f32 %v19311_v53, %v19187_v36 }
 0x5a6   :  { %v6459_v10 = vsel %vm1154_vm1, %v6428_v11, 0.0  ;;  %v6434_v11 = vmul.f32 %v19319_v1, %v19368_v20  ;;  %v6614_v1 = vmul.f32 %v6433_v24, %v19364_v50  ;;  %22305 = vst [vmem:[#allocation45_spill] sm:$0xff] %v19410_v52 }
 0x5a7   :  { %v19370_v29 = vpop.f32.mrf.mxu0  ;;  %v6461_v37 = vadd.f32 %v6460_v12, %v6459_v10  ;;  %v6466_v10 = vsel %vm1154_vm1, %v6432_v2, 0.0  ;;  %v6644_v54 = vadd.f32 %v6643_v6, %v6642_v43  ;;  %v19426_v6 = vpop.permute.xlu1 %6350  ;;  %v6616_v43 = vmul.f32 %v6435_v59, %v19385_v63 }
 0x5a8   :  { %v6615_v46 = vmul.f32 %v6434_v11, %v19368_v20  ;;  %22306 = vst [vmem:[#allocation46_spill] sm:$0xff] %v19426_v6 }
 0x5a9   :  { %v14517_v15 = vpop.f32.mrf.mxu0  ;;  %v6463_v33 = vadd.f32 %v6462_v31, %v6461_v37  ;;  %v6436_v37 = vmul.f32 %v19327_v32, %v19398_v30  ;;  %v6646_v0 = vadd.f32 %v6645_v4, %v6644_v54  ;;  %v19424_v31 = vadd.f32 %v19317_v35, %v19193_v13 }
 0x5aa   :  { %v6613_v15 = vmul.f32 %v6432_v2, %v19356_v23  ;;  %v6468_v2 = vsel %vm1154_vm1, %v6433_v24, 0.0  ;;  %v6470_v24 = vsel %vm1154_vm1, %v6434_v11, 0.0  ;;  %v6472_v13 = vsel %vm1154_vm1, %v6435_v59, 0.0 }
 0x5ab   :  { %v19392_v26 = vpop.f32.mrf.mxu0  ;;  %v6465_v23 = vadd.f32 %v6464_v47, %v6463_v33  ;;  %v6437_v33 = vmul.f32 %v19335_v19, %v19407_v51  ;;  %v6617_v35 = vmul.f32 %v6436_v37, %v19398_v30  ;;  %v6439_v54 = vmul.f32 %v19360_v45, %v19424_v31 }
 0x5ac   :  { %v6647_v8 = vsel %vm1154_vm1, %v6613_v15, 0.0  ;;  %v6649_v15 = vsel %vm1154_vm1, %v6614_v1, 0.0  ;;  %v19440_v1 = vadd.f32 %v19321_v49, %v19199_v56  ;;  %v6474_v59 = vsel %vm1154_vm1, %v6436_v37, 0.0 }
 0x5ad   :  { %v14520_v12 = vpop.f32.mrf.mxu0  ;;  %v6467_v25 = vadd.f32 %v6466_v10, %v6465_v23  ;;  %v6648_v36 = vadd.f32 %v6647_v8, %v6646_v0  ;;  %v6651_v23 = vsel %vm1154_vm1, %v6615_v46, 0.0  ;;  %v19444_v8 = vpop.permute.xlu0 %6355  ;;  %v6618_v0 = vmul.f32 %v6437_v33, %v19407_v51 }
 0x5ae   :  { %v6438_v12 = vmul.f32 %v19349_v21, %v19420_v57  ;;  %22307 = vst [vmem:[#allocation47_spill] sm:$0xff] %v19444_v8 }
 0x5af   :  { %v19412_v22 = vpop.f32.mrf.mxu0  ;;  %v6469_v53 = vadd.f32 %v6468_v2, %v6467_v25  ;;  %v6650_v11 = vadd.f32 %v6649_v15, %v6648_v36  ;;  %v6653_v2 = vsel %vm1154_vm1, %v6616_v43, 0.0  ;;  %v19451_v25 = vadd.f32 %v19325_v17, %v19205_v7  ;;  %v19457_v15 = vpop.permute.xlu1 %6360 }
 0x5b0   :  { %22309 = vst [vmem:[#allocation49_spill] sm:$0xff] %v19457_v15  ;;  %v6655_v36 = vsel %vm1154_vm1, %v6617_v35, 0.0  ;;  %v6476_v43 = vsel %vm1154_vm1, %v6437_v33, 0.0  ;;  %v6619_v37 = vmul.f32 %v6438_v12, %v19420_v57  ;;  %v19471_v33 = vadd.f32 %v19351_v41, %v19211_v42 }
 0x5b1   :  { %v14523_v47 = vpop.f32.mrf.mxu0  ;;  %v6471_v10 = vadd.f32 %v6470_v24, %v6469_v53  ;;  %22308 = vst [vmem:[#allocation48_spill] sm:$0xff] %v19451_v25  ;;  %v6652_v56 = vadd.f32 %v6651_v23, %v6650_v11  ;;  %v6440_v53 = vmul.f32 %v19378_v48, %v19440_v1  ;;  %v6620_v23 = vmul.f32 %v6439_v54, %v19424_v31 }
 0x5b2   :  { %v19455_v47 = vadd.f32 %v19337_v40, %v19208_v38  ;;  %v6657_v38 = vsel %vm1154_vm1, %v6618_v0, 0.0  ;;  %v6478_v40 = vsel %vm1154_vm1, %v6438_v12, 0.0  ;;  %v6441_v11 = vmul.f32 %v19390_v60, %v19451_v25 }
 0x5b3   :  { %v6183_v4 = vpop.f32.mrf.mxu0  ;;  %v6473_v49 = vadd.f32 %v6472_v13, %v6471_v10  ;;  %v6654_v7 = vadd.f32 %v6653_v2, %v6652_v56  ;;  %v19475_v2 = vpop.permute.xlu0 %6365  ;;  %v6659_v56 = vsel %vm1154_vm1, %v6619_v37, 0.0  ;;  %v6480_v0 = vsel %vm1154_vm1, %v6439_v54, 0.0 }
 0x5b4   :  { %22310 = vst [vmem:[#allocation50_spill] sm:$0xff] %v19475_v2  ;;  %v6621_v12 = vmul.f32 %v6440_v53, %v19440_v1  ;;  %v6443_v54 = vmul.f32 %v19426_v6, %v19471_v33  ;;  %v19493_v37 = vadd.f32 %v19392_v26, %v19217_v3  ;;  %v19505_v3 = vadd.f32 %v6183_v4, %v19223_v14 }
 0x5b5   :  { %v14526_v46 = vpop.f32.mrf.mxu0  ;;  %v6475_v17 = vadd.f32 %v6474_v59, %v6473_v49  ;;  %v6656_v35 = vadd.f32 %v6655_v36, %v6654_v7  ;;  %v19482_v49 = vadd.f32 %v19370_v29, %v19214_v39  ;;  %v6661_v36 = vsel %vm1154_vm1, %v6620_v23, 0.0 }
 0x5b6   :  { %v6442_v46 = vmul.f32 %v19410_v52, %v19455_v47  ;;  %v6663_v23 = vsel %vm1154_vm1, %v6621_v12, 0.0  ;;  %v6488_v4 = vsel %vm1154_vm1, %v6443_v54, 0.0 }
 0x5b7   :  { %v6188_v24 = vpop.f32.mrf.mxu0  ;;  %v6477_v10 = vadd.f32 %v6476_v43, %v6475_v17  ;;  %22311 = vst [vmem:[#allocation51_spill] sm:$0xff] %v19482_v49  ;;  %v6658_v42 = vadd.f32 %v6657_v38, %v6656_v35  ;;  %v19485_v43 = vpop.permute.xlu1 %6370  ;;  %v6482_v17 = vsel %vm1154_vm1, %v6440_v53, 0.0  ;;  %v6484_v35 = vsel %vm1154_vm1, %v6441_v11, 0.0 }
 0x5b8   :  { %22312 = vst [vmem:[#allocation52_spill] sm:$0xff] %v19485_v43  ;;  %v6623_v38 = vmul.f32 %v6442_v46, %v19455_v47  ;;  %v6444_v53 = vmul.f32 %v19444_v8, %v19482_v49  ;;  %v19507_v26 = vpop.permute.xlu0 %6375  ;;  %v6486_v12 = vsel %vm1154_vm1, %v6442_v46, 0.0  ;;  %v19522_v46 = vadd.f32 %v6188_v24, %v19226_v62 }
 0x5b9   :  { %v14529_v13 = vpop.f32.mrf.mxu0  ;;  %v6479_v41 = vadd.f32 %v6478_v40, %v6477_v10  ;;  %v6660_v39 = vadd.f32 %v6659_v56, %v6658_v42  ;;  %v19502_v10 = vadd.f32 %v19412_v22, %v19220_v16  ;;  %22313 = vst [vmem:[#allocation53_spill] sm:$0xff] %v19507_v26  ;;  %v6445_v42 = vmul.f32 %v19457_v15, %v19493_v37 }
 0x5ba   :  { %v6622_v13 = vmul.f32 %v6441_v11, %v19451_v25  ;;  %v6624_v11 = vmul.f32 %v6443_v54, %v19471_v33  ;;  %v6667_v22 = vsel %vm1154_vm1, %v6623_v38, 0.0 }
 0x5bb   :  { %v6193_v59 = vpop.f32.mrf.mxu0  ;;  %v6481_v29 = vadd.f32 %v6480_v0, %v6479_v41  ;;  %v6626_v54 = vmul.f32 %v6445_v42, %v19493_v37 }
 0x5bc   :  { %v6665_v0 = vsel %vm1154_vm1, %v6622_v13, 0.0  ;;  %v6446_v13 = vmul.f32 %v19475_v2, %v19502_v10  ;;  %v6669_v38 = vsel %vm1154_vm1, %v6624_v11, 0.0  ;;  %v19535_v24 = vpop.permute.xlu0 %6385 }
 0x5bd   :  { %v14532_v7 = vpop.f32.mrf.mxu0  ;;  %v6483_v25 = vadd.f32 %v6482_v17, %v6481_v29  ;;  %v6625_v17 = vmul.f32 %v6444_v53, %v19482_v49  ;;  %22317 = vst [vmem:[#allocation57_spill] sm:$0xff] %v19535_v24 }
 0x5be   :  { %v6662_v7 = vadd.f32 %v6661_v36, %v6660_v39  ;;  %v19515_v36 = vpop.permute.xlu1 %6380  ;;  %v6627_v11 = vmul.f32 %v6446_v13, %v19502_v10 }
 0x5bf   :  { %v6198_v40 = vpop.f32.mrf.mxu0  ;;  %v6485_v16 = vadd.f32 %v6484_v35, %v6483_v25  ;;  %22314 = vst [vmem:[#allocation54_spill] sm:$0xff] %v19515_v36  ;;  %v6447_v25 = vmul.f32 %v19485_v43, %v19505_v3  ;;  %v6490_v35 = vsel %vm1154_vm1, %v6444_v53, 0.0  ;;  %v6448_v53 = vmul.f32 %v19507_v26, %v19522_v46 }
 0x5c0   :  { %v6664_v41 = vadd.f32 %v6663_v23, %v6662_v7  ;;  %v19530_v7 = vadd.f32 %v6193_v59, %v19229_v34  ;;  %v19533_v62 = vadd.f32 %v6198_v40, %v19232_v9  ;;  %v6673_v40 = vsel %vm1154_vm1, %v6626_v54, 0.0 }
 0x5c1   :  { %v14535_v56 = vpop.f32.mrf.mxu0  ;;  %v6487_v29 = vadd.f32 %v6486_v12, %v6485_v16  ;;  %v6671_v12 = vsel %vm1154_vm1, %v6625_v17, 0.0  ;;  %v6628_v59 = vmul.f32 %v6447_v25, %v19505_v3  ;;  %v6629_v54 = vmul.f32 %v6448_v53, %v19522_v46 }
 0x5c2   :  { %v6666_v39 = vadd.f32 %v6665_v0, %v6664_v41  ;;  %22315 = vst [vmem:[#allocation55_spill] sm:$0xff] %v19530_v7  ;;  %22316 = vst [vmem:[#allocation56_spill] sm:$0xff] %v19533_v62  ;;  %v6492_v41 = vsel %vm1154_vm1, %v6445_v42, 0.0  ;;  %v6449_v17 = vmul.f32 %v19515_v36, %v19530_v7 }
 0x5c3   :  { %v6203_v14 = vpop.f32.mrf.mxu0  ;;  %v6489_v49 = vadd.f32 %v6488_v4, %v6487_v29  ;;  %v6494_v4 = vsel %vm1154_vm1, %v6446_v13, 0.0 }
 0x5c4   :  { %v6668_v56 = vadd.f32 %v6667_v22, %v6666_v39  ;;  %v19543_v22 = vpop.permute.xlu1 %6390  ;;  %v19550_v42 = vadd.f32 %v6203_v14, %v19235_v55  ;;  %v6677_v55 = vsel %vm1154_vm1, %v6628_v59, 0.0  ;;  %v19561_v14 = vpop.permute.xlu0 %6395 }
 0x5c5   :  { %v14538_v23 = vpop.f32.mrf.mxu0  ;;  %v6491_v34 = vadd.f32 %v6490_v35, %v6489_v49  ;;  %22318 = vst [vmem:[#allocation58_spill] sm:$0xff] %v19543_v22  ;;  %v6450_v49 = vmul.f32 %v19535_v24, %v19533_v62  ;;  %v6496_v35 = vsel %vm1154_vm1, %v6447_v25, 0.0  ;;  %22320 = vst [vmem:[#allocation60_spill] sm:$0xff] %v19561_v14 }
 0x5c6   :  { %v6670_v16 = vadd.f32 %v6669_v38, %v6668_v56  ;;  %v6675_v38 = vsel %vm1154_vm1, %v6627_v11, 0.0  ;;  %v6451_v11 = vmul.f32 %v19543_v22, %v19550_v42 }
 0x5c7   :  { %v6208_v0 = vpop.f32.mrf.mxu0  ;;  %v6493_v29 = vadd.f32 %v6492_v41, %v6491_v34  ;;  %v6498_v41 = vsel %vm1154_vm1, %v6448_v53, 0.0 }
 0x5c8   :  { %v6672_v39 = vadd.f32 %v6671_v12, %v6670_v16  ;;  %v19558_v13 = vadd.f32 %v6208_v0, %v19238_v5  ;;  %v6630_v16 = vmul.f32 %v6449_v17, %v19530_v7  ;;  %v6631_v0 = vmul.f32 %v6450_v49, %v19533_v62  ;;  %v19586_v7 = vpop.permute.xlu0 %6405 }
 0x5c9   :  { %v14541_v9 = vpop.f32.mrf.mxu0  ;;  %22322 = vst [vmem:[#allocation62_spill] sm:$0xff] %v19586_v7 }
 0x5ca   :  { %22319 = vst [vmem:[#allocation59_spill] sm:$0xff] %v19558_v13  ;;  %v6674_v56 = vadd.f32 %v6673_v40, %v6672_v39  ;;  %v6495_v9 = vadd.f32 %v6494_v4, %v6493_v29  ;;  %v19571_v40 = vpop.permute.xlu1 %6400  ;;  %v6679_v4 = vsel %vm1154_vm1, %v6629_v54, 0.0  ;;  %v6500_v39 = vsel %vm1154_vm1, %v6449_v17, 0.0 }
 0x5cb   :  { %v6213_v23 = vpop.f32.mrf.mxu0  ;;  %22321 = vst [vmem:[#allocation61_spill] sm:$0xff] %v19571_v40  ;;  %v6452_v53 = vmul.f32 %v19561_v14, %v19558_v13  ;;  %v6683_v62 = vsel %vm1154_vm1, %v6631_v0, 0.0 }
 0x5cc   :  { %v19568_v25 = vadd.f32 %v6213_v23, %v19241_v44  ;;  %v6676_v34 = vadd.f32 %v6675_v38, %v6674_v56  ;;  %v6497_v5 = vadd.f32 %v6496_v35, %v6495_v9  ;;  %v6681_v38 = vsel %vm1154_vm1, %v6630_v16, 0.0 }
 0x5cd   :  { %v14544_v12 = vpop.f32.mrf.mxu0  ;;  %v6502_v35 = vsel %vm1154_vm1, %v6450_v49, 0.0  ;;  %v6632_v56 = vmul.f32 %v6451_v11, %v19550_v42 }
 0x5ce   :  { %v6678_v12 = vadd.f32 %v6677_v55, %v6676_v34  ;;  %v6499_v44 = vadd.f32 %v6498_v41, %v6497_v5  ;;  %v6453_v54 = vmul.f32 %v19571_v40, %v19568_v25  ;;  %v6504_v55 = vsel %vm1154_vm1, %v6451_v11, 0.0 }
 0x5cf   :  { %v6218_v59 = vpop.f32.mrf.mxu0  ;;  %v6633_v41 = vmul.f32 %v6452_v53, %v19558_v13  ;;  %v6685_v0 = vsel %vm1154_vm1, %v6632_v56, 0.0 }
 0x5d0   :  { %v19578_v29 = vadd.f32 %v6218_v59, %v19244_v18  ;;  %v6680_v9 = vadd.f32 %v6679_v4, %v6678_v12  ;;  %v6501_v17 = vadd.f32 %v6500_v39, %v6499_v44  ;;  %v19595_v59 = vpop.permute.xlu1 %6410  ;;  %v6506_v39 = vsel %vm1154_vm1, %v6452_v53, 0.0  ;;  %v19608_v53 = vpop.permute.xlu0 %6415 }
 0x5d1   :  { %v14547_v23 = vpop.f32.mrf.mxu0  ;;  %22324 = vst [vmem:[#allocation64_spill] sm:$0xff] %v19595_v59  ;;  %v6634_v12 = vmul.f32 %v6453_v54, %v19568_v25  ;;  %22326 = vst [vmem:[#allocation66_spill] sm:$0xff] %v19608_v53 }
 0x5d2   :  { %v6454_v16 = vmul.f32 %v19586_v7, %v19578_v29  ;;  %v6682_v34 = vadd.f32 %v6681_v38, %v6680_v9  ;;  %v6503_v5 = vadd.f32 %v6502_v35, %v6501_v17  ;;  %v6508_v38 = vsel %vm1154_vm1, %v6453_v54, 0.0 }
 0x5d3   :  { %v6223_v18 = vpop.f32.mrf.mxu0 }
 0x5d4   :  { %v19593_v49 = vadd.f32 %v6223_v18, %v19247_v61  ;;  %v6684_v44 = vadd.f32 %v6683_v62, %v6682_v34  ;;  %v6505_v23 = vadd.f32 %v6504_v55, %v6503_v5  ;;  %v6687_v61 = vsel %vm1154_vm1, %v6633_v41, 0.0 }
 0x5d5   :  { %v14550_v4 = vpop.f32.mrf.mxu0  ;;  %v6635_v35 = vmul.f32 %v6454_v16, %v19578_v29  ;;  %v6510_v62 = vsel %vm1154_vm1, %v6454_v16, 0.0  ;;  %v19621_v16 = vpop.permute.xlu1 %6420 }
 0x5d6   :  { %22323 = vst [vmem:[#allocation63_spill] sm:$0xff] %v19593_v49  ;;  %v6455_v11 = vmul.f32 %v19595_v59, %v19593_v49  ;;  %v6686_v56 = vadd.f32 %v6685_v0, %v6684_v44  ;;  %v6507_v17 = vadd.f32 %v6506_v39, %v6505_v23  ;;  %v6689_v4 = vsel %vm1154_vm1, %v6634_v12, 0.0  ;;  %22328 = vst [vmem:[#allocation68_spill] sm:$0xff] %v19621_v16 }
 0x5d7   :  { %v6228_v13 = vpop.f32.mrf.mxu0 }
 0x5d8   :  { %v19606_v9 = vadd.f32 %v6228_v13, %v19257_v27  ;;  %v6636_v55 = vmul.f32 %v6455_v11, %v19593_v49  ;;  %v6688_v54 = vadd.f32 %v6687_v61, %v6686_v56  ;;  %v6509_v34 = vadd.f32 %v6508_v38, %v6507_v17 }
 0x5d9   :  { %v14553_v18 = vpop.f32.mrf.mxu0  ;;  %v6691_v27 = vsel %vm1154_vm1, %v6635_v35, 0.0  ;;  %v6512_v13 = vsel %vm1154_vm1, %v6455_v11, 0.0 }
 0x5da   :  { %22325 = vst [vmem:[#allocation65_spill] sm:$0xff] %v19606_v9  ;;  %v6456_v41 = vmul.f32 %v19608_v53, %v19606_v9  ;;  %v6690_v12 = vadd.f32 %v6689_v4, %v6688_v54  ;;  %v6511_v44 = vadd.f32 %v6510_v62, %v6509_v34  ;;  %v6693_v18 = vsel %vm1154_vm1, %v6636_v55, 0.0  ;;  %v22329_v62 = vld [vmem:[#allocation20_spill] sm:$0xff]  ;;  %v19633_v55 = vpop.permute.xlu0 %6425 }
 0x5db   :  { %v6233_v5 = vpop.f32.mrf.mxu0  ;;  %22331 = vst [vmem:[#allocation70_spill] sm:$0xff] %v19633_v55 }
 0x5dc   :  { %v6637_v0 = vmul.f32 %v6456_v41, %v19606_v9  ;;  %v19619_v39 = vadd.f32 %v6233_v5, %v19261_v28  ;;  %v6514_v61 = vsel %vm1154_vm1, %v6456_v41, 0.0  ;;  %v6692_v35 = vadd.f32 %v6691_v27, %v6690_v12 }
 0x5dd   :  { %v14556_v23 = vpop.f32.mrf.mxu0  ;;  %v6513_v56 = vadd.f32 %v6512_v13, %v6511_v44 }
 0x5de   :  { %22327 = vst [vmem:[#allocation67_spill] sm:$0xff] %v19619_v39  ;;  %v6457_v38 = vmul.f32 %v19621_v16, %v19619_v39  ;;  %v6695_v17 = vsel %vm1154_vm1, %v6637_v0, 0.0  ;;  %v6694_v34 = vadd.f32 %v6693_v18, %v6692_v35 }
 0x5df   :  { %v6238_v11 = vpop.f32.mrf.mxu0  ;;  %v6515_v5 = vadd.f32 %v6514_v61, %v6513_v56 }
 0x5e0   :  { %v6516_v28 = vsel %vm1154_vm1, %v6457_v38, 0.0  ;;  %v6638_v4 = vmul.f32 %v6457_v38, %v19619_v39  ;;  %v19631_v54 = vadd.f32 %v6238_v11, %v22329_v62  ;;  %v6696_v13 = vadd.f32 %v6695_v17, %v6694_v34  ;;  %v22332_v17 = vld [vmem:[#allocation19_spill] sm:$0xff] }
 0x5e1   :  { %v14559_v41 = vpop.f32.mrf.mxu0  ;;  %v6517_v0 = vadd.f32 %v6516_v28, %v6515_v5  ;;  %v22333_v28 = vmov 0.0   ;;  %v22334_v5 = vld [vmem:[#allocation21_spill] sm:$0xff] }
 0x5e2   :  { %22330 = vst [vmem:[#allocation69_spill] sm:$0xff] %v19631_v54  ;;  %v6697_v23 = vsel %vm1154_vm1, %v6638_v4, 0.0  ;;  %v6458_v27 = vmul.f32 %v19633_v55, %v19631_v54 }
 0x5e3   :  { %v6698_v38 = vadd.f32 %v6697_v23, %v6696_v13  ;;  %v22335_v23 = vld [vmem:[#allocation22_spill] sm:$0xff] }
 0x5e4   :  { %v6519_v12 = vsel %vm6518_vm5, %v6458_v27, 0.0  ;;  %v6639_v44 = vmul.f32 %v6458_v27, %v19631_v54  ;;  %v11570_v13 = vld [vmem:[%s21929_s5 + $0x58] sm:$0xf] }
 0x5e5   :  { %v6520_v11 = vadd.f32 %v6519_v12, %v6517_v0  ;;  %v7032_v0 = vld [vmem:[%s21929_s5 + $0x28] sm:$0xf]  ;;  %v11569_v12 = vld [vmem:[%s21929_s5 + $0x50] sm:$0xff] }
 0x5e6   :  { %v6699_v18 = vsel %vm6518_vm5, %v6639_v44, 0.0  ;;  %14696 = vmatpush3.msk.msra.mxu0 %vm3038_vm2, %v7032_v0  ;;  %v7031_v44 = vld [vmem:[%s21929_s5 + $0x20] sm:$0xff]  ;;  %v11640_v0 = vld [vmem:[%s21929_s5 + $0x88] sm:$0xf] }
 0x5e7   :  { %v6521_v61 = vrot.slane %v6520_v11, 4  ;;  %v6700_v35 = vadd.f32 %v6699_v18, %v6698_v38  ;;  %14697 = vmatprep.subr.mxu0 %v22333_v28  ;;  %v11568_v38 = vld [vmem:[%s21929_s5 + $0x48] sm:$0xff]  ;;  %v11567_v18 = vld [vmem:[%s21929_s5 + $0x40] sm:$0xff] }
 0x5e8   :  { %14698 = vmatpush3.msra.mxu0 %v7031_v44  ;;  %v19724_v44 = vld [vmem:[%s21930_s13] ss:$0 sm:$0xff] }
 0x5e9   :  { %v6522_v56 = vadd.f32 %v6521_v61, %v6520_v11  ;;  %v6701_v62 = vrot.slane %v6700_v35, 4  ;;  %v7030_v11 = vld [vmem:[%s21929_s5 + $0x18] sm:$0xff]  ;;  %14699 = vmatprep.subr.mxu0 %v22333_v28  ;;  %v7029_v61 = vld [vmem:[%s21929_s5 + $0x10] sm:$0xff]  ;;  %22339 = vst [vmem:[#allocation71_spill] sm:$0xff] %v19724_v44 }
 0x5ea   :  { %14700 = vmatpush3.msra.mxu0 %v7030_v11  ;;  %v22340_v11 = vld [vmem:[#allocation26_spill] sm:$0xff] }
 0x5eb   :  { %v6523_v41 = vrot.slane %v6522_v56, 2  ;;  %v6702_v4 = vadd.f32 %v6701_v62, %v6700_v35  ;;  %14701 = vmatprep.subr.mxu0 %v22333_v28  ;;  %v11566_v35 = vld [vmem:[%s21929_s5 + $0x38] sm:$0xff]  ;;  %v11565_v62 = vld [vmem:[%s21929_s5 + $0x30] sm:$0xff] }
 0x5ec   :  { %14702 = vmatpush3.msra.mxu0 %v7029_v61  ;;  %v22341_v61 = vld [vmem:[#allocation28_spill] sm:$0xff] }
 0x5ed   :  { %v6524_v39 = vadd.f32 %v6523_v41, %v6522_v56  ;;  %v6703_v55 = vrot.slane %v6702_v4, 2  ;;  %v7028_v56 = vld [vmem:[%s21929_s5 + $0x8] sm:$0xff]  ;;  %14703 = vmatprep.subr.mxu0 %v22333_v28  ;;  %v7027_v41 = vld [vmem:[%s21929_s5] sm:$0xff] }
 0x5ee   :  { %14704 = vmatpush3.msra.mxu0 %v7028_v56  ;;  %v22342_v56 = vld [vmem:[#allocation27_spill] sm:$0xff] }
 0x5ef   :  { %v6525_v9 = vrot.slane %v6524_v39, 1  ;;  %v6704_v34 = vadd.f32 %v6703_v55, %v6702_v4  ;;  %v22338_v55 = vld [vmem:[#allocation25_spill] sm:$0xff]  ;;  %v7033_v4 = vld [vmem:[#allocation4 + $0x5] sm:$0xff]  ;;  %14705 = vmatprep.subr.mxu0 %v22333_v28 }
 0x5f0   :  { %14706 = vmatpush3.msra.mxu0 %v7027_v41  ;;  %v22343_v41 = vld [vmem:[#allocation29_spill] sm:$0xff] }
 0x5f1   :  { %v6526_v49 = vadd.f32 %v6525_v9, %v6524_v39  ;;  %v6705_v27 = vrot.slane %v6704_v34, 1  ;;  %v22336_v9 = vld [vmem:[#allocation23_spill] sm:$0xff]  ;;  %14905 = vmatprep.subr.mxu0 %v22333_v28 }
 0x5f3   :  { %14573 = vmatmul.mubr.msk.f32.vlgmr.msra.gmra.mxu1 %vm1154_vm1, %v6526_v49  ;;  %v22337_v49 = vld [vmem:[#allocation24_spill] sm:$0xff]  ;;  %v6706_v39 = vadd.f32 %v6705_v27, %v6704_v34 }
 0x5f4   :  { %14576 = vmatpush3.msk.msra.mxu1 %vm3038_vm2, %v22332_v17  ;;  %14587 = vmatprep.mubr.msk.f32.mxu1 %vm15595_vm3, %v22333_v28  ;;  %v6996_v17 = vld [vmem:[#allocation4 + $0x4] sm:$0xff] }
 0x5f5   :  { %14577 = vmatprep.subr.mxu1 %v22333_v28  ;;  %14708 = vmatmul.mubr.msk.f32.vlgmr.msra.gmra.mxu0 %vm1154_vm1, %v6996_v17  ;;  %v22344_v17 = vld [vmem:[#allocation30_spill] sm:$0xff] }
 0x5f6   :  { %14578 = vmatpush3.msra.mxu1 %v22334_v5  ;;  %14710 = vmatprep.mubr.msk.f32.mxu0 %vm15595_vm3, %v22333_v28 }
 0x5f7   :  { %14579 = vmatprep.subr.mxu1 %v22333_v28 }
 0x5f8   :  { %14580 = vmatpush3.msra.mxu1 %v22335_v23 }
 0x5f9   :  { %14581 = vmatprep.subr.mxu1 %v22333_v28 }
 0x5fa   :  { %14582 = vmatpush3.msra.mxu1 %v22336_v9 }
 0x5fb   :  { %14583 = vmatprep.subr.mxu1 %v22333_v28 }
 0x5fc   :  { %14584 = vmatpush3.msra.mxu1 %v22337_v49 }
 0x5fd   :  { %14585 = vmatprep.subr.mxu1 %v22333_v28 }
 0x5fe   :  { %14586 = vmatpush3.msra.mxu1 %v22338_v55 }
 0x5ff   :  { %14588 = vmatmul.mubr.msk.f32.vlgmr.msra.gmra.mxu1 %vm1154_vm1, %v6706_v39  ;;  %14590 = vmatprep.subr.mxu1 %v22333_v28 }
 0x600   :  { %14602 = vmatprep.mubr.msk.f32.mxu1 %vm15595_vm3, %v22333_v28  ;;  %14591 = vmatpush3.msk.msra.mxu1 %vm3038_vm2, %v11570_v13 }
 0x601   :  { %14592 = vmatprep.subr.mxu1 %v22333_v28 }
 0x602   :  { %14593 = vmatpush3.msra.mxu1 %v11569_v12  ;;  %v6792_v12 = vlaneseq }
 0x603   :  { %14594 = vmatprep.subr.mxu1 %v22333_v28 }
 0x604   :  { %14595 = vmatpush3.msra.mxu1 %v11568_v38  ;;  %v6793_v38 = vshrl.u32 %v6792_v12, 7  ;;  %v19771_v12 = vmul.f32 %v19724_v44, %v19349_v21  ;;  %v19793_v21 = vmul.f32 %v19724_v44, %v19426_v6  ;;  %v19813_v6 = vmul.f32 %v19724_v44, %v19457_v15 }
 0x605   :  { %14596 = vmatprep.subr.mxu1 %v22333_v28  ;;  %v19846_v15 = vmul.f32 %v19724_v44, %v19543_v22  ;;  %v11677_v22 = vld [vmem:[%s21929_s5 + $0xb0] sm:$0xff] }
 0x606   :  { %14597 = vmatpush3.msra.mxu1 %v11567_v18  ;;  %v19728_v18 = vmul.f32 %v19724_v44, %v22340_v11 }
 0x607   :  { %14598 = vmatprep.subr.mxu1 %v22333_v28 }
 0x608   :  { %14599 = vmatpush3.msra.mxu1 %v11566_v35  ;;  %v19732_v35 = vmul.f32 %v19724_v44, %v22341_v61  ;;  %v22356_v61 = vld [vmem:[#allocation38_spill] sm:$0xff] }
 0x609   :  { %14600 = vmatprep.subr.mxu1 %v22333_v28 }
 0x60a   :  { %14601 = vmatpush3.msra.mxu1 %v11565_v62  ;;  %v19736_v62 = vmul.f32 %v19724_v44, %v22342_v56 }
 0x60b   :  { %14603 = vmatmul.mubr.msk.f32.vlgmr.msra.gmra.mxu1 %vm1154_vm1, %v7033_v4  ;;  %14800 = vmatprep.subr.mxu1 %v22333_v28  ;;  %v19740_v4 = vmul.f32 %v19724_v44, %v22343_v41  ;;  %v22354_v41 = vld [vmem:[#allocation36_spill] sm:$0xff] }
 0x60c   :  { %14605 = vmatprep.mubr.msk.f32.mxu1 %vm15595_vm3, %v22333_v28  ;;  %14801 = vmatpush3.msk.msra.mxu1 %vm3038_vm2, %v11640_v0  ;;  %v6784_v0 = vld [vmem:[%s21931_s8] sm:$0x1] }
 0x60d   :  { %14802 = vmatprep.subr.mxu1 %v22333_v28 }
 0x6b3   :  { %v6605_v34 = vpop.f32.mrf.mxu1 }
 0x6b4   :  { %v6780_v23 = vmul.f32 0.00068587105, %v6605_v34  ;;  %v19744_v34 = vmul.f32 %v19724_v44, %v22344_v17  ;;  %v19789_v17 = vmul.f32 %v19724_v44, %v19410_v52  ;;  %v19809_v52 = vmul.f32 %v19724_v44, %v19535_v24 }
 0x6b5   :  { %v14574_v5 = vpop.f32.mrf.mxu1 }
 0x6b6   :  { %v6782_v9 = vmul.f32 %v6780_v23, %v6780_v23  ;;  %v22345_v5 = vld [vmem:[#allocation31_spill] sm:$0xff] }
 0x6bf   :  { %v6776_v27 = vpop.f32.mrf.mxu1 }
 0x6c0   :  { %v6781_v49 = vmul.f32 0.00068587105, %v6776_v27  ;;  %v19748_v27 = vmul.f32 %v19724_v44, %v22345_v5  ;;  %v19785_v5 = vmul.f32 %v19724_v44, %v19390_v60  ;;  %v19805_v60 = vmul.f32 %v19724_v44, %v19507_v26 }
 0x6c1   :  { %v14589_v39 = vpop.f32.mrf.mxu1  ;;  %v19825_v26 = vmul.f32 %v19724_v44, %v19608_v53  ;;  %v11678_v53 = vld [vmem:[%s21929_s5 + $0xb8] sm:$0xf] }
 0x6c2   :  { %v6783_v55 = vsub.f32 %v6781_v49, %v6782_v9  ;;  %v22346_v9 = vld [vmem:[#allocation32_spill] sm:$0xff]  ;;  %v19756_v39 = vmul.f32 %v19724_v44, %v19323_v58  ;;  %v19775_v58 = vmul.f32 %v19724_v44, %v19360_v45  ;;  %v19797_v45 = vmul.f32 %v19724_v44, %v19444_v8  ;;  %14906 = vmatpush3.msk.msra.mxu0 %vm3038_vm2, %v11678_v53  ;;  %v22357_v53 = vld [vmem:[#allocation39_spill] sm:$0xff] }
 0x6c3   :  { %v19752_v49 = vmul.f32 %v19724_v44, %v22346_v9  ;;  %v19781_v9 = vsub.s32 0, %v6793_v38  ;;  %v19801_v38 = vmul.f32 %v19724_v44, %v19475_v2  ;;  %v19817_v8 = vmul.f32 %v19724_v44, %v19561_v14  ;;  %22350 = vst [vmem:[#allocation75_spill] sm:$0xff] %v19825_v26  ;;  %14907 = vmatprep.subr.mxu0 %v22333_v28 }
 0x6c4   :  { %v6785_v13 = vadd.f32 1e-05, %v6783_v55  ;;  %v19760_v55 = vmul.f32 %v19724_v44, %v19327_v32  ;;  %v19779_v32 = vmul.f32 %v19724_v44, %v19378_v48  ;;  %v19821_v2 = vmul.f32 %v19724_v44, %v19586_v7  ;;  %14908 = vmatpush3.msra.mxu0 %v11677_v22 }
 0x6c5   :  { %22347 = vst [vmem:[#allocation72_spill] sm:$0xff] %v19781_v9  ;;  %22348 = vst [vmem:[#allocation73_spill] sm:$0xff] %v19817_v8  ;;  %v19836_v14 = vmul.f32 %v19724_v44, %v19515_v36  ;;  %v19854_v36 = vmul.f32 %v19724_v44, %v19595_v59  ;;  %v22355_v59 = vld [vmem:[#allocation35_spill] sm:$0xff]  ;;  %14909 = vmatprep.subr.mxu0 %v22333_v28 }
 0x6c6   :  { %15590 = vrsqrt.f32 %v6785_v13  ;;  %v19764_v13 = vmul.f32 %v19724_v44, %v19335_v19  ;;  %22349 = vst [vmem:[#allocation74_spill] sm:$0xff] %v19821_v2 }
 0x6c7   :  { %22352 = vst [vmem:[#allocation77_spill] sm:$0xff] %v19854_v36 }
 0x6d3   :  { %v15591_v19 = vpop.eup %15590 }
 0x6d4   :  { %v6787_v48 = vmul.f32 %v15591_v19, %v6784_v0  ;;  %v6788_v19 = vld [vmem:[%s21932_s9] sm:$0x1]  ;;  %v19832_v0 = vmul.f32 %v19724_v44, %v19485_v43  ;;  %v19850_v43 = vmul.f32 %v19724_v44, %v19571_v40 }
 0x6d6   :  { %v6789_v24 = vmul.f32 %v6787_v48, %v6780_v23  ;;  %v19839_v7 = vrot.slane %v6787_v48, %v19781_v9  ;;  %22351 = vst [vmem:[#allocation76_spill] sm:$0xff] %v19850_v43  ;;  %v19858_v48 = vmul.f32 %v19724_v44, %v19621_v16  ;;  %v11639_v23 = vld [vmem:[%s21929_s5 + $0x80] sm:$0xff] }
 0x6d7   :  { %14803 = vmatpush3.msra.mxu1 %v11639_v23 }
 0x6d8   :  { %22353 = vst [vmem:[#allocation78_spill] sm:$0xff] %v19858_v48  ;;  %v6790_v40 = vsub.f32 %v6788_v19, %v6789_v24  ;;  %v6797_v56 = vmul.f32 %v19839_v7, %v22354_v41  ;;  %v6798_v11 = vmul.f32 %v19839_v7, %v22355_v59  ;;  %v6799_v16 = vmul.f32 %v19839_v7, %v22356_v61  ;;  %v22358_v48 = vld [vmem:[#allocation41_spill] sm:$0xff] }
 0x6d9   :  { %v6800_v44 = vmul.f32 %v19839_v7, %v22357_v53  ;;  %v6801_v26 = vmul.f32 %v19839_v7, %v22358_v48  ;;  %v6802_v24 = vmul.f32 %v19839_v7, %v19364_v50  ;;  %v6803_v41 = vmul.f32 %v19839_v7, %v19368_v20  ;;  %v11638_v50 = vld [vmem:[%s21929_s5 + $0x78] sm:$0xff]  ;;  %v22359_v48 = vld [vmem:[#allocation48_spill] sm:$0xff]  ;;  %14804 = vmatprep.subr.mxu1 %v22333_v28 }
 0x6da   :  { %v19883_v59 = vrot.slane %v6790_v40, %v19781_v9  ;;  %v6804_v61 = vmul.f32 %v19839_v7, %v19385_v63  ;;  %v6805_v19 = vmul.f32 %v19839_v7, %v19398_v30  ;;  %v6806_v53 = vmul.f32 %v19839_v7, %v19407_v51  ;;  %v11676_v51 = vld [vmem:[%s21929_s5 + $0xa8] sm:$0xff]  ;;  %14805 = vmatpush3.msra.mxu1 %v11638_v50 }
 0x6db   :  { %v6807_v20 = vmul.f32 %v19839_v7, %v19420_v57  ;;  %v6808_v40 = vmul.f32 %v19839_v7, %v19424_v31  ;;  %v6809_v63 = vmul.f32 %v19839_v7, %v19440_v1  ;;  %v6810_v30 = vmul.f32 %v19839_v7, %v22359_v48  ;;  %v11637_v1 = vld [vmem:[%s21929_s5 + $0x70] sm:$0xff]  ;;  %14910 = vmatpush3.msra.mxu0 %v11676_v51  ;;  %v11636_v51 = vld [vmem:[%s21929_s5 + $0x68] sm:$0xff] }
 0x6dc   :  { %v6834_v22 = vadd.f32 %v19883_v59, %v6797_v56  ;;  %v6835_v23 = vadd.f32 %v19883_v59, %v6798_v11  ;;  %v6836_v57 = vadd.f32 %v19883_v59, %v6799_v16  ;;  %v6837_v31 = vadd.f32 %v19883_v59, %v6800_v44  ;;  %v11675_v16 = vld [vmem:[%s21929_s5 + $0xa0] sm:$0xff]  ;;  %14806 = vmatprep.subr.mxu1 %v22333_v28 }
 0x6dd   :  { %v6838_v48 = vadd.f32 %v19883_v59, %v6801_v26  ;;  %v6839_v9 = vadd.f32 %v19883_v59, %v6802_v24  ;;  %v6840_v36 = vadd.f32 %v19883_v59, %v6803_v41  ;;  %v6841_v56 = vadd.f32 %v19883_v59, %v6804_v61  ;;  %14911 = vmatprep.subr.mxu0 %v22333_v28 }
 0x6de   :  { %v6865_v44 = vmax.f32 %v6834_v22, 0.0  ;;  %v6866_v11 = vmax.f32 %v6835_v23, 0.0  ;;  %v6867_v2 = vmax.f32 %v6836_v57, 0.0  ;;  %v6868_v54 = vmax.f32 %v6837_v31, 0.0  ;;  %14807 = vmatpush3.msra.mxu1 %v11637_v1  ;;  %14912 = vmatpush3.msra.mxu0 %v11675_v16 }
 0x6df   :  { %v6869_v43 = vmax.f32 %v6838_v48, 0.0  ;;  %v6870_v26 = vmax.f32 %v6839_v9, 0.0  ;;  %v6871_v8 = vmax.f32 %v6840_v36, 0.0  ;;  %v6872_v24 = vmax.f32 %v6841_v56, 0.0  ;;  %14808 = vmatprep.subr.mxu1 %v22333_v28  ;;  %14913 = vmatprep.subr.mxu0 %v22333_v28 }
 0x6e0   :  { %v6934_v41 = vmul.f32 %v19728_v18, %v6865_v44  ;;  %v6935_v61 = vmul.f32 %v19732_v35, %v6866_v11  ;;  %v6936_v50 = vmul.f32 %v19736_v62, %v6867_v2  ;;  %v6937_v22 = vmul.f32 %v19740_v4, %v6868_v54  ;;  %v11674_v2 = vld [vmem:[%s21929_s5 + $0x98] sm:$0xff]  ;;  %v11635_v35 = vld [vmem:[%s21929_s5 + $0x60] sm:$0xff]  ;;  %14809 = vmatpush3.msra.mxu1 %v11636_v51 }
 0x6e1   :  { %v6938_v9 = vmul.f32 %v19744_v34, %v6869_v43  ;;  %v6939_v36 = vmul.f32 %v19748_v27, %v6870_v26  ;;  %v6940_v23 = vmul.f32 %v19752_v49, %v6871_v8  ;;  %v6941_v57 = vmul.f32 %v19756_v39, %v6872_v24  ;;  %v11673_v49 = vld [vmem:[%s21929_s5 + $0x90] sm:$0xff]  ;;  %14914 = vmatpush3.msra.mxu0 %v11674_v2 }
 0x6e2   :  { %6965 = vst.msk [vmem:[#allocation4 + $0x10] sm:$0xff] %vm1154_vm1, %v6934_v41  ;;  %6966 = vst.msk [vmem:[#allocation4 + $0x18] sm:$0xff] %vm1154_vm1, %v6935_v61  ;;  %v6842_v43 = vadd.f32 %v19883_v59, %v6805_v19  ;;  %v6843_v8 = vadd.f32 %v19883_v59, %v6806_v53  ;;  %v6844_v54 = vadd.f32 %v19883_v59, %v6807_v20  ;;  %14810 = vmatprep.subr.mxu1 %v22333_v28 }
 0x6e3   :  { %6967 = vst.msk [vmem:[#allocation4 + $0x20] sm:$0xff] %vm1154_vm1, %v6936_v50  ;;  %6968 = vst.msk [vmem:[#allocation4 + $0x28] sm:$0xff] %vm1154_vm1, %v6937_v22  ;;  %v6845_v18 = vadd.f32 %v19883_v59, %v6808_v40  ;;  %v6846_v62 = vadd.f32 %v19883_v59, %v6809_v63  ;;  %v6847_v4 = vadd.f32 %v19883_v59, %v6810_v30  ;;  %14915 = vmatprep.subr.mxu0 %v22333_v28 }
 0x6e4   :  { %6969 = vst.msk [vmem:[#allocation4 + $0x30] sm:$0xff] %vm1154_vm1, %v6938_v9  ;;  %6970 = vst.msk [vmem:[#allocation4 + $0x38] sm:$0xff] %vm1154_vm1, %v6939_v36  ;;  %v6811_v34 = vmul.f32 %v19839_v7, %v19455_v47  ;;  %v6812_v27 = vmul.f32 %v19839_v7, %v19471_v33  ;;  %v6873_v39 = vmax.f32 %v6842_v43, 0.0  ;;  %v6874_v19 = vmax.f32 %v6843_v8, 0.0  ;;  %14811 = vmatpush3.msra.mxu1 %v11635_v35 }
 0x6e5   :  { %6971 = vst.msk [vmem:[#allocation4 + $0x40] sm:$0xff] %vm1154_vm1, %v6940_v23  ;;  %6972 = vst.msk [vmem:[#allocation4 + $0x48] sm:$0xff] %vm1154_vm1, %v6941_v57  ;;  %v6875_v53 = vmax.f32 %v6844_v54, 0.0  ;;  %v6876_v20 = vmax.f32 %v6845_v18, 0.0  ;;  %v6877_v40 = vmax.f32 %v6846_v62, 0.0  ;;  %v6878_v63 = vmax.f32 %v6847_v4, 0.0  ;;  %14916 = vmatpush3.msra.mxu0 %v11673_v49  ;;  %15010 = vmatprep.subr.mxu1 %v22333_v28 }
 0x6e6   :  { %v6848_v30 = vadd.f32 %v19883_v59, %v6811_v34  ;;  %v6849_v47 = vadd.f32 %v19883_v59, %v6812_v27  ;;  %v6942_v33 = vmul.f32 %v19760_v55, %v6873_v39  ;;  %v6943_v31 = vmul.f32 %v19764_v13, %v6874_v19  ;;  %15115 = vmatprep.subr.mxu0 %v22333_v28  ;;  %v22362_v23 = vld [vmem:[#allocation56_spill] sm:$0xff] }
 0x6e7   :  { %v6944_v1 = vmul.f32 %v19771_v12, %v6875_v53  ;;  %v6945_v48 = vmul.f32 %v19775_v58, %v6876_v20  ;;  %v6946_v56 = vmul.f32 %v19779_v32, %v6877_v40  ;;  %v6947_v16 = vmul.f32 %v19785_v5, %v6878_v63  ;;  %v22360_v58 = vld [vmem:[#allocation51_spill] sm:$0xff]  ;;  %v22365_v40 = vld [vmem:[#allocation65_spill] sm:$0xff] }
 0x6e8   :  { %v6879_v44 = vmax.f32 %v6848_v30, 0.0  ;;  %v6880_v11 = vmax.f32 %v6849_v47, 0.0  ;;  %6973 = vst.msk [vmem:[#allocation4 + $0x50] sm:$0xff] %vm1154_vm1, %v6942_v33  ;;  %6974 = vst.msk [vmem:[#allocation4 + $0x58] sm:$0xff] %vm1154_vm1, %v6943_v31  ;;  %v6813_v55 = vmul.f32 %v19839_v7, %v22360_v58  ;;  %v6814_v32 = vmul.f32 %v19839_v7, %v19493_v37  ;;  %v22361_v37 = vld [vmem:[#allocation55_spill] sm:$0xff] }
 0x6e9   :  { %6975 = vst.msk [vmem:[#allocation4 + $0x60] sm:$0xff] %vm1154_vm1, %v6944_v1  ;;  %6976 = vst.msk [vmem:[#allocation4 + $0x68] sm:$0xff] %vm1154_vm1, %v6945_v48  ;;  %v6815_v5 = vmul.f32 %v19839_v7, %v19502_v10  ;;  %v6816_v13 = vmul.f32 %v19839_v7, %v19505_v3  ;;  %v7034_v12 = vld [vmem:[#allocation4 + $0xd] sm:$0xff]  ;;  %v6817_v61 = vmul.f32 %v19839_v7, %v19522_v46  ;;  %v7035_v2 = vld [vmem:[#allocation4 + $0x15] sm:$0xff] }
 0x6ea   :  { %v6997_v26 = vld [vmem:[#allocation4 + $0xc] sm:$0xff]  ;;  %6977 = vst.msk [vmem:[#allocation4 + $0x70] sm:$0xff] %vm1154_vm1, %v6946_v56  ;;  %6978 = vst.msk [vmem:[#allocation4 + $0x78] sm:$0xff] %vm1154_vm1, %v6947_v16  ;;  %v6948_v24 = vmul.f32 %v19789_v17, %v6879_v44  ;;  %v6949_v41 = vmul.f32 %v19793_v21, %v6880_v11  ;;  %v6818_v50 = vmul.f32 %v19839_v7, %v22361_v37  ;;  %14606 = vmatmul.mubr.msk.f32.gmra.mxu1 %vm1154_vm1, %v7034_v12  ;;  %v6998_v43 = vld [vmem:[#allocation4 + $0x14] sm:$0xff] }
 0x6eb   :  { %14711 = vmatmul.mubr.msk.f32.gmra.mxu0 %vm1154_vm1, %v6997_v26  ;;  %v6850_v10 = vadd.f32 %v19883_v59, %v6813_v55  ;;  %v6851_v3 = vadd.f32 %v19883_v59, %v6814_v32  ;;  %v6852_v22 = vadd.f32 %v19883_v59, %v6815_v5  ;;  %14608 = vmatprep.mubr.msk.f32.mxu1 %vm15595_vm3, %v22333_v28  ;;  %v7036_v19 = vld [vmem:[#allocation4 + $0x1d] sm:$0xff]  ;;  %v22364_v53 = vld [vmem:[#allocation63_spill] sm:$0xff] }
 0x6ec   :  { %14713 = vmatprep.mubr.msk.f32.mxu0 %vm15595_vm3, %v22333_v28  ;;  %6979 = vst.msk [vmem:[#allocation4 + $0x80] sm:$0xff] %vm1154_vm1, %v6948_v24  ;;  %6980 = vst.msk [vmem:[#allocation4 + $0x88] sm:$0xff] %vm1154_vm1, %v6949_v41  ;;  %v6853_v21 = vadd.f32 %v19883_v59, %v6816_v13  ;;  %v6854_v46 = vadd.f32 %v19883_v59, %v6817_v61  ;;  %v6855_v17 = vadd.f32 %v19883_v59, %v6818_v50  ;;  %v22366_v30 = vld [vmem:[#allocation67_spill] sm:$0xff]  ;;  %v22369_v61 = vld [vmem:[#allocation69_spill] sm:$0xff] }
 0x6ed   :  { %v6881_v51 = vmax.f32 %v6850_v10, 0.0  ;;  %v6882_v9 = vmax.f32 %v6851_v3, 0.0  ;;  %v6883_v36 = vmax.f32 %v6852_v22, 0.0  ;;  %v6819_v57 = vmul.f32 %v19839_v7, %v22362_v23  ;;  %v7037_v55 = vld [vmem:[#allocation4 + $0x25] sm:$0xff]  ;;  %v22371_v3 = vld [vmem:[#allocation77_spill] sm:$0xff] }
 0x6ee   :  { %v6884_v8 = vmax.f32 %v6853_v21, 0.0  ;;  %v6885_v54 = vmax.f32 %v6854_v46, 0.0  ;;  %v6886_v18 = vmax.f32 %v6855_v17, 0.0  ;;  %v6820_v35 = vmul.f32 %v19839_v7, %v19550_v42  ;;  %14609 = vmatmul.mubr.msk.f32.gmra.mxu1 %vm1154_vm1, %v7035_v2  ;;  %v7000_v32 = vld [vmem:[#allocation4 + $0x24] sm:$0xff] }
 0x6ef   :  { %14714 = vmatmul.mubr.msk.f32.gmra.mxu0 %vm1154_vm1, %v6998_v43  ;;  %v6950_v62 = vmul.f32 %v19797_v45, %v6881_v51  ;;  %v6951_v4 = vmul.f32 %v19813_v6, %v6882_v9  ;;  %v6952_v34 = vmul.f32 %v19801_v38, %v6883_v36  ;;  %14611 = vmatprep.mubr.msk.f32.mxu1 %vm15595_vm3, %v22333_v28  ;;  %v22363_v38 = vld [vmem:[#allocation59_spill] sm:$0xff]  ;;  %v22370_v50 = vld [vmem:[#allocation74_spill] sm:$0xff] }
 0x6f0   :  { %14716 = vmatprep.mubr.msk.f32.mxu0 %vm15595_vm3, %v22333_v28  ;;  %v6953_v27 = vmul.f32 %v19832_v0, %v6884_v8  ;;  %v6954_v42 = vmul.f32 %v19805_v60, %v6885_v54  ;;  %v6955_v49 = vmul.f32 %v19836_v14, %v6886_v18  ;;  %v6856_v45 = vadd.f32 %v19883_v59, %v6819_v57  ;;  %v6999_v60 = vld [vmem:[#allocation4 + $0x1c] sm:$0xff]  ;;  %v22372_v21 = vld [vmem:[#allocation75_spill] sm:$0xff]  ;;  %v7002_v18 = vld [vmem:[#allocation4 + $0x34] sm:$0xff] }
 0x6f1   :  { %6981 = vst.msk [vmem:[#allocation4 + $0x90] sm:$0xff] %vm1154_vm1, %v6950_v62  ;;  %6982 = vst.msk [vmem:[#allocation4 + $0x98] sm:$0xff] %vm1154_vm1, %v6951_v4  ;;  %v6857_v6 = vadd.f32 %v19883_v59, %v6820_v35  ;;  %v6821_v39 = vmul.f32 %v19839_v7, %v22363_v38  ;;  %v6822_v0 = vmul.f32 %v19839_v7, %v19568_v25  ;;  %v7001_v9 = vld [vmem:[#allocation4 + $0x2c] sm:$0xff]  ;;  %v22373_v36 = vld [vmem:[#allocation78_spill] sm:$0xff] }
 0x6f2   :  { %6983 = vst.msk [vmem:[#allocation4 + $0xa0] sm:$0xff] %vm1154_vm1, %v6952_v34  ;;  %6984 = vst.msk [vmem:[#allocation4 + $0xa8] sm:$0xff] %vm1154_vm1, %v6953_v27  ;;  %v6823_v14 = vmul.f32 %v19839_v7, %v19578_v29  ;;  %v6824_v20 = vmul.f32 %v19839_v7, %v22364_v53  ;;  %v6825_v63 = vmul.f32 %v19839_v7, %v22365_v40  ;;  %14612 = vmatmul.mubr.msk.f32.gmra.mxu1 %vm1154_vm1, %v7036_v19  ;;  %v22374_v57 = vld [vmem:[#allocation70_spill] sm:$0xff]  ;;  %v22375_v2 = vld [vmem:[#allocation71_spill] sm:$0xff] }
 0x6f3   :  { %6985 = vst.msk [vmem:[#allocation4 + $0xb0] sm:$0xff] %vm1154_vm1, %v6954_v42  ;;  %6986 = vst.msk [vmem:[#allocation4 + $0xb8] sm:$0xff] %vm1154_vm1, %v6955_v49  ;;  %v6826_v25 = vmul.f32 %v19839_v7, %v22366_v30  ;;  %14717 = vmatmul.mubr.msk.f32.gmra.mxu0 %vm1154_vm1, %v6999_v60  ;;  %v6887_v47 = vmax.f32 %v6856_v45, 0.0  ;;  %v6888_v33 = vmax.f32 %v6857_v6, 0.0  ;;  %v6858_v31 = vadd.f32 %v19883_v59, %v6821_v39  ;;  %v7039_v54 = vld [vmem:[#allocation4 + $0x35] sm:$0xff]  ;;  %v7040_v35 = vld [vmem:[#allocation4 + $0x3d] sm:$0xff] }
 0x6f4   :  { %v6859_v1 = vadd.f32 %v19883_v59, %v6822_v0  ;;  %14614 = vmatprep.mubr.msk.f32.mxu1 %vm15595_vm3, %v22333_v28  ;;  %14719 = vmatprep.mubr.msk.f32.mxu0 %vm15595_vm3, %v22333_v28  ;;  %v6860_v29 = vadd.f32 %v19883_v59, %v6823_v14  ;;  %v6861_v48 = vadd.f32 %v19883_v59, %v6824_v20  ;;  %v7003_v62 = vld [vmem:[#allocation4 + $0x3c] sm:$0xff]  ;;  %v7041_v4 = vld [vmem:[#allocation4 + $0x45] sm:$0xff]  ;;  %v7042_v27 = vld [vmem:[#allocation4 + $0x4d] sm:$0xff] }
 0x6f5   :  { %v6862_v56 = vadd.f32 %v19883_v59, %v6825_v63  ;;  %v6956_v16 = vmul.f32 %v19809_v52, %v6887_v47  ;;  %v6957_v44 = vmul.f32 %v19846_v15, %v6888_v33  ;;  %v6889_v11 = vmax.f32 %v6858_v31, 0.0  ;;  %v22367_v52 = vld [vmem:[#allocation73_spill] sm:$0xff]  ;;  %v22368_v15 = vld [vmem:[#allocation76_spill] sm:$0xff]  ;;  %v7004_v34 = vld [vmem:[#allocation4 + $0x44] sm:$0xff]  ;;  %v7549_v47 = vpop.f32.mrf.mxu0 }
 0x6f6   :  { %v6890_v58 = vmax.f32 %v6859_v1, 0.0  ;;  %v6891_v5 = vmax.f32 %v6860_v29, 0.0  ;;  %v6892_v13 = vmax.f32 %v6861_v48, 0.0  ;;  %v6863_v26 = vadd.f32 %v19883_v59, %v6826_v25  ;;  %14615 = vmatmul.mubr.msk.f32.gmra.mxu1 %vm1154_vm1, %v7037_v55  ;;  %v7005_v42 = vld [vmem:[#allocation4 + $0x4c] sm:$0xff]  ;;  %v7043_v49 = vld [vmem:[#allocation4 + $0x55] sm:$0xff]  ;;  %v7044_v6 = vld [vmem:[#allocation4 + $0x5d] sm:$0xff]  ;;  %v7233_v25 = vpop.f32.mrf.mxu1 }
 0x6f7   :  { %v6893_v12 = vmax.f32 %v6862_v56, 0.0  ;;  %14720 = vmatmul.mubr.msk.f32.gmra.mxu0 %vm1154_vm1, %v7000_v32  ;;  %6987 = vst.msk [vmem:[#allocation4 + $0xc0] sm:$0xff] %vm1154_vm1, %v6956_v16  ;;  %6988 = vst.msk [vmem:[#allocation4 + $0xc8] sm:$0xff] %vm1154_vm1, %v6957_v44  ;;  %v6958_v24 = vmul.f32 %v22367_v52, %v6889_v11  ;;  %v6827_v37 = vmul.f32 %v19839_v7, %v22369_v61  ;;  %14617 = vmatprep.mubr.msk.f32.mxu1 %vm15595_vm3, %v22333_v28  ;;  %v7038_v7 = vld [vmem:[#allocation4 + $0x2d] sm:$0xff]  ;;  %v7007_v38 = vld [vmem:[#allocation4 + $0x5c] sm:$0xff]  ;;  %v14709_v48 = vpop.f32.mrf.mxu0 }
 0x6f8   :  { %v6959_v41 = vmul.f32 %v22368_v15, %v6890_v58  ;;  %14722 = vmatprep.mubr.msk.f32.mxu0 %vm15595_vm3, %v22333_v28  ;;  %v6960_v10 = vmul.f32 %v22370_v50, %v6891_v5  ;;  %v6961_v22 = vmul.f32 %v22371_v3, %v6892_v13  ;;  %v6894_v17 = vmax.f32 %v6863_v26, 0.0  ;;  %v7006_v45 = vld [vmem:[#allocation4 + $0x54] sm:$0xff]  ;;  %v7045_v39 = vld [vmem:[#allocation4 + $0x65] sm:$0xff]  ;;  %v7048_v20 = vld [vmem:[#allocation4 + $0x7d] sm:$0xff]  ;;  %v14604_v29 = vpop.f32.mrf.mxu1 }
 0x6f9   :  { %v6962_v46 = vmul.f32 %v22372_v21, %v6893_v12  ;;  %6989 = vst.msk [vmem:[#allocation4 + $0xd0] sm:$0xff] %vm1154_vm1, %v6958_v24  ;;  %v6864_v51 = vadd.f32 %v19883_v59, %v6827_v37  ;;  %v6933_v43 = vmul.f32 %v22375_v2, %v22374_v57  ;;  %v7008_v0 = vld [vmem:[#allocation4 + $0x64] sm:$0xff]  ;;  %v7046_v19 = vld [vmem:[#allocation4 + $0x6d] sm:$0xff]  ;;  %v7047_v14 = vld [vmem:[#allocation4 + $0x75] sm:$0xff]  ;;  %v20157_v33 = vadd.f32 %v7549_v47, %v7233_v25 }
 0x6fa   :  { %6990 = vst.msk [vmem:[#allocation4 + $0xd8] sm:$0xff] %vm1154_vm1, %v6959_v41  ;;  %6991 = vst.msk [vmem:[#allocation4 + $0xe0] sm:$0xff] %vm1154_vm1, %v6960_v10  ;;  %v6963_v23 = vmul.f32 %v22373_v36, %v6894_v17  ;;  %14618 = vmatmul.mubr.msk.f32.gmra.mxu1 %vm1154_vm1, %v7038_v7  ;;  %v7009_v60 = vld [vmem:[#allocation4 + $0x6c] sm:$0xff]  ;;  %v7010_v53 = vld [vmem:[#allocation4 + $0x74] sm:$0xff] }
 0x6fb   :  { %6992 = vst.msk [vmem:[#allocation4 + $0xe8] sm:$0xff] %vm1154_vm1, %v6961_v22  ;;  %6993 = vst.msk [vmem:[#allocation4 + $0xf0] sm:$0xff] %vm1154_vm1, %v6962_v46  ;;  %14723 = vmatmul.mubr.msk.f32.gmra.mxu0 %vm1154_vm1, %v7001_v9  ;;  %v6895_v8 = vmax.f32 %v6864_v51, 0.0  ;;  %14620 = vmatprep.mubr.msk.f32.mxu1 %vm15595_vm3, %v22333_v28  ;;  %v7011_v40 = vld [vmem:[#allocation4 + $0x7c] sm:$0xff]  ;;  %v7049_v63 = vld [vmem:[#allocation4 + $0x85] sm:$0xff] }
 0x6fc   :  { %14725 = vmatprep.mubr.msk.f32.mxu0 %vm15595_vm3, %v22333_v28  ;;  %6994 = vst.msk [vmem:[#allocation4 + $0xf8] sm:$0xff] %vm1154_vm1, %v6963_v23  ;;  %v7012_v30 = vld [vmem:[#allocation4 + $0x84] sm:$0xff]  ;;  %v7050_v31 = vld [vmem:[#allocation4 + $0x8d] sm:$0xff]  ;;  %v7051_v56 = vld [vmem:[#allocation4 + $0x95] sm:$0xff] }
 0x6fd   :  { %v6964_v59 = vmul.f32 %v6933_v43, %v6895_v8  ;;  %v7013_v1 = vld [vmem:[#allocation4 + $0x8c] sm:$0xff]  ;;  %v7014_v16 = vld [vmem:[#allocation4 + $0x94] sm:$0xff]  ;;  %v7052_v44 = vld [vmem:[#allocation4 + $0x9d] sm:$0xff] }
 0x6fe   :  { %14621 = vmatmul.mubr.msk.f32.gmra.mxu1 %vm1154_vm1, %v7039_v54  ;;  %v7015_v11 = vld [vmem:[#allocation4 + $0x9c] sm:$0xff]  ;;  %v7053_v58 = vld [vmem:[#allocation4 + $0xa5] sm:$0xff]  ;;  %v7054_v32 = vld [vmem:[#allocation4 + $0xad] sm:$0xff] }
 0x6ff   :  { %14726 = vmatmul.mubr.msk.f32.gmra.mxu0 %vm1154_vm1, %v7002_v18  ;;  %6995 = vst.msk [vmem:[#allocation4 + $0x100] sm:$0x3] %vm6518_vm5, %v6964_v59  ;;  %14623 = vmatprep.mubr.msk.f32.mxu1 %vm15595_vm3, %v22333_v28  ;;  %v7016_v55 = vld [vmem:[#allocation4 + $0xa4] sm:$0xff]  ;;  %v7017_v5 = vld [vmem:[#allocation4 + $0xac] sm:$0xff]  ;;  %v7055_v13 = vld [vmem:[#allocation4 + $0xb5] sm:$0xff] }
 0x700   :  { %14728 = vmatprep.mubr.msk.f32.mxu0 %vm15595_vm3, %v22333_v28  ;;  %v7018_v12 = vld [vmem:[#allocation4 + $0xb4] sm:$0xff]  ;;  %v7056_v26 = vld [vmem:[#allocation4 + $0xbd] sm:$0xff]  ;;  %v7057_v24 = vld [vmem:[#allocation4 + $0xc5] sm:$0xff] }
 0x701   :  { %v7019_v52 = vld [vmem:[#allocation4 + $0xbc] sm:$0xff]  ;;  %v7020_v15 = vld [vmem:[#allocation4 + $0xc4] sm:$0xff]  ;;  %v7058_v41 = vld [vmem:[#allocation4 + $0xcd] sm:$0xff] }
 0x702   :  { %14624 = vmatmul.mubr.msk.f32.gmra.mxu1 %vm1154_vm1, %v7040_v35  ;;  %v7021_v61 = vld [vmem:[#allocation4 + $0xcc] sm:$0xff]  ;;  %v7059_v37 = vld [vmem:[#allocation4 + $0xd5] sm:$0xff]  ;;  %v7060_v10 = vld [vmem:[#allocation4 + $0xdd] sm:$0xff] }
 0x703   :  { %14729 = vmatmul.mubr.msk.f32.gmra.mxu0 %vm1154_vm1, %v7003_v62  ;;  %14626 = vmatprep.mubr.msk.f32.mxu1 %vm15595_vm3, %v22333_v28  ;;  %v7022_v50 = vld [vmem:[#allocation4 + $0xd4] sm:$0xff]  ;;  %v7023_v3 = vld [vmem:[#allocation4 + $0xdc] sm:$0xff]  ;;  %v7061_v22 = vld [vmem:[#allocation4 + $0xe5] sm:$0xff] }
 0x704   :  { %14731 = vmatprep.mubr.msk.f32.mxu0 %vm15595_vm3, %v22333_v28  ;;  %v7024_v21 = vld [vmem:[#allocation4 + $0xe4] sm:$0xff]  ;;  %v7062_v46 = vld [vmem:[#allocation4 + $0xed] sm:$0xff]  ;;  %v7063_v51 = vld [vmem:[#allocation4 + $0xf5] sm:$0x3] }
 0x705   :  { %v7025_v17 = vld [vmem:[#allocation4 + $0xec] sm:$0xff]  ;;  %v7026_v7 = vld [vmem:[#allocation4 + $0xf4] sm:$0x3]  ;;  %v11754_v2 = vld [vmem:[%s21929_s5 + $0x118] sm:$0xf] }
 0x706   :  { %14627 = vmatmul.mubr.msk.f32.gmra.mxu1 %vm1154_vm1, %v7041_v4  ;;  %v7703_v9 = vld [vmem:[#allocation4 + $0x6] sm:$0xff]  ;;  %v8088_v36 = vld [vmem:[#allocation4 + $0xf] sm:$0xff]  ;;  %v8089_v8 = vld [vmem:[#allocation4 + $0x17] sm:$0xff] }
 0x707   :  { %14732 = vmatmul.mubr.msk.f32.gmra.mxu0 %vm1154_vm1, %v7004_v34  ;;  %14629 = vmatprep.mubr.msk.f32.mxu1 %vm15595_vm3, %v22333_v28  ;;  %v11716_v23 = vld [vmem:[%s21929_s5 + $0xe8] sm:$0xf]  ;;  %v11715_v59 = vld [vmem:[%s21929_s5 + $0xe0] sm:$0xff]  ;;  %v11753_v54 = vld [vmem:[%s21929_s5 + $0x110] sm:$0xff] }
 0x708   :  { %14734 = vmatprep.mubr.msk.f32.mxu0 %vm15595_vm3, %v22333_v28  ;;  %v7704_v43 = vld [vmem:[#allocation4 + $0xe] sm:$0xff]  ;;  %v7705_v18 = vld [vmem:[#allocation4 + $0x16] sm:$0xff]  ;;  %v8090_v35 = vld [vmem:[#allocation4 + $0x1f] sm:$0xff] }
 0x709   :  { %v11714_v62 = vld [vmem:[%s21929_s5 + $0xd8] sm:$0xff]  ;;  %v11752_v4 = vld [vmem:[%s21929_s5 + $0x108] sm:$0xff] }
 0x70a   :  { %14630 = vmatmul.mubr.msk.f32.gmra.mxu1 %vm1154_vm1, %v7042_v27  ;;  %v7706_v34 = vld [vmem:[#allocation4 + $0x1e] sm:$0xff]  ;;  %v8091_v27 = vld [vmem:[#allocation4 + $0x27] sm:$0xff]  ;;  %v8096_v25 = vld [vmem:[#allocation4 + $0x4f] sm:$0xff] }
 0x70b   :  { %14735 = vmatmul.mubr.msk.f32.gmra.mxu0 %vm1154_vm1, %v7005_v42  ;;  %14632 = vmatprep.mubr.msk.f32.mxu1 %vm15595_vm3, %v22333_v28  ;;  %v11713_v42 = vld [vmem:[%s21929_s5 + $0xd0] sm:$0xff]  ;;  %v7712_v47 = vld [vmem:[#allocation4 + $0x4e] sm:$0xff] }
 0x70c   :  { %14737 = vmatprep.mubr.msk.f32.mxu0 %vm15595_vm3, %v22333_v28  ;;  %v8098_v29 = vld [vmem:[#allocation4 + $0x5f] sm:$0xff] }
 0x70d   :  { %v7714_v48 = vld [vmem:[#allocation4 + $0x5e] sm:$0xff] }
 0x70e   :  { %14633 = vmatmul.mubr.msk.f32.gmra.mxu1 %vm1154_vm1, %v7043_v49  ;;  %v11751_v49 = vld [vmem:[%s21929_s5 + $0x100] sm:$0xff] }
 0x70f   :  { %14738 = vmatmul.mubr.msk.f32.gmra.mxu0 %vm1154_vm1, %v7006_v45  ;;  %14635 = vmatprep.mubr.msk.f32.mxu1 %vm15595_vm3, %v22333_v28  ;;  %v7707_v45 = vld [vmem:[#allocation4 + $0x26] sm:$0xff] }
 0x710   :  { %14740 = vmatprep.mubr.msk.f32.mxu0 %vm15595_vm3, %v22333_v28 }
 0x712   :  { %14636 = vmatmul.mubr.msk.f32.gmra.mxu1 %vm1154_vm1, %v7044_v6  ;;  %v8092_v6 = vld [vmem:[#allocation4 + $0x2f] sm:$0xff] }
 0x713   :  { %14741 = vmatmul.mubr.msk.f32.gmra.mxu0 %vm1154_vm1, %v7007_v38  ;;  %14638 = vmatprep.mubr.msk.f32.mxu1 %vm15595_vm3, %v22333_v28  ;;  %v11712_v38 = vld [vmem:[%s21929_s5 + $0xc8] sm:$0xff] }
 0x714   :  { %14743 = vmatprep.mubr.msk.f32.mxu0 %vm15595_vm3, %v22333_v28 }
 0x716   :  { %14639 = vmatmul.mubr.msk.f32.gmra.mxu1 %vm1154_vm1, %v7045_v39  ;;  %v11750_v39 = vld [vmem:[%s21929_s5 + $0xf8] sm:$0xff] }
 0x717   :  { %14744 = vmatmul.mubr.msk.f32.gmra.mxu0 %vm1154_vm1, %v7008_v0  ;;  %14641 = vmatprep.mubr.msk.f32.mxu1 %vm15595_vm3, %v22333_v28  ;;  %v7708_v0 = vld [vmem:[#allocation4 + $0x2e] sm:$0xff] }
 0x718   :  { %14746 = vmatprep.mubr.msk.f32.mxu0 %vm15595_vm3, %v22333_v28 }
 0x71a   :  { %14642 = vmatmul.mubr.msk.f32.gmra.mxu1 %vm1154_vm1, %v7046_v19  ;;  %v8093_v19 = vld [vmem:[#allocation4 + $0x37] sm:$0xff] }
 0x71b   :  { %14747 = vmatmul.mubr.msk.f32.gmra.mxu0 %vm1154_vm1, %v7009_v60  ;;  %14644 = vmatprep.mubr.msk.f32.mxu1 %vm15595_vm3, %v22333_v28  ;;  %v11711_v60 = vld [vmem:[%s21929_s5 + $0xc0] sm:$0xff] }
 0x71c   :  { %14749 = vmatprep.mubr.msk.f32.mxu0 %vm15595_vm3, %v22333_v28 }
 0x71e   :  { %14645 = vmatmul.mubr.msk.f32.gmra.mxu1 %vm1154_vm1, %v7047_v14  ;;  %v11749_v14 = vld [vmem:[%s21929_s5 + $0xf0] sm:$0xff] }
 0x71f   :  { %14750 = vmatmul.mubr.msk.f32.gmra.mxu0 %vm1154_vm1, %v7010_v53  ;;  %14647 = vmatprep.mubr.msk.f32.mxu1 %vm15595_vm3, %v22333_v28  ;;  %v7709_v53 = vld [vmem:[#allocation4 + $0x36] sm:$0xff] }
 0x720   :  { %14752 = vmatprep.mubr.msk.f32.mxu0 %vm15595_vm3, %v22333_v28 }
 0x722   :  { %14648 = vmatmul.mubr.msk.f32.gmra.mxu1 %vm1154_vm1, %v7048_v20  ;;  %v8094_v20 = vld [vmem:[#allocation4 + $0x3f] sm:$0xff] }
 0x723   :  { %14753 = vmatmul.mubr.msk.f32.gmra.mxu0 %vm1154_vm1, %v7011_v40  ;;  %14650 = vmatprep.mubr.msk.f32.mxu1 %vm15595_vm3, %v22333_v28  ;;  %v7710_v40 = vld [vmem:[#allocation4 + $0x3e] sm:$0xff] }
 0x724   :  { %14755 = vmatprep.mubr.msk.f32.mxu0 %vm15595_vm3, %v22333_v28 }
 0x726   :  { %14651 = vmatmul.mubr.msk.f32.gmra.mxu1 %vm1154_vm1, %v7049_v63  ;;  %v8095_v63 = vld [vmem:[#allocation4 + $0x47] sm:$0xff] }
 0x727   :  { %14756 = vmatmul.mubr.msk.f32.gmra.mxu0 %vm1154_vm1, %v7012_v30  ;;  %14653 = vmatprep.mubr.msk.f32.mxu1 %vm15595_vm3, %v22333_v28  ;;  %v7711_v30 = vld [vmem:[#allocation4 + $0x46] sm:$0xff] }
 0x728   :  { %14758 = vmatprep.mubr.msk.f32.mxu0 %vm15595_vm3, %v22333_v28 }
 0x72a   :  { %14654 = vmatmul.mubr.msk.f32.gmra.mxu1 %vm1154_vm1, %v7050_v31  ;;  %v8097_v31 = vld [vmem:[#allocation4 + $0x57] sm:$0xff] }
 0x72b   :  { %14759 = vmatmul.mubr.msk.f32.gmra.mxu0 %vm1154_vm1, %v7013_v1  ;;  %14656 = vmatprep.mubr.msk.f32.mxu1 %vm15595_vm3, %v22333_v28  ;;  %v7713_v1 = vld [vmem:[#allocation4 + $0x56] sm:$0xff] }
 0x72c   :  { %14761 = vmatprep.mubr.msk.f32.mxu0 %vm15595_vm3, %v22333_v28 }
 0x72e   :  { %14657 = vmatmul.mubr.msk.f32.gmra.mxu1 %vm1154_vm1, %v7051_v56  ;;  %v8099_v56 = vld [vmem:[#allocation4 + $0x67] sm:$0xff] }
 0x72f   :  { %14762 = vmatmul.mubr.msk.f32.gmra.mxu0 %vm1154_vm1, %v7014_v16  ;;  %14659 = vmatprep.mubr.msk.f32.mxu1 %vm15595_vm3, %v22333_v28  ;;  %v7715_v16 = vld [vmem:[#allocation4 + $0x66] sm:$0xff] }
 0x730   :  { %14764 = vmatprep.mubr.msk.f32.mxu0 %vm15595_vm3, %v22333_v28 }
 0x732   :  { %14660 = vmatmul.mubr.msk.f32.gmra.mxu1 %vm1154_vm1, %v7052_v44  ;;  %v8100_v44 = vld [vmem:[#allocation4 + $0x6f] sm:$0xff] }
 0x733   :  { %14765 = vmatmul.mubr.msk.f32.gmra.mxu0 %vm1154_vm1, %v7015_v11  ;;  %14662 = vmatprep.mubr.msk.f32.mxu1 %vm15595_vm3, %v22333_v28  ;;  %v7716_v11 = vld [vmem:[#allocation4 + $0x6e] sm:$0xff] }
 0x734   :  { %14767 = vmatprep.mubr.msk.f32.mxu0 %vm15595_vm3, %v22333_v28 }
 0x736   :  { %14663 = vmatmul.mubr.msk.f32.gmra.mxu1 %vm1154_vm1, %v7053_v58  ;;  %v8101_v58 = vld [vmem:[#allocation4 + $0x77] sm:$0xff] }
 0x737   :  { %14768 = vmatmul.mubr.msk.f32.gmra.mxu0 %vm1154_vm1, %v7016_v55  ;;  %14665 = vmatprep.mubr.msk.f32.mxu1 %vm15595_vm3, %v22333_v28  ;;  %v7717_v55 = vld [vmem:[#allocation4 + $0x76] sm:$0xff] }
 0x738   :  { %14770 = vmatprep.mubr.msk.f32.mxu0 %vm15595_vm3, %v22333_v28 }
 0x73a   :  { %14666 = vmatmul.mubr.msk.f32.gmra.mxu1 %vm1154_vm1, %v7054_v32  ;;  %v8102_v32 = vld [vmem:[#allocation4 + $0x7f] sm:$0xff] }
 0x73b   :  { %14771 = vmatmul.mubr.msk.f32.gmra.mxu0 %vm1154_vm1, %v7017_v5  ;;  %14668 = vmatprep.mubr.msk.f32.mxu1 %vm15595_vm3, %v22333_v28  ;;  %v7718_v5 = vld [vmem:[#allocation4 + $0x7e] sm:$0xff] }
 0x73c   :  { %14773 = vmatprep.mubr.msk.f32.mxu0 %vm15595_vm3, %v22333_v28 }
 0x73e   :  { %14669 = vmatmul.mubr.msk.f32.gmra.mxu1 %vm1154_vm1, %v7055_v13  ;;  %v8103_v13 = vld [vmem:[#allocation4 + $0x87] sm:$0xff] }
 0x73f   :  { %14774 = vmatmul.mubr.msk.f32.gmra.mxu0 %vm1154_vm1, %v7018_v12  ;;  %14671 = vmatprep.mubr.msk.f32.mxu1 %vm15595_vm3, %v22333_v28  ;;  %v7719_v12 = vld [vmem:[#allocation4 + $0x86] sm:$0xff] }
 0x740   :  { %14776 = vmatprep.mubr.msk.f32.mxu0 %vm15595_vm3, %v22333_v28 }
 0x742   :  { %14672 = vmatmul.mubr.msk.f32.gmra.mxu1 %vm1154_vm1, %v7056_v26  ;;  %v8104_v26 = vld [vmem:[#allocation4 + $0x8f] sm:$0xff] }
 0x743   :  { %14777 = vmatmul.mubr.msk.f32.gmra.mxu0 %vm1154_vm1, %v7019_v52  ;;  %14674 = vmatprep.mubr.msk.f32.mxu1 %vm15595_vm3, %v22333_v28  ;;  %v7720_v52 = vld [vmem:[#allocation4 + $0x8e] sm:$0xff] }
 0x744   :  { %14779 = vmatprep.mubr.msk.f32.mxu0 %vm15595_vm3, %v22333_v28 }
 0x746   :  { %14675 = vmatmul.mubr.msk.f32.gmra.mxu1 %vm1154_vm1, %v7057_v24  ;;  %v8105_v24 = vld [vmem:[#allocation4 + $0x97] sm:$0xff] }
 0x747   :  { %14780 = vmatmul.mubr.msk.f32.gmra.mxu0 %vm1154_vm1, %v7020_v15  ;;  %14677 = vmatprep.mubr.msk.f32.mxu1 %vm15595_vm3, %v22333_v28  ;;  %v7721_v15 = vld [vmem:[#allocation4 + $0x96] sm:$0xff] }
 0x748   :  { %14782 = vmatprep.mubr.msk.f32.mxu0 %vm15595_vm3, %v22333_v28 }
 0x74a   :  { %14678 = vmatmul.mubr.msk.f32.gmra.mxu1 %vm1154_vm1, %v7058_v41  ;;  %v8106_v41 = vld [vmem:[#allocation4 + $0x9f] sm:$0xff] }
 0x74b   :  { %14783 = vmatmul.mubr.msk.f32.gmra.mxu0 %vm1154_vm1, %v7021_v61  ;;  %14680 = vmatprep.mubr.msk.f32.mxu1 %vm15595_vm3, %v22333_v28 }
 0x74c   :  { %14785 = vmatprep.mubr.msk.f32.mxu0 %vm15595_vm3, %v22333_v28 }
 0x74e   :  { %14681 = vmatmul.mubr.msk.f32.gmra.mxu1 %vm1154_vm1, %v7059_v37 }
 0x74f   :  { %14786 = vmatmul.mubr.msk.f32.gmra.mxu0 %vm1154_vm1, %v7022_v50  ;;  %14683 = vmatprep.mubr.msk.f32.mxu1 %vm15595_vm3, %v22333_v28 }
 0x750   :  { %14788 = vmatprep.mubr.msk.f32.mxu0 %vm15595_vm3, %v22333_v28 }
 0x752   :  { %14684 = vmatmul.mubr.msk.f32.gmra.mxu1 %vm1154_vm1, %v7060_v10 }
 0x753   :  { %14789 = vmatmul.mubr.msk.f32.gmra.mxu0 %vm1154_vm1, %v7023_v3  ;;  %14686 = vmatprep.mubr.msk.f32.mxu1 %vm15595_vm3, %v22333_v28 }
 0x754   :  { %14791 = vmatprep.mubr.msk.f32.mxu0 %vm15595_vm3, %v22333_v28 }
 0x756   :  { %14687 = vmatmul.mubr.msk.f32.gmra.mxu1 %vm1154_vm1, %v7061_v22  ;;  %v7722_v22 = vld [vmem:[#allocation4 + $0x9e] sm:$0xff] }
 0x757   :  { %14792 = vmatmul.mubr.msk.f32.gmra.mxu0 %vm1154_vm1, %v7024_v21  ;;  %14689 = vmatprep.mubr.msk.f32.mxu1 %vm15595_vm3, %v22333_v28  ;;  %v8107_v21 = vld [vmem:[#allocation4 + $0xa7] sm:$0xff] }
 0x758   :  { %14794 = vmatprep.mubr.msk.f32.mxu0 %vm15595_vm3, %v22333_v28 }
 0x75a   :  { %14690 = vmatmul.mubr.msk.f32.gmra.mxu1 %vm1154_vm1, %v7062_v46 }
 0x75b   :  { %14795 = vmatmul.mubr.msk.f32.gmra.mxu0 %vm1154_vm1, %v7025_v17  ;;  %14692 = vmatprep.mubr.msk.f32.mxu1 %vm15595_vm3, %v22333_v28 }
 0x75c   :  { %14797 = vmatprep.mubr.msk.f32.mxu0 %vm15595_vm3, %v22333_v28 }
 0x75e   :  { %14693 = vmatmul.mubr.msk.f32.gmra.mxu1 %vm1154_vm1, %v7063_v51 }
 0x75f   :  { %14798 = vmatmul.mubr.msk.f32.gmra.mxu0 %vm1154_vm1, %v7026_v7  ;;  %14812 = vmatprep.mubr.msk.f32.mxu1 %vm15595_vm3, %v22333_v28 }
 0x760   :  { %14917 = vmatprep.mubr.msk.f32.mxu0 %vm15595_vm3, %v22333_v28 }
 0x762   :  { %14813 = vmatmul.mubr.msk.f32.vlgmr.msra.gmra.mxu1 %vm1154_vm1, %v7703_v9 }
 0x763   :  { %14918 = vmatmul.mubr.msk.f32.vlgmr.msra.gmra.mxu0 %vm1154_vm1, %v8088_v36  ;;  %14815 = vmatprep.mubr.msk.f32.mxu1 %vm15595_vm3, %v22333_v28  ;;  %v7723_v36 = vld [vmem:[#allocation4 + $0xa6] sm:$0xff] }
 0x764   :  { %14920 = vmatprep.mubr.msk.f32.mxu0 %vm15595_vm3, %v22333_v28  ;;  %15011 = vmatpush3.msk.msra.mxu1 %vm3038_vm2, %v11716_v23  ;;  %v8108_v23 = vld [vmem:[#allocation4 + $0xaf] sm:$0xff] }
 0x765   :  { %15116 = vmatpush3.msk.msra.mxu0 %vm3038_vm2, %v11754_v2  ;;  %15012 = vmatprep.subr.mxu1 %v22333_v28 }
 0x766   :  { %15117 = vmatprep.subr.mxu0 %v22333_v28  ;;  %14816 = vmatmul.mubr.msk.f32.gmra.mxu1 %vm1154_vm1, %v7704_v43 }
 0x767   :  { %14921 = vmatmul.mubr.msk.f32.gmra.mxu0 %vm1154_vm1, %v8089_v8  ;;  %14818 = vmatprep.mubr.msk.f32.mxu1 %vm15595_vm3, %v22333_v28 }
 0x768   :  { %14923 = vmatprep.mubr.msk.f32.mxu0 %vm15595_vm3, %v22333_v28  ;;  %15013 = vmatpush3.msra.mxu1 %v11715_v59 }
 0x769   :  { %15118 = vmatpush3.msra.mxu0 %v11753_v54  ;;  %15014 = vmatprep.subr.mxu1 %v22333_v28 }
 0x76a   :  { %15119 = vmatprep.subr.mxu0 %v22333_v28  ;;  %14819 = vmatmul.mubr.msk.f32.gmra.mxu1 %vm1154_vm1, %v7705_v18  ;;  %v7724_v18 = vld [vmem:[#allocation4 + $0xae] sm:$0xff] }
 0x76b   :  { %14924 = vmatmul.mubr.msk.f32.gmra.mxu0 %vm1154_vm1, %v8090_v35  ;;  %14821 = vmatprep.mubr.msk.f32.mxu1 %vm15595_vm3, %v22333_v28  ;;  %v8109_v35 = vld [vmem:[#allocation4 + $0xb7] sm:$0xff] }
 0x76c   :  { %14926 = vmatprep.mubr.msk.f32.mxu0 %vm15595_vm3, %v22333_v28  ;;  %15015 = vmatpush3.msra.mxu1 %v11714_v62 }
 0x76d   :  { %15120 = vmatpush3.msra.mxu0 %v11752_v4  ;;  %15016 = vmatprep.subr.mxu1 %v22333_v28 }
 0x76e   :  { %15121 = vmatprep.subr.mxu0 %v22333_v28  ;;  %14822 = vmatmul.mubr.msk.f32.gmra.mxu1 %vm1154_vm1, %v7706_v34 }
 0x76f   :  { %14927 = vmatmul.mubr.msk.f32.gmra.mxu0 %vm1154_vm1, %v8091_v27  ;;  %14824 = vmatprep.mubr.msk.f32.mxu1 %vm15595_vm3, %v22333_v28 }
 0x770   :  { %14929 = vmatprep.mubr.msk.f32.mxu0 %vm15595_vm3, %v22333_v28  ;;  %15017 = vmatpush3.msra.mxu1 %v11713_v42 }
 0x771   :  { %15122 = vmatpush3.msra.mxu0 %v11751_v49  ;;  %15018 = vmatprep.subr.mxu1 %v22333_v28  ;;  %v7725_v49 = vld [vmem:[#allocation4 + $0xb6] sm:$0xff] }
 0x772   :  { %15123 = vmatprep.subr.mxu0 %v22333_v28  ;;  %14825 = vmatmul.mubr.msk.f32.gmra.mxu1 %vm1154_vm1, %v7707_v45  ;;  %v8110_v45 = vld [vmem:[#allocation4 + $0xbf] sm:$0xff] }
 0x773   :  { %14930 = vmatmul.mubr.msk.f32.gmra.mxu0 %vm1154_vm1, %v8092_v6  ;;  %14827 = vmatprep.mubr.msk.f32.mxu1 %vm15595_vm3, %v22333_v28 }
 0x774   :  { %14932 = vmatprep.mubr.msk.f32.mxu0 %vm15595_vm3, %v22333_v28  ;;  %15019 = vmatpush3.msra.mxu1 %v11712_v38 }
 0x775   :  { %15124 = vmatpush3.msra.mxu0 %v11750_v39  ;;  %15020 = vmatprep.subr.mxu1 %v22333_v28 }
 0x776   :  { %15125 = vmatprep.subr.mxu0 %v22333_v28  ;;  %14828 = vmatmul.mubr.msk.f32.gmra.mxu1 %vm1154_vm1, %v7708_v0 }
 0x777   :  { %14933 = vmatmul.mubr.msk.f32.gmra.mxu0 %vm1154_vm1, %v8093_v19  ;;  %14830 = vmatprep.mubr.msk.f32.mxu1 %vm15595_vm3, %v22333_v28 }
 0x778   :  { %14935 = vmatprep.mubr.msk.f32.mxu0 %vm15595_vm3, %v22333_v28  ;;  %15021 = vmatpush3.msra.mxu1 %v11711_v60  ;;  %v7726_v60 = vld [vmem:[#allocation4 + $0xbe] sm:$0xff] }
 0x779   :  { %15126 = vmatpush3.msra.mxu0 %v11749_v14  ;;  %15220 = vmatprep.subr.mxu1 %v22333_v28  ;;  %v8111_v14 = vld [vmem:[#allocation4 + $0xc7] sm:$0xff] }
 0x77a   :  { %15325 = vmatprep.subr.mxu0 %v22333_v28  ;;  %14831 = vmatmul.mubr.msk.f32.gmra.mxu1 %vm1154_vm1, %v7709_v53 }
 0x77b   :  { %14936 = vmatmul.mubr.msk.f32.gmra.mxu0 %vm1154_vm1, %v8094_v20  ;;  %14833 = vmatprep.mubr.msk.f32.mxu1 %vm15595_vm3, %v22333_v28 }
 0x77c   :  { %14938 = vmatprep.mubr.msk.f32.mxu0 %vm15595_vm3, %v22333_v28 }
 0x77e   :  { %14834 = vmatmul.mubr.msk.f32.gmra.mxu1 %vm1154_vm1, %v7710_v40 }
 0x77f   :  { %14939 = vmatmul.mubr.msk.f32.gmra.mxu0 %vm1154_vm1, %v8095_v63  ;;  %14836 = vmatprep.mubr.msk.f32.mxu1 %vm15595_vm3, %v22333_v28 }
 0x780   :  { %14941 = vmatprep.mubr.msk.f32.mxu0 %vm15595_vm3, %v22333_v28 }
 0x782   :  { %14837 = vmatmul.mubr.msk.f32.gmra.mxu1 %vm1154_vm1, %v7711_v30 }
 0x783   :  { %14942 = vmatmul.mubr.msk.f32.gmra.mxu0 %vm1154_vm1, %v8096_v25  ;;  %14839 = vmatprep.mubr.msk.f32.mxu1 %vm15595_vm3, %v22333_v28  ;;  %v7727_v25 = vld [vmem:[#allocation4 + $0xc6] sm:$0xff] }
 0x784   :  { %14944 = vmatprep.mubr.msk.f32.mxu0 %vm15595_vm3, %v22333_v28 }
 0x786   :  { %14840 = vmatmul.mubr.msk.f32.gmra.mxu1 %vm1154_vm1, %v7712_v47  ;;  %v8112_v47 = vld [vmem:[#allocation4 + $0xcf] sm:$0xff] }
 0x787   :  { %14945 = vmatmul.mubr.msk.f32.gmra.mxu0 %vm1154_vm1, %v8097_v31  ;;  %14842 = vmatprep.mubr.msk.f32.mxu1 %vm15595_vm3, %v22333_v28 }
 0x788   :  { %14947 = vmatprep.mubr.msk.f32.mxu0 %vm15595_vm3, %v22333_v28 }
 0x78a   :  { %14843 = vmatmul.mubr.msk.f32.gmra.mxu1 %vm1154_vm1, %v7713_v1 }
 0x78b   :  { %14948 = vmatmul.mubr.msk.f32.gmra.mxu0 %vm1154_vm1, %v8098_v29  ;;  %14845 = vmatprep.mubr.msk.f32.mxu1 %vm15595_vm3, %v22333_v28 }
 0x78c   :  { %14950 = vmatprep.mubr.msk.f32.mxu0 %vm15595_vm3, %v22333_v28 }
 0x78e   :  { %14846 = vmatmul.mubr.msk.f32.gmra.mxu1 %vm1154_vm1, %v7714_v48 }
 0x78f   :  { %14951 = vmatmul.mubr.msk.f32.gmra.mxu0 %vm1154_vm1, %v8099_v56  ;;  %14848 = vmatprep.mubr.msk.f32.mxu1 %vm15595_vm3, %v22333_v28 }
 0x790   :  { %14953 = vmatprep.mubr.msk.f32.mxu0 %vm15595_vm3, %v22333_v28 }
 0x792   :  { %14849 = vmatmul.mubr.msk.f32.gmra.mxu1 %vm1154_vm1, %v7715_v16  ;;  %v7728_v16 = vld [vmem:[#allocation4 + $0xce] sm:$0xff] }
 0x793   :  { %14954 = vmatmul.mubr.msk.f32.gmra.mxu0 %vm1154_vm1, %v8100_v44  ;;  %14851 = vmatprep.mubr.msk.f32.mxu1 %vm15595_vm3, %v22333_v28  ;;  %v8113_v44 = vld [vmem:[#allocation4 + $0xd7] sm:$0xff] }
 0x794   :  { %14956 = vmatprep.mubr.msk.f32.mxu0 %vm15595_vm3, %v22333_v28 }
 0x796   :  { %14852 = vmatmul.mubr.msk.f32.gmra.mxu1 %vm1154_vm1, %v7716_v11 }
 0x797   :  { %14957 = vmatmul.mubr.msk.f32.gmra.mxu0 %vm1154_vm1, %v8101_v58  ;;  %14854 = vmatprep.mubr.msk.f32.mxu1 %vm15595_vm3, %v22333_v28 }
 0x798   :  { %14959 = vmatprep.mubr.msk.f32.mxu0 %vm15595_vm3, %v22333_v28 }
 0x79a   :  { %14855 = vmatmul.mubr.msk.f32.gmra.mxu1 %vm1154_vm1, %v7717_v55 }
 0x79b   :  { %14960 = vmatmul.mubr.msk.f32.gmra.mxu0 %vm1154_vm1, %v8102_v32  ;;  %14857 = vmatprep.mubr.msk.f32.mxu1 %vm15595_vm3, %v22333_v28 }
 0x79c   :  { %14962 = vmatprep.mubr.msk.f32.mxu0 %vm15595_vm3, %v22333_v28 }
 0x79e   :  { %14858 = vmatmul.mubr.msk.f32.gmra.mxu1 %vm1154_vm1, %v7718_v5 }
 0x79f   :  { %14963 = vmatmul.mubr.msk.f32.gmra.mxu0 %vm1154_vm1, %v8103_v13  ;;  %14860 = vmatprep.mubr.msk.f32.mxu1 %vm15595_vm3, %v22333_v28  ;;  %v7729_v13 = vld [vmem:[#allocation4 + $0xd6] sm:$0xff] }
 0x7a0   :  { %14965 = vmatprep.mubr.msk.f32.mxu0 %vm15595_vm3, %v22333_v28 }
 0x7a2   :  { %14861 = vmatmul.mubr.msk.f32.gmra.mxu1 %vm1154_vm1, %v7719_v12  ;;  %v8114_v12 = vld [vmem:[#allocation4 + $0xdf] sm:$0xff] }
 0x7a3   :  { %14966 = vmatmul.mubr.msk.f32.gmra.mxu0 %vm1154_vm1, %v8104_v26  ;;  %14863 = vmatprep.mubr.msk.f32.mxu1 %vm15595_vm3, %v22333_v28 }
 0x7a4   :  { %14968 = vmatprep.mubr.msk.f32.mxu0 %vm15595_vm3, %v22333_v28 }
 0x7a6   :  { %14864 = vmatmul.mubr.msk.f32.gmra.mxu1 %vm1154_vm1, %v7720_v52 }
 0x7a7   :  { %14969 = vmatmul.mubr.msk.f32.gmra.mxu0 %vm1154_vm1, %v8105_v24  ;;  %14866 = vmatprep.mubr.msk.f32.mxu1 %vm15595_vm3, %v22333_v28 }
 0x7a8   :  { %14971 = vmatprep.mubr.msk.f32.mxu0 %vm15595_vm3, %v22333_v28 }
 0x7aa   :  { %v7238_v61 = vpop.f32.mrf.mxu1  ;;  %14867 = vmatmul.mubr.msk.f32.gmra.mxu1 %vm1154_vm1, %v7721_v15 }
 0x7ab   :  { %v7554_v37 = vpop.f32.mrf.mxu0  ;;  %14972 = vmatmul.mubr.msk.f32.gmra.mxu0 %vm1154_vm1, %v8106_v41  ;;  %14869 = vmatprep.mubr.msk.f32.mxu1 %vm15595_vm3, %v22333_v28 }
 0x7ac   :  { %v20403_v50 = vadd.f32 %v7554_v37, %v7238_v61  ;;  %14974 = vmatprep.mubr.msk.f32.mxu0 %vm15595_vm3, %v22333_v28  ;;  %v14607_v10 = vpop.f32.mrf.mxu1  ;;  %v7730_v61 = vld [vmem:[#allocation4 + $0xde] sm:$0xff]  ;;  %v8115_v37 = vld [vmem:[#allocation4 + $0xe7] sm:$0xff] }
 0x7ad   :  { %v14712_v3 = vpop.f32.mrf.mxu0 }
 0x7ae   :  { %v7243_v46 = vpop.f32.mrf.mxu1  ;;  %14870 = vmatmul.mubr.msk.f32.gmra.mxu1 %vm1154_vm1, %v7722_v22 }
 0x7af   :  { %v7559_v17 = vpop.f32.mrf.mxu0  ;;  %14975 = vmatmul.mubr.msk.f32.gmra.mxu0 %vm1154_vm1, %v8107_v21  ;;  %14872 = vmatprep.mubr.msk.f32.mxu1 %vm15595_vm3, %v22333_v28 }
 0x7b0   :  { %v20411_v51 = vadd.f32 %v7559_v17, %v7243_v46  ;;  %14977 = vmatprep.mubr.msk.f32.mxu0 %vm15595_vm3, %v22333_v28  ;;  %v14610_v7 = vpop.f32.mrf.mxu1  ;;  %v7731_v17 = vld [vmem:[#allocation4 + $0xe6] sm:$0xff] }
 0x7b1   :  { %v14715_v9 = vpop.f32.mrf.mxu0  ;;  %v8116_v7 = vld [vmem:[#allocation4 + $0xef] sm:$0xff] }
 0x7b2   :  { %v7248_v2 = vpop.f32.mrf.mxu1  ;;  %14873 = vmatmul.mubr.msk.f32.gmra.mxu1 %vm1154_vm1, %v7723_v36 }
 0x7b3   :  { %v7564_v43 = vpop.f32.mrf.mxu0  ;;  %14978 = vmatmul.mubr.msk.f32.gmra.mxu0 %vm1154_vm1, %v8108_v23  ;;  %14875 = vmatprep.mubr.msk.f32.mxu1 %vm15595_vm3, %v22333_v28 }
 0x7b4   :  { %v20419_v8 = vadd.f32 %v7564_v43, %v7248_v2  ;;  %14980 = vmatprep.mubr.msk.f32.mxu0 %vm15595_vm3, %v22333_v28  ;;  %v14613_v59 = vpop.f32.mrf.mxu1 }
 0x7b5   :  { %v14718_v54 = vpop.f32.mrf.mxu0  ;;  %v7732_v59 = vld [vmem:[#allocation4 + $0xee] sm:$0xff] }
 0x7b6   :  { %v7253_v62 = vpop.f32.mrf.mxu1  ;;  %14876 = vmatmul.mubr.msk.f32.gmra.mxu1 %vm1154_vm1, %v7724_v18  ;;  %v8117_v54 = vld [vmem:[#allocation4 + $0xf7] sm:$0xff] }
 0x7b7   :  { %v7569_v4 = vpop.f32.mrf.mxu0  ;;  %14981 = vmatmul.mubr.msk.f32.gmra.mxu0 %vm1154_vm1, %v8109_v35  ;;  %14878 = vmatprep.mubr.msk.f32.mxu1 %vm15595_vm3, %v22333_v28 }
 0x7b8   :  { %v20427_v34 = vadd.f32 %v7569_v4, %v7253_v62  ;;  %14983 = vmatprep.mubr.msk.f32.mxu0 %vm15595_vm3, %v22333_v28  ;;  %v14616_v27 = vpop.f32.mrf.mxu1 }
 0x7b9   :  { %v14721_v42 = vpop.f32.mrf.mxu0 }
 0x7ba   :  { %v7258_v6 = vpop.f32.mrf.mxu1  ;;  %14879 = vmatmul.mubr.msk.f32.gmra.mxu1 %vm1154_vm1, %v7725_v49  ;;  %v7733_v42 = vld [vmem:[#allocation4 + $0xf6] sm:$0x3]  ;;  %v8118_v49 = vld [vmem:[#allocation4 + $0xff] sm:$0x3] }
 0x7bb   :  { %v7574_v38 = vpop.f32.mrf.mxu0  ;;  %14984 = vmatmul.mubr.msk.f32.gmra.mxu0 %vm1154_vm1, %v8110_v45  ;;  %14881 = vmatprep.mubr.msk.f32.mxu1 %vm15595_vm3, %v22333_v28 }
 0x7bc   :  { %v20435_v39 = vadd.f32 %v7574_v38, %v7258_v6  ;;  %14986 = vmatprep.mubr.msk.f32.mxu0 %vm15595_vm3, %v22333_v28  ;;  %v14619_v0 = vpop.f32.mrf.mxu1 }
 0x7bd   :  { %v14724_v19 = vpop.f32.mrf.mxu0 }
 0x7be   :  { %v7263_v53 = vpop.f32.mrf.mxu1  ;;  %14882 = vmatmul.mubr.msk.f32.gmra.mxu1 %vm1154_vm1, %v7726_v60  ;;  %v8473_v60 = vld [vmem:[#allocation4 + $0x10] sm:$0xff] }
 0x7bf   :  { %v7579_v20 = vpop.f32.mrf.mxu0  ;;  %14987 = vmatmul.mubr.msk.f32.gmra.mxu0 %vm1154_vm1, %v8111_v14  ;;  %14884 = vmatprep.mubr.msk.f32.mxu1 %vm15595_vm3, %v22333_v28  ;;  %v8858_v14 = vld [vmem:[#allocation4 + $0x11] sm:$0xff] }
 0x7c0   :  { %v20443_v40 = vadd.f32 %v7579_v20, %v7263_v53  ;;  %14989 = vmatprep.mubr.msk.f32.mxu0 %vm15595_vm3, %v22333_v28  ;;  %v14622_v63 = vpop.f32.mrf.mxu1  ;;  %v11792_v53 = vld [vmem:[%s21929_s5 + $0x148] sm:$0xf]  ;;  %v11830_v20 = vld [vmem:[%s21929_s5 + $0x178] sm:$0xf] }
 0x7c1   :  { %v14727_v30 = vpop.f32.mrf.mxu0 }
 0x7c2   :  { %v7268_v31 = vpop.f32.mrf.mxu1  ;;  %14885 = vmatmul.mubr.msk.f32.gmra.mxu1 %vm1154_vm1, %v7727_v25 }
 0x7c3   :  { %v7584_v1 = vpop.f32.mrf.mxu0  ;;  %14990 = vmatmul.mubr.msk.f32.gmra.mxu0 %vm1154_vm1, %v8112_v47  ;;  %14887 = vmatprep.mubr.msk.f32.mxu1 %vm15595_vm3, %v22333_v28 }
 0x7c4   :  { %v20451_v29 = vadd.f32 %v7584_v1, %v7268_v31  ;;  %14992 = vmatprep.mubr.msk.f32.mxu0 %vm15595_vm3, %v22333_v28  ;;  %v14625_v48 = vpop.f32.mrf.mxu1  ;;  %v8474_v1 = vld [vmem:[#allocation4 + $0x18] sm:$0xff] }
 0x7c5   :  { %v14730_v56 = vpop.f32.mrf.mxu0  ;;  %v8859_v48 = vld [vmem:[#allocation4 + $0x19] sm:$0xff] }
 0x7c6   :  { %v7273_v11 = vpop.f32.mrf.mxu1  ;;  %14888 = vmatmul.mubr.msk.f32.gmra.mxu1 %vm1154_vm1, %v7728_v16  ;;  %v11791_v56 = vld [vmem:[%s21929_s5 + $0x140] sm:$0xff]  ;;  %v11829_v16 = vld [vmem:[%s21929_s5 + $0x170] sm:$0xff] }
 0x7c7   :  { %v7589_v58 = vpop.f32.mrf.mxu0  ;;  %14993 = vmatmul.mubr.msk.f32.gmra.mxu0 %vm1154_vm1, %v8113_v44  ;;  %14890 = vmatprep.mubr.msk.f32.mxu1 %vm15595_vm3, %v22333_v28 }
 0x7c8   :  { %v20459_v55 = vadd.f32 %v7589_v58, %v7273_v11  ;;  %14995 = vmatprep.mubr.msk.f32.mxu0 %vm15595_vm3, %v22333_v28  ;;  %v14628_v32 = vpop.f32.mrf.mxu1 }
 0x7c9   :  { %v14733_v5 = vpop.f32.mrf.mxu0 }
 0x7ca   :  { %v7278_v26 = vpop.f32.mrf.mxu1  ;;  %14891 = vmatmul.mubr.msk.f32.gmra.mxu1 %vm1154_vm1, %v7729_v13  ;;  %v8475_v13 = vld [vmem:[#allocation4 + $0x20] sm:$0xff] }
 0x7cb   :  { %v7594_v52 = vpop.f32.mrf.mxu0  ;;  %14996 = vmatmul.mubr.msk.f32.gmra.mxu0 %vm1154_vm1, %v8114_v12  ;;  %14893 = vmatprep.mubr.msk.f32.mxu1 %vm15595_vm3, %v22333_v28  ;;  %v8860_v12 = vld [vmem:[#allocation4 + $0x21] sm:$0xff] }
 0x7cc   :  { %v20467_v24 = vadd.f32 %v7594_v52, %v7278_v26  ;;  %14998 = vmatprep.mubr.msk.f32.mxu0 %vm15595_vm3, %v22333_v28  ;;  %v14631_v15 = vpop.f32.mrf.mxu1  ;;  %v11790_v26 = vld [vmem:[%s21929_s5 + $0x138] sm:$0xff]  ;;  %v11828_v52 = vld [vmem:[%s21929_s5 + $0x168] sm:$0xff] }
 0x7cd   :  { %v14736_v41 = vpop.f32.mrf.mxu0 }
 0x7ce   :  { %v7283_v10 = vpop.f32.mrf.mxu1  ;;  %14894 = vmatmul.mubr.msk.f32.gmra.mxu1 %vm1154_vm1, %v7730_v61 }
 0x7cf   :  { %v7599_v3 = vpop.f32.mrf.mxu0  ;;  %14999 = vmatmul.mubr.msk.f32.gmra.mxu0 %vm1154_vm1, %v8115_v37  ;;  %14896 = vmatprep.mubr.msk.f32.mxu1 %vm15595_vm3, %v22333_v28 }
 0x7d0   :  { %v20475_v22 = vadd.f32 %v7599_v3, %v7283_v10  ;;  %15001 = vmatprep.mubr.msk.f32.mxu0 %vm15595_vm3, %v22333_v28  ;;  %v14634_v21 = vpop.f32.mrf.mxu1  ;;  %v8476_v3 = vld [vmem:[#allocation4 + $0x28] sm:$0xff] }
 0x7d1   :  { %v14739_v46 = vpop.f32.mrf.mxu0  ;;  %v8861_v21 = vld [vmem:[#allocation4 + $0x29] sm:$0xff] }
 0x7d2   :  { %v7288_v9 = vpop.f32.mrf.mxu1  ;;  %14897 = vmatmul.mubr.msk.f32.gmra.mxu1 %vm1154_vm1, %v7731_v17  ;;  %v11789_v46 = vld [vmem:[%s21929_s5 + $0x130] sm:$0xff]  ;;  %v11827_v17 = vld [vmem:[%s21929_s5 + $0x160] sm:$0xff] }
 0x7d3   :  { %v7604_v36 = vpop.f32.mrf.mxu0  ;;  %15002 = vmatmul.mubr.msk.f32.gmra.mxu0 %vm1154_vm1, %v8116_v7  ;;  %14899 = vmatprep.mubr.msk.f32.mxu1 %vm15595_vm3, %v22333_v28 }
 0x7d4   :  { %v20483_v23 = vadd.f32 %v7604_v36, %v7288_v9  ;;  %15004 = vmatprep.mubr.msk.f32.mxu0 %vm15595_vm3, %v22333_v28  ;;  %v14637_v2 = vpop.f32.mrf.mxu1 }
 0x7d5   :  { %v14742_v43 = vpop.f32.mrf.mxu0 }
 0x7d6   :  { %v7293_v18 = vpop.f32.mrf.mxu1  ;;  %14900 = vmatmul.mubr.msk.f32.gmra.mxu1 %vm1154_vm1, %v7732_v59  ;;  %v8477_v59 = vld [vmem:[#allocation4 + $0x30] sm:$0xff] }
 0x7d7   :  { %v7609_v35 = vpop.f32.mrf.mxu0  ;;  %15005 = vmatmul.mubr.msk.f32.gmra.mxu0 %vm1154_vm1, %v8117_v54  ;;  %14902 = vmatprep.mubr.msk.f32.mxu1 %vm15595_vm3, %v22333_v28  ;;  %v8862_v54 = vld [vmem:[#allocation4 + $0x31] sm:$0xff] }
 0x7d8   :  { %v20491_v62 = vadd.f32 %v7609_v35, %v7293_v18  ;;  %15007 = vmatprep.mubr.msk.f32.mxu0 %vm15595_vm3, %v22333_v28  ;;  %v14640_v4 = vpop.f32.mrf.mxu1  ;;  %v11788_v18 = vld [vmem:[%s21929_s5 + $0x128] sm:$0xff]  ;;  %v11826_v35 = vld [vmem:[%s21929_s5 + $0x158] sm:$0xff] }
 0x7d9   :  { %v14745_v27 = vpop.f32.mrf.mxu0 }
 0x7da   :  { %v7298_v45 = vpop.f32.mrf.mxu1  ;;  %14903 = vmatmul.mubr.msk.f32.gmra.mxu1 %vm1154_vm1, %v7733_v42 }
 0x7db   :  { %v7614_v6 = vpop.f32.mrf.mxu0  ;;  %15008 = vmatmul.mubr.msk.f32.gmra.mxu0 %vm1154_vm1, %v8118_v49  ;;  %15022 = vmatprep.mubr.msk.f32.mxu1 %vm15595_vm3, %v22333_v28 }
 0x7dc   :  { %v20499_v38 = vadd.f32 %v7614_v6, %v7298_v45  ;;  %15127 = vmatprep.mubr.msk.f32.mxu0 %vm15595_vm3, %v22333_v28  ;;  %v14643_v0 = vpop.f32.mrf.mxu1  ;;  %v8478_v6 = vld [vmem:[#allocation4 + $0x38] sm:$0xff] }
 0x7dd   :  { %v14748_v19 = vpop.f32.mrf.mxu0  ;;  %v8863_v0 = vld [vmem:[#allocation4 + $0x39] sm:$0xff] }
 0x7de   :  { %v7303_v63 = vpop.f32.mrf.mxu1  ;;  %15023 = vmatmul.mubr.msk.f32.vlgmr.msra.gmra.mxu1 %vm1154_vm1, %v8473_v60  ;;  %v11787_v19 = vld [vmem:[%s21929_s5 + $0x120] sm:$0xff]  ;;  %v11825_v60 = vld [vmem:[%s21929_s5 + $0x150] sm:$0xff] }
 0x7df   :  { %v7619_v30 = vpop.f32.mrf.mxu0  ;;  %15128 = vmatmul.mubr.msk.f32.vlgmr.msra.gmra.mxu0 %vm1154_vm1, %v8858_v14  ;;  %15025 = vmatprep.mubr.msk.f32.mxu1 %vm15595_vm3, %v22333_v28 }
 0x7e0   :  { %v20513_v25 = vadd.f32 %v7619_v30, %v7303_v63  ;;  %15130 = vmatprep.mubr.msk.f32.mxu0 %vm15595_vm3, %v22333_v28  ;;  %v14646_v47 = vpop.f32.mrf.mxu1  ;;  %15221 = vmatpush3.msk.msra.mxu1 %vm3038_vm2, %v11792_v53 }
 0x7e1   :  { %v14751_v31 = vpop.f32.mrf.mxu0  ;;  %15326 = vmatpush3.msk.msra.mxu0 %vm3038_vm2, %v11830_v20  ;;  %15222 = vmatprep.subr.mxu1 %v22333_v28  ;;  %v8479_v47 = vld [vmem:[#allocation4 + $0x40] sm:$0xff] }
 0x7e2   :  { %15327 = vmatprep.subr.mxu0 %v22333_v28  ;;  %v7308_v44 = vpop.f32.mrf.mxu1  ;;  %15026 = vmatmul.mubr.msk.f32.gmra.mxu1 %vm1154_vm1, %v8474_v1  ;;  %v8864_v31 = vld [vmem:[#allocation4 + $0x41] sm:$0xff] }
 0x7e3   :  { %v7624_v11 = vpop.f32.mrf.mxu0  ;;  %15131 = vmatmul.mubr.msk.f32.gmra.mxu0 %vm1154_vm1, %v8859_v48  ;;  %15028 = vmatprep.mubr.msk.f32.mxu1 %vm15595_vm3, %v22333_v28 }
 0x7e4   :  { %v20531_v58 = vadd.f32 %v7624_v11, %v7308_v44  ;;  %15133 = vmatprep.mubr.msk.f32.mxu0 %vm15595_vm3, %v22333_v28  ;;  %v14649_v32 = vpop.f32.mrf.mxu1  ;;  %15223 = vmatpush3.msra.mxu1 %v11791_v56  ;;  %v8480_v11 = vld [vmem:[#allocation4 + $0x48] sm:$0xff] }
 0x7e5   :  { %v14754_v5 = vpop.f32.mrf.mxu0  ;;  %15328 = vmatpush3.msra.mxu0 %v11829_v16  ;;  %15224 = vmatprep.subr.mxu1 %v22333_v28  ;;  %v8865_v32 = vld [vmem:[#allocation4 + $0x49] sm:$0xff] }
 0x7e6   :  { %15329 = vmatprep.subr.mxu0 %v22333_v28  ;;  %v7313_v15 = vpop.f32.mrf.mxu1  ;;  %15029 = vmatmul.mubr.msk.f32.gmra.mxu1 %vm1154_vm1, %v8475_v13 }
 0x7e7   :  { %v7629_v41 = vpop.f32.mrf.mxu0  ;;  %15134 = vmatmul.mubr.msk.f32.gmra.mxu0 %vm1154_vm1, %v8860_v12  ;;  %15031 = vmatprep.mubr.msk.f32.mxu1 %vm15595_vm3, %v22333_v28 }
 0x7e8   :  { %v20547_v61 = vadd.f32 %v7629_v41, %v7313_v15  ;;  %15136 = vmatprep.mubr.msk.f32.mxu0 %vm15595_vm3, %v22333_v28  ;;  %v14652_v37 = vpop.f32.mrf.mxu1  ;;  %15225 = vmatpush3.msra.mxu1 %v11790_v26  ;;  %v8481_v15 = vld [vmem:[#allocation4 + $0x50] sm:$0xff] }
 0x7e9   :  { %v14757_v10 = vpop.f32.mrf.mxu0  ;;  %15330 = vmatpush3.msra.mxu0 %v11828_v52  ;;  %15226 = vmatprep.subr.mxu1 %v22333_v28  ;;  %v8866_v41 = vld [vmem:[#allocation4 + $0x51] sm:$0xff] }
 0x7ea   :  { %15331 = vmatprep.subr.mxu0 %v22333_v28  ;;  %v7318_v7 = vpop.f32.mrf.mxu1  ;;  %15032 = vmatmul.mubr.msk.f32.gmra.mxu1 %vm1154_vm1, %v8476_v3 }
 0x7eb   :  { %v7634_v9 = vpop.f32.mrf.mxu0  ;;  %15137 = vmatmul.mubr.msk.f32.gmra.mxu0 %vm1154_vm1, %v8861_v21  ;;  %15034 = vmatprep.mubr.msk.f32.mxu1 %vm15595_vm3, %v22333_v28 }
 0x7ec   :  { %v20563_v36 = vadd.f32 %v7634_v9, %v7318_v7  ;;  %15139 = vmatprep.mubr.msk.f32.mxu0 %vm15595_vm3, %v22333_v28  ;;  %v14655_v2 = vpop.f32.mrf.mxu1  ;;  %15227 = vmatpush3.msra.mxu1 %v11789_v46  ;;  %v8867_v7 = vld [vmem:[#allocation4 + $0x59] sm:$0xff] }
 0x7ed   :  { %v14760_v43 = vpop.f32.mrf.mxu0  ;;  %15332 = vmatpush3.msra.mxu0 %v11827_v17  ;;  %15228 = vmatprep.subr.mxu1 %v22333_v28  ;;  %v8482_v17 = vld [vmem:[#allocation4 + $0x58] sm:$0xff] }
 0x7ee   :  { %15333 = vmatprep.subr.mxu0 %v22333_v28  ;;  %v7323_v4 = vpop.f32.mrf.mxu1  ;;  %15035 = vmatmul.mubr.msk.f32.gmra.mxu1 %vm1154_vm1, %v8477_v59 }
 0x7ef   :  { %v7639_v27 = vpop.f32.mrf.mxu0  ;;  %15140 = vmatmul.mubr.msk.f32.gmra.mxu0 %vm1154_vm1, %v8862_v54  ;;  %15037 = vmatprep.mubr.msk.f32.mxu1 %vm15595_vm3, %v22333_v28 }
 0x7f0   :  { %v20579_v42 = vadd.f32 %v7639_v27, %v7323_v4  ;;  %15142 = vmatprep.mubr.msk.f32.mxu0 %vm15595_vm3, %v22333_v28  ;;  %v14658_v49 = vpop.f32.mrf.mxu1  ;;  %15229 = vmatpush3.msra.mxu1 %v11788_v18  ;;  %v8483_v18 = vld [vmem:[#allocation4 + $0x60] sm:$0xff] }
 0x7f1   :  { %v14763_v45 = vpop.f32.mrf.mxu0  ;;  %15334 = vmatpush3.msra.mxu0 %v11826_v35  ;;  %15230 = vmatprep.subr.mxu1 %v22333_v28  ;;  %v8868_v35 = vld [vmem:[#allocation4 + $0x61] sm:$0xff] }
 0x7f2   :  { %15335 = vmatprep.subr.mxu0 %v22333_v28  ;;  %v7328_v14 = vpop.f32.mrf.mxu1  ;;  %15038 = vmatmul.mubr.msk.f32.gmra.mxu1 %vm1154_vm1, %v8478_v6 }
 0x7f3   :  { %v7644_v53 = vpop.f32.mrf.mxu0  ;;  %15143 = vmatmul.mubr.msk.f32.gmra.mxu0 %vm1154_vm1, %v8863_v0  ;;  %15040 = vmatprep.mubr.msk.f32.mxu1 %vm15595_vm3, %v22333_v28  ;;  %v8484_v0 = vld [vmem:[#allocation4 + $0x68] sm:$0xff] }
 0x7f4   :  { %v20595_v20 = vadd.f32 %v7644_v53, %v7328_v14  ;;  %15145 = vmatprep.mubr.msk.f32.mxu0 %vm15595_vm3, %v22333_v28  ;;  %v14661_v63 = vpop.f32.mrf.mxu1  ;;  %15231 = vmatpush3.msra.mxu1 %v11787_v19  ;;  %v8869_v19 = vld [vmem:[#allocation4 + $0x69] sm:$0xff] }
 0x7f5   :  { %v14766_v30 = vpop.f32.mrf.mxu0  ;;  %15336 = vmatpush3.msra.mxu0 %v11825_v60  ;;  %15430 = vmatprep.subr.mxu1 %v22333_v28 }
 0x7f6   :  { %15535 = vmatprep.subr.mxu0 %v22333_v28  ;;  %v7333_v1 = vpop.f32.mrf.mxu1  ;;  %15041 = vmatmul.mubr.msk.f32.gmra.mxu1 %vm1154_vm1, %v8479_v47  ;;  %v8485_v47 = vld [vmem:[#allocation4 + $0x70] sm:$0xff] }
 0x7f7   :  { %v7649_v48 = vpop.f32.mrf.mxu0  ;;  %15146 = vmatmul.mubr.msk.f32.gmra.mxu0 %vm1154_vm1, %v8864_v31  ;;  %15043 = vmatprep.mubr.msk.f32.mxu1 %vm15595_vm3, %v22333_v28  ;;  %v8870_v31 = vld [vmem:[#allocation4 + $0x71] sm:$0xff] }
 0x7f8   :  { %v20605_v56 = vadd.f32 %v7649_v48, %v7333_v1  ;;  %15148 = vmatprep.mubr.msk.f32.mxu0 %vm15595_vm3, %v22333_v28  ;;  %v14664_v16 = vpop.f32.mrf.mxu1 }
 0x7f9   :  { %v14769_v44 = vpop.f32.mrf.mxu0 }
 0x7fa   :  { %v7338_v5 = vpop.f32.mrf.mxu1  ;;  %15044 = vmatmul.mubr.msk.f32.gmra.mxu1 %vm1154_vm1, %v8480_v11 }
 0x7fb   :  { %v7654_v13 = vpop.f32.mrf.mxu0  ;;  %15149 = vmatmul.mubr.msk.f32.gmra.mxu0 %vm1154_vm1, %v8865_v32  ;;  %15046 = vmatprep.mubr.msk.f32.mxu1 %vm15595_vm3, %v22333_v28  ;;  %v8486_v32 = vld [vmem:[#allocation4 + $0x78] sm:$0xff] }
 0x7fc   :  { %v20613_v12 = vadd.f32 %v7654_v13, %v7338_v5  ;;  %15151 = vmatprep.mubr.msk.f32.mxu0 %vm15595_vm3, %v22333_v28  ;;  %v14667_v26 = vpop.f32.mrf.mxu1  ;;  %v8871_v5 = vld [vmem:[#allocation4 + $0x79] sm:$0xff] }
 0x7fd   :  { %v14772_v52 = vpop.f32.mrf.mxu0 }
 0x7fe   :  { %v7343_v37 = vpop.f32.mrf.mxu1  ;;  %15047 = vmatmul.mubr.msk.f32.gmra.mxu1 %vm1154_vm1, %v8481_v15 }
 0x7ff   :  { %v7659_v10 = vpop.f32.mrf.mxu0  ;;  %15152 = vmatmul.mubr.msk.f32.gmra.mxu0 %vm1154_vm1, %v8866_v41  ;;  %15049 = vmatprep.mubr.msk.f32.mxu1 %vm15595_vm3, %v22333_v28 }
 0x800   :  { %v20621_v3 = vadd.f32 %v7659_v10, %v7343_v37  ;;  %15154 = vmatprep.mubr.msk.f32.mxu0 %vm15595_vm3, %v22333_v28  ;;  %v14670_v21 = vpop.f32.mrf.mxu1  ;;  %v8487_v37 = vld [vmem:[#allocation4 + $0x80] sm:$0xff] }
 0x801   :  { %v14775_v46 = vpop.f32.mrf.mxu0  ;;  %v8872_v10 = vld [vmem:[#allocation4 + $0x81] sm:$0xff] }
 0x802   :  { %v7348_v9 = vpop.f32.mrf.mxu1  ;;  %15050 = vmatmul.mubr.msk.f32.gmra.mxu1 %vm1154_vm1, %v8482_v17 }
 0x803   :  { %v7664_v2 = vpop.f32.mrf.mxu0  ;;  %15155 = vmatmul.mubr.msk.f32.gmra.mxu0 %vm1154_vm1, %v8867_v7  ;;  %15052 = vmatprep.mubr.msk.f32.mxu1 %vm15595_vm3, %v22333_v28 }
 0x804   :  { %v20629_v43 = vadd.f32 %v7664_v2, %v7348_v9  ;;  %15157 = vmatprep.mubr.msk.f32.mxu0 %vm15595_vm3, %v22333_v28  ;;  %v14673_v59 = vpop.f32.mrf.mxu1  ;;  %v8488_v2 = vld [vmem:[#allocation4 + $0x88] sm:$0xff] }
 0x805   :  { %v14778_v54 = vpop.f32.mrf.mxu0  ;;  %v8873_v59 = vld [vmem:[#allocation4 + $0x89] sm:$0xff] }
 0x806   :  { %v7353_v4 = vpop.f32.mrf.mxu1  ;;  %15053 = vmatmul.mubr.msk.f32.gmra.mxu1 %vm1154_vm1, %v8483_v18 }
 0x807   :  { %v7669_v27 = vpop.f32.mrf.mxu0  ;;  %15158 = vmatmul.mubr.msk.f32.gmra.mxu0 %vm1154_vm1, %v8868_v35  ;;  %15055 = vmatprep.mubr.msk.f32.mxu1 %vm15595_vm3, %v22333_v28 }
 0x808   :  { %v20637_v49 = vadd.f32 %v7669_v27, %v7353_v4  ;;  %15160 = vmatprep.mubr.msk.f32.mxu0 %vm15595_vm3, %v22333_v28  ;;  %v14676_v45 = vpop.f32.mrf.mxu1 }
 0x809   :  { %v14781_v6 = vpop.f32.mrf.mxu0  ;;  %v8489_v45 = vld [vmem:[#allocation4 + $0x90] sm:$0xff] }
 0x80a   :  { %v7358_v60 = vpop.f32.mrf.mxu1  ;;  %15056 = vmatmul.mubr.msk.f32.gmra.mxu1 %vm1154_vm1, %v8484_v0  ;;  %v8874_v6 = vld [vmem:[#allocation4 + $0x91] sm:$0xff] }
 0x80b   :  { %v7674_v14 = vpop.f32.mrf.mxu0  ;;  %15161 = vmatmul.mubr.msk.f32.gmra.mxu0 %vm1154_vm1, %v8869_v19  ;;  %15058 = vmatprep.mubr.msk.f32.mxu1 %vm15595_vm3, %v22333_v28 }
 0x80c   :  { %v20645_v53 = vadd.f32 %v7674_v14, %v7358_v60  ;;  %15163 = vmatprep.mubr.msk.f32.mxu0 %vm15595_vm3, %v22333_v28  ;;  %v14679_v63 = vpop.f32.mrf.mxu1 }
 0x80d   :  { %v14784_v30 = vpop.f32.mrf.mxu0 }
 0x80e   :  { %v7363_v1 = vpop.f32.mrf.mxu1  ;;  %15059 = vmatmul.mubr.msk.f32.gmra.mxu1 %vm1154_vm1, %v8485_v47  ;;  %v8490_v30 = vld [vmem:[#allocation4 + $0x98] sm:$0xff] }
 0x80f   :  { %v7679_v48 = vpop.f32.mrf.mxu0  ;;  %15164 = vmatmul.mubr.msk.f32.gmra.mxu0 %vm1154_vm1, %v8870_v31  ;;  %15061 = vmatprep.mubr.msk.f32.mxu1 %vm15595_vm3, %v22333_v28  ;;  %v8875_v47 = vld [vmem:[#allocation4 + $0x99] sm:$0xff] }
 0x810   :  { %v20653_v16 = vadd.f32 %v7679_v48, %v7363_v1  ;;  %15166 = vmatprep.mubr.msk.f32.mxu0 %vm15595_vm3, %v22333_v28  ;;  %v14682_v44 = vpop.f32.mrf.mxu1 }
 0x811   :  { %v14787_v11 = vpop.f32.mrf.mxu0 }
 0x812   :  { %v7368_v13 = vpop.f32.mrf.mxu1  ;;  %15062 = vmatmul.mubr.msk.f32.gmra.mxu1 %vm1154_vm1, %v8486_v32 }
 0x813   :  { %v7684_v26 = vpop.f32.mrf.mxu0  ;;  %15167 = vmatmul.mubr.msk.f32.gmra.mxu0 %vm1154_vm1, %v8871_v5  ;;  %15064 = vmatprep.mubr.msk.f32.mxu1 %vm15595_vm3, %v22333_v28  ;;  %v8491_v5 = vld [vmem:[#allocation4 + $0xa0] sm:$0xff] }
 0x814   :  { %v20661_v52 = vadd.f32 %v7684_v26, %v7368_v13  ;;  %15169 = vmatprep.mubr.msk.f32.mxu0 %vm15595_vm3, %v22333_v28  ;;  %v14685_v15 = vpop.f32.mrf.mxu1  ;;  %v8876_v13 = vld [vmem:[#allocation4 + $0xa1] sm:$0xff] }
 0x815   :  { %v14790_v41 = vpop.f32.mrf.mxu0 }
 0x816   :  { %v7373_v21 = vpop.f32.mrf.mxu1  ;;  %15065 = vmatmul.mubr.msk.f32.gmra.mxu1 %vm1154_vm1, %v8487_v37 }
 0x817   :  { %v7689_v46 = vpop.f32.mrf.mxu0  ;;  %15170 = vmatmul.mubr.msk.f32.gmra.mxu0 %vm1154_vm1, %v8872_v10  ;;  %15067 = vmatprep.mubr.msk.f32.mxu1 %vm15595_vm3, %v22333_v28 }
 0x818   :  { %v20669_v17 = vadd.f32 %v7689_v46, %v7373_v21  ;;  %15172 = vmatprep.mubr.msk.f32.mxu0 %vm15595_vm3, %v22333_v28  ;;  %v14688_v7 = vpop.f32.mrf.mxu1  ;;  %v8492_v21 = vld [vmem:[#allocation4 + $0xa8] sm:$0xff] }
 0x819   :  { %v14793_v9 = vpop.f32.mrf.mxu0  ;;  %v8877_v46 = vld [vmem:[#allocation4 + $0xa9] sm:$0xff] }
 0x81a   :  { %v7378_v54 = vpop.f32.mrf.mxu1  ;;  %15068 = vmatmul.mubr.msk.f32.gmra.mxu1 %vm1154_vm1, %v8488_v2 }
 0x81b   :  { %v7694_v18 = vpop.f32.mrf.mxu0  ;;  %15173 = vmatmul.mubr.msk.f32.gmra.mxu0 %vm1154_vm1, %v8873_v59  ;;  %15070 = vmatprep.mubr.msk.f32.mxu1 %vm15595_vm3, %v22333_v28 }
 0x81c   :  { %v20677_v35 = vadd.f32 %v7694_v18, %v7378_v54  ;;  %15175 = vmatprep.mubr.msk.f32.mxu0 %vm15595_vm3, %v22333_v28  ;;  %v14691_v4 = vpop.f32.mrf.mxu1  ;;  %v8493_v18 = vld [vmem:[#allocation4 + $0xb0] sm:$0xff] }
 0x81d   :  { %v14796_v27 = vpop.f32.mrf.mxu0  ;;  %v8878_v4 = vld [vmem:[#allocation4 + $0xb1] sm:$0xff] }
 0x81e   :  { %v7383_v0 = vpop.f32.mrf.mxu1  ;;  %15071 = vmatmul.mubr.msk.f32.gmra.mxu1 %vm1154_vm1, %v8489_v45 }
 0x81f   :  { %v7699_v19 = vpop.f32.mrf.mxu0  ;;  %15176 = vmatmul.mubr.msk.f32.gmra.mxu0 %vm1154_vm1, %v8874_v6  ;;  %15073 = vmatprep.mubr.msk.f32.mxu1 %vm15595_vm3, %v22333_v28 }
 0x820   :  { %v20685_v60 = vadd.f32 %v7699_v19, %v7383_v0  ;;  %15178 = vmatprep.mubr.msk.f32.mxu0 %vm15595_vm3, %v22333_v28  ;;  %v14694_v14 = vpop.f32.mrf.mxu1 }
 0x821   :  { %v14799_v63 = vpop.f32.mrf.mxu0  ;;  %v8494_v14 = vld [vmem:[#allocation4 + $0xb8] sm:$0xff] }
 0x822   :  { %v7903_v31 = vpop.f32.mrf.mxu1  ;;  %15074 = vmatmul.mubr.msk.f32.gmra.mxu1 %vm1154_vm1, %v8490_v30  ;;  %v8879_v63 = vld [vmem:[#allocation4 + $0xb9] sm:$0xff] }
 0x823   :  { %v8288_v1 = vpop.f32.mrf.mxu0  ;;  %15179 = vmatmul.mubr.msk.f32.gmra.mxu0 %vm1154_vm1, %v8875_v47  ;;  %v8057_v48 = vadd.f32 %v7903_v31, %v20157_v33  ;;  %15076 = vmatprep.mubr.msk.f32.mxu1 %vm15595_vm3, %v22333_v28 }
 0x824   :  { %15181 = vmatprep.mubr.msk.f32.mxu0 %vm15595_vm3, %v22333_v28  ;;  %v14814_v44 = vpop.f32.mrf.mxu1 }
 0x825   :  { %v14919_v11 = vpop.f32.mrf.mxu0  ;;  %v20698_v32 = vadd.f32 %v8288_v1, %v8057_v48  ;;  %v8495_v44 = vld [vmem:[#allocation4 + $0xc0] sm:$0xff] }
 0x826   :  { %v7908_v26 = vpop.f32.mrf.mxu1  ;;  %15077 = vmatmul.mubr.msk.f32.gmra.mxu1 %vm1154_vm1, %v8491_v5  ;;  %v8880_v11 = vld [vmem:[#allocation4 + $0xc1] sm:$0xff] }
 0x827   :  { %v8293_v15 = vpop.f32.mrf.mxu0  ;;  %15182 = vmatmul.mubr.msk.f32.gmra.mxu0 %vm1154_vm1, %v8876_v13  ;;  %v8058_v33 = vadd.f32 %v7908_v26, %v20403_v50  ;;  %15079 = vmatprep.mubr.msk.f32.mxu1 %vm15595_vm3, %v22333_v28 }
 0x828   :  { %15184 = vmatprep.mubr.msk.f32.mxu0 %vm15595_vm3, %v22333_v28  ;;  %v14817_v41 = vpop.f32.mrf.mxu1 }
 0x829   :  { %v14922_v37 = vpop.f32.mrf.mxu0  ;;  %v20707_v10 = vadd.f32 %v8293_v15, %v8058_v33  ;;  %v8496_v41 = vld [vmem:[#allocation4 + $0xc8] sm:$0xff] }
 0x82a   :  { %v7913_v7 = vpop.f32.mrf.mxu1  ;;  %15080 = vmatmul.mubr.msk.f32.gmra.mxu1 %vm1154_vm1, %v8492_v21  ;;  %v8881_v37 = vld [vmem:[#allocation4 + $0xc9] sm:$0xff] }
 0x82b   :  { %v8298_v9 = vpop.f32.mrf.mxu0  ;;  %15185 = vmatmul.mubr.msk.f32.gmra.mxu0 %vm1154_vm1, %v8877_v46  ;;  %v8059_v50 = vadd.f32 %v7913_v7, %v20411_v51  ;;  %15082 = vmatprep.mubr.msk.f32.mxu1 %vm15595_vm3, %v22333_v28 }
 0x82c   :  { %15187 = vmatprep.mubr.msk.f32.mxu0 %vm15595_vm3, %v22333_v28  ;;  %v14820_v2 = vpop.f32.mrf.mxu1 }
 0x82d   :  { %v14925_v59 = vpop.f32.mrf.mxu0  ;;  %v20716_v54 = vadd.f32 %v8298_v9, %v8059_v50  ;;  %v8497_v2 = vld [vmem:[#allocation4 + $0xd0] sm:$0xff] }
 0x82e   :  { %v7918_v27 = vpop.f32.mrf.mxu1  ;;  %15083 = vmatmul.mubr.msk.f32.gmra.mxu1 %vm1154_vm1, %v8493_v18  ;;  %v8882_v59 = vld [vmem:[#allocation4 + $0xd1] sm:$0xff] }
 0x82f   :  { %v8303_v45 = vpop.f32.mrf.mxu0  ;;  %15188 = vmatmul.mubr.msk.f32.gmra.mxu0 %vm1154_vm1, %v8878_v4  ;;  %v8060_v51 = vadd.f32 %v7918_v27, %v20419_v8  ;;  %15085 = vmatprep.mubr.msk.f32.mxu1 %vm15595_vm3, %v22333_v28 }
 0x830   :  { %15190 = vmatprep.mubr.msk.f32.mxu0 %vm15595_vm3, %v22333_v28  ;;  %v14823_v6 = vpop.f32.mrf.mxu1 }
 0x831   :  { %v14928_v0 = vpop.f32.mrf.mxu0  ;;  %v20725_v19 = vadd.f32 %v8303_v45, %v8060_v51  ;;  %v8498_v6 = vld [vmem:[#allocation4 + $0xd8] sm:$0xff] }
 0x832   :  { %v7923_v30 = vpop.f32.mrf.mxu1  ;;  %15086 = vmatmul.mubr.msk.f32.gmra.mxu1 %vm1154_vm1, %v8494_v14  ;;  %v8883_v0 = vld [vmem:[#allocation4 + $0xd9] sm:$0xff] }
 0x833   :  { %v8308_v47 = vpop.f32.mrf.mxu0  ;;  %15191 = vmatmul.mubr.msk.f32.gmra.mxu0 %vm1154_vm1, %v8879_v63  ;;  %v8061_v8 = vadd.f32 %v7923_v30, %v20427_v34  ;;  %15088 = vmatprep.mubr.msk.f32.mxu1 %vm15595_vm3, %v22333_v28 }
 0x834   :  { %15193 = vmatprep.mubr.msk.f32.mxu0 %vm15595_vm3, %v22333_v28  ;;  %v14826_v31 = vpop.f32.mrf.mxu1 }
 0x835   :  { %v14931_v1 = vpop.f32.mrf.mxu0  ;;  %v20734_v48 = vadd.f32 %v8308_v47, %v8061_v8  ;;  %v8499_v31 = vld [vmem:[#allocation4 + $0xe0] sm:$0xff] }
 0x836   :  { %v7928_v5 = vpop.f32.mrf.mxu1  ;;  %15089 = vmatmul.mubr.msk.f32.gmra.mxu1 %vm1154_vm1, %v8495_v44  ;;  %v8884_v1 = vld [vmem:[#allocation4 + $0xe1] sm:$0xff] }
 0x837   :  { %v8313_v13 = vpop.f32.mrf.mxu0  ;;  %15194 = vmatmul.mubr.msk.f32.gmra.mxu0 %vm1154_vm1, %v8880_v11  ;;  %v8062_v34 = vadd.f32 %v7928_v5, %v20435_v39  ;;  %15091 = vmatprep.mubr.msk.f32.mxu1 %vm15595_vm3, %v22333_v28 }
 0x838   :  { %15196 = vmatprep.mubr.msk.f32.mxu0 %vm15595_vm3, %v22333_v28  ;;  %v14829_v26 = vpop.f32.mrf.mxu1 }
 0x839   :  { %v14934_v15 = vpop.f32.mrf.mxu0  ;;  %v20743_v33 = vadd.f32 %v8313_v13, %v8062_v34  ;;  %v8500_v26 = vld [vmem:[#allocation4 + $0xe8] sm:$0xff] }
 0x83a   :  { %v7933_v21 = vpop.f32.mrf.mxu1  ;;  %15092 = vmatmul.mubr.msk.f32.gmra.mxu1 %vm1154_vm1, %v8496_v41  ;;  %v8885_v15 = vld [vmem:[#allocation4 + $0xe9] sm:$0xff] }
 0x83b   :  { %v8318_v46 = vpop.f32.mrf.mxu0  ;;  %15197 = vmatmul.mubr.msk.f32.gmra.mxu0 %vm1154_vm1, %v8881_v37  ;;  %v8063_v39 = vadd.f32 %v7933_v21, %v20443_v40  ;;  %15094 = vmatprep.mubr.msk.f32.mxu1 %vm15595_vm3, %v22333_v28 }
 0x83c   :  { %15199 = vmatprep.mubr.msk.f32.mxu0 %vm15595_vm3, %v22333_v28  ;;  %v14832_v7 = vpop.f32.mrf.mxu1 }
 0x83d   :  { %v14937_v9 = vpop.f32.mrf.mxu0  ;;  %v20752_v50 = vadd.f32 %v8318_v46, %v8063_v39  ;;  %v8501_v7 = vld [vmem:[#allocation4 + $0xf0] sm:$0xff] }
 0x83e   :  { %v7938_v18 = vpop.f32.mrf.mxu1  ;;  %15095 = vmatmul.mubr.msk.f32.gmra.mxu1 %vm1154_vm1, %v8497_v2  ;;  %v8886_v9 = vld [vmem:[#allocation4 + $0xf1] sm:$0xff] }
 0x83f   :  { %v8323_v4 = vpop.f32.mrf.mxu0  ;;  %15200 = vmatmul.mubr.msk.f32.gmra.mxu0 %vm1154_vm1, %v8882_v59  ;;  %v8064_v40 = vadd.f32 %v7938_v18, %v20451_v29  ;;  %15097 = vmatprep.mubr.msk.f32.mxu1 %vm15595_vm3, %v22333_v28 }
 0x840   :  { %15202 = vmatprep.mubr.msk.f32.mxu0 %vm15595_vm3, %v22333_v28  ;;  %v14835_v27 = vpop.f32.mrf.mxu1 }
 0x841   :  { %v14940_v45 = vpop.f32.mrf.mxu0  ;;  %v20761_v51 = vadd.f32 %v8323_v4, %v8064_v40  ;;  %v8502_v27 = vld [vmem:[#allocation4 + $0xf8] sm:$0xff] }
 0x842   :  { %v7943_v14 = vpop.f32.mrf.mxu1  ;;  %15098 = vmatmul.mubr.msk.f32.gmra.mxu1 %vm1154_vm1, %v8498_v6  ;;  %v8887_v45 = vld [vmem:[#allocation4 + $0xf9] sm:$0xff] }
 0x843   :  { %v8328_v63 = vpop.f32.mrf.mxu0  ;;  %15203 = vmatmul.mubr.msk.f32.gmra.mxu0 %vm1154_vm1, %v8883_v0  ;;  %v8065_v29 = vadd.f32 %v7943_v14, %v20459_v55  ;;  %15100 = vmatprep.mubr.msk.f32.mxu1 %vm15595_vm3, %v22333_v28 }
 0x844   :  { %15205 = vmatprep.mubr.msk.f32.mxu0 %vm15595_vm3, %v22333_v28  ;;  %v14838_v30 = vpop.f32.mrf.mxu1 }
 0x845   :  { %v14943_v47 = vpop.f32.mrf.mxu0  ;;  %v20770_v8 = vadd.f32 %v8328_v63, %v8065_v29  ;;  %v8503_v30 = vld [vmem:[#allocation4 + $0x100] sm:$0x3] }
 0x846   :  { %v7948_v44 = vpop.f32.mrf.mxu1  ;;  %15101 = vmatmul.mubr.msk.f32.gmra.mxu1 %vm1154_vm1, %v8499_v31  ;;  %v8888_v47 = vld [vmem:[#allocation4 + $0x101] sm:$0x3] }
 0x847   :  { %v8333_v11 = vpop.f32.mrf.mxu0  ;;  %15206 = vmatmul.mubr.msk.f32.gmra.mxu0 %vm1154_vm1, %v8884_v1  ;;  %v8066_v55 = vadd.f32 %v7948_v44, %v20467_v24  ;;  %15103 = vmatprep.mubr.msk.f32.mxu1 %vm15595_vm3, %v22333_v28 }
 0x848   :  { %15208 = vmatprep.mubr.msk.f32.mxu0 %vm15595_vm3, %v22333_v28  ;;  %v14841_v5 = vpop.f32.mrf.mxu1 }
 0x849   :  { %v14946_v13 = vpop.f32.mrf.mxu0  ;;  %v20779_v34 = vadd.f32 %v8333_v11, %v8066_v55  ;;  %v9243_v5 = vld [vmem:[#allocation4 + $0x1a] sm:$0xff] }
 0x84a   :  { %v7953_v41 = vpop.f32.mrf.mxu1  ;;  %15104 = vmatmul.mubr.msk.f32.gmra.mxu1 %vm1154_vm1, %v8500_v26  ;;  %v9628_v13 = vld [vmem:[#allocation4 + $0x1b] sm:$0xff]  ;;  %v11868_v26 = vld [vmem:[%s21929_s5 + $0x1a8] sm:$0xf] }
 0x84b   :  { %v8338_v37 = vpop.f32.mrf.mxu0  ;;  %15209 = vmatmul.mubr.msk.f32.gmra.mxu0 %vm1154_vm1, %v8885_v15  ;;  %v8067_v24 = vadd.f32 %v7953_v41, %v20475_v22  ;;  %15106 = vmatprep.mubr.msk.f32.mxu1 %vm15595_vm3, %v22333_v28 }
 0x84c   :  { %15211 = vmatprep.mubr.msk.f32.mxu0 %vm15595_vm3, %v22333_v28  ;;  %v14844_v21 = vpop.f32.mrf.mxu1 }
 0x84d   :  { %v14949_v46 = vpop.f32.mrf.mxu0  ;;  %v20788_v39 = vadd.f32 %v8338_v37, %v8067_v24 }
 0x84e   :  { %v7958_v2 = vpop.f32.mrf.mxu1  ;;  %15107 = vmatmul.mubr.msk.f32.gmra.mxu1 %vm1154_vm1, %v8501_v7  ;;  %v9244_v46 = vld [vmem:[#allocation4 + $0x22] sm:$0xff] }
 0x84f   :  { %v8343_v59 = vpop.f32.mrf.mxu0  ;;  %15212 = vmatmul.mubr.msk.f32.gmra.mxu0 %vm1154_vm1, %v8886_v9  ;;  %v8068_v22 = vadd.f32 %v7958_v2, %v20483_v23  ;;  %15109 = vmatprep.mubr.msk.f32.mxu1 %vm15595_vm3, %v22333_v28  ;;  %v9629_v7 = vld [vmem:[#allocation4 + $0x23] sm:$0xff] }
 0x850   :  { %15214 = vmatprep.mubr.msk.f32.mxu0 %vm15595_vm3, %v22333_v28  ;;  %v14847_v18 = vpop.f32.mrf.mxu1 }
 0x851   :  { %v14952_v4 = vpop.f32.mrf.mxu0  ;;  %v20797_v40 = vadd.f32 %v8343_v59, %v8068_v22 }
 0x852   :  { %v7963_v6 = vpop.f32.mrf.mxu1  ;;  %15110 = vmatmul.mubr.msk.f32.gmra.mxu1 %vm1154_vm1, %v8502_v27  ;;  %v9245_v27 = vld [vmem:[#allocation4 + $0x2a] sm:$0xff] }
 0x853   :  { %v8348_v0 = vpop.f32.mrf.mxu0  ;;  %15215 = vmatmul.mubr.msk.f32.gmra.mxu0 %vm1154_vm1, %v8887_v45  ;;  %v8069_v23 = vadd.f32 %v7963_v6, %v20491_v62  ;;  %15112 = vmatprep.mubr.msk.f32.mxu1 %vm15595_vm3, %v22333_v28  ;;  %v9630_v45 = vld [vmem:[#allocation4 + $0x2b] sm:$0xff]  ;;  %v11866_v6 = vld [vmem:[%s21929_s5 + $0x198] sm:$0xff] }
 0x854   :  { %15217 = vmatprep.mubr.msk.f32.mxu0 %vm15595_vm3, %v22333_v28  ;;  %v14850_v14 = vpop.f32.mrf.mxu1 }
 0x855   :  { %v14955_v63 = vpop.f32.mrf.mxu0  ;;  %v20806_v29 = vadd.f32 %v8348_v0, %v8069_v23 }
 0x856   :  { %v7968_v31 = vpop.f32.mrf.mxu1  ;;  %15113 = vmatmul.mubr.msk.f32.gmra.mxu1 %vm1154_vm1, %v8503_v30 }
 0x857   :  { %v8353_v1 = vpop.f32.mrf.mxu0  ;;  %15218 = vmatmul.mubr.msk.f32.gmra.mxu0 %vm1154_vm1, %v8888_v47  ;;  %v8070_v62 = vadd.f32 %v7968_v31, %v20499_v38  ;;  %15232 = vmatprep.mubr.msk.f32.mxu1 %vm15595_vm3, %v22333_v28  ;;  %v9246_v47 = vld [vmem:[#allocation4 + $0x32] sm:$0xff] }
 0x858   :  { %15337 = vmatprep.mubr.msk.f32.mxu0 %vm15595_vm3, %v22333_v28  ;;  %v14853_v44 = vpop.f32.mrf.mxu1  ;;  %v9631_v31 = vld [vmem:[#allocation4 + $0x33] sm:$0xff] }
 0x859   :  { %v14958_v11 = vpop.f32.mrf.mxu0  ;;  %v20815_v55 = vadd.f32 %v8353_v1, %v8070_v62  ;;  %v11865_v1 = vld [vmem:[%s21929_s5 + $0x190] sm:$0xff] }
 0x85a   :  { %v7973_v15 = vpop.f32.mrf.mxu1  ;;  %15233 = vmatmul.mubr.msk.f32.vlgmr.msra.gmra.mxu1 %vm1154_vm1, %v9243_v5 }
 0x85b   :  { %v8358_v41 = vpop.f32.mrf.mxu0  ;;  %15338 = vmatmul.mubr.msk.f32.vlgmr.msra.gmra.mxu0 %vm1154_vm1, %v9628_v13  ;;  %v8071_v38 = vadd.f32 %v7973_v15, %v20513_v25  ;;  %15235 = vmatprep.mubr.msk.f32.mxu1 %vm15595_vm3, %v22333_v28  ;;  %v11867_v25 = vld [vmem:[%s21929_s5 + $0x1a0] sm:$0xff]  ;;  %v9632_v15 = vld [vmem:[#allocation4 + $0x3b] sm:$0xff] }
 0x85c   :  { %15340 = vmatprep.mubr.msk.f32.mxu0 %vm15595_vm3, %v22333_v28  ;;  %v14856_v37 = vpop.f32.mrf.mxu1  ;;  %15431 = vmatpush3.msk.msra.mxu1 %vm3038_vm2, %v11868_v26  ;;  %v9247_v26 = vld [vmem:[#allocation4 + $0x3a] sm:$0xff] }
 0x85d   :  { %v14961_v24 = vpop.f32.mrf.mxu0  ;;  %v20828_v21 = vadd.f32 %v8358_v41, %v8071_v38  ;;  %15432 = vmatprep.subr.mxu1 %v22333_v28  ;;  %v11864_v41 = vld [vmem:[%s21929_s5 + $0x188] sm:$0xff] }
 0x85e   :  { %v7978_v9 = vpop.f32.mrf.mxu1  ;;  %15236 = vmatmul.mubr.msk.f32.gmra.mxu1 %vm1154_vm1, %v9244_v46 }
 0x85f   :  { %v8363_v2 = vpop.f32.mrf.mxu0  ;;  %15341 = vmatmul.mubr.msk.f32.gmra.mxu0 %vm1154_vm1, %v9629_v7  ;;  %v8072_v59 = vadd.f32 %v7978_v9, %v20531_v58  ;;  %15238 = vmatprep.mubr.msk.f32.mxu1 %vm15595_vm3, %v22333_v28  ;;  %v9633_v9 = vld [vmem:[#allocation4 + $0x43] sm:$0xff] }
 0x860   :  { %15343 = vmatprep.mubr.msk.f32.mxu0 %vm15595_vm3, %v22333_v28  ;;  %v14859_v22 = vpop.f32.mrf.mxu1  ;;  %15433 = vmatpush3.msra.mxu1 %v11867_v25  ;;  %v9248_v25 = vld [vmem:[#allocation4 + $0x42] sm:$0xff] }
 0x861   :  { %v14964_v18 = vpop.f32.mrf.mxu0  ;;  %v20841_v4 = vadd.f32 %v8363_v2, %v8072_v59  ;;  %15434 = vmatprep.subr.mxu1 %v22333_v28  ;;  %v11863_v2 = vld [vmem:[%s21929_s5 + $0x180] sm:$0xff] }
 0x862   :  { %v7983_v58 = vpop.f32.mrf.mxu1  ;;  %15239 = vmatmul.mubr.msk.f32.gmra.mxu1 %vm1154_vm1, %v9245_v27 }
 0x863   :  { %v8368_v0 = vpop.f32.mrf.mxu0  ;;  %15344 = vmatmul.mubr.msk.f32.gmra.mxu0 %vm1154_vm1, %v9630_v45  ;;  %v8073_v23 = vadd.f32 %v7983_v58, %v20547_v61  ;;  %15241 = vmatprep.mubr.msk.f32.mxu1 %vm15595_vm3, %v22333_v28  ;;  %v9634_v58 = vld [vmem:[#allocation4 + $0x4b] sm:$0xff] }
 0x864   :  { %15346 = vmatprep.mubr.msk.f32.mxu0 %vm15595_vm3, %v22333_v28  ;;  %v14862_v14 = vpop.f32.mrf.mxu1  ;;  %15435 = vmatpush3.msra.mxu1 %v11866_v6  ;;  %v9249_v6 = vld [vmem:[#allocation4 + $0x4a] sm:$0xff] }
 0x865   :  { %v14967_v63 = vpop.f32.mrf.mxu0  ;;  %v20854_v30 = vadd.f32 %v8368_v0, %v8073_v23  ;;  %15436 = vmatprep.subr.mxu1 %v22333_v28 }
 0x866   :  { %v7988_v61 = vpop.f32.mrf.mxu1  ;;  %15242 = vmatmul.mubr.msk.f32.gmra.mxu1 %vm1154_vm1, %v9246_v47 }
 0x867   :  { %v8373_v62 = vpop.f32.mrf.mxu0  ;;  %15347 = vmatmul.mubr.msk.f32.gmra.mxu0 %vm1154_vm1, %v9631_v31  ;;  %v8074_v44 = vadd.f32 %v7988_v61, %v20563_v36  ;;  %15244 = vmatprep.mubr.msk.f32.mxu1 %vm15595_vm3, %v22333_v28  ;;  %v9250_v31 = vld [vmem:[#allocation4 + $0x52] sm:$0xff] }
 0x868   :  { %15349 = vmatprep.mubr.msk.f32.mxu0 %vm15595_vm3, %v22333_v28  ;;  %v14865_v11 = vpop.f32.mrf.mxu1  ;;  %15437 = vmatpush3.msra.mxu1 %v11865_v1  ;;  %v9635_v1 = vld [vmem:[#allocation4 + $0x53] sm:$0xff] }
 0x869   :  { %v14970_v5 = vpop.f32.mrf.mxu0  ;;  %v20867_v13 = vadd.f32 %v8373_v62, %v8074_v44  ;;  %15438 = vmatprep.subr.mxu1 %v22333_v28 }
 0x86a   :  { %v7993_v36 = vpop.f32.mrf.mxu1  ;;  %15245 = vmatmul.mubr.msk.f32.gmra.mxu1 %vm1154_vm1, %v9247_v26  ;;  %v9251_v26 = vld [vmem:[#allocation4 + $0x5a] sm:$0xff] }
 0x86b   :  { %v8378_v38 = vpop.f32.mrf.mxu0  ;;  %15350 = vmatmul.mubr.msk.f32.gmra.mxu0 %vm1154_vm1, %v9632_v15  ;;  %v8075_v37 = vadd.f32 %v7993_v36, %v20579_v42  ;;  %15247 = vmatprep.mubr.msk.f32.mxu1 %vm15595_vm3, %v22333_v28  ;;  %v9636_v15 = vld [vmem:[#allocation4 + $0x5b] sm:$0xff] }
 0x86c   :  { %15352 = vmatprep.mubr.msk.f32.mxu0 %vm15595_vm3, %v22333_v28  ;;  %v14868_v24 = vpop.f32.mrf.mxu1  ;;  %15439 = vmatpush3.msra.mxu1 %v11864_v41 }
 0x86d   :  { %v14973_v46 = vpop.f32.mrf.mxu0  ;;  %v20880_v7 = vadd.f32 %v8378_v38, %v8075_v37  ;;  %15440 = vmatprep.subr.mxu1 %v22333_v28 }
 0x86e   :  { %v7998_v42 = vpop.f32.mrf.mxu1  ;;  %15248 = vmatmul.mubr.msk.f32.gmra.mxu1 %vm1154_vm1, %v9248_v25  ;;  %v9252_v46 = vld [vmem:[#allocation4 + $0x62] sm:$0xff] }
 0x86f   :  { %v8383_v59 = vpop.f32.mrf.mxu0  ;;  %15353 = vmatmul.mubr.msk.f32.gmra.mxu0 %vm1154_vm1, %v9633_v9  ;;  %v8076_v22 = vadd.f32 %v7998_v42, %v20595_v20  ;;  %15250 = vmatprep.mubr.msk.f32.mxu1 %vm15595_vm3, %v22333_v28  ;;  %v9637_v25 = vld [vmem:[#allocation4 + $0x63] sm:$0xff] }
 0x870   :  { %15355 = vmatprep.mubr.msk.f32.mxu0 %vm15595_vm3, %v22333_v28  ;;  %v14871_v18 = vpop.f32.mrf.mxu1  ;;  %15441 = vmatpush3.msra.mxu1 %v11863_v2 }
 0x871   :  { %v14976_v27 = vpop.f32.mrf.mxu0  ;;  %v20893_v45 = vadd.f32 %v8383_v59, %v8076_v22  ;;  %v9253_v18 = vld [vmem:[#allocation4 + $0x6a] sm:$0xff] }
 0x872   :  { %v8003_v0 = vpop.f32.mrf.mxu1  ;;  %15251 = vmatmul.mubr.msk.f32.gmra.mxu1 %vm1154_vm1, %v9249_v6  ;;  %v9638_v27 = vld [vmem:[#allocation4 + $0x6b] sm:$0xff] }
 0x873   :  { %v8388_v23 = vpop.f32.mrf.mxu0  ;;  %15356 = vmatmul.mubr.msk.f32.gmra.mxu0 %vm1154_vm1, %v9634_v58  ;;  %v8077_v20 = vadd.f32 %v8003_v0, %v20605_v56  ;;  %15253 = vmatprep.mubr.msk.f32.mxu1 %vm15595_vm3, %v22333_v28 }
 0x874   :  { %15358 = vmatprep.mubr.msk.f32.mxu0 %vm15595_vm3, %v22333_v28  ;;  %v14874_v14 = vpop.f32.mrf.mxu1 }
 0x875   :  { %v14979_v63 = vpop.f32.mrf.mxu0  ;;  %v20902_v47 = vadd.f32 %v8388_v23, %v8077_v20  ;;  %v9254_v14 = vld [vmem:[#allocation4 + $0x72] sm:$0xff] }
 0x876   :  { %v8008_v61 = vpop.f32.mrf.mxu1  ;;  %15254 = vmatmul.mubr.msk.f32.gmra.mxu1 %vm1154_vm1, %v9250_v31  ;;  %v9639_v63 = vld [vmem:[#allocation4 + $0x73] sm:$0xff] }
 0x877   :  { %v8393_v62 = vpop.f32.mrf.mxu0  ;;  %15359 = vmatmul.mubr.msk.f32.gmra.mxu0 %vm1154_vm1, %v9635_v1  ;;  %v8078_v56 = vadd.f32 %v8008_v61, %v20613_v12  ;;  %15256 = vmatprep.mubr.msk.f32.mxu1 %vm15595_vm3, %v22333_v28 }
 0x878   :  { %15361 = vmatprep.mubr.msk.f32.mxu0 %vm15595_vm3, %v22333_v28  ;;  %v14877_v44 = vpop.f32.mrf.mxu1 }
 0x879   :  { %v14982_v11 = vpop.f32.mrf.mxu0  ;;  %v20911_v5 = vadd.f32 %v8393_v62, %v8078_v56  ;;  %v9255_v44 = vld [vmem:[#allocation4 + $0x7a] sm:$0xff] }
 0x87a   :  { %v8013_v41 = vpop.f32.mrf.mxu1  ;;  %15257 = vmatmul.mubr.msk.f32.gmra.mxu1 %vm1154_vm1, %v9251_v26  ;;  %v9640_v11 = vld [vmem:[#allocation4 + $0x7b] sm:$0xff] }
 0x87b   :  { %v8398_v36 = vpop.f32.mrf.mxu0  ;;  %15362 = vmatmul.mubr.msk.f32.gmra.mxu0 %vm1154_vm1, %v9636_v15  ;;  %v8079_v12 = vadd.f32 %v8013_v41, %v20621_v3  ;;  %15259 = vmatprep.mubr.msk.f32.mxu1 %vm15595_vm3, %v22333_v28 }
 0x87c   :  { %15364 = vmatprep.mubr.msk.f32.mxu0 %vm15595_vm3, %v22333_v28  ;;  %v14880_v38 = vpop.f32.mrf.mxu1 }
 0x87d   :  { %v14985_v37 = vpop.f32.mrf.mxu0  ;;  %v20920_v24 = vadd.f32 %v8398_v36, %v8079_v12  ;;  %v9256_v38 = vld [vmem:[#allocation4 + $0x82] sm:$0xff] }
 0x87e   :  { %v8018_v9 = vpop.f32.mrf.mxu1  ;;  %15260 = vmatmul.mubr.msk.f32.gmra.mxu1 %vm1154_vm1, %v9252_v46  ;;  %v9641_v37 = vld [vmem:[#allocation4 + $0x83] sm:$0xff] }
 0x87f   :  { %v8403_v2 = vpop.f32.mrf.mxu0  ;;  %15365 = vmatmul.mubr.msk.f32.gmra.mxu0 %vm1154_vm1, %v9637_v25  ;;  %v8080_v3 = vadd.f32 %v8018_v9, %v20629_v43  ;;  %15262 = vmatprep.mubr.msk.f32.mxu1 %vm15595_vm3, %v22333_v28 }
 0x880   :  { %15367 = vmatprep.mubr.msk.f32.mxu0 %vm15595_vm3, %v22333_v28  ;;  %v14883_v42 = vpop.f32.mrf.mxu1 }
 0x881   :  { %v14988_v59 = vpop.f32.mrf.mxu0  ;;  %v20929_v22 = vadd.f32 %v8403_v2, %v8080_v3  ;;  %v9257_v42 = vld [vmem:[#allocation4 + $0x8a] sm:$0xff] }
 0x882   :  { %v8023_v6 = vpop.f32.mrf.mxu1  ;;  %15263 = vmatmul.mubr.msk.f32.gmra.mxu1 %vm1154_vm1, %v9253_v18  ;;  %v9642_v59 = vld [vmem:[#allocation4 + $0x8b] sm:$0xff] }
 0x883   :  { %v8408_v58 = vpop.f32.mrf.mxu0  ;;  %15368 = vmatmul.mubr.msk.f32.gmra.mxu0 %vm1154_vm1, %v9638_v27  ;;  %v8081_v43 = vadd.f32 %v8023_v6, %v20637_v49  ;;  %15265 = vmatprep.mubr.msk.f32.mxu1 %vm15595_vm3, %v22333_v28 }
 0x884   :  { %15370 = vmatprep.mubr.msk.f32.mxu0 %vm15595_vm3, %v22333_v28  ;;  %v14886_v0 = vpop.f32.mrf.mxu1 }
 0x885   :  { %v14991_v23 = vpop.f32.mrf.mxu0  ;;  %v20938_v20 = vadd.f32 %v8408_v58, %v8081_v43  ;;  %v9258_v0 = vld [vmem:[#allocation4 + $0x92] sm:$0xff] }
 0x886   :  { %v8028_v31 = vpop.f32.mrf.mxu1  ;;  %15266 = vmatmul.mubr.msk.f32.gmra.mxu1 %vm1154_vm1, %v9254_v14  ;;  %v9643_v23 = vld [vmem:[#allocation4 + $0x93] sm:$0xff] }
 0x887   :  { %v8413_v1 = vpop.f32.mrf.mxu0  ;;  %15371 = vmatmul.mubr.msk.f32.gmra.mxu0 %vm1154_vm1, %v9639_v63  ;;  %v8082_v49 = vadd.f32 %v8028_v31, %v20645_v53  ;;  %15268 = vmatprep.mubr.msk.f32.mxu1 %vm15595_vm3, %v22333_v28 }
 0x888   :  { %15373 = vmatprep.mubr.msk.f32.mxu0 %vm15595_vm3, %v22333_v28  ;;  %v14889_v61 = vpop.f32.mrf.mxu1 }
 0x889   :  { %v14994_v62 = vpop.f32.mrf.mxu0  ;;  %v20947_v56 = vadd.f32 %v8413_v1, %v8082_v49  ;;  %v9259_v61 = vld [vmem:[#allocation4 + $0x9a] sm:$0xff] }
 0x88a   :  { %v8033_v26 = vpop.f32.mrf.mxu1  ;;  %15269 = vmatmul.mubr.msk.f32.gmra.mxu1 %vm1154_vm1, %v9255_v44  ;;  %v9644_v62 = vld [vmem:[#allocation4 + $0x9b] sm:$0xff] }
 0x88b   :  { %v8418_v15 = vpop.f32.mrf.mxu0  ;;  %15374 = vmatmul.mubr.msk.f32.gmra.mxu0 %vm1154_vm1, %v9640_v11  ;;  %v8083_v53 = vadd.f32 %v8033_v26, %v20653_v16  ;;  %15271 = vmatprep.mubr.msk.f32.mxu1 %vm15595_vm3, %v22333_v28 }
 0x88c   :  { %15376 = vmatprep.mubr.msk.f32.mxu0 %vm15595_vm3, %v22333_v28  ;;  %v14892_v41 = vpop.f32.mrf.mxu1 }
 0x88d   :  { %v14997_v36 = vpop.f32.mrf.mxu0  ;;  %v20956_v12 = vadd.f32 %v8418_v15, %v8083_v53  ;;  %v9260_v41 = vld [vmem:[#allocation4 + $0xa2] sm:$0xff] }
 0x88e   :  { %v8038_v46 = vpop.f32.mrf.mxu1  ;;  %15272 = vmatmul.mubr.msk.f32.gmra.mxu1 %vm1154_vm1, %v9256_v38  ;;  %v9645_v36 = vld [vmem:[#allocation4 + $0xa3] sm:$0xff] }
 0x88f   :  { %v8423_v25 = vpop.f32.mrf.mxu0  ;;  %15377 = vmatmul.mubr.msk.f32.gmra.mxu0 %vm1154_vm1, %v9641_v37  ;;  %v8084_v16 = vadd.f32 %v8038_v46, %v20661_v52  ;;  %15274 = vmatprep.mubr.msk.f32.mxu1 %vm15595_vm3, %v22333_v28 }
 0x890   :  { %15379 = vmatprep.mubr.msk.f32.mxu0 %vm15595_vm3, %v22333_v28  ;;  %v14895_v9 = vpop.f32.mrf.mxu1 }
 0x891   :  { %v15000_v2 = vpop.f32.mrf.mxu0  ;;  %v20965_v3 = vadd.f32 %v8423_v25, %v8084_v16  ;;  %v9261_v9 = vld [vmem:[#allocation4 + $0xaa] sm:$0xff] }
 0x892   :  { %v8043_v18 = vpop.f32.mrf.mxu1  ;;  %15275 = vmatmul.mubr.msk.f32.gmra.mxu1 %vm1154_vm1, %v9257_v42  ;;  %v9646_v2 = vld [vmem:[#allocation4 + $0xab] sm:$0xff] }
 0x893   :  { %v8428_v27 = vpop.f32.mrf.mxu0  ;;  %15380 = vmatmul.mubr.msk.f32.gmra.mxu0 %vm1154_vm1, %v9642_v59  ;;  %v8085_v52 = vadd.f32 %v8043_v18, %v20669_v17  ;;  %15277 = vmatprep.mubr.msk.f32.mxu1 %vm15595_vm3, %v22333_v28 }
 0x894   :  { %15382 = vmatprep.mubr.msk.f32.mxu0 %vm15595_vm3, %v22333_v28  ;;  %v14898_v6 = vpop.f32.mrf.mxu1 }
 0x895   :  { %v15003_v58 = vpop.f32.mrf.mxu0  ;;  %v20974_v43 = vadd.f32 %v8428_v27, %v8085_v52  ;;  %v9262_v6 = vld [vmem:[#allocation4 + $0xb2] sm:$0xff] }
 0x896   :  { %v8048_v14 = vpop.f32.mrf.mxu1  ;;  %15278 = vmatmul.mubr.msk.f32.gmra.mxu1 %vm1154_vm1, %v9258_v0  ;;  %v9647_v58 = vld [vmem:[#allocation4 + $0xb3] sm:$0xff] }
 0x897   :  { %v8433_v63 = vpop.f32.mrf.mxu0  ;;  %15383 = vmatmul.mubr.msk.f32.gmra.mxu0 %vm1154_vm1, %v9643_v23  ;;  %v8086_v17 = vadd.f32 %v8048_v14, %v20677_v35  ;;  %15280 = vmatprep.mubr.msk.f32.mxu1 %vm15595_vm3, %v22333_v28 }
 0x898   :  { %15385 = vmatprep.mubr.msk.f32.mxu0 %vm15595_vm3, %v22333_v28  ;;  %v14901_v31 = vpop.f32.mrf.mxu1 }
 0x899   :  { %v15006_v1 = vpop.f32.mrf.mxu0  ;;  %v20983_v49 = vadd.f32 %v8433_v63, %v8086_v17  ;;  %v9263_v31 = vld [vmem:[#allocation4 + $0xba] sm:$0xff] }
 0x89a   :  { %v8053_v44 = vpop.f32.mrf.mxu1  ;;  %15281 = vmatmul.mubr.msk.f32.gmra.mxu1 %vm1154_vm1, %v9259_v61  ;;  %v9648_v1 = vld [vmem:[#allocation4 + $0xbb] sm:$0xff] }
 0x89b   :  { %v8438_v11 = vpop.f32.mrf.mxu0  ;;  %15386 = vmatmul.mubr.msk.f32.gmra.mxu0 %vm1154_vm1, %v9644_v62  ;;  %v8087_v35 = vadd.f32 %v8053_v44, %v20685_v60  ;;  %15283 = vmatprep.mubr.msk.f32.mxu1 %vm15595_vm3, %v22333_v28 }
 0x89c   :  { %15388 = vmatprep.mubr.msk.f32.mxu0 %vm15595_vm3, %v22333_v28  ;;  %v14904_v26 = vpop.f32.mrf.mxu1 }
 0x89d   :  { %v15009_v15 = vpop.f32.mrf.mxu0  ;;  %v20992_v53 = vadd.f32 %v8438_v11, %v8087_v35  ;;  %v9264_v26 = vld [vmem:[#allocation4 + $0xc2] sm:$0xff] }
 0x89e   :  { %v8673_v38 = vpop.f32.mrf.mxu1  ;;  %15284 = vmatmul.mubr.msk.f32.gmra.mxu1 %vm1154_vm1, %v9260_v41  ;;  %v9649_v15 = vld [vmem:[#allocation4 + $0xc3] sm:$0xff] }
 0x89f   :  { %v9058_v37 = vpop.f32.mrf.mxu0  ;;  %15389 = vmatmul.mubr.msk.f32.gmra.mxu0 %vm1154_vm1, %v9645_v36  ;;  %v8827_v60 = vadd.f32 %v8673_v38, %v20698_v32  ;;  %15286 = vmatprep.mubr.msk.f32.mxu1 %vm15595_vm3, %v22333_v28 }
 0x8a0   :  { %15391 = vmatprep.mubr.msk.f32.mxu0 %vm15595_vm3, %v22333_v28  ;;  %v15024_v46 = vpop.f32.mrf.mxu1 }
 0x8a1   :  { %v15129_v25 = vpop.f32.mrf.mxu0  ;;  %v21001_v16 = vadd.f32 %v9058_v37, %v8827_v60  ;;  %v9265_v46 = vld [vmem:[#allocation4 + $0xca] sm:$0xff] }
 0x8a2   :  { %v8678_v42 = vpop.f32.mrf.mxu1  ;;  %15287 = vmatmul.mubr.msk.f32.gmra.mxu1 %vm1154_vm1, %v9261_v9  ;;  %v9650_v25 = vld [vmem:[#allocation4 + $0xcb] sm:$0xff] }
 0x8a3   :  { %v9063_v59 = vpop.f32.mrf.mxu0  ;;  %15392 = vmatmul.mubr.msk.f32.gmra.mxu0 %vm1154_vm1, %v9646_v2  ;;  %v8828_v32 = vadd.f32 %v8678_v42, %v20707_v10  ;;  %15289 = vmatprep.mubr.msk.f32.mxu1 %vm15595_vm3, %v22333_v28 }
 0x8a4   :  { %15394 = vmatprep.mubr.msk.f32.mxu0 %vm15595_vm3, %v22333_v28  ;;  %v15027_v18 = vpop.f32.mrf.mxu1 }
 0x8a5   :  { %v15132_v27 = vpop.f32.mrf.mxu0  ;;  %v21010_v52 = vadd.f32 %v9063_v59, %v8828_v32  ;;  %v9266_v18 = vld [vmem:[#allocation4 + $0xd2] sm:$0xff] }
 0x8a6   :  { %v8683_v0 = vpop.f32.mrf.mxu1  ;;  %15290 = vmatmul.mubr.msk.f32.gmra.mxu1 %vm1154_vm1, %v9262_v6  ;;  %v9651_v27 = vld [vmem:[#allocation4 + $0xd3] sm:$0xff] }
 0x8a7   :  { %v9068_v23 = vpop.f32.mrf.mxu0  ;;  %15395 = vmatmul.mubr.msk.f32.gmra.mxu0 %vm1154_vm1, %v9647_v58  ;;  %v8829_v10 = vadd.f32 %v8683_v0, %v20716_v54  ;;  %15292 = vmatprep.mubr.msk.f32.mxu1 %vm15595_vm3, %v22333_v28 }
 0x8a8   :  { %15397 = vmatprep.mubr.msk.f32.mxu0 %vm15595_vm3, %v22333_v28  ;;  %v15030_v14 = vpop.f32.mrf.mxu1 }
 0x8a9   :  { %v15135_v63 = vpop.f32.mrf.mxu0  ;;  %v21019_v17 = vadd.f32 %v9068_v23, %v8829_v10  ;;  %v9267_v14 = vld [vmem:[#allocation4 + $0xda] sm:$0xff] }
 0x8aa   :  { %v8688_v61 = vpop.f32.mrf.mxu1  ;;  %15293 = vmatmul.mubr.msk.f32.gmra.mxu1 %vm1154_vm1, %v9263_v31  ;;  %v9652_v63 = vld [vmem:[#allocation4 + $0xdb] sm:$0xff] }
 0x8ab   :  { %v9073_v62 = vpop.f32.mrf.mxu0  ;;  %15398 = vmatmul.mubr.msk.f32.gmra.mxu0 %vm1154_vm1, %v9648_v1  ;;  %v8830_v54 = vadd.f32 %v8688_v61, %v20725_v19  ;;  %15295 = vmatprep.mubr.msk.f32.mxu1 %vm15595_vm3, %v22333_v28 }
 0x8ac   :  { %15400 = vmatprep.mubr.msk.f32.mxu0 %vm15595_vm3, %v22333_v28  ;;  %v15033_v44 = vpop.f32.mrf.mxu1 }
 0x8ad   :  { %v15138_v11 = vpop.f32.mrf.mxu0  ;;  %v21028_v35 = vadd.f32 %v9073_v62, %v8830_v54  ;;  %v9268_v44 = vld [vmem:[#allocation4 + $0xe2] sm:$0xff] }
 0x8ae   :  { %v8693_v41 = vpop.f32.mrf.mxu1  ;;  %15296 = vmatmul.mubr.msk.f32.gmra.mxu1 %vm1154_vm1, %v9264_v26  ;;  %v9653_v11 = vld [vmem:[#allocation4 + $0xe3] sm:$0xff] }
 0x8af   :  { %v9078_v36 = vpop.f32.mrf.mxu0  ;;  %15401 = vmatmul.mubr.msk.f32.gmra.mxu0 %vm1154_vm1, %v9649_v15  ;;  %v8831_v19 = vadd.f32 %v8693_v41, %v20734_v48  ;;  %15298 = vmatprep.mubr.msk.f32.mxu1 %vm15595_vm3, %v22333_v28 }
 0x8b0   :  { %15403 = vmatprep.mubr.msk.f32.mxu0 %vm15595_vm3, %v22333_v28  ;;  %v15036_v38 = vpop.f32.mrf.mxu1 }
 0x8b1   :  { %v15141_v37 = vpop.f32.mrf.mxu0  ;;  %v21037_v60 = vadd.f32 %v9078_v36, %v8831_v19  ;;  %v9269_v38 = vld [vmem:[#allocation4 + $0xea] sm:$0xff] }
 0x8b2   :  { %v8698_v9 = vpop.f32.mrf.mxu1  ;;  %15299 = vmatmul.mubr.msk.f32.gmra.mxu1 %vm1154_vm1, %v9265_v46  ;;  %v9654_v37 = vld [vmem:[#allocation4 + $0xeb] sm:$0xff] }
 0x8b3   :  { %v9083_v2 = vpop.f32.mrf.mxu0  ;;  %15404 = vmatmul.mubr.msk.f32.gmra.mxu0 %vm1154_vm1, %v9650_v25  ;;  %v8832_v48 = vadd.f32 %v8698_v9, %v20743_v33  ;;  %15301 = vmatprep.mubr.msk.f32.mxu1 %vm15595_vm3, %v22333_v28 }
 0x8b4   :  { %15406 = vmatprep.mubr.msk.f32.mxu0 %vm15595_vm3, %v22333_v28  ;;  %v15039_v42 = vpop.f32.mrf.mxu1 }
 0x8b5   :  { %v15144_v59 = vpop.f32.mrf.mxu0  ;;  %v21046_v32 = vadd.f32 %v9083_v2, %v8832_v48  ;;  %v9270_v42 = vld [vmem:[#allocation4 + $0xf2] sm:$0xff] }
 0x8b6   :  { %v8703_v6 = vpop.f32.mrf.mxu1  ;;  %15302 = vmatmul.mubr.msk.f32.gmra.mxu1 %vm1154_vm1, %v9266_v18  ;;  %v9655_v59 = vld [vmem:[#allocation4 + $0xf3] sm:$0xff] }
 0x8b7   :  { %v9088_v58 = vpop.f32.mrf.mxu0  ;;  %15407 = vmatmul.mubr.msk.f32.gmra.mxu0 %vm1154_vm1, %v9651_v27  ;;  %v8833_v33 = vadd.f32 %v8703_v6, %v20752_v50  ;;  %15304 = vmatprep.mubr.msk.f32.mxu1 %vm15595_vm3, %v22333_v28 }
 0x8b8   :  { %15409 = vmatprep.mubr.msk.f32.mxu0 %vm15595_vm3, %v22333_v28  ;;  %v15042_v0 = vpop.f32.mrf.mxu1 }
 0x8b9   :  { %v15147_v23 = vpop.f32.mrf.mxu0  ;;  %v21055_v10 = vadd.f32 %v9088_v58, %v8833_v33  ;;  %v9271_v0 = vld [vmem:[#allocation4 + $0xfa] sm:$0xff] }
 0x8ba   :  { %v8708_v31 = vpop.f32.mrf.mxu1  ;;  %15305 = vmatmul.mubr.msk.f32.gmra.mxu1 %vm1154_vm1, %v9267_v14  ;;  %v9656_v23 = vld [vmem:[#allocation4 + $0xfb] sm:$0xff] }
 0x8bb   :  { %v9093_v1 = vpop.f32.mrf.mxu0  ;;  %15410 = vmatmul.mubr.msk.f32.gmra.mxu0 %vm1154_vm1, %v9652_v63  ;;  %v8834_v50 = vadd.f32 %v8708_v31, %v20761_v51  ;;  %15307 = vmatprep.mubr.msk.f32.mxu1 %vm15595_vm3, %v22333_v28  ;;  %v9272_v31 = vld [vmem:[#allocation4 + $0x102] sm:$0xff] }
 0x8bc   :  { %15412 = vmatprep.mubr.msk.f32.mxu0 %vm15595_vm3, %v22333_v28  ;;  %v15045_v61 = vpop.f32.mrf.mxu1 }
 0x8bd   :  { %v15150_v62 = vpop.f32.mrf.mxu0  ;;  %v21064_v54 = vadd.f32 %v9093_v1, %v8834_v50  ;;  %v9657_v1 = vld [vmem:[#allocation4 + $0x103] sm:$0xff] }
 0x8be   :  { %v8713_v26 = vpop.f32.mrf.mxu1  ;;  %15308 = vmatmul.mubr.msk.f32.gmra.mxu1 %vm1154_vm1, %v9268_v44 }
 0x8bf   :  { %v9098_v15 = vpop.f32.mrf.mxu0  ;;  %15413 = vmatmul.mubr.msk.f32.gmra.mxu0 %vm1154_vm1, %v9653_v11  ;;  %v8835_v51 = vadd.f32 %v8713_v26, %v20770_v8  ;;  %15310 = vmatprep.mubr.msk.f32.mxu1 %vm15595_vm3, %v22333_v28  ;;  %v9273_v26 = vld [vmem:[#allocation4 + $0x10a] sm:$0x3] }
 0x8c0   :  { %15415 = vmatprep.mubr.msk.f32.mxu0 %vm15595_vm3, %v22333_v28  ;;  %v15048_v41 = vpop.f32.mrf.mxu1 }
 0x8c1   :  { %v15153_v36 = vpop.f32.mrf.mxu0  ;;  %v21073_v19 = vadd.f32 %v9098_v15, %v8835_v51  ;;  %v9658_v15 = vld [vmem:[#allocation4 + $0x10b] sm:$0x3] }
 0x8c2   :  { %v8718_v46 = vpop.f32.mrf.mxu1  ;;  %15311 = vmatmul.mubr.msk.f32.gmra.mxu1 %vm1154_vm1, %v9269_v38 }
 0x8c3   :  { %v9103_v25 = vpop.f32.mrf.mxu0  ;;  %15416 = vmatmul.mubr.msk.f32.gmra.mxu0 %vm1154_vm1, %v9654_v37  ;;  %v8836_v8 = vadd.f32 %v8718_v46, %v20779_v34  ;;  %15313 = vmatprep.mubr.msk.f32.mxu1 %vm15595_vm3, %v22333_v28 }
 0x8c4   :  { %15418 = vmatprep.mubr.msk.f32.mxu0 %vm15595_vm3, %v22333_v28  ;;  %v15051_v9 = vpop.f32.mrf.mxu1 }
 0x8c5   :  { %v15156_v2 = vpop.f32.mrf.mxu0  ;;  %v21082_v48 = vadd.f32 %v9103_v25, %v8836_v8  ;;  %v10013_v9 = vld [vmem:[#allocation4 + $0x1c] sm:$0xff] }
 0x8c6   :  { %v8723_v18 = vpop.f32.mrf.mxu1  ;;  %15314 = vmatmul.mubr.msk.f32.gmra.mxu1 %vm1154_vm1, %v9270_v42 }
 0x8c7   :  { %v9108_v27 = vpop.f32.mrf.mxu0  ;;  %15419 = vmatmul.mubr.msk.f32.gmra.mxu0 %vm1154_vm1, %v9655_v59  ;;  %v8837_v34 = vadd.f32 %v8723_v18, %v20788_v39  ;;  %15316 = vmatprep.mubr.msk.f32.mxu1 %vm15595_vm3, %v22333_v28 }
 0x8c8   :  { %15421 = vmatprep.mubr.msk.f32.mxu0 %vm15595_vm3, %v22333_v28  ;;  %v15054_v6 = vpop.f32.mrf.mxu1 }
 0x8c9   :  { %v15159_v58 = vpop.f32.mrf.mxu0  ;;  %v21091_v33 = vadd.f32 %v9108_v27, %v8837_v34  ;;  %v10014_v34 = vld [vmem:[#allocation4 + $0x24] sm:$0xff] }
 0x8ca   :  { %v8728_v14 = vpop.f32.mrf.mxu1  ;;  %15317 = vmatmul.mubr.msk.f32.gmra.mxu1 %vm1154_vm1, %v9271_v0 }
 0x8cb   :  { %v9113_v63 = vpop.f32.mrf.mxu0  ;;  %15422 = vmatmul.mubr.msk.f32.gmra.mxu0 %vm1154_vm1, %v9656_v23  ;;  %v8838_v39 = vadd.f32 %v8728_v14, %v20797_v40  ;;  %15319 = vmatprep.mubr.msk.f32.mxu1 %vm15595_vm3, %v22333_v28 }
 0x8cc   :  { %15424 = vmatprep.mubr.msk.f32.mxu0 %vm15595_vm3, %v22333_v28  ;;  %v15057_v50 = vpop.f32.mrf.mxu1 }
 0x8cd   :  { %v15162_v61 = vpop.f32.mrf.mxu0  ;;  %v21100_v62 = vadd.f32 %v9113_v63, %v8838_v39  ;;  %v10015_v63 = vld [vmem:[#allocation4 + $0x2c] sm:$0xff] }
 0x8ce   :  { %v8733_v44 = vpop.f32.mrf.mxu1  ;;  %15320 = vmatmul.mubr.msk.f32.gmra.mxu1 %vm1154_vm1, %v9272_v31 }
 0x8cf   :  { %v9118_v11 = vpop.f32.mrf.mxu0  ;;  %15425 = vmatmul.mubr.msk.f32.gmra.mxu0 %vm1154_vm1, %v9657_v1  ;;  %v8839_v40 = vadd.f32 %v8733_v44, %v20806_v29  ;;  %15322 = vmatprep.mubr.msk.f32.mxu1 %vm15595_vm3, %v22333_v28  ;;  %v10016_v44 = vld [vmem:[#allocation4 + $0x34] sm:$0xff] }
 0x8d0   :  { %15427 = vmatprep.mubr.msk.f32.mxu0 %vm15595_vm3, %v22333_v28  ;;  %v15060_v51 = vpop.f32.mrf.mxu1 }
 0x8d1   :  { %v15165_v41 = vpop.f32.mrf.mxu0  ;;  %v21109_v36 = vadd.f32 %v9118_v11, %v8839_v40 }
 0x8d2   :  { %v8738_v38 = vpop.f32.mrf.mxu1  ;;  %15323 = vmatmul.mubr.msk.f32.gmra.mxu1 %vm1154_vm1, %v9273_v26  ;;  %v10017_v41 = vld [vmem:[#allocation4 + $0x3c] sm:$0xff] }
 0x8d3   :  { %v9123_v37 = vpop.f32.mrf.mxu0  ;;  %15428 = vmatmul.mubr.msk.f32.gmra.mxu0 %vm1154_vm1, %v9658_v15  ;;  %v8840_v29 = vadd.f32 %v8738_v38, %v20815_v55  ;;  %15442 = vmatprep.mubr.msk.f32.mxu1 %vm15595_vm3, %v22333_v28 }
 0x8d4   :  { %15557 = vmatprep.mubr.msk.f32.mxu0 %vm15595_vm3, %v22333_v28  ;;  %v15063_v46 = vpop.f32.mrf.mxu1 }
 0x8d5   :  { %v15168_v25 = vpop.f32.mrf.mxu0  ;;  %v21118_v8 = vadd.f32 %v9123_v37, %v8840_v29 }
 0x8d6   :  { %v8743_v2 = vpop.f32.mrf.mxu1  ;;  %15443 = vmatmul.mubr.msk.f32.vlgmr.msra.gmra.mxu1 %vm1154_vm1, %v10013_v9  ;;  %v10018_v9 = vld [vmem:[#allocation4 + $0x44] sm:$0xff] }
 0x8d7   :  { %v9128_v42 = vpop.f32.mrf.mxu0  ;;  %v8841_v59 = vadd.f32 %v8743_v2, %v20828_v21  ;;  %15445 = vmatprep.mubr.msk.f32.mxu1 %vm15595_vm3, %v22333_v28 }
 0x8d8   :  { %v15066_v55 = vpop.f32.mrf.mxu1 }
 0x8d9   :  { %v15171_v18 = vpop.f32.mrf.mxu0  ;;  %v21124_v27 = vadd.f32 %v9128_v42, %v8841_v59 }
 0x8da   :  { %v8748_v6 = vpop.f32.mrf.mxu1  ;;  %15446 = vmatmul.mubr.msk.f32.gmra.mxu1 %vm1154_vm1, %v10014_v34  ;;  %v10019_v34 = vld [vmem:[#allocation4 + $0x4c] sm:$0xff] }
 0x8db   :  { %v9133_v58 = vpop.f32.mrf.mxu0  ;;  %v8842_v0 = vadd.f32 %v8748_v6, %v20841_v4  ;;  %15448 = vmatprep.mubr.msk.f32.mxu1 %vm15595_vm3, %v22333_v28 }
 0x8dc   :  { %v15069_v23 = vpop.f32.mrf.mxu1 }
 0x8dd   :  { %v15174_v14 = vpop.f32.mrf.mxu0  ;;  %v21130_v21 = vadd.f32 %v9133_v58, %v8842_v0 }
 0x8de   :  { %v8753_v39 = vpop.f32.mrf.mxu1  ;;  %15449 = vmatmul.mubr.msk.f32.gmra.mxu1 %vm1154_vm1, %v10015_v63  ;;  %v10020_v63 = vld [vmem:[#allocation4 + $0x54] sm:$0xff] }
 0x8df   :  { %v9138_v31 = vpop.f32.mrf.mxu0  ;;  %v8843_v1 = vadd.f32 %v8753_v39, %v20854_v30  ;;  %15451 = vmatprep.mubr.msk.f32.mxu1 %vm15595_vm3, %v22333_v28 }
 0x8e0   :  { %v15072_v50 = vpop.f32.mrf.mxu1 }
 0x8e1   :  { %v15177_v61 = vpop.f32.mrf.mxu0  ;;  %v21136_v4 = vadd.f32 %v9138_v31, %v8843_v1 }
 0x8e2   :  { %v8758_v11 = vpop.f32.mrf.mxu1  ;;  %15452 = vmatmul.mubr.msk.f32.gmra.mxu1 %vm1154_vm1, %v10016_v44  ;;  %v10021_v44 = vld [vmem:[#allocation4 + $0x5c] sm:$0xff] }
 0x8e3   :  { %v9143_v40 = vpop.f32.mrf.mxu0  ;;  %v8844_v26 = vadd.f32 %v8758_v11, %v20867_v13  ;;  %15454 = vmatprep.mubr.msk.f32.mxu1 %vm15595_vm3, %v22333_v28 }
 0x8e4   :  { %v15075_v15 = vpop.f32.mrf.mxu1 }
 0x8e5   :  { %v15180_v51 = vpop.f32.mrf.mxu0  ;;  %v21142_v30 = vadd.f32 %v9143_v40, %v8844_v26 }
 0x8e6   :  { %v8763_v38 = vpop.f32.mrf.mxu1  ;;  %15455 = vmatmul.mubr.msk.f32.gmra.mxu1 %vm1154_vm1, %v10017_v41  ;;  %v10022_v41 = vld [vmem:[#allocation4 + $0x64] sm:$0xff] }
 0x8e7   :  { %v9148_v37 = vpop.f32.mrf.mxu0  ;;  %v8845_v29 = vadd.f32 %v8763_v38, %v20880_v7  ;;  %15457 = vmatprep.mubr.msk.f32.mxu1 %vm15595_vm3, %v22333_v28 }
 0x8e8   :  { %v15078_v46 = vpop.f32.mrf.mxu1 }
 0x8e9   :  { %v15183_v25 = vpop.f32.mrf.mxu0  ;;  %v21148_v13 = vadd.f32 %v9148_v37, %v8845_v29 }
 0x8ea   :  { %v8768_v2 = vpop.f32.mrf.mxu1  ;;  %15458 = vmatmul.mubr.msk.f32.gmra.mxu1 %vm1154_vm1, %v10018_v9  ;;  %v10023_v9 = vld [vmem:[#allocation4 + $0x6c] sm:$0xff] }
 0x8eb   :  { %v9153_v42 = vpop.f32.mrf.mxu0  ;;  %v8846_v59 = vadd.f32 %v8768_v2, %v20893_v45  ;;  %15460 = vmatprep.mubr.msk.f32.mxu1 %vm15595_vm3, %v22333_v28 }
 0x8ec   :  { %v15081_v55 = vpop.f32.mrf.mxu1 }
 0x8ed   :  { %v15186_v18 = vpop.f32.mrf.mxu0  ;;  %v21154_v7 = vadd.f32 %v9153_v42, %v8846_v59 }
 0x8ee   :  { %v8773_v6 = vpop.f32.mrf.mxu1  ;;  %15461 = vmatmul.mubr.msk.f32.gmra.mxu1 %vm1154_vm1, %v10019_v34  ;;  %v10024_v34 = vld [vmem:[#allocation4 + $0x74] sm:$0xff] }
 0x8ef   :  { %v9158_v58 = vpop.f32.mrf.mxu0  ;;  %v8847_v0 = vadd.f32 %v8773_v6, %v20902_v47  ;;  %15463 = vmatprep.mubr.msk.f32.mxu1 %vm15595_vm3, %v22333_v28 }
 0x8f0   :  { %v15084_v23 = vpop.f32.mrf.mxu1 }
 0x8f1   :  { %v15189_v14 = vpop.f32.mrf.mxu0  ;;  %v21160_v45 = vadd.f32 %v9158_v58, %v8847_v0 }
 0x8f2   :  { %v8778_v39 = vpop.f32.mrf.mxu1  ;;  %15464 = vmatmul.mubr.msk.f32.gmra.mxu1 %vm1154_vm1, %v10020_v63  ;;  %v10025_v63 = vld [vmem:[#allocation4 + $0x7c] sm:$0xff] }
 0x8f3   :  { %v9163_v31 = vpop.f32.mrf.mxu0  ;;  %v8848_v1 = vadd.f32 %v8778_v39, %v20911_v5  ;;  %15466 = vmatprep.mubr.msk.f32.mxu1 %vm15595_vm3, %v22333_v28 }
 0x8f4   :  { %v15087_v50 = vpop.f32.mrf.mxu1 }
 0x8f5   :  { %v15192_v61 = vpop.f32.mrf.mxu0  ;;  %v21166_v47 = vadd.f32 %v9163_v31, %v8848_v1 }
 0x8f6   :  { %v8783_v11 = vpop.f32.mrf.mxu1  ;;  %15467 = vmatmul.mubr.msk.f32.gmra.mxu1 %vm1154_vm1, %v10021_v44  ;;  %v10026_v44 = vld [vmem:[#allocation4 + $0x84] sm:$0xff] }
 0x8f7   :  { %v9168_v40 = vpop.f32.mrf.mxu0  ;;  %v8849_v26 = vadd.f32 %v8783_v11, %v20920_v24  ;;  %15469 = vmatprep.mubr.msk.f32.mxu1 %vm15595_vm3, %v22333_v28 }
 0x8f8   :  { %v15090_v15 = vpop.f32.mrf.mxu1 }
 0x8f9   :  { %v15195_v51 = vpop.f32.mrf.mxu0  ;;  %v21172_v5 = vadd.f32 %v9168_v40, %v8849_v26 }
 0x8fa   :  { %v8788_v38 = vpop.f32.mrf.mxu1  ;;  %15470 = vmatmul.mubr.msk.f32.gmra.mxu1 %vm1154_vm1, %v10022_v41  ;;  %v10027_v41 = vld [vmem:[#allocation4 + $0x8c] sm:$0xff] }
 0x8fb   :  { %v9173_v37 = vpop.f32.mrf.mxu0  ;;  %v8850_v29 = vadd.f32 %v8788_v38, %v20929_v22  ;;  %15472 = vmatprep.mubr.msk.f32.mxu1 %vm15595_vm3, %v22333_v28 }
 0x8fc   :  { %v15093_v46 = vpop.f32.mrf.mxu1 }
 0x8fd   :  { %v15198_v25 = vpop.f32.mrf.mxu0  ;;  %v21178_v24 = vadd.f32 %v9173_v37, %v8850_v29 }
 0x8fe   :  { %v8793_v2 = vpop.f32.mrf.mxu1  ;;  %15473 = vmatmul.mubr.msk.f32.gmra.mxu1 %vm1154_vm1, %v10023_v9  ;;  %v10028_v9 = vld [vmem:[#allocation4 + $0x94] sm:$0xff] }
 0x8ff   :  { %v9178_v42 = vpop.f32.mrf.mxu0  ;;  %v8851_v59 = vadd.f32 %v8793_v2, %v20938_v20  ;;  %15475 = vmatprep.mubr.msk.f32.mxu1 %vm15595_vm3, %v22333_v28 }
 0x900   :  { %v15096_v55 = vpop.f32.mrf.mxu1 }
 0x901   :  { %v15201_v18 = vpop.f32.mrf.mxu0  ;;  %v21184_v22 = vadd.f32 %v9178_v42, %v8851_v59 }
 0x902   :  { %v8798_v6 = vpop.f32.mrf.mxu1  ;;  %15476 = vmatmul.mubr.msk.f32.gmra.mxu1 %vm1154_vm1, %v10024_v34  ;;  %v10029_v34 = vld [vmem:[#allocation4 + $0x9c] sm:$0xff] }
 0x903   :  { %v9183_v58 = vpop.f32.mrf.mxu0  ;;  %v8852_v0 = vadd.f32 %v8798_v6, %v20947_v56  ;;  %15478 = vmatprep.mubr.msk.f32.mxu1 %vm15595_vm3, %v22333_v28 }
 0x904   :  { %v15099_v23 = vpop.f32.mrf.mxu1 }
 0x905   :  { %v15204_v14 = vpop.f32.mrf.mxu0  ;;  %v21190_v20 = vadd.f32 %v9183_v58, %v8852_v0 }
 0x906   :  { %v8803_v39 = vpop.f32.mrf.mxu1  ;;  %15479 = vmatmul.mubr.msk.f32.gmra.mxu1 %vm1154_vm1, %v10025_v63  ;;  %v10030_v63 = vld [vmem:[#allocation4 + $0xa4] sm:$0xff] }
 0x907   :  { %v9188_v31 = vpop.f32.mrf.mxu0  ;;  %v8853_v1 = vadd.f32 %v8803_v39, %v20956_v12  ;;  %15481 = vmatprep.mubr.msk.f32.mxu1 %vm15595_vm3, %v22333_v28 }
 0x908   :  { %v15102_v50 = vpop.f32.mrf.mxu1 }
 0x909   :  { %v15207_v61 = vpop.f32.mrf.mxu0  ;;  %v21196_v56 = vadd.f32 %v9188_v31, %v8853_v1 }
 0x90a   :  { %v8808_v11 = vpop.f32.mrf.mxu1  ;;  %15482 = vmatmul.mubr.msk.f32.gmra.mxu1 %vm1154_vm1, %v10026_v44  ;;  %v10031_v44 = vld [vmem:[#allocation4 + $0xac] sm:$0xff] }
 0x90b   :  { %v9193_v40 = vpop.f32.mrf.mxu0  ;;  %v8854_v26 = vadd.f32 %v8808_v11, %v20965_v3  ;;  %15484 = vmatprep.mubr.msk.f32.mxu1 %vm15595_vm3, %v22333_v28 }
 0x90c   :  { %v15105_v15 = vpop.f32.mrf.mxu1 }
 0x90d   :  { %v15210_v51 = vpop.f32.mrf.mxu0  ;;  %v21202_v12 = vadd.f32 %v9193_v40, %v8854_v26 }
 0x90e   :  { %v8813_v38 = vpop.f32.mrf.mxu1  ;;  %15485 = vmatmul.mubr.msk.f32.gmra.mxu1 %vm1154_vm1, %v10027_v41  ;;  %v10032_v41 = vld [vmem:[#allocation4 + $0xb4] sm:$0xff] }
 0x90f   :  { %v9198_v37 = vpop.f32.mrf.mxu0  ;;  %v8855_v29 = vadd.f32 %v8813_v38, %v20974_v43  ;;  %15487 = vmatprep.mubr.msk.f32.mxu1 %vm15595_vm3, %v22333_v28 }
 0x910   :  { %v15108_v46 = vpop.f32.mrf.mxu1 }
 0x911   :  { %v15213_v25 = vpop.f32.mrf.mxu0  ;;  %v21208_v3 = vadd.f32 %v9198_v37, %v8855_v29 }
 0x912   :  { %v8818_v2 = vpop.f32.mrf.mxu1  ;;  %15488 = vmatmul.mubr.msk.f32.gmra.mxu1 %vm1154_vm1, %v10028_v9  ;;  %v10033_v9 = vld [vmem:[#allocation4 + $0xbc] sm:$0xff] }
 0x913   :  { %v9203_v42 = vpop.f32.mrf.mxu0  ;;  %v8856_v59 = vadd.f32 %v8818_v2, %v20983_v49  ;;  %15490 = vmatprep.mubr.msk.f32.mxu1 %vm15595_vm3, %v22333_v28 }
 0x914   :  { %v15111_v55 = vpop.f32.mrf.mxu1 }
 0x915   :  { %v15216_v18 = vpop.f32.mrf.mxu0  ;;  %v21214_v43 = vadd.f32 %v9203_v42, %v8856_v59 }
 0x916   :  { %v8823_v6 = vpop.f32.mrf.mxu1  ;;  %15491 = vmatmul.mubr.msk.f32.gmra.mxu1 %vm1154_vm1, %v10029_v34  ;;  %v10034_v34 = vld [vmem:[#allocation4 + $0xc4] sm:$0xff] }
 0x917   :  { %v9208_v58 = vpop.f32.mrf.mxu0  ;;  %v8857_v0 = vadd.f32 %v8823_v6, %v20992_v53  ;;  %15493 = vmatprep.mubr.msk.f32.mxu1 %vm15595_vm3, %v22333_v28 }
 0x918   :  { %v15114_v23 = vpop.f32.mrf.mxu1 }
 0x919   :  { %v15219_v14 = vpop.f32.mrf.mxu0  ;;  %v21220_v49 = vadd.f32 %v9208_v58, %v8857_v0 }
 0x91a   :  { %v9443_v39 = vpop.f32.mrf.mxu1  ;;  %15494 = vmatmul.mubr.msk.f32.gmra.mxu1 %vm1154_vm1, %v10030_v63  ;;  %v10035_v63 = vld [vmem:[#allocation4 + $0xcc] sm:$0xff] }
 0x91b   :  { %v9828_v31 = vpop.f32.mrf.mxu0  ;;  %v9597_v1 = vadd.f32 %v9443_v39, %v21001_v16  ;;  %15496 = vmatprep.mubr.msk.f32.mxu1 %vm15595_vm3, %v22333_v28 }
 0x91c   :  { %v15234_v50 = vpop.f32.mrf.mxu1 }
 0x91d   :  { %v15339_v61 = vpop.f32.mrf.mxu0  ;;  %v21226_v53 = vadd.f32 %v9828_v31, %v9597_v1 }
 0x91e   :  { %v9448_v11 = vpop.f32.mrf.mxu1  ;;  %15497 = vmatmul.mubr.msk.f32.gmra.mxu1 %vm1154_vm1, %v10031_v44  ;;  %v10036_v44 = vld [vmem:[#allocation4 + $0xd4] sm:$0xff] }
 0x91f   :  { %v9833_v40 = vpop.f32.mrf.mxu0  ;;  %v9598_v26 = vadd.f32 %v9448_v11, %v21010_v52  ;;  %15499 = vmatprep.mubr.msk.f32.mxu1 %vm15595_vm3, %v22333_v28 }
 0x920   :  { %v15237_v15 = vpop.f32.mrf.mxu1 }
 0x921   :  { %v15342_v51 = vpop.f32.mrf.mxu0  ;;  %v21232_v16 = vadd.f32 %v9833_v40, %v9598_v26 }
 0x922   :  { %v9453_v38 = vpop.f32.mrf.mxu1  ;;  %15500 = vmatmul.mubr.msk.f32.gmra.mxu1 %vm1154_vm1, %v10032_v41  ;;  %v10037_v41 = vld [vmem:[#allocation4 + $0xdc] sm:$0xff] }
 0x923   :  { %v9838_v37 = vpop.f32.mrf.mxu0  ;;  %v9599_v29 = vadd.f32 %v9453_v38, %v21019_v17  ;;  %15502 = vmatprep.mubr.msk.f32.mxu1 %vm15595_vm3, %v22333_v28 }
 0x924   :  { %v15240_v46 = vpop.f32.mrf.mxu1 }
 0x925   :  { %v15345_v25 = vpop.f32.mrf.mxu0  ;;  %v21238_v52 = vadd.f32 %v9838_v37, %v9599_v29 }
 0x926   :  { %v9458_v2 = vpop.f32.mrf.mxu1  ;;  %15503 = vmatmul.mubr.msk.f32.gmra.mxu1 %vm1154_vm1, %v10033_v9  ;;  %v10038_v9 = vld [vmem:[#allocation4 + $0xe4] sm:$0xff] }
 0x927   :  { %v9843_v42 = vpop.f32.mrf.mxu0  ;;  %v9600_v59 = vadd.f32 %v9458_v2, %v21028_v35  ;;  %15505 = vmatprep.mubr.msk.f32.mxu1 %vm15595_vm3, %v22333_v28 }
 0x928   :  { %v15243_v55 = vpop.f32.mrf.mxu1 }
 0x929   :  { %v15348_v18 = vpop.f32.mrf.mxu0  ;;  %v21244_v17 = vadd.f32 %v9843_v42, %v9600_v59 }
 0x92a   :  { %v9463_v6 = vpop.f32.mrf.mxu1  ;;  %15506 = vmatmul.mubr.msk.f32.gmra.mxu1 %vm1154_vm1, %v10034_v34  ;;  %v10039_v34 = vld [vmem:[#allocation4 + $0xec] sm:$0xff] }
 0x92b   :  { %v9848_v58 = vpop.f32.mrf.mxu0  ;;  %v9601_v0 = vadd.f32 %v9463_v6, %v21037_v60  ;;  %15508 = vmatprep.mubr.msk.f32.mxu1 %vm15595_vm3, %v22333_v28 }
 0x92c   :  { %v15246_v23 = vpop.f32.mrf.mxu1 }
 0x92d   :  { %v15351_v14 = vpop.f32.mrf.mxu0  ;;  %v21250_v35 = vadd.f32 %v9848_v58, %v9601_v0 }
 0x92e   :  { %v9468_v39 = vpop.f32.mrf.mxu1  ;;  %15509 = vmatmul.mubr.msk.f32.gmra.mxu1 %vm1154_vm1, %v10035_v63  ;;  %v10040_v63 = vld [vmem:[#allocation4 + $0xf4] sm:$0xff] }
 0x92f   :  { %v9853_v31 = vpop.f32.mrf.mxu0  ;;  %v9602_v1 = vadd.f32 %v9468_v39, %v21046_v32  ;;  %15511 = vmatprep.mubr.msk.f32.mxu1 %vm15595_vm3, %v22333_v28 }
 0x930   :  { %v15249_v50 = vpop.f32.mrf.mxu1 }
 0x931   :  { %v15354_v61 = vpop.f32.mrf.mxu0  ;;  %v21256_v60 = vadd.f32 %v9853_v31, %v9602_v1 }
 0x932   :  { %v9473_v11 = vpop.f32.mrf.mxu1  ;;  %15512 = vmatmul.mubr.msk.f32.gmra.mxu1 %vm1154_vm1, %v10036_v44  ;;  %v10041_v44 = vld [vmem:[#allocation4 + $0xfc] sm:$0xff] }
 0x933   :  { %v9858_v40 = vpop.f32.mrf.mxu0  ;;  %v9603_v26 = vadd.f32 %v9473_v11, %v21055_v10  ;;  %15514 = vmatprep.mubr.msk.f32.mxu1 %vm15595_vm3, %v22333_v28 }
 0x934   :  { %v15252_v15 = vpop.f32.mrf.mxu1 }
 0x935   :  { %v15357_v51 = vpop.f32.mrf.mxu0  ;;  %v21262_v32 = vadd.f32 %v9858_v40, %v9603_v26  ;;  %v10042_v15 = vld [vmem:[#allocation4 + $0x104] sm:$0xff] }
 0x936   :  { %v9478_v38 = vpop.f32.mrf.mxu1  ;;  %15515 = vmatmul.mubr.msk.f32.gmra.mxu1 %vm1154_vm1, %v10037_v41 }
 0x937   :  { %v9863_v37 = vpop.f32.mrf.mxu0  ;;  %v9604_v29 = vadd.f32 %v9478_v38, %v21064_v54  ;;  %15517 = vmatprep.mubr.msk.f32.mxu1 %vm15595_vm3, %v22333_v28 }
 0x938   :  { %v15255_v46 = vpop.f32.mrf.mxu1 }
 0x939   :  { %v15360_v25 = vpop.f32.mrf.mxu0  ;;  %v21268_v10 = vadd.f32 %v9863_v37, %v9604_v29  ;;  %v10043_v46 = vld [vmem:[#allocation4 + $0x10c] sm:$0x3] }
 0x93a   :  { %v9483_v2 = vpop.f32.mrf.mxu1  ;;  %15518 = vmatmul.mubr.msk.f32.gmra.mxu1 %vm1154_vm1, %v10038_v9 }
 0x93b   :  { %v9868_v42 = vpop.f32.mrf.mxu0  ;;  %v9605_v59 = vadd.f32 %v9483_v2, %v21073_v19  ;;  %15520 = vmatprep.mubr.msk.f32.mxu1 %vm15595_vm3, %v22333_v28 }
 0x93c   :  { %v15258_v55 = vpop.f32.mrf.mxu1 }
 0x93d   :  { %v15363_v18 = vpop.f32.mrf.mxu0  ;;  %v21274_v54 = vadd.f32 %v9868_v42, %v9605_v59 }
 0x93e   :  { %v9488_v6 = vpop.f32.mrf.mxu1  ;;  %15521 = vmatmul.mubr.msk.f32.gmra.mxu1 %vm1154_vm1, %v10039_v34 }
 0x93f   :  { %v9873_v58 = vpop.f32.mrf.mxu0  ;;  %v9606_v0 = vadd.f32 %v9488_v6, %v21082_v48  ;;  %15523 = vmatprep.mubr.msk.f32.mxu1 %vm15595_vm3, %v22333_v28 }
 0x940   :  { %v15261_v23 = vpop.f32.mrf.mxu1 }
 0x941   :  { %v15366_v14 = vpop.f32.mrf.mxu0  ;;  %v21280_v19 = vadd.f32 %v9873_v58, %v9606_v0 }
 0x942   :  { %v9493_v39 = vpop.f32.mrf.mxu1  ;;  %15524 = vmatmul.mubr.msk.f32.gmra.mxu1 %vm1154_vm1, %v10040_v63 }
 0x943   :  { %v9878_v31 = vpop.f32.mrf.mxu0  ;;  %v9607_v1 = vadd.f32 %v9493_v39, %v21091_v33  ;;  %15526 = vmatprep.mubr.msk.f32.mxu1 %vm15595_vm3, %v22333_v28 }
 0x944   :  { %v15264_v50 = vpop.f32.mrf.mxu1 }
 0x945   :  { %v15369_v61 = vpop.f32.mrf.mxu0  ;;  %v21286_v48 = vadd.f32 %v9878_v31, %v9607_v1 }
 0x946   :  { %v9498_v11 = vpop.f32.mrf.mxu1  ;;  %15527 = vmatmul.mubr.msk.f32.gmra.mxu1 %vm1154_vm1, %v10041_v44 }
 0x947   :  { %v9883_v40 = vpop.f32.mrf.mxu0  ;;  %v9608_v26 = vadd.f32 %v9498_v11, %v21100_v62  ;;  %15529 = vmatprep.mubr.msk.f32.mxu1 %vm15595_vm3, %v22333_v28 }
 0x948   :  { %v15267_v51 = vpop.f32.mrf.mxu1 }
 0x949   :  { %v15372_v33 = vpop.f32.mrf.mxu0  ;;  %v21292_v41 = vadd.f32 %v9883_v40, %v9608_v26 }
 0x94a   :  { %v9503_v38 = vpop.f32.mrf.mxu1  ;;  %15530 = vmatmul.mubr.msk.f32.gmra.mxu1 %vm1154_vm1, %v10042_v15 }
 0x94b   :  { %v9888_v37 = vpop.f32.mrf.mxu0  ;;  %v9609_v29 = vadd.f32 %v9503_v38, %v21109_v36  ;;  %15532 = vmatprep.mubr.msk.f32.mxu1 %vm15595_vm3, %v22333_v28 }
 0x94c   :  { %v15270_v25 = vpop.f32.mrf.mxu1 }
 0x94d   :  { %v15375_v62 = vpop.f32.mrf.mxu0  ;;  %v21298_v9 = vadd.f32 %v9888_v37, %v9609_v29 }
 0x94e   :  { %v9508_v2 = vpop.f32.mrf.mxu1  ;;  %15533 = vmatmul.mubr.msk.f32.gmra.mxu1 %vm1154_vm1, %v10043_v46 }
 0x94f   :  { %v9893_v42 = vpop.f32.mrf.mxu0  ;;  %v9610_v59 = vadd.f32 %v9508_v2, %v21118_v8 }
 0x950   :  { %v15273_v55 = vpop.f32.mrf.mxu1 }
 0x951   :  { %v15378_v18 = vpop.f32.mrf.mxu0  ;;  %v21302_v34 = vadd.f32 %v9893_v42, %v9610_v59 }
 0x952   :  { %v9513_v6 = vpop.f32.mrf.mxu1 }
 0x953   :  { %v9898_v36 = vpop.f32.mrf.mxu0  ;;  %v9611_v58 = vadd.f32 %v9513_v6, %v21124_v27 }
 0x954   :  { %v15276_v0 = vpop.f32.mrf.mxu1 }
 0x955   :  { %v15381_v23 = vpop.f32.mrf.mxu0  ;;  %v21305_v14 = vadd.f32 %v9898_v36, %v9611_v58 }
 0x956   :  { %v9518_v63 = vpop.f32.mrf.mxu1 }
 0x957   :  { %v9903_v39 = vpop.f32.mrf.mxu0  ;;  %v9612_v31 = vadd.f32 %v9518_v63, %v21130_v21 }
 0x958   :  { %v15279_v1 = vpop.f32.mrf.mxu1 }
 0x959   :  { %v15384_v50 = vpop.f32.mrf.mxu0  ;;  %v21308_v61 = vadd.f32 %v9903_v39, %v9612_v31 }
 0x95a   :  { %v9523_v8 = vpop.f32.mrf.mxu1 }
 0x95b   :  { %v9908_v44 = vpop.f32.mrf.mxu0  ;;  %v9613_v11 = vadd.f32 %v9523_v8, %v21136_v4 }
 0x95c   :  { %v15282_v40 = vpop.f32.mrf.mxu1 }
 0x95d   :  { %v15387_v26 = vpop.f32.mrf.mxu0  ;;  %v21311_v15 = vadd.f32 %v9908_v44, %v9613_v11 }
 0x95e   :  { %v9528_v27 = vpop.f32.mrf.mxu1 }
 0x95f   :  { %v9913_v51 = vpop.f32.mrf.mxu0  ;;  %v9614_v33 = vadd.f32 %v9528_v27, %v21142_v30 }
 0x960   :  { %v15285_v38 = vpop.f32.mrf.mxu1 }
 0x961   :  { %v15390_v37 = vpop.f32.mrf.mxu0  ;;  %v21314_v29 = vadd.f32 %v9913_v51, %v9614_v33 }
 0x962   :  { %v9533_v21 = vpop.f32.mrf.mxu1 }
 0x963   :  { %v9918_v46 = vpop.f32.mrf.mxu0  ;;  %v9615_v25 = vadd.f32 %v9533_v21, %v21148_v13 }
 0x964   :  { %v15288_v62 = vpop.f32.mrf.mxu1 }
 0x965   :  { %v15393_v2 = vpop.f32.mrf.mxu0  ;;  %v21317_v42 = vadd.f32 %v9918_v46, %v9615_v25 }
 0x966   :  { %v9538_v4 = vpop.f32.mrf.mxu1 }
 0x967   :  { %v9923_v59 = vpop.f32.mrf.mxu0  ;;  %v9616_v55 = vadd.f32 %v9538_v4, %v21154_v7 }
 0x968   :  { %v15291_v18 = vpop.f32.mrf.mxu1 }
 0x969   :  { %v15396_v6 = vpop.f32.mrf.mxu0  ;;  %v21320_v36 = vadd.f32 %v9923_v59, %v9616_v55 }
 0x96a   :  { %v9543_v30 = vpop.f32.mrf.mxu1 }
 0x96b   :  { %v9928_v58 = vpop.f32.mrf.mxu0  ;;  %v9617_v0 = vadd.f32 %v9543_v30, %v21160_v45 }
 0x96c   :  { %v15294_v23 = vpop.f32.mrf.mxu1 }
 0x96d   :  { %v15399_v63 = vpop.f32.mrf.mxu0  ;;  %v21323_v39 = vadd.f32 %v9928_v58, %v9617_v0 }
 0x96e   :  { %v9548_v13 = vpop.f32.mrf.mxu1 }
 0x96f   :  { %v9933_v31 = vpop.f32.mrf.mxu0  ;;  %v9618_v1 = vadd.f32 %v9548_v13, %v21166_v47 }
 0x970   :  { %v15297_v50 = vpop.f32.mrf.mxu1 }
 0x971   :  { %v15402_v8 = vpop.f32.mrf.mxu0  ;;  %v21326_v44 = vadd.f32 %v9933_v31, %v9618_v1 }
 0x972   :  { %v9553_v7 = vpop.f32.mrf.mxu1 }
 0x973   :  { %v9938_v11 = vpop.f32.mrf.mxu0  ;;  %v9619_v40 = vadd.f32 %v9553_v7, %v21172_v5 }
 0x974   :  { %v15300_v26 = vpop.f32.mrf.mxu1 }
 0x975   :  { %v15405_v27 = vpop.f32.mrf.mxu0  ;;  %v21329_v51 = vadd.f32 %v9938_v11, %v9619_v40 }
 0x976   :  { %v9558_v45 = vpop.f32.mrf.mxu1 }
 0x977   :  { %v9943_v33 = vpop.f32.mrf.mxu0  ;;  %v9620_v38 = vadd.f32 %v9558_v45, %v21178_v24 }
 0x978   :  { %v15303_v37 = vpop.f32.mrf.mxu1 }
 0x979   :  { %v15408_v21 = vpop.f32.mrf.mxu0  ;;  %v21332_v46 = vadd.f32 %v9943_v33, %v9620_v38 }
 0x97a   :  { %v9563_v47 = vpop.f32.mrf.mxu1 }
 0x97b   :  { %v9948_v25 = vpop.f32.mrf.mxu0  ;;  %v9621_v62 = vadd.f32 %v9563_v47, %v21184_v22 }
 0x97c   :  { %v15306_v2 = vpop.f32.mrf.mxu1 }
 0x97d   :  { %v15411_v4 = vpop.f32.mrf.mxu0  ;;  %v21335_v59 = vadd.f32 %v9948_v25, %v9621_v62 }
 0x97e   :  { %v9568_v5 = vpop.f32.mrf.mxu1 }
 0x97f   :  { %v9953_v55 = vpop.f32.mrf.mxu0  ;;  %v9622_v18 = vadd.f32 %v9568_v5, %v21190_v20 }
 0x980   :  { %v15309_v6 = vpop.f32.mrf.mxu1 }
 0x981   :  { %v15414_v30 = vpop.f32.mrf.mxu0  ;;  %v21338_v58 = vadd.f32 %v9953_v55, %v9622_v18 }
 0x982   :  { %v9573_v24 = vpop.f32.mrf.mxu1 }
 0x983   :  { %v9958_v0 = vpop.f32.mrf.mxu0  ;;  %v9623_v23 = vadd.f32 %v9573_v24, %v21196_v56 }
 0x984   :  { %v15312_v63 = vpop.f32.mrf.mxu1 }
 0x985   :  { %v15417_v13 = vpop.f32.mrf.mxu0  ;;  %v21341_v31 = vadd.f32 %v9958_v0, %v9623_v23  ;;  %v21365_v63 = vld [vmem:[%s21933_s7 + $0x48] sm:$0xff] }
 0x986   :  { %v9578_v22 = vpop.f32.mrf.mxu1  ;;  %22377 = vst [vmem:[#allocation80_spill] sm:$0xff] %v21365_v63 }
 0x987   :  { %v9963_v1 = vpop.f32.mrf.mxu0  ;;  %v9624_v50 = vadd.f32 %v9578_v22, %v21202_v12  ;;  %v21353_v12 = vld [vmem:[%s21933_s7 + $0x50] sm:$0xff]  ;;  %v21377_v22 = vld [vmem:[%s21933_s7 + $0x38] sm:$0xff] }
 0x988   :  { %v15315_v8 = vpop.f32.mrf.mxu1  ;;  %22376 = vst [vmem:[#allocation79_spill] sm:$0xff] %v21353_v12  ;;  %15536 = vmatpush3.msra.mxu0 %v21353_v12  ;;  %22379 = vst [vmem:[#allocation5_spill] sm:$0xff] %v21377_v22 }
 0x989   :  { %v15420_v7 = vpop.f32.mrf.mxu0  ;;  %v21344_v11 = vadd.f32 %v9963_v1, %v9624_v50  ;;  %15537 = vmatprep.subr.mxu0 %v22333_v28  ;;  %v21384_v50 = vld [vmem:[%s21933_s7 + $0x30] sm:$0xff] }
 0x98a   :  { %v9583_v20 = vpop.f32.mrf.mxu1  ;;  %15538 = vmatpush3.msra.mxu0 %v21365_v63  ;;  %22380 = vst [vmem:[#allocation6_spill] sm:$0xff] %v21384_v50  ;;  %v21391_v7 = vld [vmem:[%s21933_s7 + $0x28] sm:$0xff] }
 0x98b   :  { %v9968_v40 = vpop.f32.mrf.mxu0  ;;  %v9625_v26 = vadd.f32 %v9583_v20, %v21208_v3  ;;  %15539 = vmatprep.subr.mxu0 %v22333_v28  ;;  %22381 = vst [vmem:[#allocation7_spill] sm:$0xff] %v21391_v7 }
 0x98c   :  { %v15318_v27 = vpop.f32.mrf.mxu1 }
 0x98d   :  { %v15423_v45 = vpop.f32.mrf.mxu0  ;;  %v21347_v33 = vadd.f32 %v9968_v40, %v9625_v26  ;;  %v21398_v40 = vld [vmem:[%s21933_s7 + $0x20] sm:$0xff]  ;;  %v21405_v27 = vld [vmem:[%s21933_s7 + $0x18] sm:$0xff] }
 0x98e   :  { %v9588_v56 = vpop.f32.mrf.mxu1  ;;  %22382 = vst [vmem:[#allocation9_spill] sm:$0xff] %v21398_v40  ;;  %22383 = vst [vmem:[#allocation8_spill] sm:$0xff] %v21405_v27 }
 0x98f   :  { %v9973_v38 = vpop.f32.mrf.mxu0  ;;  %v9626_v37 = vadd.f32 %v9588_v56, %v21214_v43  ;;  %v21412_v56 = vld [vmem:[%s21933_s7 + $0x10] sm:$0xff] }
 0x990   :  { %v15321_v21 = vpop.f32.mrf.mxu1  ;;  %22384 = vst [vmem:[#allocation10_spill] sm:$0xff] %v21412_v56 }
 0x991   :  { %v15426_v47 = vpop.f32.mrf.mxu0  ;;  %v21356_v25 = vadd.f32 %v9973_v38, %v9626_v37  ;;  %v21419_v37 = vld [vmem:[%s21933_s7 + $0x8] sm:$0xff] }
 0x992   :  { %v9593_v3 = vpop.f32.mrf.mxu1  ;;  %22385 = vst [vmem:[#allocation11_spill] sm:$0xff] %v21419_v37  ;;  %v21426_v47 = vld [vmem:[%s21933_s7] sm:$0xff] }
 0x993   :  { %v9978_v62 = vpop.f32.mrf.mxu0  ;;  %v9627_v2 = vadd.f32 %v9593_v3, %v21220_v49  ;;  %v21370_v49 = vld [vmem:[%s21933_s7 + $0x40] sm:$0xff]  ;;  %22386 = vst [vmem:[#allocation13_spill] sm:$0xff] %v21426_v47 }
 0x994   :  { %v15324_v4 = vpop.f32.mrf.mxu1  ;;  %22378 = vst [vmem:[#allocation81_spill] sm:$0xff] %v21370_v49  ;;  %15540 = vmatpush3.msra.mxu0 %v21370_v49 }
 0x995   :  { %v15429_v5 = vpop.f32.mrf.mxu0  ;;  %v21360_v43 = vadd.f32 %v9978_v62, %v9627_v2  ;;  %15541 = vmatprep.subr.mxu0 %v22333_v28 }
 0x996   :  { %v10213_v55 = vpop.f32.mrf.mxu1  ;;  %15542 = vmatpush3.msra.mxu0 %v21377_v22 }
 0x997   :  { %15543 = vmatprep.subr.mxu0 %v22333_v28 }
 0x998   :  { %v15444_v18 = vpop.f32.mrf.mxu1  ;;  %15544 = vmatpush3.msra.mxu0 %v21384_v50 }
 0x999   :  { %15545 = vmatprep.subr.mxu0 %v22333_v28 }
 0x99a   :  { %v10218_v6 = vpop.f32.mrf.mxu1  ;;  %15546 = vmatpush3.msra.mxu0 %v21391_v7 }
 0x99b   :  { %15547 = vmatprep.subr.mxu0 %v22333_v28 }
 0x99c   :  { %v15447_v30 = vpop.f32.mrf.mxu1  ;;  %15548 = vmatpush3.msra.mxu0 %v21398_v40  ;;  %v22388_v40 = vld [vmem:[#allocation26_spill] sm:$0xff] }
 0x99d   :  { %15549 = vmatprep.subr.mxu0 %v22333_v28 }
 0x99e   :  { %v10223_v24 = vpop.f32.mrf.mxu1  ;;  %15550 = vmatpush3.msra.mxu0 %v21405_v27 }
 0x99f   :  { %15551 = vmatprep.subr.mxu0 %v22333_v28 }
 0x9a0   :  { %v15450_v0 = vpop.f32.mrf.mxu1  ;;  %15552 = vmatpush3.msra.mxu0 %v21412_v56 }
 0x9a1   :  { %15553 = vmatprep.subr.mxu0 %v22333_v28 }
 0x9a2   :  { %v10228_v23 = vpop.f32.mrf.mxu1  ;;  %15554 = vmatpush3.msra.mxu0 %v21419_v37 }
 0x9a3   :  { %15555 = vmatprep.subr.mxu0 %v22333_v28  ;;  %v21452_v27 = vadd.f32 %v10228_v23, %v21244_v17 }
 0x9a4   :  { %v15453_v13 = vpop.f32.mrf.mxu1  ;;  %15556 = vmatpush3.msra.mxu0 %v21426_v47  ;;  %v21439_v47 = vadd.f32 %v10218_v6, %v21232_v16  ;;  %v22389_v6 = vld [vmem:[#allocation27_spill] sm:$0xff] }
 0x9a5   :  { %15560 = vmatprep.subr.mxu0 %v22333_v28  ;;  %v22394_v28 = vld [vmem:[#allocation32_spill] sm:$0xff] }
 0x9a6   :  { %v10233_v1 = vpop.f32.mrf.mxu1 }
 0x9a8   :  { %v15456_v8 = vpop.f32.mrf.mxu1 }
 0x9aa   :  { %v10238_v20 = vpop.f32.mrf.mxu1 }
 0x9ab   :  { %v21467_v17 = vadd.f32 %v10238_v20, %v21256_v60 }
 0x9ac   :  { %v15459_v26 = vpop.f32.mrf.mxu1 }
 0x9ae   :  { %v10243_v45 = vpop.f32.mrf.mxu1 }
 0x9b0   :  { %v15462_v38 = vpop.f32.mrf.mxu1 }
 0x9b2   :  { %v10248_v21 = vpop.f32.mrf.mxu1 }
 0x9b3   :  { %v21482_v20 = vadd.f32 %v10248_v21, %v21268_v10 }
 0x9b4   :  { %v15465_v3 = vpop.f32.mrf.mxu1 }
 0x9b6   :  { %v10253_v62 = vpop.f32.mrf.mxu1 }
 0x9b8   :  { %v15468_v2 = vpop.f32.mrf.mxu1 }
 0x9b9   :  { %v21442_v2 = vadd.f32 %v10213_v55, %v21226_v53  ;;  %v21459_v53 = vadd.f32 %v10233_v1, %v21250_v35  ;;  %v21474_v1 = vadd.f32 %v10243_v45, %v21262_v32  ;;  %v21489_v45 = vadd.f32 %v10253_v62, %v21274_v54 }
 0x9ba   :  { %v10258_v4 = vpop.f32.mrf.mxu1 }
 0x9bb   :  { %v10398_v16 = vmul.f32 %v21442_v2, %v22388_v40  ;;  %22390 = vst [vmem:[#allocation12_spill] sm:$0xff] %v21459_v53  ;;  %v10404_v32 = vmul.f32 %v21474_v1, %v22394_v28 }
 0x9bc   :  { %v15471_v5 = vpop.f32.mrf.mxu1 }
 0x9bd   :  { %v21445_v5 = vadd.f32 %v10223_v24, %v21238_v52  ;;  %v22391_v24 = vld [vmem:[#allocation29_spill] sm:$0xff]  ;;  %v10430_v40 = vsel %vm10429_vm6, %v10398_v16, 0.0 }
 0x9be   :  { %v10263_v18 = vpop.f32.mrf.mxu1 }
 0x9c0   :  { %v15474_v30 = vpop.f32.mrf.mxu1 }
 0x9c2   :  { %v10268_v0 = vpop.f32.mrf.mxu1 }
 0x9c4   :  { %v15477_v13 = vpop.f32.mrf.mxu1 }
 0x9c5   :  { %v22387_v13 = vld [vmem:[#allocation28_spill] sm:$0xff] }
 0x9c6   :  { %v21432_v8 = vpop.f32.mrf.mxu1 }
 0x9c8   :  { %v15480_v26 = vpop.f32.mrf.mxu1 }
 0x9c9   :  { %v10399_v26 = vmul.f32 %v21439_v47, %v22387_v13  ;;  %v10401_v13 = vmul.f32 %v21452_v27, %v22391_v24  ;;  %v22393_v24 = vld [vmem:[#allocation31_spill] sm:$0xff] }
 0x9ca   :  { %v21434_v38 = vpop.f32.mrf.mxu1  ;;  %v10403_v60 = vmul.f32 %v21467_v17, %v22393_v24 }
 0x9cb   :  { %v10431_v55 = vsel %vm10429_vm6, %v10399_v26, 0.0  ;;  %v10435_v22 = vsel %vm10429_vm6, %v10401_v13, 0.0  ;;  %v10585_v62 = vmul.f32 %v10401_v13, %v21452_v27  ;;  %v22397_v13 = vld [vmem:[#allocation37_spill] sm:$0xff] }
 0x9cc   :  { %v15483_v3 = vpop.f32.mrf.mxu1  ;;  %v10432_v7 = vadd.f32 %v10431_v55, %v10430_v40  ;;  %v10582_v55 = vmul.f32 %v10398_v16, %v21442_v2  ;;  %v10439_v21 = vsel %vm10429_vm6, %v10403_v60, 0.0 }
 0x9ce   :  { %v21436_v37 = vpop.f32.mrf.mxu1  ;;  %v10613_v24 = vsel %vm10429_vm6, %v10582_v55, 0.0 }
 0x9d0   :  { %v15486_v56 = vpop.f32.mrf.mxu1 }
 0x9d1   :  { %v10400_v56 = vmul.f32 %v21445_v5, %v22389_v6  ;;  %v22392_v6 = vld [vmem:[#allocation30_spill] sm:$0xff] }
 0x9d2   :  { %v21447_v30 = vpop.f32.mrf.mxu1  ;;  %v10402_v35 = vmul.f32 %v21459_v53, %v22392_v6 }
 0x9d3   :  { %v10584_v10 = vmul.f32 %v10400_v56, %v21445_v5 }
 0x9d4   :  { %v15489_v3 = vpop.f32.mrf.mxu1  ;;  %v10437_v6 = vsel %vm10429_vm6, %v10402_v35, 0.0 }
 0x9d5   :  { %v10433_v3 = vsel %vm10429_vm6, %v10400_v56, 0.0  ;;  %v21507_v56 = vadd.f32 %v10263_v18, %v21286_v48  ;;  %v10587_v48 = vmul.f32 %v10403_v60, %v21467_v17  ;;  %v10588_v60 = vmul.f32 %v10404_v32, %v21474_v1 }
 0x9d6   :  { %v21461_v52 = vpop.f32.mrf.mxu1  ;;  %v10434_v49 = vadd.f32 %v10433_v3, %v10432_v7  ;;  %v21499_v7 = vadd.f32 %v10258_v4, %v21280_v19 }
 0x9d8   :  { %v15492_v23 = vpop.f32.mrf.mxu1  ;;  %v10436_v40 = vadd.f32 %v10435_v22, %v10434_v49  ;;  %v10441_v49 = vsel %vm10429_vm6, %v10404_v32, 0.0  ;;  %v22396_v22 = vld [vmem:[#allocation34_spill] sm:$0xff] }
 0x9d9   :  { %v10583_v23 = vmul.f32 %v10399_v26, %v21439_v47  ;;  %v22395_v26 = vld [vmem:[#allocation33_spill] sm:$0xff]  ;;  %v10406_v16 = vmul.f32 %v21489_v45, %v22396_v22 }
 0x9da   :  { %v21476_v50 = vpop.f32.mrf.mxu1  ;;  %v10438_v3 = vadd.f32 %v10437_v6, %v10436_v40  ;;  %v10407_v40 = vmul.f32 %v21499_v7, %v22397_v13 }
 0x9db   :  { %v10614_v28 = vsel %vm10429_vm6, %v10583_v23, 0.0  ;;  %v10616_v23 = vsel %vm10429_vm6, %v10584_v10, 0.0 }
 0x9dc   :  { %v15495_v63 = vpop.f32.mrf.mxu1  ;;  %v10440_v19 = vadd.f32 %v10439_v21, %v10438_v3  ;;  %v10615_v22 = vadd.f32 %v10614_v28, %v10613_v24  ;;  %v10445_v21 = vsel %vm10429_vm6, %v10406_v16, 0.0  ;;  %v22398_v3 = vld [vmem:[#allocation40_spill] sm:$0xff]  ;;  %v22399_v24 = vld [vmem:[#allocation42_spill] sm:$0xff] }
 0x9dd   :  { %v10405_v63 = vmul.f32 %v21482_v20, %v22395_v26  ;;  %v10586_v26 = vmul.f32 %v10402_v35, %v21459_v53  ;;  %v10618_v35 = vsel %vm10429_vm6, %v10585_v62, 0.0  ;;  %v10408_v10 = vmul.f32 %v21507_v56, %v22398_v3 }
 0x9de   :  { %v21492_v12 = vpop.f32.mrf.mxu1  ;;  %v10442_v18 = vadd.f32 %v10441_v49, %v10440_v19  ;;  %v21527_v53 = vadd.f32 %v21432_v8, %v21298_v9  ;;  %v10617_v13 = vadd.f32 %v10616_v23, %v10615_v22  ;;  %v10447_v49 = vsel %vm10429_vm6, %v10407_v40, 0.0  ;;  %v22400_v22 = vld [vmem:[#allocation43_spill] sm:$0xff] }
 0x9df   :  { %v10443_v6 = vsel %vm10429_vm6, %v10405_v63, 0.0  ;;  %v21536_v19 = vadd.f32 %v21434_v38, %v21302_v34  ;;  %v10622_v9 = vsel %vm10429_vm6, %v10587_v48, 0.0  ;;  %v10590_v34 = vmul.f32 %v10406_v16, %v21489_v45 }
 0x9e0   :  { %v15498_v54 = vpop.f32.mrf.mxu1  ;;  %v10410_v32 = vmul.f32 %v21527_v53, %v22400_v22  ;;  %v10624_v48 = vsel %vm10429_vm6, %v10588_v60, 0.0  ;;  %v22403_v22 = vld [vmem:[#allocation46_spill] sm:$0xff] }
 0x9e1   :  { %v21518_v54 = vadd.f32 %v10268_v0, %v21292_v41  ;;  %v10620_v41 = vsel %vm10429_vm6, %v10586_v26, 0.0  ;;  %v10444_v0 = vadd.f32 %v10443_v6, %v10442_v18  ;;  %v10589_v26 = vmul.f32 %v10405_v63, %v21482_v20 }
 0x9e2   :  { %v21511_v4 = vpop.f32.mrf.mxu1  ;;  %v10449_v6 = vsel %vm10429_vm6, %v10408_v10, 0.0  ;;  %v21545_v18 = vadd.f32 %v21436_v37, %v21305_v14  ;;  %v10591_v14 = vmul.f32 %v10407_v40, %v21499_v7  ;;  %v10592_v40 = vmul.f32 %v10408_v10, %v21507_v56 }
 0x9e3   :  { %v10409_v62 = vmul.f32 %v21518_v54, %v22399_v24  ;;  %v10446_v8 = vadd.f32 %v10445_v21, %v10444_v0  ;;  %v21554_v0 = vadd.f32 %v21447_v30, %v21308_v61  ;;  %v10626_v16 = vsel %vm10429_vm6, %v10589_v26, 0.0 }
 0x9e4   :  { %v15501_v55 = vpop.f32.mrf.mxu1  ;;  %v10628_v61 = vsel %vm10429_vm6, %v10590_v34, 0.0 }
 0x9e5   :  { %v10619_v55 = vadd.f32 %v10618_v35, %v10617_v13  ;;  %v10448_v38 = vadd.f32 %v10447_v49, %v10446_v8  ;;  %v10451_v21 = vsel %vm10429_vm6, %v10409_v62, 0.0  ;;  %v22401_v13 = vld [vmem:[#allocation44_spill] sm:$0xff]  ;;  %v10453_v49 = vsel %vm10429_vm6, %v10410_v32, 0.0 }
 0x9e6   :  { %v10313_v28 = vpop.f32.mrf.mxu1  ;;  %v10411_v63 = vmul.f32 %v21536_v19, %v22401_v13  ;;  %v21563_v8 = vadd.f32 %v21461_v52, %v21311_v15  ;;  %v10413_v26 = vmul.f32 %v21554_v0, %v22403_v22  ;;  %v10630_v15 = vsel %vm10429_vm6, %v10591_v14, 0.0  ;;  %v22404_v13 = vld [vmem:[#allocation47_spill] sm:$0xff] }
 0x9e7   :  { %v10621_v3 = vadd.f32 %v10620_v41, %v10619_v55  ;;  %v10450_v37 = vadd.f32 %v10449_v6, %v10448_v38  ;;  %v22402_v55 = vld [vmem:[#allocation45_spill] sm:$0xff]  ;;  %v10593_v34 = vmul.f32 %v10409_v62, %v21518_v54  ;;  %v10632_v14 = vsel %vm10429_vm6, %v10592_v40, 0.0 }
 0x9e8   :  { %v15504_v23 = vpop.f32.mrf.mxu1  ;;  %v10412_v60 = vmul.f32 %v21545_v18, %v22402_v55  ;;  %v10455_v6 = vsel %vm10429_vm6, %v10411_v63, 0.0  ;;  %v10414_v10 = vmul.f32 %v21563_v8, %v22404_v13  ;;  %v21590_v55 = vadd.f32 %v21511_v4, %v21320_v36 }
 0x9e9   :  { %v10623_v24 = vadd.f32 %v10622_v9, %v10621_v3  ;;  %v10452_v30 = vadd.f32 %v10451_v21, %v10450_v37  ;;  %v21572_v3 = vadd.f32 %v21476_v50, %v21314_v29  ;;  %v10594_v29 = vmul.f32 %v10410_v32, %v21527_v53 }
 0x9ea   :  { %v10318_v35 = vpop.f32.mrf.mxu1  ;;  %v10457_v21 = vsel %vm10429_vm6, %v10412_v60, 0.0  ;;  %v10634_v32 = vsel %vm10429_vm6, %v10593_v34, 0.0  ;;  %v21598_v22 = vadd.f32 %v10313_v28, %v21323_v39 }
 0x9eb   :  { %v10625_v23 = vadd.f32 %v10624_v48, %v10623_v24  ;;  %v10454_v52 = vadd.f32 %v10453_v49, %v10452_v30  ;;  %v21581_v24 = vadd.f32 %v21492_v12, %v21317_v42  ;;  %v22405_v49 = vld [vmem:[#allocation49_spill] sm:$0xff]  ;;  %v10595_v42 = vmul.f32 %v10411_v63, %v21536_v19 }
 0x9ec   :  { %v15507_v41 = vpop.f32.mrf.mxu1  ;;  %v10415_v62 = vmul.f32 %v21572_v3, %v22405_v49  ;;  %v10461_v30 = vsel %vm10429_vm6, %v10414_v10, 0.0 }
 0x9ed   :  { %v10627_v38 = vadd.f32 %v10626_v16, %v10625_v23  ;;  %v10456_v50 = vadd.f32 %v10455_v6, %v10454_v52  ;;  %v10459_v16 = vsel %vm10429_vm6, %v10413_v26, 0.0  ;;  %v22406_v6 = vld [vmem:[#allocation50_spill] sm:$0xff]  ;;  %v10636_v52 = vsel %vm10429_vm6, %v10594_v29, 0.0 }
 0x9ee   :  { %v10323_v9 = vpop.f32.mrf.mxu1  ;;  %v10416_v40 = vmul.f32 %v21581_v24, %v22406_v6  ;;  %v10463_v63 = vsel %vm10429_vm6, %v10415_v62, 0.0  ;;  %v10599_v6 = vmul.f32 %v10415_v62, %v21572_v3 }
 0x9ef   :  { %v10629_v37 = vadd.f32 %v10628_v61, %v10627_v38  ;;  %v10458_v12 = vadd.f32 %v10457_v21, %v10456_v50  ;;  %v21606_v21 = vadd.f32 %v10318_v35, %v21326_v44  ;;  %v10597_v50 = vmul.f32 %v10413_v26, %v21554_v0 }
 0x9f0   :  { %v15510_v48 = vpop.f32.mrf.mxu1  ;;  %v10465_v29 = vsel %vm10429_vm6, %v10416_v40, 0.0 }
 0x9f1   :  { %v10631_v23 = vadd.f32 %v10630_v15, %v10629_v37  ;;  %v10460_v36 = vadd.f32 %v10459_v16, %v10458_v12  ;;  %v10596_v15 = vmul.f32 %v10412_v60, %v21545_v18  ;;  %v22407_v48 = vld [vmem:[#allocation52_spill] sm:$0xff]  ;;  %v10638_v37 = vsel %vm10429_vm6, %v10595_v42, 0.0 }
 0x9f2   :  { %v10328_v41 = vpop.f32.mrf.mxu1  ;;  %v10417_v34 = vmul.f32 %v21590_v55, %v22407_v48  ;;  %v21614_v16 = vadd.f32 %v10323_v9, %v21329_v51 }
 0x9f3   :  { %v10633_v38 = vadd.f32 %v10632_v14, %v10631_v23  ;;  %v10462_v39 = vadd.f32 %v10461_v30, %v10460_v36  ;;  %v22408_v14 = vld [vmem:[#allocation53_spill] sm:$0xff]  ;;  %v10598_v23 = vmul.f32 %v10414_v10, %v21563_v8  ;;  %v10640_v12 = vsel %vm10429_vm6, %v10596_v15, 0.0 }
 0x9f4   :  { %v15513_v61 = vpop.f32.mrf.mxu1  ;;  %v10418_v60 = vmul.f32 %v21598_v22, %v22408_v14  ;;  %v10467_v42 = vsel %vm10429_vm6, %v10417_v34, 0.0  ;;  %v10601_v14 = vmul.f32 %v10417_v34, %v21590_v55 }
 0x9f5   :  { %v10635_v13 = vadd.f32 %v10634_v32, %v10633_v38  ;;  %v10464_v44 = vadd.f32 %v10463_v63, %v10462_v39  ;;  %v22409_v61 = vld [vmem:[#allocation54_spill] sm:$0xff]  ;;  %v21622_v32 = vadd.f32 %v10328_v41, %v21332_v46  ;;  %v10642_v38 = vsel %vm10429_vm6, %v10597_v50, 0.0 }
 0x9f6   :  { %v10333_v4 = vpop.f32.mrf.mxu1  ;;  %v10419_v26 = vmul.f32 %v21606_v21, %v22409_v61  ;;  %v10469_v10 = vsel %vm10429_vm6, %v10418_v60, 0.0  ;;  %v10644_v48 = vsel %vm10429_vm6, %v10598_v23, 0.0  ;;  %v22412_v23 = vld [vmem:[#allocation60_spill] sm:$0xff] }
 0x9f7   :  { %v10637_v49 = vadd.f32 %v10636_v52, %v10635_v13  ;;  %v10466_v51 = vadd.f32 %v10465_v29, %v10464_v44  ;;  %v22410_v52 = vld [vmem:[#allocation57_spill] sm:$0xff]  ;;  %v21630_v15 = vadd.f32 %v10333_v4, %v21335_v59  ;;  %v10600_v13 = vmul.f32 %v10416_v40, %v21581_v24 }
 0x9f8   :  { %v15516_v28 = vpop.f32.mrf.mxu1  ;;  %v10420_v36 = vmul.f32 %v21614_v16, %v22410_v52  ;;  %v10471_v62 = vsel %vm10429_vm6, %v10419_v26, 0.0  ;;  %v10646_v29 = vsel %vm10429_vm6, %v10599_v6, 0.0  ;;  %v22413_v6 = vld [vmem:[#allocation61_spill] sm:$0xff]  ;;  %v10603_v52 = vmul.f32 %v10419_v26, %v21606_v21 }
 0x9f9   :  { %v10639_v30 = vadd.f32 %v10638_v37, %v10637_v49  ;;  %v10468_v46 = vadd.f32 %v10467_v42, %v10466_v51  ;;  %v22411_v37 = vld [vmem:[#allocation58_spill] sm:$0xff]  ;;  %v10422_v40 = vmul.f32 %v21630_v15, %v22412_v23  ;;  %v10602_v42 = vmul.f32 %v10418_v60, %v21598_v22 }
 0x9fa   :  { %v10338_v35 = vpop.f32.mrf.mxu1  ;;  %v10421_v39 = vmul.f32 %v21622_v32, %v22411_v37  ;;  %v10473_v49 = vsel %vm10429_vm6, %v10420_v36, 0.0  ;;  %v10648_v61 = vsel %vm10429_vm6, %v10600_v13, 0.0 }
 0x9fb   :  { %v10641_v63 = vadd.f32 %v10640_v12, %v10639_v30  ;;  %v21638_v28 = vadd.f32 %v10338_v35, %v21338_v58  ;;  %v10470_v59 = vadd.f32 %v10469_v10, %v10468_v46  ;;  %v10477_v60 = vsel %vm10429_vm6, %v10422_v40, 0.0 }
 0x9fc   :  { %v15519_v9 = vpop.f32.mrf.mxu1  ;;  %v10475_v30 = vsel %vm10429_vm6, %v10421_v39, 0.0  ;;  %v10605_v23 = vmul.f32 %v10421_v39, %v21622_v32 }
 0x9fd   :  { %v10643_v50 = vadd.f32 %v10642_v38, %v10641_v63  ;;  %v10472_v58 = vadd.f32 %v10471_v62, %v10470_v59  ;;  %v10423_v34 = vmul.f32 %v21638_v28, %v22413_v6  ;;  %v22414_v63 = vld [vmem:[#allocation62_spill] sm:$0xff] }
 0x9fe   :  { %v10343_v41 = vpop.f32.mrf.mxu1 }
 0x9ff   :  { %v21646_v44 = vadd.f32 %v10343_v41, %v21341_v31  ;;  %v10645_v12 = vadd.f32 %v10644_v48, %v10643_v50  ;;  %v10474_v38 = vadd.f32 %v10473_v49, %v10472_v58  ;;  %v10650_v31 = vsel %vm10429_vm6, %v10601_v14, 0.0  ;;  %v22415_v50 = vld [vmem:[#allocation64_spill] sm:$0xff] }
 0xa00   :  { %v15522_v4 = vpop.f32.mrf.mxu1  ;;  %v10652_v41 = vsel %vm10429_vm6, %v10602_v42, 0.0  ;;  %v10479_v37 = vsel %vm10429_vm6, %v10423_v34, 0.0  ;;  %v10654_v49 = vsel %vm10429_vm6, %v10603_v52, 0.0  ;;  %v22416_v42 = vld [vmem:[#allocation66_spill] sm:$0xff]  ;;  %v10607_v52 = vmul.f32 %v10423_v34, %v21638_v28 }
 0xa01   :  { %v10647_v9 = vadd.f32 %v10646_v29, %v10645_v12  ;;  %v10424_v48 = vmul.f32 %v21646_v44, %v22414_v63  ;;  %v10476_v13 = vadd.f32 %v10475_v30, %v10474_v38  ;;  %v22417_v63 = vld [vmem:[#allocation68_spill] sm:$0xff] }
 0xa02   :  { %v10348_v35 = vpop.f32.mrf.mxu1 }
 0xa03   :  { %v21654_v51 = vadd.f32 %v10348_v35, %v21344_v11  ;;  %v10649_v46 = vadd.f32 %v10648_v61, %v10647_v9  ;;  %v10604_v11 = vmul.f32 %v10420_v36, %v21614_v16  ;;  %v10478_v4 = vadd.f32 %v10477_v60, %v10476_v13 }
 0xa04   :  { %v15525_v10 = vpop.f32.mrf.mxu1  ;;  %v10481_v12 = vsel %vm10429_vm6, %v10424_v48, 0.0 }
 0xa05   :  { %v10425_v29 = vmul.f32 %v21654_v51, %v22415_v50  ;;  %v10651_v26 = vadd.f32 %v10650_v31, %v10649_v46  ;;  %v10480_v35 = vadd.f32 %v10479_v37, %v10478_v4  ;;  %v10656_v30 = vsel %vm10429_vm6, %v10604_v11, 0.0 }
 0xa06   :  { %v10353_v62 = vpop.f32.mrf.mxu1  ;;  %v10658_v31 = vsel %vm10429_vm6, %v10605_v23, 0.0  ;;  %v10662_v4 = vsel %vm10429_vm6, %v10607_v52, 0.0 }
 0xa07   :  { %v21667_v59 = vadd.f32 %v10353_v62, %v21347_v33  ;;  %v10653_v58 = vadd.f32 %v10652_v41, %v10651_v26  ;;  %v10606_v33 = vmul.f32 %v10422_v40, %v21630_v15  ;;  %v10483_v6 = vsel %vm10429_vm6, %v10425_v29, 0.0 }
 0xa08   :  { %v15528_v14 = vpop.f32.mrf.mxu1  ;;  %v10482_v10 = vadd.f32 %v10481_v12, %v10480_v35 }
 0xa09   :  { %v10426_v36 = vmul.f32 %v21667_v59, %v22416_v42  ;;  %v10655_v38 = vadd.f32 %v10654_v49, %v10653_v58  ;;  %v10660_v62 = vsel %vm10429_vm6, %v10606_v33, 0.0  ;;  %v10609_v14 = vmul.f32 %v10425_v29, %v21654_v51 }
 0xa0a   :  { %v10358_v61 = vpop.f32.mrf.mxu1  ;;  %v10484_v13 = vadd.f32 %v10483_v6, %v10482_v10 }
 0xa0b   :  { %v21678_v9 = vadd.f32 %v10358_v61, %v21356_v25  ;;  %v10485_v60 = vsel %vm10429_vm6, %v10426_v36, 0.0  ;;  %v10657_v41 = vadd.f32 %v10656_v30, %v10655_v38  ;;  %v10608_v25 = vmul.f32 %v10424_v48, %v21646_v44 }
 0xa0c   :  { %v15531_v39 = vpop.f32.mrf.mxu1  ;;  %v10486_v26 = vadd.f32 %v10485_v60, %v10484_v13  ;;  %v10610_v42 = vmul.f32 %v10426_v36, %v21667_v59  ;;  %v10666_v61 = vsel %vm10429_vm6, %v10609_v14, 0.0  ;;  %v22423_v14 = vld [vmem:[#allocation6_spill] sm:$0xff] }
 0xa0d   :  { %v10427_v46 = vmul.f32 %v21678_v9, %v22417_v63  ;;  %v10659_v50 = vadd.f32 %v10658_v31, %v10657_v41  ;;  %v10664_v48 = vsel %vm10429_vm6, %v10608_v25, 0.0  ;;  %v22419_v25 = vmov 0.0  }
 0xa0e   :  { %v10363_v40 = vpop.f32.mrf.mxu1  ;;  %v10668_v29 = vsel %vm10429_vm6, %v10610_v42, 0.0 }
 0xa0f   :  { %v10487_v11 = vsel %vm10429_vm6, %v10427_v46, 0.0  ;;  %v21689_v37 = vadd.f32 %v10363_v40, %v21360_v43  ;;  %v10661_v23 = vadd.f32 %v10660_v62, %v10659_v50  ;;  %v10611_v30 = vmul.f32 %v10427_v46, %v21678_v9  ;;  %v22418_v62 = vld [vmem:[#allocation79_spill] sm:$0xff] }
 0xa10   :  { %v15534_v34 = vpop.f32.mrf.mxu1  ;;  %v10488_v12 = vadd.f32 %v10487_v11, %v10486_v26  ;;  %v22420_v11 = vld [vmem:[#allocation80_spill] sm:$0xff]  ;;  %v22421_v26 = vld [vmem:[#allocation81_spill] sm:$0xff] }
 0xa11   :  { %v10428_v49 = vmul.f32 %v21689_v37, %v22374_v57  ;;  %v10663_v58 = vadd.f32 %v10662_v4, %v10661_v23  ;;  %v10670_v39 = vsel %vm10429_vm6, %v10611_v30, 0.0  ;;  %v22422_v34 = vld [vmem:[#allocation5_spill] sm:$0xff] }
 0xa13   :  { %v10490_v43 = vsel %vm10489_vm7, %v10428_v49, 0.0  ;;  %v10665_v33 = vadd.f32 %v10664_v48, %v10663_v58  ;;  %v10612_v57 = vmul.f32 %v10428_v49, %v21689_v37  ;;  %v22424_v49 = vld [vmem:[#allocation7_spill] sm:$0xff]  ;;  %v22426_v48 = vld [vmem:[#allocation8_spill] sm:$0xff] }
 0xa14   :  { %v10491_v35 = vadd.f32 %v10490_v43, %v10488_v12  ;;  %v22425_v12 = vld [vmem:[#allocation9_spill] sm:$0xff]  ;;  %v22427_v43 = vld [vmem:[#allocation10_spill] sm:$0xff]  ;;  %v22428_v58 = vld [vmem:[#allocation11_spill] sm:$0xff] }
 0xa15   :  { %v10667_v38 = vadd.f32 %v10666_v61, %v10665_v33  ;;  %v10672_v52 = vsel %vm10489_vm7, %v10612_v57, 0.0  ;;  %v22429_v61 = vld [vmem:[#allocation13_spill] sm:$0xff] }
 0xa16   :  { %v10492_v6 = vrot.slane %v10491_v35, 4 }
 0xa17   :  { %v10669_v31 = vadd.f32 %v10668_v29, %v10667_v38 }
 0xa18   :  { %v10493_v10 = vadd.f32 %v10492_v6, %v10491_v35 }
 0xa19   :  { %v10671_v60 = vadd.f32 %v10670_v39, %v10669_v31 }
 0xa1a   :  { %v10494_v36 = vrot.slane %v10493_v10, 2 }
 0xa1b   :  { %v10673_v13 = vadd.f32 %v10672_v52, %v10671_v60 }
 0xa1c   :  { %v10495_v63 = vadd.f32 %v10494_v36, %v10493_v10  ;;  %v10757_v36 = vld [vmem:[%s21934_s10] sm:$0x1] }
 0xa1d   :  { %v10674_v46 = vrot.slane %v10673_v13, 4 }
 0xa1e   :  { %v10496_v41 = vrot.slane %v10495_v63, 1 }
 0xa1f   :  { %v10675_v50 = vadd.f32 %v10674_v46, %v10673_v13  ;;  %v22430_v13 = vld [vmem:[#allocation72_spill] sm:$0xff] }
 0xa20   :  { %v10497_v40 = vadd.f32 %v10496_v41, %v10495_v63  ;;  %v10761_v63 = vld [vmem:[%s21935_s11] sm:$0x1] }
 0xa21   :  { %v10676_v4 = vrot.slane %v10675_v50, 2 }
 0xa22   :  { %15558 = vmatmul.mubr.msk.f32.vlgmr.msra.gmra.mxu0 %vm10429_vm6, %v10497_v40 }
 0xa23   :  { %15561 = vmatpush3.msra.mxu0 %v22418_v62  ;;  %15582 = vmatprep.mubr.msk.f32.mxu0 %vm15595_vm3, %v22419_v25  ;;  %v10677_v23 = vadd.f32 %v10676_v4, %v10675_v50 }
 0xa24   :  { %15562 = vmatprep.subr.mxu0 %v22419_v25 }
 0xa25   :  { %15563 = vmatpush3.msra.mxu0 %v22420_v11  ;;  %v10678_v42 = vrot.slane %v10677_v23, 1 }
 0xa26   :  { %15564 = vmatprep.subr.mxu0 %v22419_v25 }
 0xa27   :  { %15565 = vmatpush3.msra.mxu0 %v22421_v26  ;;  %v10679_v35 = vadd.f32 %v10678_v42, %v10677_v23  ;;  %v22431_v26 = vld [vmem:[#allocation12_spill] sm:$0xff] }
 0xa28   :  { %15566 = vmatprep.subr.mxu0 %v22419_v25 }
 0xa29   :  { %15567 = vmatpush3.msra.mxu0 %v22422_v34 }
 0xa2a   :  { %15568 = vmatprep.subr.mxu0 %v22419_v25 }
 0xa2b   :  { %15569 = vmatpush3.msra.mxu0 %v22423_v14 }
 0xa2c   :  { %15570 = vmatprep.subr.mxu0 %v22419_v25 }
 0xa2d   :  { %15571 = vmatpush3.msra.mxu0 %v22424_v49 }
 0xa2e   :  { %15572 = vmatprep.subr.mxu0 %v22419_v25 }
 0xa2f   :  { %15573 = vmatpush3.msra.mxu0 %v22425_v12 }
 0xa30   :  { %15574 = vmatprep.subr.mxu0 %v22419_v25 }
 0xa31   :  { %15575 = vmatpush3.msra.mxu0 %v22426_v48 }
 0xa32   :  { %15576 = vmatprep.subr.mxu0 %v22419_v25 }
 0xa33   :  { %15577 = vmatpush3.msra.mxu0 %v22427_v43 }
 0xa34   :  { %15578 = vmatprep.subr.mxu0 %v22419_v25 }
 0xa35   :  { %15579 = vmatpush3.msra.mxu0 %v22428_v58 }
 0xa36   :  { %15580 = vmatprep.subr.mxu0 %v22419_v25 }
 0xa37   :  { %15581 = vmatpush3.msra.mxu0 %v22429_v61 }
 0xa38   :  { %15583 = vmatmul.mubr.msk.f32.vlgmr.msra.gmra.mxu0 %vm10429_vm6, %v10679_v35 }
 0xae2   :  { %v10578_v30 = vpop.f32.mrf.mxu0 }
 0xae3   :  { %v10753_v6 = vmul.f32 0.00068587105, %v10578_v30 }
 0xae4   :  { %v15559_v33 = vpop.f32.mrf.mxu0 }
 0xae5   :  { %v10755_v57 = vmul.f32 %v10753_v6, %v10753_v6 }
 0xaf8   :  { %v10749_v29 = vpop.f32.mrf.mxu0 }
 0xaf9   :  { %v10754_v38 = vmul.f32 0.00068587105, %v10749_v29 }
 0xafa   :  { %v15584_v10 = vpop.f32.mrf.mxu0 }
 0xafb   :  { %v10756_v39 = vsub.f32 %v10754_v38, %v10755_v57 }
 0xafd   :  { %v10758_v31 = vadd.f32 1e-05, %v10756_v39 }
 0xaff   :  { %15592 = vrsqrt.f32 %v10758_v31 }
 0xb0c   :  { %v15593_v52 = vpop.eup %15592 }
 0xb0d   :  { %v10760_v60 = vmul.f32 %v15593_v52, %v10757_v36 }
 0xb0f   :  { %v10762_v41 = vmul.f32 %v10760_v60, %v10753_v6  ;;  %v10768_v40 = vrot.slane %v10760_v60, %v22430_v13 }
 0xb11   :  { %v10763_v46 = vsub.f32 %v10761_v63, %v10762_v41  ;;  %v10770_v62 = vmul.f32 %v10768_v40, %v21442_v2  ;;  %v10771_v25 = vmul.f32 %v10768_v40, %v21439_v47  ;;  %v10772_v11 = vmul.f32 %v10768_v40, %v21445_v5 }
 0xb12   :  { %v10773_v50 = vmul.f32 %v10768_v40, %v21452_v27  ;;  %v10774_v34 = vmul.f32 %v10768_v40, %v22431_v26  ;;  %v10775_v4 = vmul.f32 %v10768_v40, %v21467_v17  ;;  %v10776_v14 = vmul.f32 %v10768_v40, %v21474_v1 }
 0xb13   :  { %v10777_v49 = vmul.f32 %v10768_v40, %v21482_v20  ;;  %v10778_v23 = vmul.f32 %v10768_v40, %v21489_v45  ;;  %v10779_v12 = vmul.f32 %v10768_v40, %v21499_v7  ;;  %v10780_v2 = vmul.f32 %v10768_v40, %v21507_v56 }
 0xb14   :  { %v10781_v47 = vmul.f32 %v10768_v40, %v21518_v54  ;;  %v10782_v5 = vmul.f32 %v10768_v40, %v21527_v53  ;;  %v10783_v27 = vmul.f32 %v10768_v40, %v21536_v19  ;;  %v10784_v48 = vmul.f32 %v10768_v40, %v21545_v18 }
 0xb15   :  { %v10785_v17 = vmul.f32 %v10768_v40, %v21554_v0  ;;  %v10786_v1 = vmul.f32 %v10768_v40, %v21563_v8  ;;  %v10787_v20 = vmul.f32 %v10768_v40, %v21572_v3  ;;  %v10788_v45 = vmul.f32 %v10768_v40, %v21581_v24 }
 0xb16   :  { %v10789_v7 = vmul.f32 %v10768_v40, %v21590_v55  ;;  %v10790_v56 = vmul.f32 %v10768_v40, %v21598_v22  ;;  %v10791_v54 = vmul.f32 %v10768_v40, %v21606_v21  ;;  %v10792_v53 = vmul.f32 %v10768_v40, %v21614_v16 }
 0xb17   :  { %v10793_v19 = vmul.f32 %v10768_v40, %v21622_v32  ;;  %v10794_v18 = vmul.f32 %v10768_v40, %v21630_v15  ;;  %v10795_v0 = vmul.f32 %v10768_v40, %v21638_v28  ;;  %v10796_v8 = vmul.f32 %v10768_v40, %v21646_v44 }
 0xb18   :  { %v10805_v3 = vrot.slane %v10763_v46, %v22430_v13  ;;  %v10797_v24 = vmul.f32 %v10768_v40, %v21654_v51  ;;  %v10798_v55 = vmul.f32 %v10768_v40, %v21667_v59  ;;  %v10799_v22 = vmul.f32 %v10768_v40, %v21678_v9 }
 0xb19   :  { %v10800_v21 = vmul.f32 %v10768_v40, %v21689_v37 }
 0xb1a   :  { %v10807_v42 = vadd.f32 %v10805_v3, %v10770_v62  ;;  %v10808_v16 = vadd.f32 %v10805_v3, %v10771_v25  ;;  %v10809_v43 = vadd.f32 %v10805_v3, %v10772_v11  ;;  %v10810_v32 = vadd.f32 %v10805_v3, %v10773_v50 }
 0xb1b   :  { %v10811_v58 = vadd.f32 %v10805_v3, %v10774_v34  ;;  %v10812_v15 = vadd.f32 %v10805_v3, %v10775_v4  ;;  %v10813_v35 = vadd.f32 %v10805_v3, %v10776_v14  ;;  %v10814_v28 = vadd.f32 %v10805_v3, %v10777_v49 }
 0xb1c   :  { %v10815_v61 = vadd.f32 %v10805_v3, %v10778_v23  ;;  %v10816_v44 = vadd.f32 %v10805_v3, %v10779_v12  ;;  %v10817_v30 = vadd.f32 %v10805_v3, %v10780_v2  ;;  %v10818_v33 = vadd.f32 %v10805_v3, %v10781_v47 }
 0xb1d   :  { %v10819_v6 = vadd.f32 %v10805_v3, %v10782_v5  ;;  %v10820_v51 = vadd.f32 %v10805_v3, %v10783_v27  ;;  %v10821_v29 = vadd.f32 %v10805_v3, %v10784_v48  ;;  %v10822_v59 = vadd.f32 %v10805_v3, %v10785_v17 }
 0xb1e   :  { %v10823_v57 = vadd.f32 %v10805_v3, %v10786_v1  ;;  %v10824_v9 = vadd.f32 %v10805_v3, %v10787_v20  ;;  %v10825_v38 = vadd.f32 %v10805_v3, %v10788_v45  ;;  %v10826_v37 = vadd.f32 %v10805_v3, %v10789_v7 }
 0xb1f   :  { %v10827_v10 = vadd.f32 %v10805_v3, %v10790_v56  ;;  %v21768_v39 = vadd.f32 %v10805_v3, %v10791_v54  ;;  %v21770_v31 = vadd.f32 %v10805_v3, %v10792_v53  ;;  %v21772_v36 = vadd.f32 %v10805_v3, %v10793_v19 }
 0xb20   :  { %v21774_v52 = vadd.f32 %v10805_v3, %v10794_v18  ;;  %v21776_v60 = vadd.f32 %v10805_v3, %v10795_v0  ;;  %v21778_v63 = vadd.f32 %v10805_v3, %v10796_v8  ;;  %v21780_v41 = vadd.f32 %v10805_v3, %v10797_v24 }
 0xb21   :  { %v21782_v13 = vadd.f32 %v10805_v3, %v10798_v55  ;;  %v21784_v40 = vadd.f32 %v10805_v3, %v10799_v22  ;;  %v21786_v46 = vadd.f32 %v10805_v3, %v10800_v21  ;;  %v10838_v62 = vmax.f32 %v10807_v42, 0.0 }
 0xb22   :  { %v10839_v25 = vmax.f32 %v10808_v16, 0.0  ;;  %v10840_v11 = vmax.f32 %v10809_v43, 0.0  ;;  %v10841_v50 = vmax.f32 %v10810_v32, 0.0  ;;  %v10842_v26 = vmax.f32 %v10811_v58, 0.0 }
 0xb23   :  { %v10843_v34 = vmax.f32 %v10812_v15, 0.0  ;;  %v10844_v4 = vmax.f32 %v10813_v35, 0.0  ;;  %v10845_v14 = vmax.f32 %v10814_v28, 0.0  ;;  %v10846_v49 = vmax.f32 %v10815_v61, 0.0  ;;  %10869 = vst.msk [vmem:[%s21936_s14] sm:$0xff] %vm10429_vm6, %v10838_v62 }
 0xb24   :  { %v10847_v23 = vmax.f32 %v10816_v44, 0.0  ;;  %v10848_v12 = vmax.f32 %v10817_v30, 0.0  ;;  %v10849_v2 = vmax.f32 %v10818_v33, 0.0  ;;  %v10850_v47 = vmax.f32 %v10819_v6, 0.0  ;;  %10870 = vst.msk [vmem:[%s21936_s14 + $0x8] sm:$0xff] %vm10429_vm6, %v10839_v25  ;;  %10871 = vst.msk [vmem:[%s21936_s14 + $0x10] sm:$0xff] %vm10429_vm6, %v10840_v11 }
 0xb25   :  { %10872 = vst.msk [vmem:[%s21936_s14 + $0x18] sm:$0xff] %vm10429_vm6, %v10841_v50  ;;  %10873 = vst.msk [vmem:[%s21936_s14 + $0x20] sm:$0xff] %vm10429_vm6, %v10842_v26  ;;  %v10851_v5 = vmax.f32 %v10820_v51, 0.0  ;;  %v10852_v27 = vmax.f32 %v10821_v29, 0.0  ;;  %v10853_v48 = vmax.f32 %v10822_v59, 0.0  ;;  %v10854_v17 = vmax.f32 %v10823_v57, 0.0 }
 0xb26   :  { %10874 = vst.msk [vmem:[%s21936_s14 + $0x28] sm:$0xff] %vm10429_vm6, %v10843_v34  ;;  %10875 = vst.msk [vmem:[%s21936_s14 + $0x30] sm:$0xff] %vm10429_vm6, %v10844_v4  ;;  %v10855_v1 = vmax.f32 %v10824_v9, 0.0  ;;  %v10856_v20 = vmax.f32 %v10825_v38, 0.0  ;;  %v10857_v45 = vmax.f32 %v10826_v37, 0.0  ;;  %v10858_v7 = vmax.f32 %v10827_v10, 0.0 }
 0xb27   :  { %10876 = vst.msk [vmem:[%s21936_s14 + $0x38] sm:$0xff] %vm10429_vm6, %v10845_v14  ;;  %10877 = vst.msk [vmem:[%s21936_s14 + $0x40] sm:$0xff] %vm10429_vm6, %v10846_v49  ;;  %v10859_v56 = vmax.f32 %v21768_v39, 0.0  ;;  %v10860_v54 = vmax.f32 %v21770_v31, 0.0  ;;  %v10861_v53 = vmax.f32 %v21772_v36, 0.0  ;;  %v10862_v19 = vmax.f32 %v21774_v52, 0.0 }
 0xb28   :  { %10878 = vst.msk [vmem:[%s21936_s14 + $0x48] sm:$0xff] %vm10429_vm6, %v10847_v23  ;;  %10879 = vst.msk [vmem:[%s21936_s14 + $0x50] sm:$0xff] %vm10429_vm6, %v10848_v12  ;;  %v10863_v18 = vmax.f32 %v21776_v60, 0.0  ;;  %v10864_v0 = vmax.f32 %v21778_v63, 0.0  ;;  %v10865_v8 = vmax.f32 %v21780_v41, 0.0  ;;  %v10866_v3 = vmax.f32 %v21782_v13, 0.0 }
 0xb29   :  { %10880 = vst.msk [vmem:[%s21936_s14 + $0x58] sm:$0xff] %vm10429_vm6, %v10849_v2  ;;  %10881 = vst.msk [vmem:[%s21936_s14 + $0x60] sm:$0xff] %vm10429_vm6, %v10850_v47  ;;  %v10867_v24 = vmax.f32 %v21784_v40, 0.0  ;;  %v10868_v55 = vmax.f32 %v21786_v46, 0.0 }
 0xb2a   :  { %10882 = vst.msk [vmem:[%s21936_s14 + $0x68] sm:$0xff] %vm10429_vm6, %v10851_v5  ;;  %10883 = vst.msk [vmem:[%s21936_s14 + $0x70] sm:$0xff] %vm10429_vm6, %v10852_v27 }
 0xb2b   :  { %10884 = vst.msk [vmem:[%s21936_s14 + $0x78] sm:$0xff] %vm10429_vm6, %v10853_v48  ;;  %10885 = vst.msk [vmem:[%s21936_s14 + $0x80] sm:$0xff] %vm10429_vm6, %v10854_v17 }
 0xb2c   :  { %10886 = vst.msk [vmem:[%s21936_s14 + $0x88] sm:$0xff] %vm10429_vm6, %v10855_v1  ;;  %10887 = vst.msk [vmem:[%s21936_s14 + $0x90] sm:$0xff] %vm10429_vm6, %v10856_v20 }
 0xb2d   :  { %10888 = vst.msk [vmem:[%s21936_s14 + $0x98] sm:$0xff] %vm10429_vm6, %v10857_v45  ;;  %10889 = vst.msk [vmem:[%s21936_s14 + $0xa0] sm:$0xff] %vm10429_vm6, %v10858_v7 }
 0xb2e   :  { %10890 = vst.msk [vmem:[%s21936_s14 + $0xa8] sm:$0xff] %vm10429_vm6, %v10859_v56  ;;  %10891 = vst.msk [vmem:[%s21936_s14 + $0xb0] sm:$0xff] %vm10429_vm6, %v10860_v54 }
 0xb2f   :  { %10892 = vst.msk [vmem:[%s21936_s14 + $0xb8] sm:$0xff] %vm10429_vm6, %v10861_v53  ;;  %10893 = vst.msk [vmem:[%s21936_s14 + $0xc0] sm:$0xff] %vm10429_vm6, %v10862_v19 }
 0xb30   :  { %10894 = vst.msk [vmem:[%s21936_s14 + $0xc8] sm:$0xff] %vm10429_vm6, %v10863_v18  ;;  %10895 = vst.msk [vmem:[%s21936_s14 + $0xd0] sm:$0xff] %vm10429_vm6, %v10864_v0 }
 0xb31   :  { %10896 = vst.msk [vmem:[%s21936_s14 + $0xd8] sm:$0xff] %vm10429_vm6, %v10865_v8  ;;  %10897 = vst.msk [vmem:[%s21936_s14 + $0xe0] sm:$0xff] %vm10429_vm6, %v10866_v3 }
 0xb32   :  { %10898 = vst.msk [vmem:[%s21936_s14 + $0xe8] sm:$0xff] %vm10429_vm6, %v10867_v24 }
 0xb33   :  { %10899 = vst.msk [vmem:[%s21936_s14 + $0xf0] sm:$0x3] %vm10489_vm7, %v10868_v55 }

</bundles_post_ra>
